<compile_context>
chip_gen: v7x
topology: tpu7x:2x2x1
jax: 0.10.0
libtpu: 0.0.40
codegen_flags: <defaults>
</compile_context>

<pallas_src>
import functools
import math

import jax
import jax.numpy as jnp
from jax.experimental import pallas as pl
from jax.experimental.pallas import tpu as pltpu


def _round_up(x, m):
    return (x + m - 1) // m * m


@functools.lru_cache(maxsize=None)
def _vmem_limit_bytes():
    # v5e/v6e have ~128 MiB VMEM -> allow ~64 MiB scoped; v7x has 64 MiB -> ~32 MiB.
    try:
        cap = int(pltpu.get_tpu_info().vmem_capacity_bytes)
        return max(32 * 1024 * 1024, min(96 * 1024 * 1024, cap // 2))
    except Exception:
        return 32 * 1024 * 1024


# ----------------------------------------------------------------------------
# Tiled MXU matmul (bf16 operands, f32 accumulate), optional fused bias +
# per-channel [sum; sumsq] statistics of the output (for BatchNorm)
# ----------------------------------------------------------------------------

def _mm_kernel(x_ref, w_ref, o_ref, acc_ref):
    @pl.when(pl.program_id(2) == 0)
    def _():
        acc_ref[...] = jnp.zeros_like(acc_ref)

    acc_ref[...] += jnp.dot(x_ref[...].astype(jnp.bfloat16),
                            w_ref[...].astype(jnp.bfloat16),
                            preferred_element_type=jnp.float32)

    @pl.when(pl.program_id(2) == pl.num_programs(2) - 1)
    def _():
        o_ref[...] = acc_ref[...]


def _mm_bias_stats_kernel(x_ref, w_ref, b_ref, o_ref, s_ref, acc_ref, sacc_ref,
                          *, tm, m_true):
    i = pl.program_id(1)          # M-tile index (grid order: j, i, k)
    k = pl.program_id(2)          # K-tile index

    @pl.when(k == 0)
    def _():
        acc_ref[...] = jnp.zeros_like(acc_ref)

    @pl.when((i == 0) & (k == 0))
    def _():
        sacc_ref[...] = jnp.zeros_like(sacc_ref)

    acc_ref[...] += jnp.dot(x_ref[...].astype(jnp.bfloat16),
                            w_ref[...].astype(jnp.bfloat16),
                            preferred_element_type=jnp.float32)

    @pl.when(k == pl.num_programs(2) - 1)
    def _():
        y = acc_ref[...] + b_ref[...]
        o_ref[...] = y
        # BatchNorm statistics of the conv output, masked against padded rows.
        rows = jax.lax.broadcasted_iota(jnp.int32, (tm, 1), 0) + i * tm
        ym = jnp.where(rows < m_true, y, 0.0)
        sacc_ref[0:1, :] += jnp.sum(ym, axis=0, keepdims=True)
        sacc_ref[1:2, :] += jnp.sum(ym * ym, axis=0, keepdims=True)

    @pl.when((i == pl.num_programs(1) - 1) & (k == pl.num_programs(2) - 1))
    def _():
        s_ref[...] = sacc_ref[...]          # single write per N tile


def pallas_matmul(x, w, b=None, *, with_stats=False, m_true=None,
                  tm_max=512, tn_max=512, tk_max=1024):
    """(M, K) @ (K, N) [+ b].  If with_stats, also returns (2, N) per-column
    [sum; sum-of-squares] of the (bias-included) output over the first m_true rows,
    accumulated inside the matmul epilogue (fused BatchNorm statistics)."""
    M, K = x.shape
    N = w.shape[1]
    Mp, Kp, Np = _round_up(M, 8), _round_up(K, 8), _round_up(N, 128)
    tm = Mp if Mp <= tm_max else tm_max
    tn = Np if Np <= tn_max else tn_max
    tk = Kp if Kp <= tk_max else tk_max
    Mp, Np, Kp = _round_up(Mp, tm), _round_up(Np, tn), _round_up(Kp, tk)

    xp = jnp.pad(x, ((0, Mp - M), (0, Kp - K))) if (Mp != M or Kp != K) else x
    wp = jnp.pad(w, ((0, Kp - K), (0, Np - N))) if (Kp != K or Np != N) else w

    grid = (Np // tn, Mp // tm, Kp // tk)          # (j, i, k): N outer, M mid, K inner
    x_spec = pl.BlockSpec((tm, tk), lambda j, i, k: (i, k))
    w_spec = pl.BlockSpec((tk, tn), lambda j, i, k: (k, j))
    o_spec = pl.BlockSpec((tm, tn), lambda j, i, k: (i, j))
    vmem_limit = _vmem_limit_bytes()

    if not with_stats:
        assert b is None
        out = pl.pallas_call(
            _mm_kernel,
            out_shape=jax.ShapeDtypeStruct((Mp, Np), jnp.float32),
            grid=grid,
            in_specs=[x_spec, w_spec],
            out_specs=o_spec,
            scratch_shapes=[pltpu.VMEM((tm, tn), jnp.float32)],
            compiler_params=pltpu.CompilerParams(
                dimension_semantics=("parallel", "parallel", "arbitrary"),
                vmem_limit_bytes=vmem_limit),
        )(xp, wp)
        return out[:M, :N] if (Mp != M or Np != N) else out

    if m_true is None:
        m_true = M
    bp = b.reshape(1, N)
    if Np != N:
        bp = jnp.pad(bp, ((0, 0), (0, Np - N)))
    b_spec = pl.BlockSpec((1, tn), lambda j, i, k: (0, j))
    s_spec = pl.BlockSpec((2, tn), lambda j, i, k: (0, j))   # resident across i, k

    out, stats = pl.pallas_call(
        functools.partial(_mm_bias_stats_kernel, tm=tm, m_true=m_true),
        out_shape=(jax.ShapeDtypeStruct((Mp, Np), jnp.float32),
                   jax.ShapeDtypeStruct((2, Np), jnp.float32)),
        grid=grid,
        in_specs=[x_spec, w_spec, b_spec],
        out_specs=[o_spec, s_spec],
        scratch_shapes=[pltpu.VMEM((tm, tn), jnp.float32),
                        pltpu.VMEM((2, tn), jnp.float32)],
        compiler_params=pltpu.CompilerParams(
            # M/K carry the stats reduction -> must be "arbitrary"; N tiles parallel.
            dimension_semantics=("parallel", "arbitrary", "arbitrary"),
            vmem_limit_bytes=vmem_limit),
    )(xp, wp, bp)
    out = out[:M, :N] if (Mp != M or Np != N) else out
    return out, stats[:, :N]


# ----------------------------------------------------------------------------
# Fused BatchNorm apply (+ residual + ReLU) from pre-computed sum/sumsq stats
# ----------------------------------------------------------------------------

def _affine_kernel(x_ref, sc_ref, sh_ref, o_ref, *, relu):
    y = x_ref[...] * sc_ref[...] + sh_ref[...]
    if relu:
        y = jnp.maximum(y, 0.0)
    o_ref[...] = y


def _affine_res_kernel(x_ref, sc_ref, sh_ref, r_ref, o_ref, *, relu):
    y = x_ref[...] * sc_ref[...] + sh_ref[...] + r_ref[...]
    if relu:
        y = jnp.maximum(y, 0.0)
    o_ref[...] = y


def bn_act(x2, stats, gamma, beta, count, *, eps=1e-5, residual=None, relu=True,
           tr_max=512):
    """x2: (M, C).  Training-mode BatchNorm from fused [sum; sumsq] stats, with the
    residual add + ReLU fused in.  Small channel counts are folded into the lane
    dimension (e.g. C=8 -> (M/16, 128)) so the pass is lane-dense."""
    M, C = x2.shape
    mean = stats[0] / count
    var = stats[1] / count - mean * mean            # biased variance (training-mode BN)
    scale = gamma * jax.lax.rsqrt(var + eps)
    shift = beta - mean * scale

    f = 1
    if C < 128:
        f = max(1, 128 // C)
        while f > 1 and M % f != 0:
            f -= 1
    Mf, Cf = M // f, C * f
    xf = x2.reshape(Mf, Cf)
    sc = jnp.tile(scale, f).reshape(1, Cf)
    sh = jnp.tile(shift, f).reshape(1, Cf)
    rf = residual.reshape(Mf, Cf) if residual is not None else None

    tr = Mf if Mf <= tr_max else tr_max
    Mfp = _round_up(Mf, tr)
    if Mfp != Mf:
        xf = jnp.pad(xf, ((0, Mfp - Mf), (0, 0)))
        if rf is not None:
            rf = jnp.pad(rf, ((0, Mfp - Mf), (0, 0)))

    row_spec = pl.BlockSpec((tr, Cf), lambda i: (i, 0))
    vec_spec = pl.BlockSpec((1, Cf), lambda i: (0, 0))
    cparams = pltpu.CompilerParams(dimension_semantics=("parallel",),
                                   vmem_limit_bytes=_vmem_limit_bytes())
    if residual is None:
        out = pl.pallas_call(
            functools.partial(_affine_kernel, relu=relu),
            out_shape=jax.ShapeDtypeStruct((Mfp, Cf), jnp.float32),
            grid=(Mfp // tr,),
            in_specs=[row_spec, vec_spec, vec_spec],
            out_specs=row_spec,
            compiler_params=cparams,
        )(xf, sc, sh)
    else:
        out = pl.pallas_call(
            functools.partial(_affine_res_kernel, relu=relu),
            out_shape=jax.ShapeDtypeStruct((Mfp, Cf), jnp.float32),
            grid=(Mfp // tr,),
            in_specs=[row_spec, vec_spec, vec_spec, row_spec],
            out_specs=row_spec,
            compiler_params=cparams,
        )(xf, sc, sh, rf)
    if Mfp != Mf:
        out = out[:Mf]
    return out.reshape(M, C)


# ----------------------------------------------------------------------------
# Fused attention: all Nh heads of a batch element per grid step
# ----------------------------------------------------------------------------

def _attn_kernel(q_ref, k_ref, v_ref, b_ref, o_ref):
    q = q_ref[0].astype(jnp.bfloat16)     # (Nh, HW, dkh)
    k = k_ref[0].astype(jnp.bfloat16)
    logits = jnp.einsum('nqd,nkd->nqk', q, k,
                        preferred_element_type=jnp.float32) + b_ref[0]
    m = jnp.max(logits, axis=-1, keepdims=True)
    e = jnp.exp(logits - m)
    w = e / jnp.sum(e, axis=-1, keepdims=True)      # exact softmax division
    o_ref[0] = jnp.einsum('nqk,nkd->nqd', w.astype(jnp.bfloat16),
                          v_ref[0].astype(jnp.bfloat16),
                          preferred_element_type=jnp.float32)


def attention_fused(flat_q, flat_k, flat_v, bias):
    """flat_q/k: (B, Nh, HW, dkh), flat_v: (B, Nh, HW, dvh), bias: (B, Nh, HW, HW)."""
    B, Nh, HW, dkh = flat_q.shape
    dvh = flat_v.shape[-1]
    dvp = _round_up(dvh, 8)       # 8-sublane granule only (was a 128x lane pad before)
    vp = flat_v if dvp == dvh else jnp.pad(flat_v, ((0, 0), (0, 0), (0, 0), (0, dvp - dvh)))
    out = pl.pallas_call(
        _attn_kernel,
        out_shape=jax.ShapeDtypeStruct((B, Nh, HW, dvp), jnp.float32),
        grid=(B,),
        in_specs=[
            pl.BlockSpec((1, Nh, HW, dkh), lambda b: (b, 0, 0, 0)),
            pl.BlockSpec((1, Nh, HW, dkh), lambda b: (b, 0, 0, 0)),
            pl.BlockSpec((1, Nh, HW, dvp), lambda b: (b, 0, 0, 0)),
            pl.BlockSpec((1, Nh, HW, HW), lambda b: (b, 0, 0, 0)),
        ],
        out_specs=pl.BlockSpec((1, Nh, HW, dvp), lambda b: (b, 0, 0, 0)),
        compiler_params=pltpu.CompilerParams(
            dimension_semantics=("parallel",),
            vmem_limit_bytes=_vmem_limit_bytes()),
    )(flat_q, flat_k, vp, bias)
    return out[..., :dvh] if dvp != dvh else out


# ----------------------------------------------------------------------------
# Conv helpers (NHWC, stride 1) and relative-position logits
# ----------------------------------------------------------------------------

def _im2col_3x3(x_nhwc, padding):
    """(B, H, W, C) -> (B*H*W, 9*C), tap-major / channel-minor (stride 1)."""
    # TODO(synk): at ResNet-scale this 9x patch expansion should move inside the matmul
    # kernel (halo blocks / per-tap K axis) to avoid the 9x HBM read amplification.
    B, H, W, C = x_nhwc.shape
    xp = jnp.pad(x_nhwc, ((0, 0), (padding, padding), (padding, padding), (0, 0)))
    taps = [xp[:, i:i + H, j:j + W, :] for i in range(3) for j in range(3)]
    return jnp.concatenate(taps, axis=-1).reshape(B * H * W, 9 * C)


def rel_to_abs(x):
    B, Nh, L, _ = x.shape
    x = jnp.pad(x, ((0, 0), (0, 0), (0, 0), (0, 1)))
    flat = x.reshape(B, Nh, L * 2 * L)
    flat = jnp.pad(flat, ((0, 0), (0, 0), (0, L - 1)))
    final = flat.reshape(B, Nh, L + 1, 2 * L - 1)
    return final[:, :, :L, L - 1:]


def relative_logits_1d(q, key_rel, H, W, Nh, case):
    # q: (B, Nh, A, Bd, dkh) ; key_rel: (2W-1, dkh)
    dkh = q.shape[-1]
    rel = pallas_matmul(q.reshape(-1, dkh), key_rel.T)          # no-bias MXU matmul
    rel = rel.reshape(-1, Nh * H, W, 2 * W - 1)
    rel = rel_to_abs(rel)
    rel = rel.reshape(-1, Nh, H, W, W)
    rel = jnp.expand_dims(rel, 3)
    rel = jnp.tile(rel, (1, 1, 1, H, 1, 1))
    if case == 'h':
        # torch: transpose(2, 4).transpose(3, 5)
        rel = jnp.transpose(rel, (0, 1, 4, 5, 2, 3))
    return rel.reshape(-1, Nh, H * W, H * W)


# ----------------------------------------------------------------------------
# AAConv2d forward (NHWC / (M, C) activations) with fused BN statistics
# ----------------------------------------------------------------------------

def aaconv2d_forward(x2, p, *, B, H, W, kernel_size, padding=0,
                     dk=40, dv=4, Nh=4, relative=True):
    """x2: (M, Cin) NHWC-flattened activations.
    Returns (out (M, out_channels), stats (2, out_channels)): stats are per-channel
    [sum; sumsq] of the output, produced in the conv matmul epilogues."""
    M = B * H * W
    Cin = x2.shape[1]
    Cgen = p['gen']['w'].shape[0]
    Cqkv = 2 * dk + dv
    dkh, dvh = dk // Nh, dv // Nh

    w_qkv = p['qkv']['w'].reshape(Cqkv, Cin).T                  # (Cin, Cqkv)
    if kernel_size == 1:
        # Fuse the 'gen' and 'qkv' 1x1 convs into one lane-dense matmul (+ fused stats).
        w_cat = jnp.concatenate([p['gen']['w'].reshape(Cgen, Cin).T, w_qkv], axis=1)
        xin = x2
    else:
        # 3x3 'gen' conv via im2col; the 1x1 'qkv' conv is fused into the SAME matmul by
        # placing its weights on the centre tap of the 3x3 patch.
        xin = _im2col_3x3(x2.reshape(B, H, W, Cin), padding)
        w_gen = jnp.transpose(p['gen']['w'], (2, 3, 1, 0)).reshape(9 * Cin, Cgen)
        w_qkv_full = jnp.zeros((9 * Cin, Cqkv), jnp.float32)
        w_qkv_full = w_qkv_full.at[4 * Cin:5 * Cin].set(w_qkv)   # centre tap (1,1)
        w_cat = jnp.concatenate([w_gen, w_qkv_full], axis=1)
    b_cat = jnp.concatenate([p['gen']['b'], p['qkv']['b']])

    fused, fused_stats = pallas_matmul(xin, w_cat, b_cat, with_stats=True, m_true=M)
    conv_out = fused[:, :Cgen]
    conv_stats = fused_stats[:, :Cgen]
    qkv = fused[:, Cgen:Cgen + Cqkv]

    # --- q/k/v head split, reproducing the reference's NCHW reshape quirks ---
    qkv_nchw = jnp.transpose(qkv.reshape(B, H, W, Cqkv), (0, 3, 1, 2))
    q = qkv_nchw[:, :dk].reshape(B, Nh, dkh, H, W)
    k = qkv_nchw[:, dk:2 * dk].reshape(B, Nh, dkh, H, W)
    v = qkv_nchw[:, 2 * dk:].reshape(B, Nh, dvh, H, W)
    # NB: reproduces the reference quirk `q = q / dkh ** (-0.5)` (multiply by sqrt(dkh))
    q = q / (dkh ** (-0.5))
    # NB: reference builds flat_q/k/v with a plain reshape (not a transpose)
    flat_q = q.reshape(B, Nh, H * W, dkh)
    flat_k = k.reshape(B, Nh, H * W, dkh)
    flat_v = v.reshape(B, Nh, H * W, dvh)

    if relative:
        qt = jnp.transpose(q, (0, 1, 3, 4, 2))                  # (B, Nh, H, W, dkh)
        rel_h = relative_logits_1d(qt, p['key_rel_h'], H, W, Nh, 'h')
        rel_w = relative_logits_1d(jnp.transpose(qt, (0, 1, 3, 2, 4)),
                                   p['key_rel_w'], H, W, Nh, 'w')
        bias = (rel_h + rel_w).reshape(B, Nh, H * W, H * W)
    else:
        bias = jnp.zeros((B, Nh, H * W, H * W), jnp.float32)
    # TODO(synk): for ResNet-scale HW the O(HW^2) bias should be generated per KV tile
    # inside a flash-style attention loop instead of being materialized in HBM.

    attn = attention_fused(flat_q, flat_k, flat_v, bias)        # (B, Nh, HW, dvh)
    # combine_heads_2d -> NHWC (M, Nh*dvh)
    attn_nhwc = jnp.transpose(attn.reshape(B, Nh, H, W, dvh),
                              (0, 2, 3, 1, 4)).reshape(M, Nh * dvh)

    if kernel_size == 1:
        attn_out, attn_stats = pallas_matmul(
            attn_nhwc, p['out']['w'].reshape(dv, dv).T, p['out']['b'],
            with_stats=True, m_true=M)
    else:
        cols_a = _im2col_3x3(attn_nhwc.reshape(B, H, W, dv), padding)
        w_out = jnp.transpose(p['out']['w'], (2, 3, 1, 0)).reshape(9 * dv, dv)
        attn_out, attn_stats = pallas_matmul(cols_a, w_out, p['out']['b'],
                                             with_stats=True, m_true=M)

    out = jnp.concatenate([conv_out, attn_out], axis=1)
    stats = jnp.concatenate([conv_stats, attn_stats], axis=1)
    return out, stats


# ----------------------------------------------------------------------------
# Bottleneck forward
# ----------------------------------------------------------------------------

def bottleneck_forward(x, params):
    """x: (B, Cin, H, W) NCHW, like the PyTorch module."""
    B, C, H, W = x.shape
    M = B * H * W
    # NCHW -> NHWC exactly once; everything inside runs on (M, C) tiles.
    # TODO(synk): channel padding to 128 could be carried end-to-end to drop the
    # remaining per-call N-slice copies once real ResNet channel counts are used.
    x2 = jnp.transpose(x, (0, 2, 3, 1)).reshape(M, C)
    residual = x2

    out, st = aaconv2d_forward(x2, params['conv1'], B=B, H=H, W=W,
                               kernel_size=1, padding=0)
    out = bn_act(out, st, params['bn1']['gamma'], params['bn1']['beta'], M, relu=True)
    out, st = aaconv2d_forward(out, params['conv2'], B=B, H=H, W=W,
                               kernel_size=3, padding=1)
    out = bn_act(out, st, params['bn2']['gamma'], params['bn2']['beta'], M, relu=True)
    out, st = aaconv2d_forward(out, params['conv3'], B=B, H=H, W=W,
                               kernel_size=1, padding=0)
    # downsample is None (stride=1, inplanes == planes*4): residual add + ReLU fused.
    out = bn_act(out, st, params['bn3']['gamma'], params['bn3']['beta'], M,
                 residual=residual, relu=True)

    return jnp.transpose(out.reshape(B, H, W, -1), (0, 3, 1, 2))   # back to NCHW once


# ----------------------------------------------------------------------------
# Deterministic parameter init (shapes per the module's __init__)
# ----------------------------------------------------------------------------

def conv_init(key, cout, cin, k):
    k1, k2 = jax.random.split(key)
    bound = 1.0 / math.sqrt(cin * k * k)
    w = jax.random.uniform(k1, (cout, cin, k, k), jnp.float32, -bound, bound)
    b = jax.random.uniform(k2, (cout,), jnp.float32, -bound, bound)
    return {'w': w, 'b': b}


def init_aaconv(key, cin, cout, k, H, W, dk=40, dv=4, Nh=4):
    keys = jax.random.split(key, 5)
    dkh = dk // Nh
    # TODO(synk): reference re-samples key_rel_h/key_rel_w with torch.randn on EVERY
    # forward call; here they are fixed deterministic parameters instead.
    return {
        'gen': conv_init(keys[0], cout - dv, cin, k),
        'out': conv_init(keys[1], dv, dv, k),
        'qkv': conv_init(keys[2], 2 * dk + dv, cin, 1),
        'key_rel_h': jax.random.normal(keys[3], (2 * H - 1, dkh), jnp.float32),
        'key_rel_w': jax.random.normal(keys[4], (2 * W - 1, dkh), jnp.float32),
    }


if __name__ == "__main__":
    key = jax.random.PRNGKey(0)
    B, H, W = 2, 8, 8
    planes = 8
    inplanes = planes * 4          # residual add requires inplanes == planes*expansion

    keys = jax.random.split(key, 4)
    params = {
        'conv1': init_aaconv(keys[0], inplanes, planes, 1, H, W),
        'conv2': init_aaconv(keys[1], planes, planes, 3, H, W),
        'conv3': init_aaconv(keys[2], planes, planes * 4, 1, H, W),
        'bn1': {'gamma': jnp.ones((planes,), jnp.float32),
                'beta': jnp.zeros((planes,), jnp.float32)},
        'bn2': {'gamma': jnp.ones((planes,), jnp.float32),
                'beta': jnp.zeros((planes,), jnp.float32)},
        'bn3': {'gamma': jnp.ones((planes * 4,), jnp.float32),
                'beta': jnp.zeros((planes * 4,), jnp.float32)},
    }
    x = jax.random.normal(keys[3], (B, inplanes, H, W), jnp.float32)

    out = jax.jit(bottleneck_forward)(x, params)
    jax.block_until_ready(out)
    assert out.shape == (B, inplanes, H, W), out.shape
    assert bool(jnp.all(jnp.isfinite(out)))
    print("KERNEL_OK")
</pallas_src>

<mosaic_0001>
module attributes {stable_mosaic.version = 11 : i64} {
  func.func @_mm_bias_stats_kernel(%arg0: i32, %arg1: i32, %arg2: i32, %arg3: memref<128x32xf32, #tpu.memory_space<vmem>>, %arg4: memref<32x128xf32, #tpu.memory_space<vmem>>, %arg5: memref<1x128xf32, #tpu.memory_space<vmem>>, %arg6: memref<128x128xf32, #tpu.memory_space<vmem>>, %arg7: memref<2x128xf32, #tpu.memory_space<vmem>>, %arg8: memref<128x128xf32, #tpu.memory_space<vmem>>, %arg9: memref<2x128xf32, #tpu.memory_space<vmem>>) attributes {dimension_semantics = [#tpu.dimension_semantics<parallel>, #tpu.dimension_semantics<arbitrary>, #tpu.dimension_semantics<arbitrary>], iteration_bounds = array<i64: 1, 1, 1>, scalar_prefetch = 0 : i64, scratch_operands = 2 : i64, tpu.core_type = #tpu.core_type<tc>, window_params = [{transform_indices = @transform_0, window_bounds = array<i64: 128, 32>}, {transform_indices = @transform_1, window_bounds = array<i64: 32, 128>}, {transform_indices = @transform_2, window_bounds = array<i64: 1, 128>}, {transform_indices = @transform_3, window_bounds = array<i64: 128, 128>}, {transform_indices = @transform_4, window_bounds = array<i64: 2, 128>}]} {
    %c0_i32 = arith.constant 0 : i32
    %0 = arith.cmpi eq, %arg2, %c0_i32 : i32
    %1 = arith.extui %0 : i1 to i32
    %c0_i32_0 = arith.constant 0 : i32
    %2 = arith.cmpi ne, %1, %c0_i32_0 : i32
    scf.if %2 {
      %cst_16 = arith.constant 0.000000e+00 : f32
      %24 = vector.broadcast %cst_16 : f32 to vector<128x128xf32>
      %c0_17 = arith.constant 0 : index
      %c0_18 = arith.constant 0 : index
      %25 = vector.load %arg8[%c0_17, %c0_18] : memref<128x128xf32, #tpu.memory_space<vmem>>, vector<128x128xf32>
      tpu.vector_store %arg8[%c0_17, %c0_18], %24 {strides = array<i32>} : memref<128x128xf32, #tpu.memory_space<vmem>>, vector<128x128xf32>,
    } else {
    }
    %c0_i32_1 = arith.constant 0 : i32
    %3 = arith.cmpi eq, %arg1, %c0_i32_1 : i32
    %c0_i32_2 = arith.constant 0 : i32
    %4 = arith.cmpi eq, %arg2, %c0_i32_2 : i32
    %5 = arith.andi %3, %4 : i1
    %6 = arith.extui %5 : i1 to i32
    %c0_i32_3 = arith.constant 0 : i32
    %7 = arith.cmpi ne, %6, %c0_i32_3 : i32
    scf.if %7 {
      %cst_16 = arith.constant 0.000000e+00 : f32
      %24 = vector.broadcast %cst_16 : f32 to vector<2x128xf32>
      %c0_17 = arith.constant 0 : index
      %c0_18 = arith.constant 0 : index
      %25 = vector.load %arg9[%c0_17, %c0_18] : memref<2x128xf32, #tpu.memory_space<vmem>>, vector<2x128xf32>
      tpu.vector_store %arg9[%c0_17, %c0_18], %24 {strides = array<i32>} : memref<2x128xf32, #tpu.memory_space<vmem>>, vector<2x128xf32>,
    } else {
    }
    %c0 = arith.constant 0 : index
    %c0_4 = arith.constant 0 : index
    %8 = vector.load %arg8[%c0, %c0_4] : memref<128x128xf32, #tpu.memory_space<vmem>>, vector<128x128xf32>
    %c0_5 = arith.constant 0 : index
    %c0_6 = arith.constant 0 : index
    %9 = vector.load %arg3[%c0_5, %c0_6] : memref<128x32xf32, #tpu.memory_space<vmem>>, vector<128x32xf32>
    %10 = arith.truncf %9 : vector<128x32xf32> to vector<128x32xbf16>
    %c0_7 = arith.constant 0 : index
    %c0_8 = arith.constant 0 : index
    %11 = vector.load %arg4[%c0_7, %c0_8] : memref<32x128xf32, #tpu.memory_space<vmem>>, vector<32x128xf32>
    %12 = arith.truncf %11 : vector<32x128xf32> to vector<32x128xbf16>
    %cst = arith.constant dense<0.000000e+00> : vector<128x128xf32>
    %13 = tpu.matmul %10, %12, %cst {dimension_numbers = #tpu.dot_dimension_numbers<[1], [0], [0], [1], [0, 0, 1, 1], [], []>} : vector<128x32xbf16>, vector<32x128xbf16>, vector<128x128xf32> -> vector<128x128xf32>
    %14 = arith.addf %8, %13 : vector<128x128xf32>
    %c0_9 = arith.constant 0 : index
    %c0_10 = arith.constant 0 : index
    %15 = vector.load %arg8[%c0_9, %c0_10] : memref<128x128xf32, #tpu.memory_space<vmem>>, vector<128x128xf32>
    tpu.vector_store %arg8[%c0_9, %c0_10], %14 {strides = array<i32>} : memref<128x128xf32, #tpu.memory_space<vmem>>, vector<128x128xf32>,
    %c0_i32_11 = arith.constant 0 : i32
    %16 = arith.cmpi eq, %arg2, %c0_i32_11 : i32
    %17 = arith.extui %16 : i1 to i32
    %c0_i32_12 = arith.constant 0 : i32
    %18 = arith.cmpi ne, %17, %c0_i32_12 : i32
    scf.if %18 {
      %c0_16 = arith.constant 0 : index
      %c0_17 = arith.constant 0 : index
      %24 = vector.load %arg8[%c0_16, %c0_17] : memref<128x128xf32, #tpu.memory_space<vmem>>, vector<128x128xf32>
      %c0_18 = arith.constant 0 : index
      %c0_19 = arith.constant 0 : index
      %25 = vector.load %arg5[%c0_18, %c0_19] : memref<1x128xf32, #tpu.memory_space<vmem>>, vector<1x128xf32>
      %26 = vector.broadcast %25 : vector<1x128xf32> to vector<128x128xf32>
      %27 = arith.addf %24, %26 : vector<128x128xf32>
      %c0_20 = arith.constant 0 : index
      %c0_21 = arith.constant 0 : index
      %28 = vector.load %arg6[%c0_20, %c0_21] : memref<128x128xf32, #tpu.memory_space<vmem>>, vector<128x128xf32>
      tpu.vector_store %arg6[%c0_20, %c0_21], %27 {strides = array<i32>} : memref<128x128xf32, #tpu.memory_space<vmem>>, vector<128x128xf32>,
      %29 = tpu.iota {dimensions = array<i32: 0>} : vector<128x1xi32>
      %c128_i32 = arith.constant 128 : i32
      %30 = arith.muli %arg1, %c128_i32 : i32
      %31 = vector.broadcast %30 : i32 to vector<128x1xi32>
      %32 = arith.addi %29, %31 : vector<128x1xi32>
      %c128_i32_22 = arith.constant 128 : i32
      %33 = vector.broadcast %c128_i32_22 : i32 to vector<128x1xi32>
      %34 = arith.cmpi slt, %32, %33 : vector<128x1xi32>
      %cst_23 = arith.constant 0.000000e+00 : f32
      %35 = vector.shape_cast %34 : vector<128x1xi1> to vector<128x1xi1>
      %36 = vector.broadcast %35 : vector<128x1xi1> to vector<128x128xi1>
      %37 = vector.broadcast %cst_23 : f32 to vector<128x128xf32>
      %38 = arith.select %36, %27, %37 : vector<128x128xi1>, vector<128x128xf32>
      %c0_24 = arith.constant 0 : index
      %c0_25 = arith.constant 0 : index
      %39 = vector.load %arg9[%c0_24, %c0_25] : memref<2x128xf32, #tpu.memory_space<vmem>>, vector<1x128xf32>
      %cst_26 = arith.constant dense<0.000000e+00> : vector<128xf32>
      %40 = vector.multi_reduction <add>, %38, %cst_26 [0] : vector<128x128xf32> to vector<128xf32>
      %41 = vector.shape_cast %40 : vector<128xf32> to vector<1x128xf32>
      %42 = arith.addf %39, %41 : vector<1x128xf32>
      %c0_27 = arith.constant 0 : index
      %c0_28 = arith.constant 0 : index
      %43 = vector.load %arg9[%c0_27, %c0_28] : memref<2x128xf32, #tpu.memory_space<vmem>>, vector<1x128xf32>
      tpu.vector_store %arg9[%c0_27, %c0_28], %42 {strides = array<i32>} : memref<2x128xf32, #tpu.memory_space<vmem>>, vector<1x128xf32>,
      %c1 = arith.constant 1 : index
      %c0_29 = arith.constant 0 : index
      %44 = vector.load %arg9[%c1, %c0_29] : memref<2x128xf32, #tpu.memory_space<vmem>>, vector<1x128xf32>
      %45 = arith.mulf %38, %38 : vector<128x128xf32>
      %cst_30 = arith.constant dense<0.000000e+00> : vector<128xf32>
      %46 = vector.multi_reduction <add>, %45, %cst_30 [0] : vector<128x128xf32> to vector<128xf32>
      %47 = vector.shape_cast %46 : vector<128xf32> to vector<1x128xf32>
      %48 = arith.addf %44, %47 : vector<1x128xf32>
      %c1_31 = arith.constant 1 : index
      %c0_32 = arith.constant 0 : index
      %49 = vector.load %arg9[%c1_31, %c0_32] : memref<2x128xf32, #tpu.memory_space<vmem>>, vector<1x128xf32>
      tpu.vector_store %arg9[%c1_31, %c0_32], %48 {strides = array<i32>} : memref<2x128xf32, #tpu.memory_space<vmem>>, vector<1x128xf32>,
    } else {
    }
    %c0_i32_13 = arith.constant 0 : i32
    %19 = arith.cmpi eq, %arg1, %c0_i32_13 : i32
    %c0_i32_14 = arith.constant 0 : i32
    %20 = arith.cmpi eq, %arg2, %c0_i32_14 : i32
    %21 = arith.andi %19, %20 : i1
    %22 = arith.extui %21 : i1 to i32
    %c0_i32_15 = arith.constant 0 : i32
    %23 = arith.cmpi ne, %22, %c0_i32_15 : i32
    scf.if %23 {
      %c0_16 = arith.constant 0 : index
      %c0_17 = arith.constant 0 : index
      %24 = vector.load %arg9[%c0_16, %c0_17] : memref<2x128xf32, #tpu.memory_space<vmem>>, vector<2x128xf32>
      %c0_18 = arith.constant 0 : index
      %c0_19 = arith.constant 0 : index
      %25 = vector.load %arg7[%c0_18, %c0_19] : memref<2x128xf32, #tpu.memory_space<vmem>>, vector<2x128xf32>
      tpu.vector_store %arg7[%c0_18, %c0_19], %24 {strides = array<i32>} : memref<2x128xf32, #tpu.memory_space<vmem>>, vector<2x128xf32>,
    } else {
    }
    return
  }
  func.func @transform_0(%arg0: i32, %arg1: i32, %arg2: i32) -> (i32, i32) {
    %c0_i32 = arith.constant 0 : i32
    return %arg1, %arg2 : i32, i32
  }
  func.func @transform_1(%arg0: i32, %arg1: i32, %arg2: i32) -> (i32, i32) {
    %c0_i32 = arith.constant 0 : i32
    return %arg2, %arg0 : i32, i32
  }
  func.func @transform_2(%arg0: i32, %arg1: i32, %arg2: i32) -> (i32, i32) {
    %c0_i32 = arith.constant 0 : i32
    %c0_i32_0 = arith.constant 0 : i32
    return %c0_i32, %arg0 : i32, i32
  }
  func.func @transform_3(%arg0: i32, %arg1: i32, %arg2: i32) -> (i32, i32) {
    %c0_i32 = arith.constant 0 : i32
    return %arg1, %arg0 : i32, i32
  }
  func.func @transform_4(%arg0: i32, %arg1: i32, %arg2: i32) -> (i32, i32) {
    %c0_i32 = arith.constant 0 : i32
    %c0_i32_0 = arith.constant 0 : i32
    return %c0_i32, %arg0 : i32, i32
  }
}

module attributes {stable_mosaic.version = 11 : i64} {
  func.func @_mm_kernel(%arg0: i32, %arg1: i32, %arg2: i32, %arg3: memref<512x16xf32, #tpu.memory_space<vmem>>, %arg4: memref<16x128xf32, #tpu.memory_space<vmem>>, %arg5: memref<512x128xf32, #tpu.memory_space<vmem>>, %arg6: memref<512x128xf32, #tpu.memory_space<vmem>>) attributes {dimension_semantics = [#tpu.dimension_semantics<parallel>, #tpu.dimension_semantics<parallel>, #tpu.dimension_semantics<arbitrary>], iteration_bounds = array<i64: 1, 1, 1>, scalar_prefetch = 0 : i64, scratch_operands = 1 : i64, tpu.core_type = #tpu.core_type<tc>, window_params = [{transform_indices = @transform_0, window_bounds = array<i64: 512, 16>}, {transform_indices = @transform_1, window_bounds = array<i64: 16, 128>}, {transform_indices = @transform_2, window_bounds = array<i64: 512, 128>}]} {
    %c0_i32 = arith.constant 0 : i32
    %0 = arith.cmpi eq, %arg2, %c0_i32 : i32
    %1 = arith.extui %0 : i1 to i32
    %c0_i32_0 = arith.constant 0 : i32
    %2 = arith.cmpi ne, %1, %c0_i32_0 : i32
    scf.if %2 {
      %cst_10 = arith.constant 0.000000e+00 : f32
      %14 = vector.broadcast %cst_10 : f32 to vector<512x128xf32>
      %c0_11 = arith.constant 0 : index
      %c0_12 = arith.constant 0 : index
      %15 = vector.load %arg6[%c0_11, %c0_12] : memref<512x128xf32, #tpu.memory_space<vmem>>, vector<512x128xf32>
      tpu.vector_store %arg6[%c0_11, %c0_12], %14 {strides = array<i32>} : memref<512x128xf32, #tpu.memory_space<vmem>>, vector<512x128xf32>,
    } else {
    }
    %c0 = arith.constant 0 : index
    %c0_1 = arith.constant 0 : index
    %3 = vector.load %arg6[%c0, %c0_1] : memref<512x128xf32, #tpu.memory_space<vmem>>, vector<512x128xf32>
    %c0_2 = arith.constant 0 : index
    %c0_3 = arith.constant 0 : index
    %4 = vector.load %arg3[%c0_2, %c0_3] : memref<512x16xf32, #tpu.memory_space<vmem>>, vector<512x16xf32>
    %5 = arith.truncf %4 : vector<512x16xf32> to vector<512x16xbf16>
    %c0_4 = arith.constant 0 : index
    %c0_5 = arith.constant 0 : index
    %6 = vector.load %arg4[%c0_4, %c0_5] : memref<16x128xf32, #tpu.memory_space<vmem>>, vector<16x128xf32>
    %7 = arith.truncf %6 : vector<16x128xf32> to vector<16x128xbf16>
    %cst = arith.constant dense<0.000000e+00> : vector<512x128xf32>
    %8 = tpu.matmul %5, %7, %cst {dimension_numbers = #tpu.dot_dimension_numbers<[1], [0], [0], [1], [0, 0, 1, 1], [], []>} : vector<512x16xbf16>, vector<16x128xbf16>, vector<512x128xf32> -> vector<512x128xf32>
    %9 = arith.addf %3, %8 : vector<512x128xf32>
    %c0_6 = arith.constant 0 : index
    %c0_7 = arith.constant 0 : index
    %10 = vector.load %arg6[%c0_6, %c0_7] : memref<512x128xf32, #tpu.memory_space<vmem>>, vector<512x128xf32>
    tpu.vector_store %arg6[%c0_6, %c0_7], %9 {strides = array<i32>} : memref<512x128xf32, #tpu.memory_space<vmem>>, vector<512x128xf32>,
    %c0_i32_8 = arith.constant 0 : i32
    %11 = arith.cmpi eq, %arg2, %c0_i32_8 : i32
    %12 = arith.extui %11 : i1 to i32
    %c0_i32_9 = arith.constant 0 : i32
    %13 = arith.cmpi ne, %12, %c0_i32_9 : i32
    scf.if %13 {
      %c0_10 = arith.constant 0 : index
      %c0_11 = arith.constant 0 : index
      %14 = vector.load %arg6[%c0_10, %c0_11] : memref<512x128xf32, #tpu.memory_space<vmem>>, vector<512x128xf32>
      %c0_12 = arith.constant 0 : index
      %c0_13 = arith.constant 0 : index
      %15 = vector.load %arg5[%c0_12, %c0_13] : memref<512x128xf32, #tpu.memory_space<vmem>>, vector<512x128xf32>
      tpu.vector_store %arg5[%c0_12, %c0_13], %14 {strides = array<i32>} : memref<512x128xf32, #tpu.memory_space<vmem>>, vector<512x128xf32>,
    } else {
    }
    return
  }
  func.func @transform_0(%arg0: i32, %arg1: i32, %arg2: i32) -> (i32, i32) {
    %c0_i32 = arith.constant 0 : i32
    return %arg1, %arg2 : i32, i32
  }
  func.func @transform_1(%arg0: i32, %arg1: i32, %arg2: i32) -> (i32, i32) {
    %c0_i32 = arith.constant 0 : i32
    return %arg2, %arg0 : i32, i32
  }
  func.func @transform_2(%arg0: i32, %arg1: i32, %arg2: i32) -> (i32, i32) {
    %c0_i32 = arith.constant 0 : i32
    return %arg1, %arg0 : i32, i32
  }
}

module attributes {stable_mosaic.version = 11 : i64} {
  func.func @_attn_kernel(%arg0: i32, %arg1: memref<1x4x64x10xf32, #tpu.memory_space<vmem>>, %arg2: memref<1x4x64x10xf32, #tpu.memory_space<vmem>>, %arg3: memref<1x4x64x8xf32, #tpu.memory_space<vmem>>, %arg4: memref<1x4x64x64xf32, #tpu.memory_space<vmem>>, %arg5: memref<1x4x64x8xf32, #tpu.memory_space<vmem>>) attributes {dimension_semantics = [#tpu.dimension_semantics<parallel>], iteration_bounds = array<i64: 2>, scalar_prefetch = 0 : i64, scratch_operands = 0 : i64, tpu.core_type = #tpu.core_type<tc>, window_params = [{transform_indices = @transform_0, window_bounds = array<i64: 1, 4, 64, 10>}, {transform_indices = @transform_1, window_bounds = array<i64: 1, 4, 64, 10>}, {transform_indices = @transform_2, window_bounds = array<i64: 1, 4, 64, 8>}, {transform_indices = @transform_3, window_bounds = array<i64: 1, 4, 64, 64>}, {transform_indices = @transform_4, window_bounds = array<i64: 1, 4, 64, 8>}]} {
    %c0 = arith.constant 0 : index
    %c0_0 = arith.constant 0 : index
    %c0_1 = arith.constant 0 : index
    %c0_2 = arith.constant 0 : index
    %0 = vector.load %arg1[%c0, %c0_0, %c0_1, %c0_2] : memref<1x4x64x10xf32, #tpu.memory_space<vmem>>, vector<1x4x64x10xf32>
    %1 = vector.shape_cast %0 : vector<1x4x64x10xf32> to vector<4x64x10xf32>
    %2 = arith.truncf %1 : vector<4x64x10xf32> to vector<4x64x10xbf16>
    %c0_3 = arith.constant 0 : index
    %c0_4 = arith.constant 0 : index
    %c0_5 = arith.constant 0 : index
    %c0_6 = arith.constant 0 : index
    %3 = vector.load %arg2[%c0_3, %c0_4, %c0_5, %c0_6] : memref<1x4x64x10xf32, #tpu.memory_space<vmem>>, vector<1x4x64x10xf32>
    %4 = vector.shape_cast %3 : vector<1x4x64x10xf32> to vector<4x64x10xf32>
    %5 = arith.truncf %4 : vector<4x64x10xf32> to vector<4x64x10xbf16>
    "tpu.trace_start"() <{level = 10 : i32, message = "nqd,nkd->nqk"}> : () -> ()
    %cst = arith.constant dense<0.000000e+00> : vector<4x64x64xf32>
    %6 = tpu.matmul %2, %5, %cst {dimension_numbers = #tpu.dot_dimension_numbers<[2], [2], [1], [1], [0, 0, 0, 1, 1, 1], [0], [0]>} : vector<4x64x10xbf16>, vector<4x64x10xbf16>, vector<4x64x64xf32> -> vector<4x64x64xf32>
    "tpu.trace_stop"() : () -> ()
    %c0_7 = arith.constant 0 : index
    %c0_8 = arith.constant 0 : index
    %c0_9 = arith.constant 0 : index
    %c0_10 = arith.constant 0 : index
    %7 = vector.load %arg4[%c0_7, %c0_8, %c0_9, %c0_10] : memref<1x4x64x64xf32, #tpu.memory_space<vmem>>, vector<1x4x64x64xf32>
    %8 = vector.shape_cast %7 : vector<1x4x64x64xf32> to vector<4x64x64xf32>
    %9 = arith.addf %6, %8 : vector<4x64x64xf32>
    %cst_11 = arith.constant dense<0xFF800000> : vector<4x64xf32>
    %10 = vector.multi_reduction <maximumf>, %9, %cst_11 [2] : vector<4x64x64xf32> to vector<4x64xf32>
    %11 = vector.shape_cast %10 : vector<4x64xf32> to vector<4x64x1xf32>
    %12 = vector.broadcast %11 : vector<4x64x1xf32> to vector<4x64x64xf32>
    %13 = arith.subf %9, %12 : vector<4x64x64xf32>
    %14 = math.exp %13 : vector<4x64x64xf32>
    %cst_12 = arith.constant dense<0.000000e+00> : vector<4x64xf32>
    %15 = vector.multi_reduction <add>, %14, %cst_12 [2] : vector<4x64x64xf32> to vector<4x64xf32>
    %16 = vector.shape_cast %15 : vector<4x64xf32> to vector<4x64x1xf32>
    %17 = vector.broadcast %16 : vector<4x64x1xf32> to vector<4x64x64xf32>
    %18 = arith.divf %14, %17 : vector<4x64x64xf32>
    %19 = arith.truncf %18 : vector<4x64x64xf32> to vector<4x64x64xbf16>
    %c0_13 = arith.constant 0 : index
    %c0_14 = arith.constant 0 : index
    %c0_15 = arith.constant 0 : index
    %c0_16 = arith.constant 0 : index
    %20 = vector.load %arg3[%c0_13, %c0_14, %c0_15, %c0_16] : memref<1x4x64x8xf32, #tpu.memory_space<vmem>>, vector<1x4x64x8xf32>
    %21 = vector.shape_cast %20 : vector<1x4x64x8xf32> to vector<4x64x8xf32>
    %22 = arith.truncf %21 : vector<4x64x8xf32> to vector<4x64x8xbf16>
    "tpu.trace_start"() <{level = 10 : i32, message = "nqk,nkd->nqd"}> : () -> ()
    %cst_17 = arith.constant dense<0.000000e+00> : vector<4x64x8xf32>
    %23 = tpu.matmul %19, %22, %cst_17 {dimension_numbers = #tpu.dot_dimension_numbers<[2], [1], [1], [2], [0, 0, 0, 1, 1, 2], [0], [0]>} : vector<4x64x64xbf16>, vector<4x64x8xbf16>, vector<4x64x8xf32> -> vector<4x64x8xf32>
    "tpu.trace_stop"() : () -> ()
    %c0_18 = arith.constant 0 : index
    %c0_19 = arith.constant 0 : index
    %c0_20 = arith.constant 0 : index
    %c0_21 = arith.constant 0 : index
    %24 = vector.load %arg5[%c0_18, %c0_19, %c0_20, %c0_21] : memref<1x4x64x8xf32, #tpu.memory_space<vmem>>, vector<1x4x64x8xf32>
    %25 = vector.shape_cast %24 : vector<1x4x64x8xf32> to vector<4x64x8xf32>
    %26 = vector.shape_cast %23 : vector<4x64x8xf32> to vector<1x4x64x8xf32>
    tpu.vector_store %arg5[%c0_18, %c0_19, %c0_20, %c0_21], %26 {strides = array<i32>} : memref<1x4x64x8xf32, #tpu.memory_space<vmem>>, vector<1x4x64x8xf32>,
    return
  }
  func.func @transform_0(%arg0: i32) -> (i32, i32, i32, i32) {
    %c0_i32 = arith.constant 0 : i32
    %c0_i32_0 = arith.constant 0 : i32
    %c0_i32_1 = arith.constant 0 : i32
    %c0_i32_2 = arith.constant 0 : i32
    return %arg0, %c0_i32, %c0_i32_0, %c0_i32_1 : i32, i32, i32, i32
  }
  func.func @transform_1(%arg0: i32) -> (i32, i32, i32, i32) {
    %c0_i32 = arith.constant 0 : i32
    %c0_i32_0 = arith.constant 0 : i32
    %c0_i32_1 = arith.constant 0 : i32
    %c0_i32_2 = arith.constant 0 : i32
    return %arg0, %c0_i32, %c0_i32_0, %c0_i32_1 : i32, i32, i32, i32
  }
  func.func @transform_2(%arg0: i32) -> (i32, i32, i32, i32) {
    %c0_i32 = arith.constant 0 : i32
    %c0_i32_0 = arith.constant 0 : i32
    %c0_i32_1 = arith.constant 0 : i32
    %c0_i32_2 = arith.constant 0 : i32
    return %arg0, %c0_i32, %c0_i32_0, %c0_i32_1 : i32, i32, i32, i32
  }
  func.func @transform_3(%arg0: i32) -> (i32, i32, i32, i32) {
    %c0_i32 = arith.constant 0 : i32
    %c0_i32_0 = arith.constant 0 : i32
    %c0_i32_1 = arith.constant 0 : i32
    %c0_i32_2 = arith.constant 0 : i32
    return %arg0, %c0_i32, %c0_i32_0, %c0_i32_1 : i32, i32, i32, i32
  }
  func.func @transform_4(%arg0: i32) -> (i32, i32, i32, i32) {
    %c0_i32 = arith.constant 0 : i32
    %c0_i32_0 = arith.constant 0 : i32
    %c0_i32_1 = arith.constant 0 : i32
    %c0_i32_2 = arith.constant 0 : i32
    return %arg0, %c0_i32, %c0_i32_0, %c0_i32_1 : i32, i32, i32, i32
  }
}

module attributes {stable_mosaic.version = 11 : i64} {
  func.func @_mm_bias_stats_kernel(%arg0: i32, %arg1: i32, %arg2: i32, %arg3: memref<128x8xf32, #tpu.memory_space<vmem>>, %arg4: memref<8x128xf32, #tpu.memory_space<vmem>>, %arg5: memref<1x128xf32, #tpu.memory_space<vmem>>, %arg6: memref<128x128xf32, #tpu.memory_space<vmem>>, %arg7: memref<2x128xf32, #tpu.memory_space<vmem>>, %arg8: memref<128x128xf32, #tpu.memory_space<vmem>>, %arg9: memref<2x128xf32, #tpu.memory_space<vmem>>) attributes {dimension_semantics = [#tpu.dimension_semantics<parallel>, #tpu.dimension_semantics<arbitrary>, #tpu.dimension_semantics<arbitrary>], iteration_bounds = array<i64: 1, 1, 1>, scalar_prefetch = 0 : i64, scratch_operands = 2 : i64, tpu.core_type = #tpu.core_type<tc>, window_params = [{transform_indices = @transform_0, window_bounds = array<i64: 128, 8>}, {transform_indices = @transform_1, window_bounds = array<i64: 8, 128>}, {transform_indices = @transform_2, window_bounds = array<i64: 1, 128>}, {transform_indices = @transform_3, window_bounds = array<i64: 128, 128>}, {transform_indices = @transform_4, window_bounds = array<i64: 2, 128>}]} {
    %c0_i32 = arith.constant 0 : i32
    %0 = arith.cmpi eq, %arg2, %c0_i32 : i32
    %1 = arith.extui %0 : i1 to i32
    %c0_i32_0 = arith.constant 0 : i32
    %2 = arith.cmpi ne, %1, %c0_i32_0 : i32
    scf.if %2 {
      %cst_16 = arith.constant 0.000000e+00 : f32
      %24 = vector.broadcast %cst_16 : f32 to vector<128x128xf32>
      %c0_17 = arith.constant 0 : index
      %c0_18 = arith.constant 0 : index
      %25 = vector.load %arg8[%c0_17, %c0_18] : memref<128x128xf32, #tpu.memory_space<vmem>>, vector<128x128xf32>
      tpu.vector_store %arg8[%c0_17, %c0_18], %24 {strides = array<i32>} : memref<128x128xf32, #tpu.memory_space<vmem>>, vector<128x128xf32>,
    } else {
    }
    %c0_i32_1 = arith.constant 0 : i32
    %3 = arith.cmpi eq, %arg1, %c0_i32_1 : i32
    %c0_i32_2 = arith.constant 0 : i32
    %4 = arith.cmpi eq, %arg2, %c0_i32_2 : i32
    %5 = arith.andi %3, %4 : i1
    %6 = arith.extui %5 : i1 to i32
    %c0_i32_3 = arith.constant 0 : i32
    %7 = arith.cmpi ne, %6, %c0_i32_3 : i32
    scf.if %7 {
      %cst_16 = arith.constant 0.000000e+00 : f32
      %24 = vector.broadcast %cst_16 : f32 to vector<2x128xf32>
      %c0_17 = arith.constant 0 : index
      %c0_18 = arith.constant 0 : index
      %25 = vector.load %arg9[%c0_17, %c0_18] : memref<2x128xf32, #tpu.memory_space<vmem>>, vector<2x128xf32>
      tpu.vector_store %arg9[%c0_17, %c0_18], %24 {strides = array<i32>} : memref<2x128xf32, #tpu.memory_space<vmem>>, vector<2x128xf32>,
    } else {
    }
    %c0 = arith.constant 0 : index
    %c0_4 = arith.constant 0 : index
    %8 = vector.load %arg8[%c0, %c0_4] : memref<128x128xf32, #tpu.memory_space<vmem>>, vector<128x128xf32>
    %c0_5 = arith.constant 0 : index
    %c0_6 = arith.constant 0 : index
    %9 = vector.load %arg3[%c0_5, %c0_6] : memref<128x8xf32, #tpu.memory_space<vmem>>, vector<128x8xf32>
    %10 = arith.truncf %9 : vector<128x8xf32> to vector<128x8xbf16>
    %c0_7 = arith.constant 0 : index
    %c0_8 = arith.constant 0 : index
    %11 = vector.load %arg4[%c0_7, %c0_8] : memref<8x128xf32, #tpu.memory_space<vmem>>, vector<8x128xf32>
    %12 = arith.truncf %11 : vector<8x128xf32> to vector<8x128xbf16>
    %cst = arith.constant dense<0.000000e+00> : vector<128x128xf32>
    %13 = tpu.matmul %10, %12, %cst {dimension_numbers = #tpu.dot_dimension_numbers<[1], [0], [0], [1], [0, 0, 1, 1], [], []>} : vector<128x8xbf16>, vector<8x128xbf16>, vector<128x128xf32> -> vector<128x128xf32>
    %14 = arith.addf %8, %13 : vector<128x128xf32>
    %c0_9 = arith.constant 0 : index
    %c0_10 = arith.constant 0 : index
    %15 = vector.load %arg8[%c0_9, %c0_10] : memref<128x128xf32, #tpu.memory_space<vmem>>, vector<128x128xf32>
    tpu.vector_store %arg8[%c0_9, %c0_10], %14 {strides = array<i32>} : memref<128x128xf32, #tpu.memory_space<vmem>>, vector<128x128xf32>,
    %c0_i32_11 = arith.constant 0 : i32
    %16 = arith.cmpi eq, %arg2, %c0_i32_11 : i32
    %17 = arith.extui %16 : i1 to i32
    %c0_i32_12 = arith.constant 0 : i32
    %18 = arith.cmpi ne, %17, %c0_i32_12 : i32
    scf.if %18 {
      %c0_16 = arith.constant 0 : index
      %c0_17 = arith.constant 0 : index
      %24 = vector.load %arg8[%c0_16, %c0_17] : memref<128x128xf32, #tpu.memory_space<vmem>>, vector<128x128xf32>
      %c0_18 = arith.constant 0 : index
      %c0_19 = arith.constant 0 : index
      %25 = vector.load %arg5[%c0_18, %c0_19] : memref<1x128xf32, #tpu.memory_space<vmem>>, vector<1x128xf32>
      %26 = vector.broadcast %25 : vector<1x128xf32> to vector<128x128xf32>
      %27 = arith.addf %24, %26 : vector<128x128xf32>
      %c0_20 = arith.constant 0 : index
      %c0_21 = arith.constant 0 : index
      %28 = vector.load %arg6[%c0_20, %c0_21] : memref<128x128xf32, #tpu.memory_space<vmem>>, vector<128x128xf32>
      tpu.vector_store %arg6[%c0_20, %c0_21], %27 {strides = array<i32>} : memref<128x128xf32, #tpu.memory_space<vmem>>, vector<128x128xf32>,
      %29 = tpu.iota {dimensions = array<i32: 0>} : vector<128x1xi32>
      %c128_i32 = arith.constant 128 : i32
      %30 = arith.muli %arg1, %c128_i32 : i32
      %31 = vector.broadcast %30 : i32 to vector<128x1xi32>
      %32 = arith.addi %29, %31 : vector<128x1xi32>
      %c128_i32_22 = arith.constant 128 : i32
      %33 = vector.broadcast %c128_i32_22 : i32 to vector<128x1xi32>
      %34 = arith.cmpi slt, %32, %33 : vector<128x1xi32>
      %cst_23 = arith.constant 0.000000e+00 : f32
      %35 = vector.shape_cast %34 : vector<128x1xi1> to vector<128x1xi1>
      %36 = vector.broadcast %35 : vector<128x1xi1> to vector<128x128xi1>
      %37 = vector.broadcast %cst_23 : f32 to vector<128x128xf32>
      %38 = arith.select %36, %27, %37 : vector<128x128xi1>, vector<128x128xf32>
      %c0_24 = arith.constant 0 : index
      %c0_25 = arith.constant 0 : index
      %39 = vector.load %arg9[%c0_24, %c0_25] : memref<2x128xf32, #tpu.memory_space<vmem>>, vector<1x128xf32>
      %cst_26 = arith.constant dense<0.000000e+00> : vector<128xf32>
      %40 = vector.multi_reduction <add>, %38, %cst_26 [0] : vector<128x128xf32> to vector<128xf32>
      %41 = vector.shape_cast %40 : vector<128xf32> to vector<1x128xf32>
      %42 = arith.addf %39, %41 : vector<1x128xf32>
      %c0_27 = arith.constant 0 : index
      %c0_28 = arith.constant 0 : index
      %43 = vector.load %arg9[%c0_27, %c0_28] : memref<2x128xf32, #tpu.memory_space<vmem>>, vector<1x128xf32>
      tpu.vector_store %arg9[%c0_27, %c0_28], %42 {strides = array<i32>} : memref<2x128xf32, #tpu.memory_space<vmem>>, vector<1x128xf32>,
      %c1 = arith.constant 1 : index
      %c0_29 = arith.constant 0 : index
      %44 = vector.load %arg9[%c1, %c0_29] : memref<2x128xf32, #tpu.memory_space<vmem>>, vector<1x128xf32>
      %45 = arith.mulf %38, %38 : vector<128x128xf32>
      %cst_30 = arith.constant dense<0.000000e+00> : vector<128xf32>
      %46 = vector.multi_reduction <add>, %45, %cst_30 [0] : vector<128x128xf32> to vector<128xf32>
      %47 = vector.shape_cast %46 : vector<128xf32> to vector<1x128xf32>
      %48 = arith.addf %44, %47 : vector<1x128xf32>
      %c1_31 = arith.constant 1 : index
      %c0_32 = arith.constant 0 : index
      %49 = vector.load %arg9[%c1_31, %c0_32] : memref<2x128xf32, #tpu.memory_space<vmem>>, vector<1x128xf32>
      tpu.vector_store %arg9[%c1_31, %c0_32], %48 {strides = array<i32>} : memref<2x128xf32, #tpu.memory_space<vmem>>, vector<1x128xf32>,
    } else {
    }
    %c0_i32_13 = arith.constant 0 : i32
    %19 = arith.cmpi eq, %arg1, %c0_i32_13 : i32
    %c0_i32_14 = arith.constant 0 : i32
    %20 = arith.cmpi eq, %arg2, %c0_i32_14 : i32
    %21 = arith.andi %19, %20 : i1
    %22 = arith.extui %21 : i1 to i32
    %c0_i32_15 = arith.constant 0 : i32
    %23 = arith.cmpi ne, %22, %c0_i32_15 : i32
    scf.if %23 {
      %c0_16 = arith.constant 0 : index
      %c0_17 = arith.constant 0 : index
      %24 = vector.load %arg9[%c0_16, %c0_17] : memref<2x128xf32, #tpu.memory_space<vmem>>, vector<2x128xf32>
      %c0_18 = arith.constant 0 : index
      %c0_19 = arith.constant 0 : index
      %25 = vector.load %arg7[%c0_18, %c0_19] : memref<2x128xf32, #tpu.memory_space<vmem>>, vector<2x128xf32>
      tpu.vector_store %arg7[%c0_18, %c0_19], %24 {strides = array<i32>} : memref<2x128xf32, #tpu.memory_space<vmem>>, vector<2x128xf32>,
    } else {
    }
    return
  }
  func.func @transform_0(%arg0: i32, %arg1: i32, %arg2: i32) -> (i32, i32) {
    %c0_i32 = arith.constant 0 : i32
    return %arg1, %arg2 : i32, i32
  }
  func.func @transform_1(%arg0: i32, %arg1: i32, %arg2: i32) -> (i32, i32) {
    %c0_i32 = arith.constant 0 : i32
    return %arg2, %arg0 : i32, i32
  }
  func.func @transform_2(%arg0: i32, %arg1: i32, %arg2: i32) -> (i32, i32) {
    %c0_i32 = arith.constant 0 : i32
    %c0_i32_0 = arith.constant 0 : i32
    return %c0_i32, %arg0 : i32, i32
  }
  func.func @transform_3(%arg0: i32, %arg1: i32, %arg2: i32) -> (i32, i32) {
    %c0_i32 = arith.constant 0 : i32
    return %arg1, %arg0 : i32, i32
  }
  func.func @transform_4(%arg0: i32, %arg1: i32, %arg2: i32) -> (i32, i32) {
    %c0_i32 = arith.constant 0 : i32
    %c0_i32_0 = arith.constant 0 : i32
    return %c0_i32, %arg0 : i32, i32
  }
}

module attributes {stable_mosaic.version = 11 : i64} {
  func.func @_affine_kernel(%arg0: i32, %arg1: memref<8x128xf32, #tpu.memory_space<vmem>>, %arg2: memref<1x128xf32, #tpu.memory_space<vmem>>, %arg3: memref<1x128xf32, #tpu.memory_space<vmem>>, %arg4: memref<8x128xf32, #tpu.memory_space<vmem>>) attributes {dimension_semantics = [#tpu.dimension_semantics<parallel>], iteration_bounds = array<i64: 1>, scalar_prefetch = 0 : i64, scratch_operands = 0 : i64, tpu.core_type = #tpu.core_type<tc>, window_params = [{transform_indices = @transform_0, window_bounds = array<i64: 8, 128>}, {pipeline_mode = #tpu.pipeline_mode<synchronous>, transform_indices = @transform_1, window_bounds = array<i64: 1, 128>}, {pipeline_mode = #tpu.pipeline_mode<synchronous>, transform_indices = @transform_2, window_bounds = array<i64: 1, 128>}, {transform_indices = @transform_3, window_bounds = array<i64: 8, 128>}]} {
    %c0 = arith.constant 0 : index
    %c0_0 = arith.constant 0 : index
    %0 = vector.load %arg1[%c0, %c0_0] : memref<8x128xf32, #tpu.memory_space<vmem>>, vector<8x128xf32>
    %c0_1 = arith.constant 0 : index
    %c0_2 = arith.constant 0 : index
    %1 = vector.load %arg2[%c0_1, %c0_2] : memref<1x128xf32, #tpu.memory_space<vmem>>, vector<1x128xf32>
    %2 = vector.broadcast %1 : vector<1x128xf32> to vector<8x128xf32>
    %3 = arith.mulf %0, %2 : vector<8x128xf32>
    %c0_3 = arith.constant 0 : index
    %c0_4 = arith.constant 0 : index
    %4 = vector.load %arg3[%c0_3, %c0_4] : memref<1x128xf32, #tpu.memory_space<vmem>>, vector<1x128xf32>
    %5 = vector.broadcast %4 : vector<1x128xf32> to vector<8x128xf32>
    %6 = arith.addf %3, %5 : vector<8x128xf32>
    %cst = arith.constant 0.000000e+00 : f32
    %7 = vector.broadcast %cst : f32 to vector<8x128xf32>
    %8 = arith.maximumf %6, %7 : vector<8x128xf32>
    %c0_5 = arith.constant 0 : index
    %c0_6 = arith.constant 0 : index
    %9 = vector.load %arg4[%c0_5, %c0_6] : memref<8x128xf32, #tpu.memory_space<vmem>>, vector<8x128xf32>
    tpu.vector_store %arg4[%c0_5, %c0_6], %8 {strides = array<i32>} : memref<8x128xf32, #tpu.memory_space<vmem>>, vector<8x128xf32>,
    return
  }
  func.func @transform_0(%arg0: i32) -> (i32, i32) {
    %c0_i32 = arith.constant 0 : i32
    %c0_i32_0 = arith.constant 0 : i32
    return %arg0, %c0_i32 : i32, i32
  }
  func.func @transform_1(%arg0: i32) -> (i32, i32) {
    %c0_i32 = arith.constant 0 : i32
    %c0_i32_0 = arith.constant 0 : i32
    %c0_i32_1 = arith.constant 0 : i32
    return %c0_i32, %c0_i32_0 : i32, i32
  }
  func.func @transform_2(%arg0: i32) -> (i32, i32) {
    %c0_i32 = arith.constant 0 : i32
    %c0_i32_0 = arith.constant 0 : i32
    %c0_i32_1 = arith.constant 0 : i32
    return %c0_i32, %c0_i32_0 : i32, i32
  }
  func.func @transform_3(%arg0: i32) -> (i32, i32) {
    %c0_i32 = arith.constant 0 : i32
    %c0_i32_0 = arith.constant 0 : i32
    return %arg0, %c0_i32 : i32, i32
  }
}

module attributes {stable_mosaic.version = 11 : i64} {
  func.func @_mm_bias_stats_kernel(%arg0: i32, %arg1: i32, %arg2: i32, %arg3: memref<128x72xf32, #tpu.memory_space<vmem>>, %arg4: memref<72x128xf32, #tpu.memory_space<vmem>>, %arg5: memref<1x128xf32, #tpu.memory_space<vmem>>, %arg6: memref<128x128xf32, #tpu.memory_space<vmem>>, %arg7: memref<2x128xf32, #tpu.memory_space<vmem>>, %arg8: memref<128x128xf32, #tpu.memory_space<vmem>>, %arg9: memref<2x128xf32, #tpu.memory_space<vmem>>) attributes {dimension_semantics = [#tpu.dimension_semantics<parallel>, #tpu.dimension_semantics<arbitrary>, #tpu.dimension_semantics<arbitrary>], iteration_bounds = array<i64: 1, 1, 1>, scalar_prefetch = 0 : i64, scratch_operands = 2 : i64, tpu.core_type = #tpu.core_type<tc>, window_params = [{transform_indices = @transform_0, window_bounds = array<i64: 128, 72>}, {transform_indices = @transform_1, window_bounds = array<i64: 72, 128>}, {transform_indices = @transform_2, window_bounds = array<i64: 1, 128>}, {transform_indices = @transform_3, window_bounds = array<i64: 128, 128>}, {transform_indices = @transform_4, window_bounds = array<i64: 2, 128>}]} {
    %c0_i32 = arith.constant 0 : i32
    %0 = arith.cmpi eq, %arg2, %c0_i32 : i32
    %1 = arith.extui %0 : i1 to i32
    %c0_i32_0 = arith.constant 0 : i32
    %2 = arith.cmpi ne, %1, %c0_i32_0 : i32
    scf.if %2 {
      %cst_16 = arith.constant 0.000000e+00 : f32
      %24 = vector.broadcast %cst_16 : f32 to vector<128x128xf32>
      %c0_17 = arith.constant 0 : index
      %c0_18 = arith.constant 0 : index
      %25 = vector.load %arg8[%c0_17, %c0_18] : memref<128x128xf32, #tpu.memory_space<vmem>>, vector<128x128xf32>
      tpu.vector_store %arg8[%c0_17, %c0_18], %24 {strides = array<i32>} : memref<128x128xf32, #tpu.memory_space<vmem>>, vector<128x128xf32>,
    } else {
    }
    %c0_i32_1 = arith.constant 0 : i32
    %3 = arith.cmpi eq, %arg1, %c0_i32_1 : i32
    %c0_i32_2 = arith.constant 0 : i32
    %4 = arith.cmpi eq, %arg2, %c0_i32_2 : i32
    %5 = arith.andi %3, %4 : i1
    %6 = arith.extui %5 : i1 to i32
    %c0_i32_3 = arith.constant 0 : i32
    %7 = arith.cmpi ne, %6, %c0_i32_3 : i32
    scf.if %7 {
      %cst_16 = arith.constant 0.000000e+00 : f32
      %24 = vector.broadcast %cst_16 : f32 to vector<2x128xf32>
      %c0_17 = arith.constant 0 : index
      %c0_18 = arith.constant 0 : index
      %25 = vector.load %arg9[%c0_17, %c0_18] : memref<2x128xf32, #tpu.memory_space<vmem>>, vector<2x128xf32>
      tpu.vector_store %arg9[%c0_17, %c0_18], %24 {strides = array<i32>} : memref<2x128xf32, #tpu.memory_space<vmem>>, vector<2x128xf32>,
    } else {
    }
    %c0 = arith.constant 0 : index
    %c0_4 = arith.constant 0 : index
    %8 = vector.load %arg8[%c0, %c0_4] : memref<128x128xf32, #tpu.memory_space<vmem>>, vector<128x128xf32>
    %c0_5 = arith.constant 0 : index
    %c0_6 = arith.constant 0 : index
    %9 = vector.load %arg3[%c0_5, %c0_6] : memref<128x72xf32, #tpu.memory_space<vmem>>, vector<128x72xf32>
    %10 = arith.truncf %9 : vector<128x72xf32> to vector<128x72xbf16>
    %c0_7 = arith.constant 0 : index
    %c0_8 = arith.constant 0 : index
    %11 = vector.load %arg4[%c0_7, %c0_8] : memref<72x128xf32, #tpu.memory_space<vmem>>, vector<72x128xf32>
    %12 = arith.truncf %11 : vector<72x128xf32> to vector<72x128xbf16>
    %cst = arith.constant dense<0.000000e+00> : vector<128x128xf32>
    %13 = tpu.matmul %10, %12, %cst {dimension_numbers = #tpu.dot_dimension_numbers<[1], [0], [0], [1], [0, 0, 1, 1], [], []>} : vector<128x72xbf16>, vector<72x128xbf16>, vector<128x128xf32> -> vector<128x128xf32>
    %14 = arith.addf %8, %13 : vector<128x128xf32>
    %c0_9 = arith.constant 0 : index
    %c0_10 = arith.constant 0 : index
    %15 = vector.load %arg8[%c0_9, %c0_10] : memref<128x128xf32, #tpu.memory_space<vmem>>, vector<128x128xf32>
    tpu.vector_store %arg8[%c0_9, %c0_10], %14 {strides = array<i32>} : memref<128x128xf32, #tpu.memory_space<vmem>>, vector<128x128xf32>,
    %c0_i32_11 = arith.constant 0 : i32
    %16 = arith.cmpi eq, %arg2, %c0_i32_11 : i32
    %17 = arith.extui %16 : i1 to i32
    %c0_i32_12 = arith.constant 0 : i32
    %18 = arith.cmpi ne, %17, %c0_i32_12 : i32
    scf.if %18 {
      %c0_16 = arith.constant 0 : index
      %c0_17 = arith.constant 0 : index
      %24 = vector.load %arg8[%c0_16, %c0_17] : memref<128x128xf32, #tpu.memory_space<vmem>>, vector<128x128xf32>
      %c0_18 = arith.constant 0 : index
      %c0_19 = arith.constant 0 : index
      %25 = vector.load %arg5[%c0_18, %c0_19] : memref<1x128xf32, #tpu.memory_space<vmem>>, vector<1x128xf32>
      %26 = vector.broadcast %25 : vector<1x128xf32> to vector<128x128xf32>
      %27 = arith.addf %24, %26 : vector<128x128xf32>
      %c0_20 = arith.constant 0 : index
      %c0_21 = arith.constant 0 : index
      %28 = vector.load %arg6[%c0_20, %c0_21] : memref<128x128xf32, #tpu.memory_space<vmem>>, vector<128x128xf32>
      tpu.vector_store %arg6[%c0_20, %c0_21], %27 {strides = array<i32>} : memref<128x128xf32, #tpu.memory_space<vmem>>, vector<128x128xf32>,
      %29 = tpu.iota {dimensions = array<i32: 0>} : vector<128x1xi32>
      %c128_i32 = arith.constant 128 : i32
      %30 = arith.muli %arg1, %c128_i32 : i32
      %31 = vector.broadcast %30 : i32 to vector<128x1xi32>
      %32 = arith.addi %29, %31 : vector<128x1xi32>
      %c128_i32_22 = arith.constant 128 : i32
      %33 = vector.broadcast %c128_i32_22 : i32 to vector<128x1xi32>
      %34 = arith.cmpi slt, %32, %33 : vector<128x1xi32>
      %cst_23 = arith.constant 0.000000e+00 : f32
      %35 = vector.shape_cast %34 : vector<128x1xi1> to vector<128x1xi1>
      %36 = vector.broadcast %35 : vector<128x1xi1> to vector<128x128xi1>
      %37 = vector.broadcast %cst_23 : f32 to vector<128x128xf32>
      %38 = arith.select %36, %27, %37 : vector<128x128xi1>, vector<128x128xf32>
      %c0_24 = arith.constant 0 : index
      %c0_25 = arith.constant 0 : index
      %39 = vector.load %arg9[%c0_24, %c0_25] : memref<2x128xf32, #tpu.memory_space<vmem>>, vector<1x128xf32>
      %cst_26 = arith.constant dense<0.000000e+00> : vector<128xf32>
      %40 = vector.multi_reduction <add>, %38, %cst_26 [0] : vector<128x128xf32> to vector<128xf32>
      %41 = vector.shape_cast %40 : vector<128xf32> to vector<1x128xf32>
      %42 = arith.addf %39, %41 : vector<1x128xf32>
      %c0_27 = arith.constant 0 : index
      %c0_28 = arith.constant 0 : index
      %43 = vector.load %arg9[%c0_27, %c0_28] : memref<2x128xf32, #tpu.memory_space<vmem>>, vector<1x128xf32>
      tpu.vector_store %arg9[%c0_27, %c0_28], %42 {strides = array<i32>} : memref<2x128xf32, #tpu.memory_space<vmem>>, vector<1x128xf32>,
      %c1 = arith.constant 1 : index
      %c0_29 = arith.constant 0 : index
      %44 = vector.load %arg9[%c1, %c0_29] : memref<2x128xf32, #tpu.memory_space<vmem>>, vector<1x128xf32>
      %45 = arith.mulf %38, %38 : vector<128x128xf32>
      %cst_30 = arith.constant dense<0.000000e+00> : vector<128xf32>
      %46 = vector.multi_reduction <add>, %45, %cst_30 [0] : vector<128x128xf32> to vector<128xf32>
      %47 = vector.shape_cast %46 : vector<128xf32> to vector<1x128xf32>
      %48 = arith.addf %44, %47 : vector<1x128xf32>
      %c1_31 = arith.constant 1 : index
      %c0_32 = arith.constant 0 : index
      %49 = vector.load %arg9[%c1_31, %c0_32] : memref<2x128xf32, #tpu.memory_space<vmem>>, vector<1x128xf32>
      tpu.vector_store %arg9[%c1_31, %c0_32], %48 {strides = array<i32>} : memref<2x128xf32, #tpu.memory_space<vmem>>, vector<1x128xf32>,
    } else {
    }
    %c0_i32_13 = arith.constant 0 : i32
    %19 = arith.cmpi eq, %arg1, %c0_i32_13 : i32
    %c0_i32_14 = arith.constant 0 : i32
    %20 = arith.cmpi eq, %arg2, %c0_i32_14 : i32
    %21 = arith.andi %19, %20 : i1
    %22 = arith.extui %21 : i1 to i32
    %c0_i32_15 = arith.constant 0 : i32
    %23 = arith.cmpi ne, %22, %c0_i32_15 : i32
    scf.if %23 {
      %c0_16 = arith.constant 0 : index
      %c0_17 = arith.constant 0 : index
      %24 = vector.load %arg9[%c0_16, %c0_17] : memref<2x128xf32, #tpu.memory_space<vmem>>, vector<2x128xf32>
      %c0_18 = arith.constant 0 : index
      %c0_19 = arith.constant 0 : index
      %25 = vector.load %arg7[%c0_18, %c0_19] : memref<2x128xf32, #tpu.memory_space<vmem>>, vector<2x128xf32>
      tpu.vector_store %arg7[%c0_18, %c0_19], %24 {strides = array<i32>} : memref<2x128xf32, #tpu.memory_space<vmem>>, vector<2x128xf32>,
    } else {
    }
    return
  }
  func.func @transform_0(%arg0: i32, %arg1: i32, %arg2: i32) -> (i32, i32) {
    %c0_i32 = arith.constant 0 : i32
    return %arg1, %arg2 : i32, i32
  }
  func.func @transform_1(%arg0: i32, %arg1: i32, %arg2: i32) -> (i32, i32) {
    %c0_i32 = arith.constant 0 : i32
    return %arg2, %arg0 : i32, i32
  }
  func.func @transform_2(%arg0: i32, %arg1: i32, %arg2: i32) -> (i32, i32) {
    %c0_i32 = arith.constant 0 : i32
    %c0_i32_0 = arith.constant 0 : i32
    return %c0_i32, %arg0 : i32, i32
  }
  func.func @transform_3(%arg0: i32, %arg1: i32, %arg2: i32) -> (i32, i32) {
    %c0_i32 = arith.constant 0 : i32
    return %arg1, %arg0 : i32, i32
  }
  func.func @transform_4(%arg0: i32, %arg1: i32, %arg2: i32) -> (i32, i32) {
    %c0_i32 = arith.constant 0 : i32
    %c0_i32_0 = arith.constant 0 : i32
    return %c0_i32, %arg0 : i32, i32
  }
}

module attributes {stable_mosaic.version = 11 : i64} {
  func.func @_mm_bias_stats_kernel(%arg0: i32, %arg1: i32, %arg2: i32, %arg3: memref<128x40xf32, #tpu.memory_space<vmem>>, %arg4: memref<40x128xf32, #tpu.memory_space<vmem>>, %arg5: memref<1x128xf32, #tpu.memory_space<vmem>>, %arg6: memref<128x128xf32, #tpu.memory_space<vmem>>, %arg7: memref<2x128xf32, #tpu.memory_space<vmem>>, %arg8: memref<128x128xf32, #tpu.memory_space<vmem>>, %arg9: memref<2x128xf32, #tpu.memory_space<vmem>>) attributes {dimension_semantics = [#tpu.dimension_semantics<parallel>, #tpu.dimension_semantics<arbitrary>, #tpu.dimension_semantics<arbitrary>], iteration_bounds = array<i64: 1, 1, 1>, scalar_prefetch = 0 : i64, scratch_operands = 2 : i64, tpu.core_type = #tpu.core_type<tc>, window_params = [{transform_indices = @transform_0, window_bounds = array<i64: 128, 40>}, {transform_indices = @transform_1, window_bounds = array<i64: 40, 128>}, {transform_indices = @transform_2, window_bounds = array<i64: 1, 128>}, {transform_indices = @transform_3, window_bounds = array<i64: 128, 128>}, {transform_indices = @transform_4, window_bounds = array<i64: 2, 128>}]} {
    %c0_i32 = arith.constant 0 : i32
    %0 = arith.cmpi eq, %arg2, %c0_i32 : i32
    %1 = arith.extui %0 : i1 to i32
    %c0_i32_0 = arith.constant 0 : i32
    %2 = arith.cmpi ne, %1, %c0_i32_0 : i32
    scf.if %2 {
      %cst_16 = arith.constant 0.000000e+00 : f32
      %24 = vector.broadcast %cst_16 : f32 to vector<128x128xf32>
      %c0_17 = arith.constant 0 : index
      %c0_18 = arith.constant 0 : index
      %25 = vector.load %arg8[%c0_17, %c0_18] : memref<128x128xf32, #tpu.memory_space<vmem>>, vector<128x128xf32>
      tpu.vector_store %arg8[%c0_17, %c0_18], %24 {strides = array<i32>} : memref<128x128xf32, #tpu.memory_space<vmem>>, vector<128x128xf32>,
    } else {
    }
    %c0_i32_1 = arith.constant 0 : i32
    %3 = arith.cmpi eq, %arg1, %c0_i32_1 : i32
    %c0_i32_2 = arith.constant 0 : i32
    %4 = arith.cmpi eq, %arg2, %c0_i32_2 : i32
    %5 = arith.andi %3, %4 : i1
    %6 = arith.extui %5 : i1 to i32
    %c0_i32_3 = arith.constant 0 : i32
    %7 = arith.cmpi ne, %6, %c0_i32_3 : i32
    scf.if %7 {
      %cst_16 = arith.constant 0.000000e+00 : f32
      %24 = vector.broadcast %cst_16 : f32 to vector<2x128xf32>
      %c0_17 = arith.constant 0 : index
      %c0_18 = arith.constant 0 : index
      %25 = vector.load %arg9[%c0_17, %c0_18] : memref<2x128xf32, #tpu.memory_space<vmem>>, vector<2x128xf32>
      tpu.vector_store %arg9[%c0_17, %c0_18], %24 {strides = array<i32>} : memref<2x128xf32, #tpu.memory_space<vmem>>, vector<2x128xf32>,
    } else {
    }
    %c0 = arith.constant 0 : index
    %c0_4 = arith.constant 0 : index
    %8 = vector.load %arg8[%c0, %c0_4] : memref<128x128xf32, #tpu.memory_space<vmem>>, vector<128x128xf32>
    %c0_5 = arith.constant 0 : index
    %c0_6 = arith.constant 0 : index
    %9 = vector.load %arg3[%c0_5, %c0_6] : memref<128x40xf32, #tpu.memory_space<vmem>>, vector<128x40xf32>
    %10 = arith.truncf %9 : vector<128x40xf32> to vector<128x40xbf16>
    %c0_7 = arith.constant 0 : index
    %c0_8 = arith.constant 0 : index
    %11 = vector.load %arg4[%c0_7, %c0_8] : memref<40x128xf32, #tpu.memory_space<vmem>>, vector<40x128xf32>
    %12 = arith.truncf %11 : vector<40x128xf32> to vector<40x128xbf16>
    %cst = arith.constant dense<0.000000e+00> : vector<128x128xf32>
    %13 = tpu.matmul %10, %12, %cst {dimension_numbers = #tpu.dot_dimension_numbers<[1], [0], [0], [1], [0, 0, 1, 1], [], []>} : vector<128x40xbf16>, vector<40x128xbf16>, vector<128x128xf32> -> vector<128x128xf32>
    %14 = arith.addf %8, %13 : vector<128x128xf32>
    %c0_9 = arith.constant 0 : index
    %c0_10 = arith.constant 0 : index
    %15 = vector.load %arg8[%c0_9, %c0_10] : memref<128x128xf32, #tpu.memory_space<vmem>>, vector<128x128xf32>
    tpu.vector_store %arg8[%c0_9, %c0_10], %14 {strides = array<i32>} : memref<128x128xf32, #tpu.memory_space<vmem>>, vector<128x128xf32>,
    %c0_i32_11 = arith.constant 0 : i32
    %16 = arith.cmpi eq, %arg2, %c0_i32_11 : i32
    %17 = arith.extui %16 : i1 to i32
    %c0_i32_12 = arith.constant 0 : i32
    %18 = arith.cmpi ne, %17, %c0_i32_12 : i32
    scf.if %18 {
      %c0_16 = arith.constant 0 : index
      %c0_17 = arith.constant 0 : index
      %24 = vector.load %arg8[%c0_16, %c0_17] : memref<128x128xf32, #tpu.memory_space<vmem>>, vector<128x128xf32>
      %c0_18 = arith.constant 0 : index
      %c0_19 = arith.constant 0 : index
      %25 = vector.load %arg5[%c0_18, %c0_19] : memref<1x128xf32, #tpu.memory_space<vmem>>, vector<1x128xf32>
      %26 = vector.broadcast %25 : vector<1x128xf32> to vector<128x128xf32>
      %27 = arith.addf %24, %26 : vector<128x128xf32>
      %c0_20 = arith.constant 0 : index
      %c0_21 = arith.constant 0 : index
      %28 = vector.load %arg6[%c0_20, %c0_21] : memref<128x128xf32, #tpu.memory_space<vmem>>, vector<128x128xf32>
      tpu.vector_store %arg6[%c0_20, %c0_21], %27 {strides = array<i32>} : memref<128x128xf32, #tpu.memory_space<vmem>>, vector<128x128xf32>,
      %29 = tpu.iota {dimensions = array<i32: 0>} : vector<128x1xi32>
      %c128_i32 = arith.constant 128 : i32
      %30 = arith.muli %arg1, %c128_i32 : i32
      %31 = vector.broadcast %30 : i32 to vector<128x1xi32>
      %32 = arith.addi %29, %31 : vector<128x1xi32>
      %c128_i32_22 = arith.constant 128 : i32
      %33 = vector.broadcast %c128_i32_22 : i32 to vector<128x1xi32>
      %34 = arith.cmpi slt, %32, %33 : vector<128x1xi32>
      %cst_23 = arith.constant 0.000000e+00 : f32
      %35 = vector.shape_cast %34 : vector<128x1xi1> to vector<128x1xi1>
      %36 = vector.broadcast %35 : vector<128x1xi1> to vector<128x128xi1>
      %37 = vector.broadcast %cst_23 : f32 to vector<128x128xf32>
      %38 = arith.select %36, %27, %37 : vector<128x128xi1>, vector<128x128xf32>
      %c0_24 = arith.constant 0 : index
      %c0_25 = arith.constant 0 : index
      %39 = vector.load %arg9[%c0_24, %c0_25] : memref<2x128xf32, #tpu.memory_space<vmem>>, vector<1x128xf32>
      %cst_26 = arith.constant dense<0.000000e+00> : vector<128xf32>
      %40 = vector.multi_reduction <add>, %38, %cst_26 [0] : vector<128x128xf32> to vector<128xf32>
      %41 = vector.shape_cast %40 : vector<128xf32> to vector<1x128xf32>
      %42 = arith.addf %39, %41 : vector<1x128xf32>
      %c0_27 = arith.constant 0 : index
      %c0_28 = arith.constant 0 : index
      %43 = vector.load %arg9[%c0_27, %c0_28] : memref<2x128xf32, #tpu.memory_space<vmem>>, vector<1x128xf32>
      tpu.vector_store %arg9[%c0_27, %c0_28], %42 {strides = array<i32>} : memref<2x128xf32, #tpu.memory_space<vmem>>, vector<1x128xf32>,
      %c1 = arith.constant 1 : index
      %c0_29 = arith.constant 0 : index
      %44 = vector.load %arg9[%c1, %c0_29] : memref<2x128xf32, #tpu.memory_space<vmem>>, vector<1x128xf32>
      %45 = arith.mulf %38, %38 : vector<128x128xf32>
      %cst_30 = arith.constant dense<0.000000e+00> : vector<128xf32>
      %46 = vector.multi_reduction <add>, %45, %cst_30 [0] : vector<128x128xf32> to vector<128xf32>
      %47 = vector.shape_cast %46 : vector<128xf32> to vector<1x128xf32>
      %48 = arith.addf %44, %47 : vector<1x128xf32>
      %c1_31 = arith.constant 1 : index
      %c0_32 = arith.constant 0 : index
      %49 = vector.load %arg9[%c1_31, %c0_32] : memref<2x128xf32, #tpu.memory_space<vmem>>, vector<1x128xf32>
      tpu.vector_store %arg9[%c1_31, %c0_32], %48 {strides = array<i32>} : memref<2x128xf32, #tpu.memory_space<vmem>>, vector<1x128xf32>,
    } else {
    }
    %c0_i32_13 = arith.constant 0 : i32
    %19 = arith.cmpi eq, %arg1, %c0_i32_13 : i32
    %c0_i32_14 = arith.constant 0 : i32
    %20 = arith.cmpi eq, %arg2, %c0_i32_14 : i32
    %21 = arith.andi %19, %20 : i1
    %22 = arith.extui %21 : i1 to i32
    %c0_i32_15 = arith.constant 0 : i32
    %23 = arith.cmpi ne, %22, %c0_i32_15 : i32
    scf.if %23 {
      %c0_16 = arith.constant 0 : index
      %c0_17 = arith.constant 0 : index
      %24 = vector.load %arg9[%c0_16, %c0_17] : memref<2x128xf32, #tpu.memory_space<vmem>>, vector<2x128xf32>
      %c0_18 = arith.constant 0 : index
      %c0_19 = arith.constant 0 : index
      %25 = vector.load %arg7[%c0_18, %c0_19] : memref<2x128xf32, #tpu.memory_space<vmem>>, vector<2x128xf32>
      tpu.vector_store %arg7[%c0_18, %c0_19], %24 {strides = array<i32>} : memref<2x128xf32, #tpu.memory_space<vmem>>, vector<2x128xf32>,
    } else {
    }
    return
  }
  func.func @transform_0(%arg0: i32, %arg1: i32, %arg2: i32) -> (i32, i32) {
    %c0_i32 = arith.constant 0 : i32
    return %arg1, %arg2 : i32, i32
  }
  func.func @transform_1(%arg0: i32, %arg1: i32, %arg2: i32) -> (i32, i32) {
    %c0_i32 = arith.constant 0 : i32
    return %arg2, %arg0 : i32, i32
  }
  func.func @transform_2(%arg0: i32, %arg1: i32, %arg2: i32) -> (i32, i32) {
    %c0_i32 = arith.constant 0 : i32
    %c0_i32_0 = arith.constant 0 : i32
    return %c0_i32, %arg0 : i32, i32
  }
  func.func @transform_3(%arg0: i32, %arg1: i32, %arg2: i32) -> (i32, i32) {
    %c0_i32 = arith.constant 0 : i32
    return %arg1, %arg0 : i32, i32
  }
  func.func @transform_4(%arg0: i32, %arg1: i32, %arg2: i32) -> (i32, i32) {
    %c0_i32 = arith.constant 0 : i32
    %c0_i32_0 = arith.constant 0 : i32
    return %c0_i32, %arg0 : i32, i32
  }
}

module attributes {stable_mosaic.version = 11 : i64} {
  func.func @_affine_res_kernel(%arg0: i32, %arg1: memref<32x128xf32, #tpu.memory_space<vmem>>, %arg2: memref<1x128xf32, #tpu.memory_space<vmem>>, %arg3: memref<1x128xf32, #tpu.memory_space<vmem>>, %arg4: memref<32x128xf32, #tpu.memory_space<vmem>>, %arg5: memref<32x128xf32, #tpu.memory_space<vmem>>) attributes {dimension_semantics = [#tpu.dimension_semantics<parallel>], iteration_bounds = array<i64: 1>, scalar_prefetch = 0 : i64, scratch_operands = 0 : i64, tpu.core_type = #tpu.core_type<tc>, window_params = [{transform_indices = @transform_0, window_bounds = array<i64: 32, 128>}, {pipeline_mode = #tpu.pipeline_mode<synchronous>, transform_indices = @transform_1, window_bounds = array<i64: 1, 128>}, {pipeline_mode = #tpu.pipeline_mode<synchronous>, transform_indices = @transform_2, window_bounds = array<i64: 1, 128>}, {transform_indices = @transform_3, window_bounds = array<i64: 32, 128>}, {transform_indices = @transform_4, window_bounds = array<i64: 32, 128>}]} {
    %c0 = arith.constant 0 : index
    %c0_0 = arith.constant 0 : index
    %0 = vector.load %arg1[%c0, %c0_0] : memref<32x128xf32, #tpu.memory_space<vmem>>, vector<32x128xf32>
    %c0_1 = arith.constant 0 : index
    %c0_2 = arith.constant 0 : index
    %1 = vector.load %arg2[%c0_1, %c0_2] : memref<1x128xf32, #tpu.memory_space<vmem>>, vector<1x128xf32>
    %2 = vector.broadcast %1 : vector<1x128xf32> to vector<32x128xf32>
    %3 = arith.mulf %0, %2 : vector<32x128xf32>
    %c0_3 = arith.constant 0 : index
    %c0_4 = arith.constant 0 : index
    %4 = vector.load %arg3[%c0_3, %c0_4] : memref<1x128xf32, #tpu.memory_space<vmem>>, vector<1x128xf32>
    %5 = vector.broadcast %4 : vector<1x128xf32> to vector<32x128xf32>
    %6 = arith.addf %3, %5 : vector<32x128xf32>
    %c0_5 = arith.constant 0 : index
    %c0_6 = arith.constant 0 : index
    %7 = vector.load %arg4[%c0_5, %c0_6] : memref<32x128xf32, #tpu.memory_space<vmem>>, vector<32x128xf32>
    %8 = arith.addf %6, %7 : vector<32x128xf32>
    %cst = arith.constant 0.000000e+00 : f32
    %9 = vector.broadcast %cst : f32 to vector<32x128xf32>
    %10 = arith.maximumf %8, %9 : vector<32x128xf32>
    %c0_7 = arith.constant 0 : index
    %c0_8 = arith.constant 0 : index
    %11 = vector.load %arg5[%c0_7, %c0_8] : memref<32x128xf32, #tpu.memory_space<vmem>>, vector<32x128xf32>
    tpu.vector_store %arg5[%c0_7, %c0_8], %10 {strides = array<i32>} : memref<32x128xf32, #tpu.memory_space<vmem>>, vector<32x128xf32>,
    return
  }
  func.func @transform_0(%arg0: i32) -> (i32, i32) {
    %c0_i32 = arith.constant 0 : i32
    %c0_i32_0 = arith.constant 0 : i32
    return %arg0, %c0_i32 : i32, i32
  }
  func.func @transform_1(%arg0: i32) -> (i32, i32) {
    %c0_i32 = arith.constant 0 : i32
    %c0_i32_0 = arith.constant 0 : i32
    %c0_i32_1 = arith.constant 0 : i32
    return %c0_i32, %c0_i32_0 : i32, i32
  }
  func.func @transform_2(%arg0: i32) -> (i32, i32) {
    %c0_i32 = arith.constant 0 : i32
    %c0_i32_0 = arith.constant 0 : i32
    %c0_i32_1 = arith.constant 0 : i32
    return %c0_i32, %c0_i32_0 : i32, i32
  }
  func.func @transform_3(%arg0: i32) -> (i32, i32) {
    %c0_i32 = arith.constant 0 : i32
    %c0_i32_0 = arith.constant 0 : i32
    return %arg0, %c0_i32 : i32, i32
  }
  func.func @transform_4(%arg0: i32) -> (i32, i32) {
    %c0_i32 = arith.constant 0 : i32
    %c0_i32_0 = arith.constant 0 : i32
    return %arg0, %c0_i32 : i32, i32
  }
}

</mosaic_0001>

<bundles_post_ra>
// kernel: bottleneck_forward.18
= control target key start
LH: loop header
LB: loop body
LE: loop exit
PB: predicated region body
PF: predicated region fallthrough
CT: control target
= control target key end

     0   :  { %10 = vsyncpa [#allocation5], 0  ;;  %s562_s15 = smov [#allocation4]   ;;  %s689_s0 = inlined_call_operand.hbm [shape: f32[128,32], index: 0, kind: input, shape index: {}]   ;;  %s690_s1 = inlined_call_operand.vmem [shape: f32[32,128], index: 1, kind: input, shape index: {}]   ;;  %s691_s2 = inlined_call_operand.vmem [shape: f32[1,128], index: 2, kind: input, shape index: {}]   ;;  %s692_s3 = inlined_call_operand.vmem [shape: f32[128,128], index: 3, kind: output, shape index: {0}]   ;;  %s693_s4 = inlined_call_operand.vmem [shape: f32[2,128], index: 4, kind: output, shape index: {1}]  }
   0x1   :  { %s16_s16 = sshll.u32 %s562_s15, 4  ;;  %s538_s19 = scalar_lea.hbm %s689_s0, 2048  ;;  %s17_s16 = int_to_ptr.vmem [resolvable:$true] %s16_s16 }
   0x2   :  { %p539_p0 = scmp.ne.s32.totalorder %s689_s0, %s538_s19  ;;  %p542_p1 = scmp.lt.u32.totalorder %s538_s19, %s689_s0 }
   0x4   :  { %p544_p2 = pnand %p542_p1, %p539_p0 }
   0x6   :  { %547 = shalt.err (!%p544_p2)
}
   0x7   :  { %s548_s24 = scalar_lea.vmem %s17_s16, 2048  ;;  %p553_p4 = scmp.lt.s32.totalorder %s17_s16, %s17_s16 }
   0x8   :  { %p549_p3 = scmp.ne.s32.totalorder %s17_s16, %s548_s24  ;;  %p554_p5 = scmp.lt.s32.totalorder %s548_s24, %s548_s24 }
   0xa   :  { %p555_p6 = por %p554_p5, %p553_p4 }
   0xc   :  { %p556_p7 = pnand %p555_p6, %p549_p3 }
   0xe   :  { %559 = shalt.err (!%p556_p7)
}
   0xf   :  { %s563_s25 = smov 128   ;;  %s564_s26 = smov 8  }
  0x10   :  { %22 = dma.hbm_to_vmem [thread:$0]  %s689_s0, 2048, %s17_s16, [#allocation5], %s563_s25, %s563_s25, %s564_s26  }
  0x11   :  { %560 = dma.done.wait [#allocation5], 2048  }
  0x12   :  { %561 = vsyncadd [#allocation5], 4294965248  ;;  %v97_v0 = vld [vmem:[%s690_s1] sm:$0xff]  ;;  %v98_v1 = vld [vmem:[%s690_s1 + $0x8] sm:$0xff]  ;;  %vm103_vm0 = vcmask 261120   ;;  %v565_v30 = vmov 0.0  }
  0x13   :  { %v99_v2 = vld [vmem:[%s690_s1 + $0x10] sm:$0xff]  ;;  %v101_v3 = vpack.c.bf16 %v98_v1, %v97_v0  ;;  %v100_v4 = vld [vmem:[%s690_s1 + $0x18] sm:$0xff]  ;;  %v73_v5 = vld [vmem:[#allocation4] sm:$0xff]  ;;  %56 = vst [vmem:[#allocation3] sm:$0x3] %v565_v30 }
  0x14   :  { %v74_v6 = vld [vmem:[#allocation4 + $0x8] sm:$0xff]  ;;  %v102_v7 = vpack.c.bf16 %v100_v4, %v99_v2  ;;  %v75_v9 = vld [vmem:[#allocation4 + $0x10] sm:$0xff]  ;;  %v76_v10 = vld [vmem:[#allocation4 + $0x18] sm:$0xff] }
  0x15   :  { %v89_v8 = vpack.c.bf16 %v74_v6, %v73_v5  ;;  %510 = vmatprep.subr.bf16.mxu0 %v101_v3  ;;  %530 = vmatprep.subr.bf16.mxu1 %v101_v3  ;;  %v77_v11 = vld [vmem:[#allocation4 + $0x20] sm:$0xff]  ;;  %v82_v13 = vld [vmem:[#allocation4 + $0x48] sm:$0xff]  ;;  %v83_v16 = vld [vmem:[#allocation4 + $0x50] sm:$0xff]  ;;  %v90_v20 = vpack.c.bf16 %v76_v10, %v75_v9 }
  0x16   :  { %511 = vmatpush3.bf16.msra.mxu0 %v101_v3  ;;  %v81_v12 = vld [vmem:[#allocation4 + $0x40] sm:$0xff]  ;;  %532 = vmatpush3.bf16.msra.mxu1 %v101_v3  ;;  %v78_v14 = vld [vmem:[#allocation4 + $0x28] sm:$0xff]  ;;  %v84_v17 = vld [vmem:[#allocation4 + $0x58] sm:$0xff] }
  0x17   :  { %514 = vmatprep.mubr.msk.bf16.mxu0 %vm103_vm0, %v89_v8  ;;  %512 = vmatprep.subr.bf16.mxu0 %v102_v7  ;;  %v93_v15 = vpack.c.bf16 %v82_v13, %v81_v12  ;;  %v85_v18 = vld [vmem:[#allocation4 + $0x60] sm:$0xff]  ;;  %v86_v19 = vld [vmem:[#allocation4 + $0x68] sm:$0xff]  ;;  %v91_v21 = vpack.c.bf16 %v78_v14, %v77_v11  ;;  %v94_v22 = vpack.c.bf16 %v84_v17, %v83_v16  ;;  %v79_v24 = vld [vmem:[#allocation4 + $0x30] sm:$0xff] }
  0x18   :  { %531 = vmatprep.subr.bf16.mxu1 %v102_v7  ;;  %v95_v23 = vpack.c.bf16 %v86_v19, %v85_v18  ;;  %v80_v25 = vld [vmem:[#allocation4 + $0x38] sm:$0xff]  ;;  %v87_v26 = vld [vmem:[#allocation4 + $0x70] sm:$0xff] }
  0x19   :  { %522 = vmatprep.mubr.msk.bf16.mxu1 %vm103_vm0, %v93_v15  ;;  %v88_v27 = vld [vmem:[#allocation4 + $0x78] sm:$0xff]  ;;  %v92_v28 = vpack.c.bf16 %v80_v25, %v79_v24 }
  0x1a   :  { %513 = vmatpush3.bf16.msra.mxu0 %v102_v7  ;;  %533 = vmatpush3.bf16.msra.mxu1 %v102_v7  ;;  %v96_v29 = vpack.c.bf16 %v88_v27, %v87_v26  ;;  %v499_v31 = vld [vmem:[%s691_s2] ss:$0 sm:$0xff] }
  0x1d   :  { %515 = vmatmul.mubr.msk.bf16.vlgmr.msra.gmra.mrb[0].mxu0 %vm103_vm0, %v90_v20  ;;  %523 = vmatmul.mubr.msk.bf16.vlgmr.msra.gmra.mrb[0].mxu1 %vm103_vm0, %v94_v22 }
  0x1e   :  { %518 = vmatprep.mubr.msk.bf16.mxu0 %vm103_vm0, %v91_v21  ;;  %526 = vmatprep.mubr.msk.bf16.mxu1 %vm103_vm0, %v95_v23 }
  0x25   :  { %519 = vmatmul.mubr.msk.bf16.gmra.mrb[4].mxu0 %vm103_vm0, %v92_v28  ;;  %527 = vmatmul.mubr.msk.bf16.gmra.mrb[4].mxu1 %vm103_vm0, %v96_v29 }
  0xf0   :  { %v516_v32 = vpop.f32.mrb[0].mxu0  ;;  %v524_v35 = vpop.f32.mrb[0].mxu1 }
  0xf1   :  { %v285_v33 = vadd.f32 %v516_v32, %v499_v31  ;;  %v162_v34 = vpop.f32.mrb[1].mxu0  ;;  %v626_v38 = vadd.f32 %v524_v35, %v499_v31  ;;  %v194_v39 = vpop.f32.mrb[1].mxu1 }
  0xf2   :  { %v283_v36 = vadd.f32 %v499_v31, %v162_v34  ;;  %v517_v37 = vpop.f32.mrb[2].mxu0  ;;  %v291_v42 = vadd.f32 %v499_v31, %v194_v39  ;;  %v525_v43 = vpop.f32.mrb[2].mxu1 }
  0xf3   :  { %301 = vst [vmem:[%s692_s3 + $0x10] sm:$0xff] %v285_v33  ;;  %v286_v40 = vadd.f32 %v517_v37, %v499_v31  ;;  %v165_v41 = vpop.f32.mrb[3].mxu0  ;;  %309 = vst [vmem:[%s692_s3 + $0x50] sm:$0xff] %v626_v38  ;;  %v638_v45 = vadd.f32 %v525_v43, %v499_v31  ;;  %v197_v46 = vpop.f32.mrb[3].mxu1  ;;  %v441_v51 = vmul.f32 %v285_v33, %v285_v33 }
  0xf4   :  { %299 = vst [vmem:[%s692_s3] sm:$0xff] %v283_v36  ;;  %v284_v44 = vadd.f32 %v499_v31, %v165_v41  ;;  %307 = vst [vmem:[%s692_s3 + $0x40] sm:$0xff] %v291_v42  ;;  %v292_v47 = vadd.f32 %v499_v31, %v197_v46  ;;  %v439_v48 = vmul.f32 %v283_v36, %v283_v36 }
  0xf5   :  { %302 = vst [vmem:[%s692_s3 + $0x18] sm:$0xff] %v286_v40  ;;  %310 = vst [vmem:[%s692_s3 + $0x58] sm:$0xff] %v638_v45  ;;  %v442_v55 = vmul.f32 %v286_v40, %v286_v40  ;;  %v447_v21 = vmul.f32 %v291_v42, %v291_v42  ;;  %v449_v27 = vmul.f32 %v626_v38, %v626_v38 }
  0xf6   :  { %300 = vst [vmem:[%s692_s3 + $0x8] sm:$0xff] %v284_v44  ;;  %v415_v49 = vadd.f32 %v284_v44, %v283_v36  ;;  %v440_v50 = vmul.f32 %v284_v44, %v284_v44  ;;  %308 = vst [vmem:[%s692_s3 + $0x48] sm:$0xff] %v292_v47  ;;  %v448_v26 = vmul.f32 %v292_v47, %v292_v47 }
  0xf7   :  { %v450_v30 = vmul.f32 %v638_v45, %v638_v45 }
  0xf8   :  { %v416_v52 = vadd.f32 %v415_v49, %v285_v33  ;;  %v455_v53 = vadd.f32 %v440_v50, %v439_v48  ;;  %v520_v54 = vpop.f32.mrb[4].mxu0  ;;  %v528_v58 = vpop.f32.mrb[4].mxu1 }
  0xf9   :  { %v289_v56 = vadd.f32 %v520_v54, %v499_v31  ;;  %v178_v57 = vpop.f32.mrb[5].mxu0  ;;  %v297_v63 = vadd.f32 %v528_v58, %v499_v31  ;;  %v210_v0 = vpop.f32.mrb[5].mxu1  ;;  %v438_v58 = vld [vmem:[#allocation3 + $0x1] sm:$0x1] }
  0xfa   :  { %v456_v59 = vadd.f32 %v455_v53, %v441_v51  ;;  %v287_v60 = vadd.f32 %v499_v31, %v178_v57  ;;  %v417_v61 = vadd.f32 %v416_v52, %v286_v40  ;;  %v521_v62 = vpop.f32.mrb[6].mxu0  ;;  %v295_v3 = vadd.f32 %v499_v31, %v210_v0  ;;  %v529_v4 = vpop.f32.mrb[6].mxu1 }
  0xfb   :  { %305 = vst [vmem:[%s692_s3 + $0x30] sm:$0xff] %v289_v56  ;;  %v290_v1 = vadd.f32 %v521_v62, %v499_v31  ;;  %v181_v2 = vpop.f32.mrb[7].mxu0  ;;  %313 = vst [vmem:[%s692_s3 + $0x70] sm:$0xff] %v297_v63  ;;  %v213_v9 = vpop.f32.mrb[7].mxu1  ;;  %v298_v10 = vadd.f32 %v529_v4, %v499_v31  ;;  %v445_v15 = vmul.f32 %v289_v56, %v289_v56 }
  0xfc   :  { %303 = vst [vmem:[%s692_s3 + $0x20] sm:$0xff] %v287_v60  ;;  %v418_v5 = vadd.f32 %v417_v61, %v287_v60  ;;  %v443_v6 = vmul.f32 %v287_v60, %v287_v60  ;;  %v457_v7 = vadd.f32 %v456_v59, %v442_v55  ;;  %v288_v8 = vadd.f32 %v499_v31, %v181_v2  ;;  %v414_v55 = vld [vmem:[#allocation3] sm:$0x1] }
  0xfd   :  { %306 = vst [vmem:[%s692_s3 + $0x38] sm:$0xff] %v290_v1  ;;  %311 = vst [vmem:[%s692_s3 + $0x60] sm:$0xff] %v295_v3  ;;  %v296_v14 = vadd.f32 %v499_v31, %v213_v9  ;;  %v446_v18 = vmul.f32 %v290_v1, %v290_v1  ;;  %v451_v33 = vmul.f32 %v295_v3, %v295_v3 }
  0xfe   :  { %v458_v11 = vadd.f32 %v457_v7, %v443_v6  ;;  %304 = vst [vmem:[%s692_s3 + $0x28] sm:$0xff] %v288_v8  ;;  %v419_v12 = vadd.f32 %v418_v5, %v288_v8  ;;  %v444_v13 = vmul.f32 %v288_v8, %v288_v8  ;;  %314 = vst [vmem:[%s692_s3 + $0x78] sm:$0xff] %v298_v10 }
  0xff   :  { %312 = vst [vmem:[%s692_s3 + $0x68] sm:$0xff] %v296_v14  ;;  %v452_v39 = vmul.f32 %v296_v14, %v296_v14  ;;  %v453_v40 = vmul.f32 %v297_v63, %v297_v63  ;;  %v454_v43 = vmul.f32 %v298_v10, %v298_v10 }
 0x100   :  { %v420_v16 = vadd.f32 %v419_v12, %v289_v56  ;;  %v459_v17 = vadd.f32 %v458_v11, %v444_v13 }
 0x102   :  { %v460_v19 = vadd.f32 %v459_v17, %v445_v15  ;;  %v421_v20 = vadd.f32 %v420_v16, %v290_v1 }
 0x104   :  { %v422_v22 = vadd.f32 %v421_v20, %v291_v42  ;;  %v461_v23 = vadd.f32 %v460_v19, %v446_v18 }
 0x106   :  { %v462_v24 = vadd.f32 %v461_v23, %v447_v21  ;;  %v423_v25 = vadd.f32 %v422_v22, %v292_v47 }
 0x108   :  { %v424_v28 = vadd.f32 %v423_v25, %v626_v38  ;;  %v463_v29 = vadd.f32 %v462_v24, %v448_v26 }
 0x10a   :  { %v464_v31 = vadd.f32 %v463_v29, %v449_v27  ;;  %v425_v32 = vadd.f32 %v424_v28, %v638_v45 }
 0x10c   :  { %v426_v34 = vadd.f32 %v425_v32, %v295_v3  ;;  %v465_v35 = vadd.f32 %v464_v31, %v450_v30 }
 0x10e   :  { %v466_v36 = vadd.f32 %v465_v35, %v451_v33  ;;  %v427_v37 = vadd.f32 %v426_v34, %v296_v14 }
 0x110   :  { %v428_v41 = vadd.f32 %v427_v37, %v297_v63  ;;  %v467_v42 = vadd.f32 %v466_v36, %v452_v39 }
 0x112   :  { %v429_v44 = vadd.f32 %v428_v41, %v298_v10  ;;  %v468_v46 = vadd.f32 %v467_v42, %v453_v40 }
 0x114   :  { %v430_v38 = vrot.slane %v429_v44, 4  ;;  %v469_v47 = vadd.f32 %v468_v46, %v454_v43 }
 0x116   :  { %v431_v48 = vadd.f32 %v430_v38, %v429_v44  ;;  %v470_v49 = vrot.slane %v469_v47, 4 }
 0x118   :  { %v432_v50 = vrot.slane %v431_v48, 2  ;;  %v471_v51 = vadd.f32 %v470_v49, %v469_v47 }
 0x11a   :  { %v433_v52 = vadd.f32 %v432_v50, %v431_v48  ;;  %v472_v45 = vrot.slane %v471_v51, 2 }
 0x11c   :  { %v434_v53 = vrot.slane %v433_v52, 1  ;;  %v473_v54 = vadd.f32 %v472_v45, %v471_v51 }
 0x11e   :  { %v435_v56 = vadd.f32 %v434_v53, %v433_v52  ;;  %v474_v57 = vrot.slane %v473_v54, 1 }
 0x120   :  { %v436_v59 = vadd.f32 %v435_v56, %v414_v55  ;;  %v475_v60 = vadd.f32 %v474_v57, %v473_v54 }
 0x122   :  { %437 = vst [vmem:[#allocation3] sm:$0x1] %v436_v59  ;;  %v476_v61 = vadd.f32 %v475_v60, %v438_v58 }
 0x124   :  { %477 = vst [vmem:[#allocation3 + $0x1] sm:$0x1] %v476_v61 }
 0x12b   :  { %v480_v62 = vld [vmem:[#allocation3] sm:$0x3] }
 0x12c   :  { %481 = vst [vmem:[%s693_s4] sm:$0x3] %v480_v62 }
 0x12d   :  { %490 = vsyncpa [#allocation5], 1 }

// kernel: bottleneck_forward.19
= control target key start
LH: loop header
LB: loop body
LE: loop exit
PB: predicated region body
PF: predicated region fallthrough
CT: control target
= control target key end

     0   :  { %vm243_vm0 = vcmask 130048   ;;  %s1462_s1 = inlined_call_operand.vmem [shape: f32[16,128], index: 1, kind: input, shape index: {}]   ;;  %s1463_s0 = inlined_call_operand.vmem [shape: f32[512,16], index: 0, kind: input, shape index: {}]   ;;  %s1464_s2 = inlined_call_operand.vmem [shape: f32[512,128], index: 2, kind: output, shape index: {}]  }
   0x1   :  { %v240_v0 = vld [vmem:[%s1462_s1] sm:$0xff]  ;;  %v241_v1 = vld [vmem:[%s1462_s1 + $0x8] sm:$0xff]  ;;  %v146_v9 = vld [vmem:[%s1463_s0 + $0x10] sm:$0xff] }
   0x2   :  { %v144_v2 = vld [vmem:[%s1463_s0] sm:$0xff]  ;;  %v242_v3 = vpack.c.bf16 %v241_v1, %v240_v0  ;;  %v145_v4 = vld [vmem:[%s1463_s0 + $0x8] sm:$0xff]  ;;  %v147_v10 = vld [vmem:[%s1463_s0 + $0x18] sm:$0xff] }
   0x3   :  { %v176_v5 = vld [vmem:[%s1463_s0 + $0x100] sm:$0xff]  ;;  %v177_v6 = vld [vmem:[%s1463_s0 + $0x108] sm:$0xff]  ;;  %v208_v7 = vpack.c.bf16 %v145_v4, %v144_v2  ;;  %v178_v11 = vld [vmem:[%s1463_s0 + $0x110] sm:$0xff]  ;;  %v209_v12 = vpack.c.bf16 %v147_v10, %v146_v9 }
   0x4   :  { %v224_v8 = vpack.c.bf16 %v177_v6, %v176_v5  ;;  %957 = vmatprep.subr.bf16.mxu0 %v242_v3  ;;  %1023 = vmatprep.subr.bf16.mxu1 %v242_v3  ;;  %v179_v13 = vld [vmem:[%s1463_s0 + $0x118] sm:$0xff]  ;;  %v148_v14 = vld [vmem:[%s1463_s0 + $0x20] sm:$0xff]  ;;  %v149_v15 = vld [vmem:[%s1463_s0 + $0x28] sm:$0xff] }
   0x5   :  { %958 = vmatpush3.bf16.msra.mxu0 %v242_v3  ;;  %1024 = vmatpush3.bf16.msra.mxu1 %v242_v3  ;;  %v225_v16 = vpack.c.bf16 %v179_v13, %v178_v11  ;;  %v210_v17 = vpack.c.bf16 %v149_v15, %v148_v14  ;;  %v180_v18 = vld [vmem:[%s1463_s0 + $0x120] sm:$0xff]  ;;  %v181_v19 = vld [vmem:[%s1463_s0 + $0x128] sm:$0xff]  ;;  %v150_v21 = vld [vmem:[%s1463_s0 + $0x30] sm:$0xff] }
   0x6   :  { %959 = vmatprep.mubr.msk.bf16.mxu0 %vm243_vm0, %v208_v7  ;;  %991 = vmatprep.mubr.msk.bf16.mxu1 %vm243_vm0, %v224_v8  ;;  %v226_v20 = vpack.c.bf16 %v181_v19, %v180_v18  ;;  %v151_v22 = vld [vmem:[%s1463_s0 + $0x38] sm:$0xff]  ;;  %v182_v23 = vld [vmem:[%s1463_s0 + $0x130] sm:$0xff]  ;;  %v152_v25 = vld [vmem:[%s1463_s0 + $0x40] sm:$0xff] }
   0x7   :  { %v183_v24 = vld [vmem:[%s1463_s0 + $0x138] sm:$0xff]  ;;  %v153_v26 = vld [vmem:[%s1463_s0 + $0x48] sm:$0xff]  ;;  %v184_v27 = vld [vmem:[%s1463_s0 + $0x140] sm:$0xff]  ;;  %v211_v29 = vpack.c.bf16 %v151_v22, %v150_v21 }
   0x8   :  { %960 = vmatmul.mubr.msk.bf16.vlgmr.msra.gmra.mrb[0].mxu0 %vm243_vm0, %v209_v12  ;;  %992 = vmatmul.mubr.msk.bf16.vlgmr.msra.gmra.mrb[0].mxu1 %vm243_vm0, %v225_v16  ;;  %v185_v28 = vld [vmem:[%s1463_s0 + $0x148] sm:$0xff]  ;;  %v227_v30 = vpack.c.bf16 %v183_v24, %v182_v23  ;;  %v212_v31 = vpack.c.bf16 %v153_v26, %v152_v25  ;;  %v154_v33 = vld [vmem:[%s1463_s0 + $0x50] sm:$0xff]  ;;  %v155_v34 = vld [vmem:[%s1463_s0 + $0x58] sm:$0xff] }
   0x9   :  { %963 = vmatprep.mubr.msk.bf16.mxu0 %vm243_vm0, %v210_v17  ;;  %995 = vmatprep.mubr.msk.bf16.mxu1 %vm243_vm0, %v226_v20  ;;  %v228_v32 = vpack.c.bf16 %v185_v28, %v184_v27  ;;  %v186_v35 = vld [vmem:[%s1463_s0 + $0x150] sm:$0xff]  ;;  %v187_v36 = vld [vmem:[%s1463_s0 + $0x158] sm:$0xff]  ;;  %v156_v37 = vld [vmem:[%s1463_s0 + $0x60] sm:$0xff]  ;;  %v213_v41 = vpack.c.bf16 %v155_v34, %v154_v33 }
   0xa   :  { %v157_v38 = vld [vmem:[%s1463_s0 + $0x68] sm:$0xff]  ;;  %v188_v39 = vld [vmem:[%s1463_s0 + $0x160] sm:$0xff]  ;;  %v229_v42 = vpack.c.bf16 %v187_v36, %v186_v35  ;;  %v158_v45 = vld [vmem:[%s1463_s0 + $0x70] sm:$0xff] }
   0xb   :  { %v189_v40 = vld [vmem:[%s1463_s0 + $0x168] sm:$0xff]  ;;  %v214_v43 = vpack.c.bf16 %v157_v38, %v156_v37  ;;  %v159_v46 = vld [vmem:[%s1463_s0 + $0x78] sm:$0xff]  ;;  %v190_v47 = vld [vmem:[%s1463_s0 + $0x170] sm:$0xff] }
   0xc   :  { %v230_v44 = vpack.c.bf16 %v189_v40, %v188_v39  ;;  %v191_v48 = vld [vmem:[%s1463_s0 + $0x178] sm:$0xff]  ;;  %v160_v49 = vld [vmem:[%s1463_s0 + $0x80] sm:$0xff]  ;;  %v161_v50 = vld [vmem:[%s1463_s0 + $0x88] sm:$0xff]  ;;  %v215_v53 = vpack.c.bf16 %v159_v46, %v158_v45 }
   0xd   :  { %v192_v51 = vld [vmem:[%s1463_s0 + $0x180] sm:$0xff]  ;;  %v193_v52 = vld [vmem:[%s1463_s0 + $0x188] sm:$0xff]  ;;  %v231_v54 = vpack.c.bf16 %v191_v48, %v190_v47  ;;  %v216_v55 = vpack.c.bf16 %v161_v50, %v160_v49  ;;  %v162_v57 = vld [vmem:[%s1463_s0 + $0x90] sm:$0xff] }
   0xe   :  { %v232_v56 = vpack.c.bf16 %v193_v52, %v192_v51  ;;  %v163_v58 = vld [vmem:[%s1463_s0 + $0x98] sm:$0xff]  ;;  %v194_v59 = vld [vmem:[%s1463_s0 + $0x190] sm:$0xff]  ;;  %v164_v61 = vld [vmem:[%s1463_s0 + $0xa0] sm:$0xff] }
   0xf   :  { %v195_v60 = vld [vmem:[%s1463_s0 + $0x198] sm:$0xff]  ;;  %v165_v62 = vld [vmem:[%s1463_s0 + $0xa8] sm:$0xff]  ;;  %v196_v63 = vld [vmem:[%s1463_s0 + $0x1a0] sm:$0xff]  ;;  %v217_v1 = vpack.c.bf16 %v163_v58, %v162_v57 }
  0x10   :  { %964 = vmatmul.mubr.msk.bf16.gmra.mrb[4].mxu0 %vm243_vm0, %v211_v29  ;;  %996 = vmatmul.mubr.msk.bf16.gmra.mrb[4].mxu1 %vm243_vm0, %v227_v30  ;;  %v197_v0 = vld [vmem:[%s1463_s0 + $0x1a8] sm:$0xff]  ;;  %v233_v2 = vpack.c.bf16 %v195_v60, %v194_v59  ;;  %v218_v3 = vpack.c.bf16 %v165_v62, %v164_v61  ;;  %v166_v5 = vld [vmem:[%s1463_s0 + $0xb0] sm:$0xff]  ;;  %v167_v6 = vld [vmem:[%s1463_s0 + $0xb8] sm:$0xff] }
  0x11   :  { %967 = vmatprep.mubr.msk.bf16.mxu0 %vm243_vm0, %v212_v31  ;;  %999 = vmatprep.mubr.msk.bf16.mxu1 %vm243_vm0, %v228_v32  ;;  %v234_v4 = vpack.c.bf16 %v197_v0, %v196_v63  ;;  %v198_v7 = vld [vmem:[%s1463_s0 + $0x1b0] sm:$0xff]  ;;  %v199_v8 = vld [vmem:[%s1463_s0 + $0x1b8] sm:$0xff]  ;;  %v168_v9 = vld [vmem:[%s1463_s0 + $0xc0] sm:$0xff]  ;;  %v219_v13 = vpack.c.bf16 %v167_v6, %v166_v5 }
  0x12   :  { %v169_v10 = vld [vmem:[%s1463_s0 + $0xc8] sm:$0xff]  ;;  %v200_v11 = vld [vmem:[%s1463_s0 + $0x1c0] sm:$0xff]  ;;  %v235_v14 = vpack.c.bf16 %v199_v8, %v198_v7  ;;  %v170_v17 = vld [vmem:[%s1463_s0 + $0xd0] sm:$0xff] }
  0x13   :  { %v201_v12 = vld [vmem:[%s1463_s0 + $0x1c8] sm:$0xff]  ;;  %v220_v15 = vpack.c.bf16 %v169_v10, %v168_v9  ;;  %v171_v18 = vld [vmem:[%s1463_s0 + $0xd8] sm:$0xff]  ;;  %v202_v19 = vld [vmem:[%s1463_s0 + $0x1d0] sm:$0xff] }
  0x14   :  { %v236_v16 = vpack.c.bf16 %v201_v12, %v200_v11  ;;  %v203_v20 = vld [vmem:[%s1463_s0 + $0x1d8] sm:$0xff]  ;;  %v172_v21 = vld [vmem:[%s1463_s0 + $0xe0] sm:$0xff]  ;;  %v173_v22 = vld [vmem:[%s1463_s0 + $0xe8] sm:$0xff]  ;;  %v221_v25 = vpack.c.bf16 %v171_v18, %v170_v17 }
  0x15   :  { %v204_v23 = vld [vmem:[%s1463_s0 + $0x1e0] sm:$0xff]  ;;  %v205_v24 = vld [vmem:[%s1463_s0 + $0x1e8] sm:$0xff]  ;;  %v237_v26 = vpack.c.bf16 %v203_v20, %v202_v19  ;;  %v222_v27 = vpack.c.bf16 %v173_v22, %v172_v21  ;;  %v174_v29 = vld [vmem:[%s1463_s0 + $0xf0] sm:$0xff] }
  0x16   :  { %v238_v28 = vpack.c.bf16 %v205_v24, %v204_v23  ;;  %v175_v30 = vld [vmem:[%s1463_s0 + $0xf8] sm:$0xff]  ;;  %v206_v31 = vld [vmem:[%s1463_s0 + $0x1f0] sm:$0xff] }
  0x17   :  { %v207_v32 = vld [vmem:[%s1463_s0 + $0x1f8] sm:$0xff]  ;;  %v223_v33 = vpack.c.bf16 %v175_v30, %v174_v29 }
  0x18   :  { %968 = vmatmul.mubr.msk.bf16.gmra.mrb[8].mxu0 %vm243_vm0, %v213_v41  ;;  %1000 = vmatmul.mubr.msk.bf16.gmra.mrb[8].mxu1 %vm243_vm0, %v229_v42  ;;  %v239_v34 = vpack.c.bf16 %v207_v32, %v206_v31 }
  0x19   :  { %971 = vmatprep.mubr.msk.bf16.mxu0 %vm243_vm0, %v214_v43  ;;  %1003 = vmatprep.mubr.msk.bf16.mxu1 %vm243_vm0, %v230_v44 }
  0x20   :  { %972 = vmatmul.mubr.msk.bf16.gmra.mrb[12].mxu0 %vm243_vm0, %v215_v53  ;;  %1004 = vmatmul.mubr.msk.bf16.gmra.mrb[12].mxu1 %vm243_vm0, %v231_v54 }
  0x21   :  { %975 = vmatprep.mubr.msk.bf16.mxu0 %vm243_vm0, %v216_v55  ;;  %1007 = vmatprep.mubr.msk.bf16.mxu1 %vm243_vm0, %v232_v56 }
  0x28   :  { %976 = vmatmul.mubr.msk.bf16.gmra.mrb[16].mxu0 %vm243_vm0, %v217_v1  ;;  %1008 = vmatmul.mubr.msk.bf16.gmra.mrb[16].mxu1 %vm243_vm0, %v233_v2 }
  0x29   :  { %979 = vmatprep.mubr.msk.bf16.mxu0 %vm243_vm0, %v218_v3  ;;  %1011 = vmatprep.mubr.msk.bf16.mxu1 %vm243_vm0, %v234_v4 }
  0x30   :  { %980 = vmatmul.mubr.msk.bf16.gmra.mrb[20].mxu0 %vm243_vm0, %v219_v13  ;;  %1012 = vmatmul.mubr.msk.bf16.gmra.mrb[20].mxu1 %vm243_vm0, %v235_v14 }
  0x31   :  { %983 = vmatprep.mubr.msk.bf16.mxu0 %vm243_vm0, %v220_v15  ;;  %1015 = vmatprep.mubr.msk.bf16.mxu1 %vm243_vm0, %v236_v16 }
  0x38   :  { %984 = vmatmul.mubr.msk.bf16.gmra.mrb[24].mxu0 %vm243_vm0, %v221_v25  ;;  %1016 = vmatmul.mubr.msk.bf16.gmra.mrb[24].mxu1 %vm243_vm0, %v237_v26 }
  0x39   :  { %987 = vmatprep.mubr.msk.bf16.mxu0 %vm243_vm0, %v222_v27  ;;  %1019 = vmatprep.mubr.msk.bf16.mxu1 %vm243_vm0, %v238_v28 }
  0x40   :  { %988 = vmatmul.mubr.msk.bf16.gmra.mrb[28].mxu0 %vm243_vm0, %v223_v33  ;;  %1020 = vmatmul.mubr.msk.bf16.gmra.mrb[28].mxu1 %vm243_vm0, %v239_v34 }
  0xdb   :  { %v961_v35 = vpop.f32.mrb[0].mxu0  ;;  %v993_v36 = vpop.f32.mrb[0].mxu1 }
  0xdc   :  { %826 = vst [vmem:[%s1464_s2 + $0x10] sm:$0xff] %v961_v35  ;;  %858 = vst [vmem:[%s1464_s2 + $0x110] sm:$0xff] %v993_v36  ;;  %v374_v37 = vpop.f32.mrb[1].mxu0  ;;  %v502_v38 = vpop.f32.mrb[1].mxu1 }
  0xdd   :  { %824 = vst [vmem:[%s1464_s2] sm:$0xff] %v374_v37  ;;  %856 = vst [vmem:[%s1464_s2 + $0x100] sm:$0xff] %v502_v38  ;;  %v962_v39 = vpop.f32.mrb[2].mxu0  ;;  %v994_v40 = vpop.f32.mrb[2].mxu1 }
  0xde   :  { %827 = vst [vmem:[%s1464_s2 + $0x18] sm:$0xff] %v962_v39  ;;  %859 = vst [vmem:[%s1464_s2 + $0x118] sm:$0xff] %v994_v40  ;;  %v377_v41 = vpop.f32.mrb[3].mxu0  ;;  %v505_v42 = vpop.f32.mrb[3].mxu1 }
  0xdf   :  { %825 = vst [vmem:[%s1464_s2 + $0x8] sm:$0xff] %v377_v41  ;;  %857 = vst [vmem:[%s1464_s2 + $0x108] sm:$0xff] %v505_v42 }
  0xe3   :  { %v965_v43 = vpop.f32.mrb[4].mxu0  ;;  %v997_v44 = vpop.f32.mrb[4].mxu1 }
  0xe4   :  { %830 = vst [vmem:[%s1464_s2 + $0x30] sm:$0xff] %v965_v43  ;;  %862 = vst [vmem:[%s1464_s2 + $0x130] sm:$0xff] %v997_v44  ;;  %v390_v45 = vpop.f32.mrb[5].mxu0  ;;  %v518_v46 = vpop.f32.mrb[5].mxu1 }
  0xe5   :  { %828 = vst [vmem:[%s1464_s2 + $0x20] sm:$0xff] %v390_v45  ;;  %860 = vst [vmem:[%s1464_s2 + $0x120] sm:$0xff] %v518_v46  ;;  %v966_v47 = vpop.f32.mrb[6].mxu0  ;;  %v998_v48 = vpop.f32.mrb[6].mxu1 }
  0xe6   :  { %831 = vst [vmem:[%s1464_s2 + $0x38] sm:$0xff] %v966_v47  ;;  %863 = vst [vmem:[%s1464_s2 + $0x138] sm:$0xff] %v998_v48  ;;  %v393_v49 = vpop.f32.mrb[7].mxu0  ;;  %v521_v50 = vpop.f32.mrb[7].mxu1 }
  0xe7   :  { %829 = vst [vmem:[%s1464_s2 + $0x28] sm:$0xff] %v393_v49  ;;  %861 = vst [vmem:[%s1464_s2 + $0x128] sm:$0xff] %v521_v50 }
  0xeb   :  { %v969_v51 = vpop.f32.mrb[8].mxu0  ;;  %v1001_v52 = vpop.f32.mrb[8].mxu1 }
  0xec   :  { %834 = vst [vmem:[%s1464_s2 + $0x50] sm:$0xff] %v969_v51  ;;  %866 = vst [vmem:[%s1464_s2 + $0x150] sm:$0xff] %v1001_v52  ;;  %v406_v53 = vpop.f32.mrb[9].mxu0  ;;  %v534_v54 = vpop.f32.mrb[9].mxu1 }
  0xed   :  { %832 = vst [vmem:[%s1464_s2 + $0x40] sm:$0xff] %v406_v53  ;;  %864 = vst [vmem:[%s1464_s2 + $0x140] sm:$0xff] %v534_v54  ;;  %v970_v55 = vpop.f32.mrb[10].mxu0  ;;  %v1002_v56 = vpop.f32.mrb[10].mxu1 }
  0xee   :  { %835 = vst [vmem:[%s1464_s2 + $0x58] sm:$0xff] %v970_v55  ;;  %867 = vst [vmem:[%s1464_s2 + $0x158] sm:$0xff] %v1002_v56  ;;  %v409_v57 = vpop.f32.mrb[11].mxu0  ;;  %v537_v58 = vpop.f32.mrb[11].mxu1 }
  0xef   :  { %833 = vst [vmem:[%s1464_s2 + $0x48] sm:$0xff] %v409_v57  ;;  %865 = vst [vmem:[%s1464_s2 + $0x148] sm:$0xff] %v537_v58 }
  0xf3   :  { %v973_v59 = vpop.f32.mrb[12].mxu0  ;;  %v1005_v60 = vpop.f32.mrb[12].mxu1 }
  0xf4   :  { %838 = vst [vmem:[%s1464_s2 + $0x70] sm:$0xff] %v973_v59  ;;  %870 = vst [vmem:[%s1464_s2 + $0x170] sm:$0xff] %v1005_v60  ;;  %v422_v61 = vpop.f32.mrb[13].mxu0  ;;  %v550_v62 = vpop.f32.mrb[13].mxu1 }
  0xf5   :  { %836 = vst [vmem:[%s1464_s2 + $0x60] sm:$0xff] %v422_v61  ;;  %868 = vst [vmem:[%s1464_s2 + $0x160] sm:$0xff] %v550_v62  ;;  %v974_v63 = vpop.f32.mrb[14].mxu0  ;;  %v1006_v0 = vpop.f32.mrb[14].mxu1 }
  0xf6   :  { %839 = vst [vmem:[%s1464_s2 + $0x78] sm:$0xff] %v974_v63  ;;  %871 = vst [vmem:[%s1464_s2 + $0x178] sm:$0xff] %v1006_v0  ;;  %v425_v1 = vpop.f32.mrb[15].mxu0  ;;  %v553_v2 = vpop.f32.mrb[15].mxu1 }
  0xf7   :  { %837 = vst [vmem:[%s1464_s2 + $0x68] sm:$0xff] %v425_v1  ;;  %869 = vst [vmem:[%s1464_s2 + $0x168] sm:$0xff] %v553_v2 }
  0xfb   :  { %v977_v3 = vpop.f32.mrb[16].mxu0  ;;  %v1009_v4 = vpop.f32.mrb[16].mxu1 }
  0xfc   :  { %842 = vst [vmem:[%s1464_s2 + $0x90] sm:$0xff] %v977_v3  ;;  %874 = vst [vmem:[%s1464_s2 + $0x190] sm:$0xff] %v1009_v4  ;;  %v438_v5 = vpop.f32.mrb[17].mxu0  ;;  %v566_v6 = vpop.f32.mrb[17].mxu1 }
  0xfd   :  { %840 = vst [vmem:[%s1464_s2 + $0x80] sm:$0xff] %v438_v5  ;;  %872 = vst [vmem:[%s1464_s2 + $0x180] sm:$0xff] %v566_v6  ;;  %v978_v7 = vpop.f32.mrb[18].mxu0  ;;  %v1010_v8 = vpop.f32.mrb[18].mxu1 }
  0xfe   :  { %843 = vst [vmem:[%s1464_s2 + $0x98] sm:$0xff] %v978_v7  ;;  %875 = vst [vmem:[%s1464_s2 + $0x198] sm:$0xff] %v1010_v8  ;;  %v441_v9 = vpop.f32.mrb[19].mxu0  ;;  %v569_v10 = vpop.f32.mrb[19].mxu1 }
  0xff   :  { %841 = vst [vmem:[%s1464_s2 + $0x88] sm:$0xff] %v441_v9  ;;  %873 = vst [vmem:[%s1464_s2 + $0x188] sm:$0xff] %v569_v10 }
 0x103   :  { %v981_v11 = vpop.f32.mrb[20].mxu0  ;;  %v1013_v12 = vpop.f32.mrb[20].mxu1 }
 0x104   :  { %846 = vst [vmem:[%s1464_s2 + $0xb0] sm:$0xff] %v981_v11  ;;  %878 = vst [vmem:[%s1464_s2 + $0x1b0] sm:$0xff] %v1013_v12  ;;  %v454_v13 = vpop.f32.mrb[21].mxu0  ;;  %v582_v14 = vpop.f32.mrb[21].mxu1 }
 0x105   :  { %844 = vst [vmem:[%s1464_s2 + $0xa0] sm:$0xff] %v454_v13  ;;  %876 = vst [vmem:[%s1464_s2 + $0x1a0] sm:$0xff] %v582_v14  ;;  %v982_v15 = vpop.f32.mrb[22].mxu0  ;;  %v1014_v16 = vpop.f32.mrb[22].mxu1 }
 0x106   :  { %847 = vst [vmem:[%s1464_s2 + $0xb8] sm:$0xff] %v982_v15  ;;  %879 = vst [vmem:[%s1464_s2 + $0x1b8] sm:$0xff] %v1014_v16  ;;  %v457_v17 = vpop.f32.mrb[23].mxu0  ;;  %v585_v18 = vpop.f32.mrb[23].mxu1 }
 0x107   :  { %845 = vst [vmem:[%s1464_s2 + $0xa8] sm:$0xff] %v457_v17  ;;  %877 = vst [vmem:[%s1464_s2 + $0x1a8] sm:$0xff] %v585_v18 }
 0x10b   :  { %v985_v19 = vpop.f32.mrb[24].mxu0  ;;  %v1017_v20 = vpop.f32.mrb[24].mxu1 }
 0x10c   :  { %850 = vst [vmem:[%s1464_s2 + $0xd0] sm:$0xff] %v985_v19  ;;  %882 = vst [vmem:[%s1464_s2 + $0x1d0] sm:$0xff] %v1017_v20  ;;  %v470_v21 = vpop.f32.mrb[25].mxu0  ;;  %v598_v22 = vpop.f32.mrb[25].mxu1 }
 0x10d   :  { %848 = vst [vmem:[%s1464_s2 + $0xc0] sm:$0xff] %v470_v21  ;;  %880 = vst [vmem:[%s1464_s2 + $0x1c0] sm:$0xff] %v598_v22  ;;  %v986_v23 = vpop.f32.mrb[26].mxu0  ;;  %v1018_v24 = vpop.f32.mrb[26].mxu1 }
 0x10e   :  { %851 = vst [vmem:[%s1464_s2 + $0xd8] sm:$0xff] %v986_v23  ;;  %883 = vst [vmem:[%s1464_s2 + $0x1d8] sm:$0xff] %v1018_v24  ;;  %v473_v25 = vpop.f32.mrb[27].mxu0  ;;  %v601_v26 = vpop.f32.mrb[27].mxu1 }
 0x10f   :  { %849 = vst [vmem:[%s1464_s2 + $0xc8] sm:$0xff] %v473_v25  ;;  %881 = vst [vmem:[%s1464_s2 + $0x1c8] sm:$0xff] %v601_v26 }
 0x113   :  { %v989_v27 = vpop.f32.mrb[28].mxu0  ;;  %v1021_v28 = vpop.f32.mrb[28].mxu1 }
 0x114   :  { %854 = vst [vmem:[%s1464_s2 + $0xf0] sm:$0xff] %v989_v27  ;;  %886 = vst [vmem:[%s1464_s2 + $0x1f0] sm:$0xff] %v1021_v28  ;;  %v486_v29 = vpop.f32.mrb[29].mxu0  ;;  %v614_v30 = vpop.f32.mrb[29].mxu1 }
 0x115   :  { %852 = vst [vmem:[%s1464_s2 + $0xe0] sm:$0xff] %v486_v29  ;;  %884 = vst [vmem:[%s1464_s2 + $0x1e0] sm:$0xff] %v614_v30  ;;  %v990_v31 = vpop.f32.mrb[30].mxu0  ;;  %v1022_v32 = vpop.f32.mrb[30].mxu1 }
 0x116   :  { %855 = vst [vmem:[%s1464_s2 + $0xf8] sm:$0xff] %v990_v31  ;;  %887 = vst [vmem:[%s1464_s2 + $0x1f8] sm:$0xff] %v1022_v32  ;;  %v489_v33 = vpop.f32.mrb[31].mxu0  ;;  %v617_v34 = vpop.f32.mrb[31].mxu1 }
 0x117   :  { %853 = vst [vmem:[%s1464_s2 + $0xe8] sm:$0xff] %v489_v33  ;;  %885 = vst [vmem:[%s1464_s2 + $0x1e8] sm:$0xff] %v617_v34 }

// kernel: tile.61
= control target key start
LH: loop header
LB: loop body
LE: loop exit
PB: predicated region body
PF: predicated region fallthrough
CT: control target
= control target key end

     0   :  { %vm4_vm0 = vcmask 1047556   ;;  %s7029_s14 = smov 56   ;;  %vm6_vm1 = vcmask 64512   ;;  %vm583_vm2 = vcmask 523712   ;;  %s7030_s3 = smov 48   ;;  %vm1286_vm3 = vcmask 458112   ;;  %s13126_s0 = inlined_call_operand.vmem [shape: f32[2,4,8,8,8,1,8], index: 0, kind: input, shape index: {}]   ;;  %s13127_s1 = inlined_call_operand.vmem [shape: f32[2,4,64,64], index: 1, kind: output, shape index: {}]  }
   0x1   :  { %v5690_v0 = vld [vmem:[%s13126_s0 + $0x207] ss:$8 sm:$0xf]   ;;  %s7031_s25 = smov 40   ;;  %vm1989_vm4 = vcmask 392512   ;;  %s7032_s16 = smov 32  }
   0x2   :  { %v5691_v1 = vld [vmem:[%s13126_s0 + $0x207] ss:$8 sm:$0xf0]   ;;  %vm2692_vm5 = vcmask 326912   ;;  %s7033_s8 = smov 24   ;;  %vm3395_vm6 = vcmask 261312  }
   0x3   :  { %v601_v2 = vsel %vm4_vm0, %v5691_v1, %v5690_v0  ;;  %v5685_v3 = vld [vmem:[%s13126_s0 + $0x7] ss:$8 sm:$0xf]   ;;  %s7034_s28 = smov 16   ;;  %vm4098_vm7 = vcmask 195712   ;;  %s7035_s19 = smov 8  }
   0x4   :  { %v5686_v4 = vld [vmem:[%s13126_s0 + $0x7] ss:$8 sm:$0xf0]   ;;  %602 = vrot.lane.b32.xlu1 %v601_v2, %s7029_s14  ;;  %vm4801_vm8 = vcmask 130112  }
   0x5   :  { %v580_v5 = vsel %vm4_vm0, %v5686_v4, %v5685_v3  ;;  %v5693_v6 = vld [vmem:[%s13126_s0 + $0x307] ss:$8 sm:$0xf]  }
   0x6   :  { %v5694_v7 = vld [vmem:[%s13126_s0 + $0x307] ss:$8 sm:$0xf0]   ;;  %581 = vrot.lane.b32.xlu0 %v580_v5, %s7029_s14 }
   0x7   :  { %v612_v8 = vsel %vm4_vm0, %v5694_v7, %v5693_v6  ;;  %v5687_v9 = vld [vmem:[%s13126_s0 + $0x107] ss:$8 sm:$0xf]  }
   0x8   :  { %v5688_v10 = vld [vmem:[%s13126_s0 + $0x107] ss:$8 sm:$0xf0]   ;;  %613 = vrot.lane.b32.xlu1 %v612_v8, %s7029_s14 }
   0x9   :  { %v590_v11 = vsel %vm4_vm0, %v5688_v10, %v5687_v9  ;;  %v5699_v12 = vld [vmem:[%s13126_s0 + $0x507] ss:$8 sm:$0xf]  }
   0xa   :  { %v5700_v13 = vld [vmem:[%s13126_s0 + $0x507] ss:$8 sm:$0xf0]   ;;  %591 = vrot.lane.b32.xlu0 %v590_v11, %s7029_s14 }
   0xb   :  { %v5696_v14 = vld [vmem:[%s13126_s0 + $0x407] ss:$8 sm:$0xf]   ;;  %v634_v16 = vsel %vm4_vm0, %v5700_v13, %v5699_v12 }
   0xc   :  { %v5697_v15 = vld [vmem:[%s13126_s0 + $0x407] ss:$8 sm:$0xf0]   ;;  %635 = vrot.lane.b32.xlu1 %v634_v16, %s7029_s14 }
   0xd   :  { %v623_v17 = vsel %vm4_vm0, %v5697_v15, %v5696_v14  ;;  %v5705_v18 = vld [vmem:[%s13126_s0 + $0x707] ss:$8 sm:$0xf]  }
   0xe   :  { %v5706_v19 = vld [vmem:[%s13126_s0 + $0x707] ss:$8 sm:$0xf0]   ;;  %624 = vrot.lane.b32.xlu0 %v623_v17, %s7029_s14 }
   0xf   :  { %v5702_v20 = vld [vmem:[%s13126_s0 + $0x607] ss:$8 sm:$0xf]   ;;  %v656_v22 = vsel %vm4_vm0, %v5706_v19, %v5705_v18 }
  0x10   :  { %v5703_v21 = vld [vmem:[%s13126_s0 + $0x607] ss:$8 sm:$0xf0]   ;;  %657 = vrot.lane.b32.xlu1 %v656_v22, %s7029_s14 }
  0x11   :  { %v645_v23 = vsel %vm4_vm0, %v5703_v21, %v5702_v20  ;;  %v5711_v24 = vld [vmem:[%s13126_s0 + $0x907] ss:$8 sm:$0xf]  }
  0x12   :  { %v5712_v25 = vld [vmem:[%s13126_s0 + $0x907] ss:$8 sm:$0xf0]   ;;  %646 = vrot.lane.b32.xlu0 %v645_v23, %s7029_s14 }
  0x13   :  { %v5708_v26 = vld [vmem:[%s13126_s0 + $0x807] ss:$8 sm:$0xf]   ;;  %v678_v28 = vsel %vm4_vm0, %v5712_v25, %v5711_v24 }
  0x14   :  { %v5709_v27 = vld [vmem:[%s13126_s0 + $0x807] ss:$8 sm:$0xf0]   ;;  %679 = vrot.lane.b32.xlu1 %v678_v28, %s7029_s14 }
  0x15   :  { %v667_v29 = vsel %vm4_vm0, %v5709_v27, %v5708_v26  ;;  %v5717_v30 = vld [vmem:[%s13126_s0 + $0xb07] ss:$8 sm:$0xf]  }
  0x16   :  { %v5718_v31 = vld [vmem:[%s13126_s0 + $0xb07] ss:$8 sm:$0xf0]   ;;  %668 = vrot.lane.b32.xlu0 %v667_v29, %s7029_s14 }
  0x17   :  { %v5714_v32 = vld [vmem:[%s13126_s0 + $0xa07] ss:$8 sm:$0xf]   ;;  %v700_v34 = vsel %vm4_vm0, %v5718_v31, %v5717_v30  ;;  %v5517_v30 = vld [vmem:[%s13126_s0 + $0x200] ss:$8 sm:$0xf]  }
  0x18   :  { %v5715_v33 = vld [vmem:[%s13126_s0 + $0xa07] ss:$8 sm:$0xf0]   ;;  %701 = vrot.lane.b32.xlu1 %v700_v34, %s7029_s14  ;;  %v5518_v31 = vld [vmem:[%s13126_s0 + $0x200] ss:$8 sm:$0xf0]  }
  0x19   :  { %v689_v35 = vsel %vm4_vm0, %v5715_v33, %v5714_v32  ;;  %v5723_v36 = vld [vmem:[%s13126_s0 + $0xd07] ss:$8 sm:$0xf]   ;;  %v76_v33 = vsel %vm4_vm0, %v5518_v31, %v5517_v30  ;;  %v2_v34 = vld [vmem:[%s13126_s0] ss:$8 sm:$0xf]  }
  0x1a   :  { %v5724_v37 = vld [vmem:[%s13126_s0 + $0xd07] ss:$8 sm:$0xf0]   ;;  %690 = vrot.lane.b32.xlu0 %v689_v35, %s7029_s14  ;;  %v3_v35 = vld [vmem:[%s13126_s0] ss:$8 sm:$0xf0]  }
  0x1b   :  { %v5720_v38 = vld [vmem:[%s13126_s0 + $0xc07] ss:$8 sm:$0xf]   ;;  %v722_v40 = vsel %vm4_vm0, %v5724_v37, %v5723_v36  ;;  %5519 = vst.msk [vmem:[%s13127_s1 + $0x40] sm:$0xff] %vm6_vm1, %v76_v33  }
  0x1c   :  { %v5721_v39 = vld [vmem:[%s13126_s0 + $0xc07] ss:$8 sm:$0xf0]   ;;  %723 = vrot.lane.b32.xlu1 %v722_v40, %s7029_s14  ;;  %v5613_v30 = vld [vmem:[%s13126_s0 + $0xa00] ss:$8 sm:$0xf]  }
  0x1d   :  { %v711_v41 = vsel %vm4_vm0, %v5721_v39, %v5720_v38  ;;  %v5729_v42 = vld [vmem:[%s13126_s0 + $0xf07] ss:$8 sm:$0xf]   ;;  %v5_v39 = vsel %vm4_vm0, %v3_v35, %v2_v34  ;;  %v5614_v34 = vld [vmem:[%s13126_s0 + $0xa00] ss:$8 sm:$0xf0]  }
  0x1e   :  { %v5730_v43 = vld [vmem:[%s13126_s0 + $0xf07] ss:$8 sm:$0xf0]   ;;  %712 = vrot.lane.b32.xlu0 %v711_v41, %s7029_s14  ;;  %7 = vst.msk [vmem:[%s13127_s1] sm:$0xff] %vm6_vm1, %v5_v39  }
  0x1f   :  { %v5726_v44 = vld [vmem:[%s13126_s0 + $0xe07] ss:$8 sm:$0xf]   ;;  %v744_v46 = vsel %vm4_vm0, %v5730_v43, %v5729_v42  ;;  %v5529_v42 = vld [vmem:[%s13126_s0 + $0x300] ss:$8 sm:$0xf]  }
  0x20   :  { %v5727_v45 = vld [vmem:[%s13126_s0 + $0xe07] ss:$8 sm:$0xf0]   ;;  %745 = vrot.lane.b32.xlu1 %v744_v46, %s7029_s14  ;;  %v5530_v43 = vld [vmem:[%s13126_s0 + $0x300] ss:$8 sm:$0xf0]  }
  0x21   :  { %v733_v47 = vsel %vm4_vm0, %v5727_v45, %v5726_v44  ;;  %v5735_v48 = vld [vmem:[%s13126_s0 + $0x147] ss:$8 sm:$0xf]   ;;  %v112_v45 = vsel %vm4_vm0, %v5530_v43, %v5529_v42  ;;  %v5505_v46 = vld [vmem:[%s13126_s0 + $0x100] ss:$8 sm:$0xf]  }
  0x22   :  { %v5736_v49 = vld [vmem:[%s13126_s0 + $0x147] ss:$8 sm:$0xf0]   ;;  %734 = vrot.lane.b32.xlu0 %v733_v47, %s7029_s14  ;;  %v5506_v47 = vld [vmem:[%s13126_s0 + $0x100] ss:$8 sm:$0xf0]  }
  0x23   :  { %v5732_v50 = vld [vmem:[%s13126_s0 + $0x47] ss:$8 sm:$0xf]   ;;  %v766_v52 = vsel %vm4_vm0, %v5736_v49, %v5735_v48  ;;  %5531 = vst.msk [vmem:[%s13127_s1 + $0x60] sm:$0xff] %vm6_vm1, %v112_v45  }
  0x24   :  { %v5733_v51 = vld [vmem:[%s13126_s0 + $0x47] ss:$8 sm:$0xf0]   ;;  %767 = vrot.lane.b32.xlu1 %v766_v52, %s7029_s14  ;;  %v5649_v39 = vld [vmem:[%s13126_s0 + $0xd00] ss:$8 sm:$0xf]  }
  0x25   :  { %v755_v53 = vsel %vm4_vm0, %v5733_v51, %v5732_v50  ;;  %v5741_v54 = vld [vmem:[%s13126_s0 + $0x347] ss:$8 sm:$0xf]   ;;  %v40_v51 = vsel %vm4_vm0, %v5506_v47, %v5505_v46  ;;  %v5637_v42 = vld [vmem:[%s13126_s0 + $0xc00] ss:$8 sm:$0xf]  }
  0x26   :  { %v5742_v55 = vld [vmem:[%s13126_s0 + $0x347] ss:$8 sm:$0xf0]   ;;  %756 = vrot.lane.b32.xlu0 %v755_v53, %s7029_s14  ;;  %5507 = vst.msk [vmem:[%s13127_s1 + $0x20] sm:$0xff] %vm6_vm1, %v40_v51  }
  0x27   :  { %v5738_v56 = vld [vmem:[%s13126_s0 + $0x247] ss:$8 sm:$0xf]   ;;  %v788_v58 = vsel %vm4_vm0, %v5742_v55, %v5741_v54  ;;  %v5553_v54 = vld [vmem:[%s13126_s0 + $0x500] ss:$8 sm:$0xf]  }
  0x28   :  { %v5739_v57 = vld [vmem:[%s13126_s0 + $0x247] ss:$8 sm:$0xf0]   ;;  %789 = vrot.lane.b32.xlu1 %v788_v58, %s7029_s14  ;;  %v5554_v55 = vld [vmem:[%s13126_s0 + $0x500] ss:$8 sm:$0xf0]  }
  0x29   :  { %v777_v59 = vsel %vm4_vm0, %v5739_v57, %v5738_v56  ;;  %v5747_v60 = vld [vmem:[%s13126_s0 + $0x547] ss:$8 sm:$0xf]   ;;  %v184_v57 = vsel %vm4_vm0, %v5554_v55, %v5553_v54  ;;  %v5541_v58 = vld [vmem:[%s13126_s0 + $0x400] ss:$8 sm:$0xf]  }
  0x2a   :  { %v5748_v61 = vld [vmem:[%s13126_s0 + $0x547] ss:$8 sm:$0xf0]   ;;  %778 = vrot.lane.b32.xlu0 %v777_v59, %s7029_s14  ;;  %v5542_v59 = vld [vmem:[%s13126_s0 + $0x400] ss:$8 sm:$0xf0]  }
  0x2b   :  { %v5744_v62 = vld [vmem:[%s13126_s0 + $0x447] ss:$8 sm:$0xf]   ;;  %v810_v0 = vsel %vm4_vm0, %v5748_v61, %v5747_v60  ;;  %5555 = vst.msk [vmem:[%s13127_s1 + $0xa0] sm:$0xff] %vm6_vm1, %v184_v57  }
  0x2c   :  { %v5745_v63 = vld [vmem:[%s13126_s0 + $0x447] ss:$8 sm:$0xf0]   ;;  %811 = vrot.lane.b32.xlu1 %v810_v0, %s7029_s14  ;;  %v5638_v46 = vld [vmem:[%s13126_s0 + $0xc00] ss:$8 sm:$0xf0]  }
  0x2d   :  { %v799_v1 = vsel %vm4_vm0, %v5745_v63, %v5744_v62  ;;  %v5753_v2 = vld [vmem:[%s13126_s0 + $0x747] ss:$8 sm:$0xf]   ;;  %v148_v63 = vsel %vm4_vm0, %v5542_v59, %v5541_v58  ;;  %v5673_v51 = vld [vmem:[%s13126_s0 + $0xf00] ss:$8 sm:$0xf]  }
  0x2e   :  { %v5754_v3 = vld [vmem:[%s13126_s0 + $0x747] ss:$8 sm:$0xf0]   ;;  %800 = vrot.lane.b32.xlu0 %v799_v1, %s7029_s14  ;;  %5543 = vst.msk [vmem:[%s13127_s1 + $0x80] sm:$0xff] %vm6_vm1, %v148_v63  }
  0x2f   :  { %v5750_v4 = vld [vmem:[%s13126_s0 + $0x647] ss:$8 sm:$0xf]   ;;  %v832_v6 = vsel %vm4_vm0, %v5754_v3, %v5753_v2  ;;  %v5577_v2 = vld [vmem:[%s13126_s0 + $0x700] ss:$8 sm:$0xf]  }
  0x30   :  { %v5751_v5 = vld [vmem:[%s13126_s0 + $0x647] ss:$8 sm:$0xf0]   ;;  %833 = vrot.lane.b32.xlu1 %v832_v6, %s7029_s14  ;;  %v5578_v3 = vld [vmem:[%s13126_s0 + $0x700] ss:$8 sm:$0xf0]  }
  0x31   :  { %v821_v7 = vsel %vm4_vm0, %v5751_v5, %v5750_v4  ;;  %v5759_v8 = vld [vmem:[%s13126_s0 + $0x947] ss:$8 sm:$0xf]   ;;  %v256_v5 = vsel %vm4_vm0, %v5578_v3, %v5577_v2  ;;  %v5565_v6 = vld [vmem:[%s13126_s0 + $0x600] ss:$8 sm:$0xf]  }
  0x32   :  { %v5760_v9 = vld [vmem:[%s13126_s0 + $0x947] ss:$8 sm:$0xf0]   ;;  %822 = vrot.lane.b32.xlu0 %v821_v7, %s7029_s14  ;;  %v5566_v7 = vld [vmem:[%s13126_s0 + $0x600] ss:$8 sm:$0xf0]  }
  0x33   :  { %v5756_v10 = vld [vmem:[%s13126_s0 + $0x847] ss:$8 sm:$0xf]   ;;  %v854_v12 = vsel %vm4_vm0, %v5760_v9, %v5759_v8  ;;  %5579 = vst.msk [vmem:[%s13127_s1 + $0xe0] sm:$0xff] %vm6_vm1, %v256_v5  }
  0x34   :  { %v5757_v11 = vld [vmem:[%s13126_s0 + $0x847] ss:$8 sm:$0xf0]   ;;  %855 = vrot.lane.b32.xlu1 %v854_v12, %s7029_s14  ;;  %v5661_v54 = vld [vmem:[%s13126_s0 + $0xe00] ss:$8 sm:$0xf]  }
  0x35   :  { %v843_v13 = vsel %vm4_vm0, %v5757_v11, %v5756_v10  ;;  %v5765_v14 = vld [vmem:[%s13126_s0 + $0xb47] ss:$8 sm:$0xf]   ;;  %v220_v11 = vsel %vm4_vm0, %v5566_v7, %v5565_v6  ;;  %v5662_v58 = vld [vmem:[%s13126_s0 + $0xe00] ss:$8 sm:$0xf0]  }
  0x36   :  { %v5766_v15 = vld [vmem:[%s13126_s0 + $0xb47] ss:$8 sm:$0xf0]   ;;  %844 = vrot.lane.b32.xlu0 %v843_v13, %s7029_s14  ;;  %5567 = vst.msk [vmem:[%s13127_s1 + $0xc0] sm:$0xff] %vm6_vm1, %v220_v11  }
  0x37   :  { %v5762_v16 = vld [vmem:[%s13126_s0 + $0xa47] ss:$8 sm:$0xf]   ;;  %v876_v18 = vsel %vm4_vm0, %v5766_v15, %v5765_v14  ;;  %v5601_v15 = vld [vmem:[%s13126_s0 + $0x900] ss:$8 sm:$0xf]  }
  0x38   :  { %v5763_v17 = vld [vmem:[%s13126_s0 + $0xa47] ss:$8 sm:$0xf0]   ;;  %877 = vrot.lane.b32.xlu1 %v876_v18, %s7029_s14  ;;  %v5589_v18 = vld [vmem:[%s13126_s0 + $0x800] ss:$8 sm:$0xf]  }
  0x39   :  { %v865_v19 = vsel %vm4_vm0, %v5763_v17, %v5762_v16  ;;  %v5771_v20 = vld [vmem:[%s13126_s0 + $0xd47] ss:$8 sm:$0xf]   ;;  %v5602_v17 = vld [vmem:[%s13126_s0 + $0x900] ss:$8 sm:$0xf0]  }
  0x3a   :  { %v5772_v21 = vld [vmem:[%s13126_s0 + $0xd47] ss:$8 sm:$0xf0]   ;;  %866 = vrot.lane.b32.xlu0 %v865_v19, %s7029_s14  ;;  %v5508_v63 = vld [vmem:[%s13126_s0 + $0x140] ss:$8 sm:$0xf]  }
  0x3b   :  { %v5768_v22 = vld [vmem:[%s13126_s0 + $0xc47] ss:$8 sm:$0xf]   ;;  %v898_v24 = vsel %vm4_vm0, %v5772_v21, %v5771_v20  ;;  %v328_v21 = vsel %vm4_vm0, %v5602_v17, %v5601_v15  ;;  %v5496_v2 = vld [vmem:[%s13126_s0 + $0x40] ss:$8 sm:$0xf]  }
  0x3c   :  { %v5769_v23 = vld [vmem:[%s13126_s0 + $0xc47] ss:$8 sm:$0xf0]   ;;  %899 = vrot.lane.b32.xlu1 %v898_v24, %s7029_s14  ;;  %5603 = vst.msk [vmem:[%s13127_s1 + $0x120] sm:$0xff] %vm6_vm1, %v328_v21  }
  0x3d   :  { %v887_v25 = vsel %vm4_vm0, %v5769_v23, %v5768_v22  ;;  %v5777_v26 = vld [vmem:[%s13126_s0 + $0xf47] ss:$8 sm:$0xf]   ;;  %v5590_v22 = vld [vmem:[%s13126_s0 + $0x800] ss:$8 sm:$0xf0]  }
  0x3e   :  { %v5778_v27 = vld [vmem:[%s13126_s0 + $0xf47] ss:$8 sm:$0xf0]   ;;  %888 = vrot.lane.b32.xlu0 %v887_v25, %s7029_s14  ;;  %v292_v25 = vsel %vm4_vm0, %v5590_v22, %v5589_v18  ;;  %v5497_v6 = vld [vmem:[%s13126_s0 + $0x40] ss:$8 sm:$0xf0]  }
  0x3f   :  { %v5774_v28 = vld [vmem:[%s13126_s0 + $0xe47] ss:$8 sm:$0xf]   ;;  %v920_v32 = vsel %vm4_vm0, %v5778_v27, %v5777_v26  ;;  %5591 = vst.msk [vmem:[%s13127_s1 + $0x100] sm:$0xff] %vm6_vm1, %v292_v25  }
  0x40   :  { %v5775_v29 = vld [vmem:[%s13126_s0 + $0xe47] ss:$8 sm:$0xf0]   ;;  %921 = vrot.lane.b32.xlu1 %v920_v32, %s7029_s14  ;;  %v5625_v27 = vld [vmem:[%s13126_s0 + $0xb00] ss:$8 sm:$0xf]  }
  0x41   :  { %v909_v36 = vsel %vm4_vm0, %v5775_v29, %v5774_v28  ;;  %v5783_v37 = vld [vmem:[%s13126_s0 + $0x187] ss:$8 sm:$0xf]   ;;  %v5626_v29 = vld [vmem:[%s13126_s0 + $0xb00] ss:$8 sm:$0xf0]  }
  0x42   :  { %v5784_v38 = vld [vmem:[%s13126_s0 + $0x187] ss:$8 sm:$0xf0]   ;;  %910 = vrot.lane.b32.xlu0 %v909_v36, %s7029_s14  ;;  %v400_v33 = vsel %vm4_vm0, %v5626_v29, %v5625_v27  ;;  %v5532_v11 = vld [vmem:[%s13126_s0 + $0x340] ss:$8 sm:$0xf]  }
  0x43   :  { %v5780_v40 = vld [vmem:[%s13126_s0 + $0x87] ss:$8 sm:$0xf]   ;;  %v942_v44 = vsel %vm4_vm0, %v5784_v38, %v5783_v37  ;;  %5627 = vst.msk [vmem:[%s13127_s1 + $0x160] sm:$0xff] %vm6_vm1, %v400_v33   ;;  %v364_v37 = vsel %vm4_vm0, %v5614_v34, %v5613_v30 }
  0x44   :  { %v5781_v41 = vld [vmem:[%s13126_s0 + $0x87] ss:$8 sm:$0xf0]   ;;  %943 = vrot.lane.b32.xlu1 %v942_v44, %s7029_s14  ;;  %5615 = vst.msk [vmem:[%s13127_s1 + $0x140] sm:$0xff] %vm6_vm1, %v364_v37  }
  0x45   :  { %v931_v48 = vsel %vm4_vm0, %v5781_v41, %v5780_v40  ;;  %v5789_v49 = vld [vmem:[%s13126_s0 + $0x387] ss:$8 sm:$0xf]   ;;  %v5650_v41 = vld [vmem:[%s13126_s0 + $0xd00] ss:$8 sm:$0xf0]  }
  0x46   :  { %v5790_v50 = vld [vmem:[%s13126_s0 + $0x387] ss:$8 sm:$0xf0]   ;;  %932 = vrot.lane.b32.xlu0 %v931_v48, %s7029_s14  ;;  %v472_v45 = vsel %vm4_vm0, %v5650_v41, %v5649_v39  ;;  %v5521_v18 = vld [vmem:[%s13126_s0 + $0x240] ss:$8 sm:$0xf0]  }
  0x47   :  { %v5786_v52 = vld [vmem:[%s13126_s0 + $0x287] ss:$8 sm:$0xf]   ;;  %v964_v56 = vsel %vm4_vm0, %v5790_v50, %v5789_v49  ;;  %5651 = vst.msk [vmem:[%s13127_s1 + $0x1a0] sm:$0xff] %vm6_vm1, %v472_v45   ;;  %v436_v49 = vsel %vm4_vm0, %v5638_v46, %v5637_v42 }
  0x48   :  { %v5787_v53 = vld [vmem:[%s13126_s0 + $0x287] ss:$8 sm:$0xf0]   ;;  %965 = vrot.lane.b32.xlu1 %v964_v56, %s7029_s14  ;;  %5639 = vst.msk [vmem:[%s13127_s1 + $0x180] sm:$0xff] %vm6_vm1, %v436_v49  }
  0x49   :  { %v953_v60 = vsel %vm4_vm0, %v5787_v53, %v5786_v52  ;;  %v5795_v61 = vld [vmem:[%s13126_s0 + $0x587] ss:$8 sm:$0xf]   ;;  %v5674_v53 = vld [vmem:[%s13126_s0 + $0xf00] ss:$8 sm:$0xf0]  }
  0x4a   :  { %v5796_v62 = vld [vmem:[%s13126_s0 + $0x587] ss:$8 sm:$0xf0]   ;;  %954 = vrot.lane.b32.xlu0 %v953_v60, %s7029_s14  ;;  %v544_v57 = vsel %vm4_vm0, %v5674_v53, %v5673_v51  ;;  %v5557_v25 = vld [vmem:[%s13126_s0 + $0x540] ss:$8 sm:$0xf0]  }
  0x4b   :  { %v5792_v0 = vld [vmem:[%s13126_s0 + $0x487] ss:$8 sm:$0xf]   ;;  %v986_v4 = vsel %vm4_vm0, %v5796_v62, %v5795_v61  ;;  %5675 = vst.msk [vmem:[%s13127_s1 + $0x1e0] sm:$0xff] %vm6_vm1, %v544_v57   ;;  %v508_v61 = vsel %vm4_vm0, %v5662_v58, %v5661_v54 }
  0x4c   :  { %v5793_v1 = vld [vmem:[%s13126_s0 + $0x487] ss:$8 sm:$0xf0]   ;;  %987 = vrot.lane.b32.xlu1 %v986_v4, %s7029_s14  ;;  %5663 = vst.msk [vmem:[%s13127_s1 + $0x1c0] sm:$0xff] %vm6_vm1, %v508_v61  }
  0x4d   :  { %v975_v8 = vsel %vm4_vm0, %v5793_v1, %v5792_v0  ;;  %v5801_v9 = vld [vmem:[%s13126_s0 + $0x787] ss:$8 sm:$0xf]   ;;  %v5509_v1 = vld [vmem:[%s13126_s0 + $0x140] ss:$8 sm:$0xf0]  }
  0x4e   :  { %v5802_v10 = vld [vmem:[%s13126_s0 + $0x787] ss:$8 sm:$0xf0]   ;;  %976 = vrot.lane.b32.xlu0 %v975_v8, %s7029_s14  ;;  %v49_v5 = vsel %vm4_vm0, %v5509_v1, %v5508_v63  ;;  %v5545_v30 = vld [vmem:[%s13126_s0 + $0x440] ss:$8 sm:$0xf0]  }
  0x4f   :  { %v5798_v12 = vld [vmem:[%s13126_s0 + $0x687] ss:$8 sm:$0xf]   ;;  %v1008_v16 = vsel %vm4_vm0, %v5802_v10, %v5801_v9  ;;  %5510 = vst.msk [vmem:[%s13127_s1 + $0x28] sm:$0xff] %vm6_vm1, %v49_v5   ;;  %v13_v9 = vsel %vm4_vm0, %v5497_v6, %v5496_v2 }
  0x50   :  { %v5799_v13 = vld [vmem:[%s13126_s0 + $0x687] ss:$8 sm:$0xf0]   ;;  %1009 = vrot.lane.b32.xlu1 %v1008_v16, %s7029_s14  ;;  %5498 = vst.msk [vmem:[%s13127_s1 + $0x8] sm:$0xff] %vm6_vm1, %v13_v9  }
  0x51   :  { %v5807_v14 = vld [vmem:[%s13126_s0 + $0x987] ss:$8 sm:$0xf]   ;;  %v997_v19 = vsel %vm4_vm0, %v5799_v13, %v5798_v12  ;;  %v5533_v13 = vld [vmem:[%s13126_s0 + $0x340] ss:$8 sm:$0xf0]  }
  0x52   :  { %v5808_v20 = vld [vmem:[%s13126_s0 + $0x987] ss:$8 sm:$0xf0]   ;;  %998 = vrot.lane.b32.xlu0 %v997_v19, %s7029_s14  ;;  %v121_v17 = vsel %vm4_vm0, %v5533_v13, %v5532_v11  ;;  %v5581_v37 = vld [vmem:[%s13126_s0 + $0x740] ss:$8 sm:$0xf0]  }
  0x53   :  { %v5804_v23 = vld [vmem:[%s13126_s0 + $0x887] ss:$8 sm:$0xf]   ;;  %v1030_v28 = vsel %vm4_vm0, %v5808_v20, %v5807_v14  ;;  %v5520_v14 = vld [vmem:[%s13126_s0 + $0x240] ss:$8 sm:$0xf]  }
  0x54   :  { %v5805_v24 = vld [vmem:[%s13126_s0 + $0x887] ss:$8 sm:$0xf0]   ;;  %1031 = vrot.lane.b32.xlu1 %v1030_v28, %s7029_s14  ;;  %5534 = vst.msk [vmem:[%s13127_s1 + $0x68] sm:$0xff] %vm6_vm1, %v121_v17   ;;  %v85_v21 = vsel %vm4_vm0, %v5521_v18, %v5520_v14 }
  0x55   :  { %v5813_v26 = vld [vmem:[%s13126_s0 + $0xb87] ss:$8 sm:$0xf]   ;;  %v1019_v31 = vsel %vm4_vm0, %v5805_v24, %v5804_v23  ;;  %5522 = vst.msk [vmem:[%s13127_s1 + $0x48] sm:$0xff] %vm6_vm1, %v85_v21  }
  0x56   :  { %v5814_v32 = vld [vmem:[%s13126_s0 + $0xb87] ss:$8 sm:$0xf0]   ;;  %1020 = vrot.lane.b32.xlu0 %v1019_v31, %s7029_s14  ;;  %v5556_v23 = vld [vmem:[%s13126_s0 + $0x540] ss:$8 sm:$0xf]  }
  0x57   :  { %v5810_v35 = vld [vmem:[%s13126_s0 + $0xa87] ss:$8 sm:$0xf]   ;;  %v1052_v40 = vsel %vm4_vm0, %v5814_v32, %v5813_v26  ;;  %v5544_v26 = vld [vmem:[%s13126_s0 + $0x440] ss:$8 sm:$0xf]   ;;  %v193_v29 = vsel %vm4_vm0, %v5557_v25, %v5556_v23 }
  0x58   :  { %v5811_v36 = vld [vmem:[%s13126_s0 + $0xa87] ss:$8 sm:$0xf0]   ;;  %1053 = vrot.lane.b32.xlu1 %v1052_v40, %s7029_s14  ;;  %5558 = vst.msk [vmem:[%s13127_s1 + $0xa8] sm:$0xff] %vm6_vm1, %v193_v29   ;;  %v157_v33 = vsel %vm4_vm0, %v5545_v30, %v5544_v26 }
  0x59   :  { %v5819_v38 = vld [vmem:[%s13126_s0 + $0xd87] ss:$8 sm:$0xf]   ;;  %v1041_v43 = vsel %vm4_vm0, %v5811_v36, %v5810_v35  ;;  %5546 = vst.msk [vmem:[%s13127_s1 + $0x88] sm:$0xff] %vm6_vm1, %v157_v33  }
  0x5a   :  { %v5820_v44 = vld [vmem:[%s13126_s0 + $0xd87] ss:$8 sm:$0xf0]   ;;  %1042 = vrot.lane.b32.xlu0 %v1041_v43, %s7029_s14  ;;  %v5580_v35 = vld [vmem:[%s13126_s0 + $0x740] ss:$8 sm:$0xf]  }
  0x5b   :  { %v5816_v47 = vld [vmem:[%s13126_s0 + $0xc87] ss:$8 sm:$0xf]   ;;  %v1074_v52 = vsel %vm4_vm0, %v5820_v44, %v5819_v38  ;;  %v5568_v38 = vld [vmem:[%s13126_s0 + $0x640] ss:$8 sm:$0xf]   ;;  %v265_v41 = vsel %vm4_vm0, %v5581_v37, %v5580_v35 }
  0x5c   :  { %v5817_v48 = vld [vmem:[%s13126_s0 + $0xc87] ss:$8 sm:$0xf0]   ;;  %1075 = vrot.lane.b32.xlu1 %v1074_v52, %s7029_s14  ;;  %v5569_v42 = vld [vmem:[%s13126_s0 + $0x640] ss:$8 sm:$0xf0]  }
  0x5d   :  { %v5825_v50 = vld [vmem:[%s13126_s0 + $0xf87] ss:$8 sm:$0xf]   ;;  %v1063_v55 = vsel %vm4_vm0, %v5817_v48, %v5816_v47  ;;  %5582 = vst.msk [vmem:[%s13127_s1 + $0xe8] sm:$0xff] %vm6_vm1, %v265_v41   ;;  %v229_v45 = vsel %vm4_vm0, %v5569_v42, %v5568_v38 }
  0x5e   :  { %v5826_v56 = vld [vmem:[%s13126_s0 + $0xf87] ss:$8 sm:$0xf0]   ;;  %1064 = vrot.lane.b32.xlu0 %v1063_v55, %s7029_s14  ;;  %5570 = vst.msk [vmem:[%s13127_s1 + $0xc8] sm:$0xff] %vm6_vm1, %v229_v45  }
  0x5f   :  { %v5822_v59 = vld [vmem:[%s13126_s0 + $0xe87] ss:$8 sm:$0xf]   ;;  %v1096_v0 = vsel %vm4_vm0, %v5826_v56, %v5825_v50  ;;  %v5604_v47 = vld [vmem:[%s13126_s0 + $0x940] ss:$8 sm:$0xf]  }
  0x60   :  { %v5823_v60 = vld [vmem:[%s13126_s0 + $0xe87] ss:$8 sm:$0xf0]   ;;  %1097 = vrot.lane.b32.xlu1 %v1096_v0, %s7029_s14  ;;  %v5605_v49 = vld [vmem:[%s13126_s0 + $0x940] ss:$8 sm:$0xf0]  }
  0x61   :  { %v5831_v62 = vld [vmem:[%s13126_s0 + $0x1c7] ss:$8 sm:$0xf]   ;;  %v1085_v3 = vsel %vm4_vm0, %v5823_v60, %v5822_v59  ;;  %v5592_v50 = vld [vmem:[%s13126_s0 + $0x840] ss:$8 sm:$0xf]   ;;  %v337_v53 = vsel %vm4_vm0, %v5605_v49, %v5604_v47 }
  0x62   :  { %v5832_v4 = vld [vmem:[%s13126_s0 + $0x1c7] ss:$8 sm:$0xf0]   ;;  %1086 = vrot.lane.b32.xlu0 %v1085_v3, %s7029_s14  ;;  %v5593_v54 = vld [vmem:[%s13126_s0 + $0x840] ss:$8 sm:$0xf0]  }
  0x63   :  { %v5828_v7 = vld [vmem:[%s13126_s0 + $0xc7] ss:$8 sm:$0xf]   ;;  %v1118_v12 = vsel %vm4_vm0, %v5832_v4, %v5831_v62  ;;  %5606 = vst.msk [vmem:[%s13127_s1 + $0x128] sm:$0xff] %vm6_vm1, %v337_v53   ;;  %v301_v57 = vsel %vm4_vm0, %v5593_v54, %v5592_v50 }
  0x64   :  { %v5829_v8 = vld [vmem:[%s13126_s0 + $0xc7] ss:$8 sm:$0xf0]   ;;  %1119 = vrot.lane.b32.xlu1 %v1118_v12, %s7029_s14  ;;  %5594 = vst.msk [vmem:[%s13127_s1 + $0x108] sm:$0xff] %vm6_vm1, %v301_v57  }
  0x65   :  { %v5837_v10 = vld [vmem:[%s13126_s0 + $0x3c7] ss:$8 sm:$0xf]   ;;  %v1107_v15 = vsel %vm4_vm0, %v5829_v8, %v5828_v7  ;;  %v5628_v59 = vld [vmem:[%s13126_s0 + $0xb40] ss:$8 sm:$0xf]  }
  0x66   :  { %v5838_v16 = vld [vmem:[%s13126_s0 + $0x3c7] ss:$8 sm:$0xf0]   ;;  %1108 = vrot.lane.b32.xlu0 %v1107_v15, %s7029_s14  ;;  %v5629_v61 = vld [vmem:[%s13126_s0 + $0xb40] ss:$8 sm:$0xf0]  }
  0x67   :  { %v5834_v19 = vld [vmem:[%s13126_s0 + $0x2c7] ss:$8 sm:$0xf]   ;;  %v1140_v24 = vsel %vm4_vm0, %v5838_v16, %v5837_v10  ;;  %v5616_v62 = vld [vmem:[%s13126_s0 + $0xa40] ss:$8 sm:$0xf]   ;;  %v409_v1 = vsel %vm4_vm0, %v5629_v61, %v5628_v59 }
  0x68   :  { %v5835_v20 = vld [vmem:[%s13126_s0 + $0x2c7] ss:$8 sm:$0xf0]   ;;  %1141 = vrot.lane.b32.xlu1 %v1140_v24, %s7029_s14  ;;  %v5617_v2 = vld [vmem:[%s13126_s0 + $0xa40] ss:$8 sm:$0xf0]  }
  0x69   :  { %v5843_v22 = vld [vmem:[%s13126_s0 + $0x5c7] ss:$8 sm:$0xf]   ;;  %v1129_v27 = vsel %vm4_vm0, %v5835_v20, %v5834_v19  ;;  %5630 = vst.msk [vmem:[%s13127_s1 + $0x168] sm:$0xff] %vm6_vm1, %v409_v1   ;;  %v373_v5 = vsel %vm4_vm0, %v5617_v2, %v5616_v62 }
  0x6a   :  { %v5844_v28 = vld [vmem:[%s13126_s0 + $0x5c7] ss:$8 sm:$0xf0]   ;;  %1130 = vrot.lane.b32.xlu0 %v1129_v27, %s7029_s14  ;;  %5618 = vst.msk [vmem:[%s13127_s1 + $0x148] sm:$0xff] %vm6_vm1, %v373_v5  }
  0x6b   :  { %v5840_v31 = vld [vmem:[%s13126_s0 + $0x4c7] ss:$8 sm:$0xf]   ;;  %v1162_v36 = vsel %vm4_vm0, %v5844_v28, %v5843_v22  ;;  %v5652_v7 = vld [vmem:[%s13126_s0 + $0xd40] ss:$8 sm:$0xf]  }
  0x6c   :  { %v5841_v32 = vld [vmem:[%s13126_s0 + $0x4c7] ss:$8 sm:$0xf0]   ;;  %1163 = vrot.lane.b32.xlu1 %v1162_v36, %s7029_s14  ;;  %v5653_v9 = vld [vmem:[%s13126_s0 + $0xd40] ss:$8 sm:$0xf0]  }
  0x6d   :  { %v5849_v34 = vld [vmem:[%s13126_s0 + $0x7c7] ss:$8 sm:$0xf]   ;;  %v1151_v39 = vsel %vm4_vm0, %v5841_v32, %v5840_v31  ;;  %v5640_v10 = vld [vmem:[%s13126_s0 + $0xc40] ss:$8 sm:$0xf]   ;;  %v481_v14 = vsel %vm4_vm0, %v5653_v9, %v5652_v7 }
  0x6e   :  { %v5850_v40 = vld [vmem:[%s13126_s0 + $0x7c7] ss:$8 sm:$0xf0]   ;;  %1152 = vrot.lane.b32.xlu0 %v1151_v39, %s7029_s14  ;;  %v5641_v15 = vld [vmem:[%s13126_s0 + $0xc40] ss:$8 sm:$0xf0]  }
  0x6f   :  { %v5846_v43 = vld [vmem:[%s13126_s0 + $0x6c7] ss:$8 sm:$0xf]   ;;  %v1184_v48 = vsel %vm4_vm0, %v5850_v40, %v5849_v34  ;;  %5654 = vst.msk [vmem:[%s13127_s1 + $0x1a8] sm:$0xff] %vm6_vm1, %v481_v14   ;;  %v445_v19 = vsel %vm4_vm0, %v5641_v15, %v5640_v10 }
  0x70   :  { %v5847_v44 = vld [vmem:[%s13126_s0 + $0x6c7] ss:$8 sm:$0xf0]   ;;  %1185 = vrot.lane.b32.xlu1 %v1184_v48, %s7029_s14  ;;  %5642 = vst.msk [vmem:[%s13127_s1 + $0x188] sm:$0xff] %vm6_vm1, %v445_v19  }
  0x71   :  { %v5855_v46 = vld [vmem:[%s13126_s0 + $0x9c7] ss:$8 sm:$0xf]   ;;  %v1173_v51 = vsel %vm4_vm0, %v5847_v44, %v5846_v43  ;;  %v5676_v22 = vld [vmem:[%s13126_s0 + $0xf40] ss:$8 sm:$0xf]  }
  0x72   :  { %v5856_v52 = vld [vmem:[%s13126_s0 + $0x9c7] ss:$8 sm:$0xf0]   ;;  %1174 = vrot.lane.b32.xlu0 %v1173_v51, %s7029_s14  ;;  %v5677_v24 = vld [vmem:[%s13126_s0 + $0xf40] ss:$8 sm:$0xf0]  }
  0x73   :  { %v5852_v55 = vld [vmem:[%s13126_s0 + $0x8c7] ss:$8 sm:$0xf]   ;;  %v1206_v60 = vsel %vm4_vm0, %v5856_v52, %v5855_v46  ;;  %v5664_v25 = vld [vmem:[%s13126_s0 + $0xe40] ss:$8 sm:$0xf]   ;;  %v553_v29 = vsel %vm4_vm0, %v5677_v24, %v5676_v22 }
  0x74   :  { %v5853_v56 = vld [vmem:[%s13126_s0 + $0x8c7] ss:$8 sm:$0xf0]   ;;  %1207 = vrot.lane.b32.xlu1 %v1206_v60, %s7029_s14  ;;  %v5665_v30 = vld [vmem:[%s13126_s0 + $0xe40] ss:$8 sm:$0xf0]  }
  0x75   :  { %v5861_v58 = vld [vmem:[%s13126_s0 + $0xbc7] ss:$8 sm:$0xf]   ;;  %v1195_v63 = vsel %vm4_vm0, %v5853_v56, %v5852_v55  ;;  %5678 = vst.msk [vmem:[%s13127_s1 + $0x1e8] sm:$0xff] %vm6_vm1, %v553_v29   ;;  %v517_v33 = vsel %vm4_vm0, %v5665_v30, %v5664_v25 }
  0x76   :  { %v5862_v0 = vld [vmem:[%s13126_s0 + $0xbc7] ss:$8 sm:$0xf0]   ;;  %1196 = vrot.lane.b32.xlu0 %v1195_v63, %s7029_s14  ;;  %v603_v11 = vpop.permute.xlu1 %602   ;;  %v5878_v34 = vld [vmem:[%s13126_s0 + $0x106] ss:$8 sm:$0xf]  }
  0x77   :  { %v5858_v3 = vld [vmem:[%s13126_s0 + $0xac7] ss:$8 sm:$0xf]   ;;  %v1228_v8 = vsel %vm4_vm0, %v5862_v0, %v5861_v58  ;;  %5692 = vst.msk [vmem:[%s13127_s1 + $0x40] sm:$0xff] %vm583_vm2, %v603_v11  }
  0x78   :  { %v5859_v4 = vld [vmem:[%s13126_s0 + $0xac7] ss:$8 sm:$0xf0]   ;;  %v582_v16 = vpop.permute.xlu0 %581   ;;  %1229 = vrot.lane.b32.xlu1 %v1228_v8, %s7029_s14  ;;  %5666 = vst.msk [vmem:[%s13127_s1 + $0x1c8] sm:$0xff] %vm6_vm1, %v517_v33  }
  0x79   :  { %v5867_v6 = vld [vmem:[%s13126_s0 + $0xdc7] ss:$8 sm:$0xf]   ;;  %v1217_v12 = vsel %vm4_vm0, %v5859_v4, %v5858_v3  ;;  %584 = vst.msk [vmem:[%s13127_s1] sm:$0xff] %vm583_vm2, %v582_v16  }
  0x7a   :  { %v5868_v13 = vld [vmem:[%s13126_s0 + $0xdc7] ss:$8 sm:$0xf0]   ;;  %1218 = vrot.lane.b32.xlu0 %v1217_v12, %s7029_s14  ;;  %v614_v26 = vpop.permute.xlu1 %613   ;;  %v5511_v35 = vld [vmem:[%s13126_s0 + $0x180] ss:$8 sm:$0xf]  }
  0x7b   :  { %v5864_v17 = vld [vmem:[%s13126_s0 + $0xcc7] ss:$8 sm:$0xf]   ;;  %v1250_v23 = vsel %vm4_vm0, %v5868_v13, %v5867_v6  ;;  %5695 = vst.msk [vmem:[%s13127_s1 + $0x60] sm:$0xff] %vm583_vm2, %v614_v26  }
  0x7c   :  { %v5865_v18 = vld [vmem:[%s13126_s0 + $0xcc7] ss:$8 sm:$0xf0]   ;;  %v592_v31 = vpop.permute.xlu0 %591   ;;  %1251 = vrot.lane.b32.xlu1 %v1250_v23, %s7029_s14  ;;  %v5512_v37 = vld [vmem:[%s13126_s0 + $0x180] ss:$8 sm:$0xf0]  }
  0x7d   :  { %v5873_v20 = vld [vmem:[%s13126_s0 + $0xfc7] ss:$8 sm:$0xf]   ;;  %v1239_v27 = vsel %vm4_vm0, %v5865_v18, %v5864_v17  ;;  %5689 = vst.msk [vmem:[%s13127_s1 + $0x20] sm:$0xff] %vm583_vm2, %v592_v31   ;;  %v58_v42 = vsel %vm4_vm0, %v5512_v37, %v5511_v35 }
  0x7e   :  { %v5874_v21 = vld [vmem:[%s13126_s0 + $0xfc7] ss:$8 sm:$0xf0]   ;;  %1240 = vrot.lane.b32.xlu0 %v1239_v27, %s7029_s14  ;;  %v5499_v38 = vld [vmem:[%s13126_s0 + $0x80] ss:$8 sm:$0xf]   ;;  %v636_v39 = vpop.permute.xlu1 %635  }
  0x7f   :  { %v5870_v28 = vld [vmem:[%s13126_s0 + $0xec7] ss:$8 sm:$0xf]   ;;  %v1272_v36 = vsel %vm4_vm0, %v5874_v21, %v5873_v20  ;;  %v5879_v41 = vld [vmem:[%s13126_s0 + $0x106] ss:$8 sm:$0xf0]  }
  0x80   :  { %v5871_v32 = vld [vmem:[%s13126_s0 + $0xec7] ss:$8 sm:$0xf0]   ;;  %v5500_v43 = vld [vmem:[%s13126_s0 + $0x80] ss:$8 sm:$0xf0]   ;;  %v625_v44 = vpop.permute.xlu0 %624   ;;  %1273 = vrot.lane.b32.xlu1 %v1272_v36, %s7029_s14  ;;  %v1293_v50 = vsel %vm4_vm0, %v5879_v41, %v5878_v34 }
  0x81   :  { %v1261_v40 = vsel %vm4_vm0, %v5871_v32, %v5870_v28  ;;  %5701 = vst.msk [vmem:[%s13127_s1 + $0xa0] sm:$0xff] %vm583_vm2, %v636_v39   ;;  %v5876_v45 = vld [vmem:[%s13126_s0 + $0x6] ss:$8 sm:$0xf]   ;;  %v22_v47 = vsel %vm4_vm0, %v5500_v43, %v5499_v38  ;;  %5698 = vst.msk [vmem:[%s13127_s1 + $0x80] sm:$0xff] %vm583_vm2, %v625_v44  }
  0x82   :  { %v5877_v46 = vld [vmem:[%s13126_s0 + $0x6] ss:$8 sm:$0xf0]   ;;  %5513 = vst.msk [vmem:[%s13127_s1 + $0x30] sm:$0xff] %vm6_vm1, %v58_v42   ;;  %5501 = vst.msk [vmem:[%s13127_s1 + $0x10] sm:$0xff] %vm6_vm1, %v22_v47   ;;  %1262 = vrot.lane.b32.xlu0 %v1261_v40, %s7029_s14  ;;  %v658_v53 = vpop.permute.xlu1 %657  }
  0x83   :  { %v5884_v48 = vld [vmem:[%s13126_s0 + $0x306] ss:$8 sm:$0xf]   ;;  %v5535_v49 = vld [vmem:[%s13126_s0 + $0x380] ss:$8 sm:$0xf]   ;;  %v1283_v54 = vsel %vm4_vm0, %v5877_v46, %v5876_v45 }
  0x84   :  { %v5536_v51 = vld [vmem:[%s13126_s0 + $0x380] ss:$8 sm:$0xf0]   ;;  %v5885_v55 = vld [vmem:[%s13126_s0 + $0x306] ss:$8 sm:$0xf0]   ;;  %v647_v58 = vpop.permute.xlu0 %646   ;;  %1294 = vrot.lane.b32.xlu1 %v1293_v50, %s7030_s3 }
  0x85   :  { %v5523_v52 = vld [vmem:[%s13126_s0 + $0x280] ss:$8 sm:$0xf]   ;;  %v130_v56 = vsel %vm4_vm0, %v5536_v51, %v5535_v49  ;;  %5707 = vst.msk [vmem:[%s13127_s1 + $0xe0] sm:$0xff] %vm583_vm2, %v658_v53   ;;  %5704 = vst.msk [vmem:[%s13127_s1 + $0xc0] sm:$0xff] %vm583_vm2, %v647_v58   ;;  %v1315_v0 = vsel %vm4_vm0, %v5885_v55, %v5884_v48 }
  0x86   :  { %v5524_v57 = vld [vmem:[%s13126_s0 + $0x280] ss:$8 sm:$0xf0]   ;;  %v5881_v59 = vld [vmem:[%s13126_s0 + $0x206] ss:$8 sm:$0xf]   ;;  %1284 = vrot.lane.b32.xlu0 %v1283_v54, %s7030_s3  ;;  %v680_v3 = vpop.permute.xlu1 %679  }
  0x87   :  { %v5882_v60 = vld [vmem:[%s13126_s0 + $0x206] ss:$8 sm:$0xf0]   ;;  %5537 = vst.msk [vmem:[%s13127_s1 + $0x70] sm:$0xff] %vm6_vm1, %v130_v56   ;;  %v94_v61 = vsel %vm4_vm0, %v5524_v57, %v5523_v52 }
  0x88   :  { %v5890_v62 = vld [vmem:[%s13126_s0 + $0x506] ss:$8 sm:$0xf]   ;;  %5525 = vst.msk [vmem:[%s13127_s1 + $0x50] sm:$0xff] %vm6_vm1, %v94_v61   ;;  %v1304_v4 = vsel %vm4_vm0, %v5882_v60, %v5881_v59  ;;  %v669_v8 = vpop.permute.xlu0 %668   ;;  %1316 = vrot.lane.b32.xlu1 %v1315_v0, %s7030_s3 }
  0x89   :  { %v5559_v63 = vld [vmem:[%s13126_s0 + $0x580] ss:$8 sm:$0xf]   ;;  %v5891_v5 = vld [vmem:[%s13126_s0 + $0x506] ss:$8 sm:$0xf0]  }
  0x8a   :  { %v5560_v1 = vld [vmem:[%s13126_s0 + $0x580] ss:$8 sm:$0xf0]   ;;  %5713 = vst.msk [vmem:[%s13127_s1 + $0x120] sm:$0xff] %vm583_vm2, %v680_v3   ;;  %5710 = vst.msk [vmem:[%s13127_s1 + $0x100] sm:$0xff] %vm583_vm2, %v669_v8   ;;  %1305 = vrot.lane.b32.xlu0 %v1304_v4, %s7030_s3  ;;  %v1337_v14 = vsel %vm4_vm0, %v5891_v5, %v5890_v62  ;;  %v702_v17 = vpop.permute.xlu1 %701  }
  0x8b   :  { %v5547_v2 = vld [vmem:[%s13126_s0 + $0x480] ss:$8 sm:$0xf]   ;;  %v202_v6 = vsel %vm4_vm0, %v5560_v1, %v5559_v63  ;;  %v5887_v9 = vld [vmem:[%s13126_s0 + $0x406] ss:$8 sm:$0xf]  }
  0x8c   :  { %v5548_v7 = vld [vmem:[%s13126_s0 + $0x480] ss:$8 sm:$0xf0]   ;;  %v5888_v10 = vld [vmem:[%s13126_s0 + $0x406] ss:$8 sm:$0xf0]   ;;  %v691_v22 = vpop.permute.xlu0 %690   ;;  %1338 = vrot.lane.b32.xlu1 %v1337_v14, %s7030_s3 }
  0x8d   :  { %5561 = vst.msk [vmem:[%s13127_s1 + $0xb0] sm:$0xff] %vm6_vm1, %v202_v6   ;;  %v166_v11 = vsel %vm4_vm0, %v5548_v7, %v5547_v2  ;;  %v5896_v12 = vld [vmem:[%s13126_s0 + $0x706] ss:$8 sm:$0xf]   ;;  %v1326_v18 = vsel %vm4_vm0, %v5888_v10, %v5887_v9 }
  0x8e   :  { %5549 = vst.msk [vmem:[%s13127_s1 + $0x90] sm:$0xff] %vm6_vm1, %v166_v11   ;;  %v5583_v13 = vld [vmem:[%s13126_s0 + $0x780] ss:$8 sm:$0xf]   ;;  %1327 = vrot.lane.b32.xlu0 %v1326_v18, %s7030_s3  ;;  %v724_v31 = vpop.permute.xlu1 %723  }
  0x8f   :  { %v5584_v15 = vld [vmem:[%s13126_s0 + $0x780] ss:$8 sm:$0xf0]   ;;  %v5897_v19 = vld [vmem:[%s13126_s0 + $0x706] ss:$8 sm:$0xf0]  }
  0x90   :  { %v5571_v16 = vld [vmem:[%s13126_s0 + $0x680] ss:$8 sm:$0xf]   ;;  %v274_v20 = vsel %vm4_vm0, %v5584_v15, %v5583_v13  ;;  %5719 = vst.msk [vmem:[%s13127_s1 + $0x160] sm:$0xff] %vm583_vm2, %v702_v17   ;;  %5716 = vst.msk [vmem:[%s13127_s1 + $0x140] sm:$0xff] %vm583_vm2, %v691_v22   ;;  %v1359_v28 = vsel %vm4_vm0, %v5897_v19, %v5896_v12  ;;  %v713_v36 = vpop.permute.xlu0 %712  }
  0x91   :  { %v5572_v21 = vld [vmem:[%s13126_s0 + $0x680] ss:$8 sm:$0xf0]   ;;  %v5893_v23 = vld [vmem:[%s13126_s0 + $0x606] ss:$8 sm:$0xf]   ;;  %1360 = vrot.lane.b32.xlu1 %v1359_v28, %s7030_s3 }
  0x92   :  { %v5894_v24 = vld [vmem:[%s13126_s0 + $0x606] ss:$8 sm:$0xf0]   ;;  %5585 = vst.msk [vmem:[%s13127_s1 + $0xf0] sm:$0xff] %vm6_vm1, %v274_v20   ;;  %v238_v25 = vsel %vm4_vm0, %v5572_v21, %v5571_v16  ;;  %v746_v45 = vpop.permute.xlu1 %745  }
  0x93   :  { %v5902_v26 = vld [vmem:[%s13126_s0 + $0x906] ss:$8 sm:$0xf]   ;;  %5573 = vst.msk [vmem:[%s13127_s1 + $0xd0] sm:$0xff] %vm6_vm1, %v238_v25   ;;  %v1348_v32 = vsel %vm4_vm0, %v5894_v24, %v5893_v23 }
  0x94   :  { %v5607_v27 = vld [vmem:[%s13126_s0 + $0x980] ss:$8 sm:$0xf]   ;;  %v5903_v33 = vld [vmem:[%s13126_s0 + $0x906] ss:$8 sm:$0xf0]   ;;  %1349 = vrot.lane.b32.xlu0 %v1348_v32, %s7030_s3  ;;  %v735_v50 = vpop.permute.xlu0 %734  }
  0x95   :  { %v5608_v29 = vld [vmem:[%s13126_s0 + $0x980] ss:$8 sm:$0xf0]   ;;  %5725 = vst.msk [vmem:[%s13127_s1 + $0x1a0] sm:$0xff] %vm583_vm2, %v724_v31   ;;  %5722 = vst.msk [vmem:[%s13127_s1 + $0x180] sm:$0xff] %vm583_vm2, %v713_v36   ;;  %v1381_v42 = vsel %vm4_vm0, %v5903_v33, %v5902_v26 }
  0x96   :  { %v5595_v30 = vld [vmem:[%s13126_s0 + $0x880] ss:$8 sm:$0xf]   ;;  %v346_v34 = vsel %vm4_vm0, %v5608_v29, %v5607_v27  ;;  %v5899_v37 = vld [vmem:[%s13126_s0 + $0x806] ss:$8 sm:$0xf]   ;;  %1382 = vrot.lane.b32.xlu1 %v1381_v42, %s7030_s3  ;;  %v768_v59 = vpop.permute.xlu1 %767  }
  0x97   :  { %v5596_v35 = vld [vmem:[%s13126_s0 + $0x880] ss:$8 sm:$0xf0]   ;;  %v5900_v38 = vld [vmem:[%s13126_s0 + $0x806] ss:$8 sm:$0xf0]  }
  0x98   :  { %5609 = vst.msk [vmem:[%s13127_s1 + $0x130] sm:$0xff] %vm6_vm1, %v346_v34   ;;  %v310_v39 = vsel %vm4_vm0, %v5596_v35, %v5595_v30  ;;  %v5908_v40 = vld [vmem:[%s13126_s0 + $0xb06] ss:$8 sm:$0xf]   ;;  %v1370_v46 = vsel %vm4_vm0, %v5900_v38, %v5899_v37  ;;  %v757_v0 = vpop.permute.xlu0 %756  }
  0x99   :  { %5597 = vst.msk [vmem:[%s13127_s1 + $0x110] sm:$0xff] %vm6_vm1, %v310_v39   ;;  %v5631_v41 = vld [vmem:[%s13126_s0 + $0xb80] ss:$8 sm:$0xf]   ;;  %1371 = vrot.lane.b32.xlu0 %v1370_v46, %s7030_s3 }
  0x9a   :  { %v5632_v43 = vld [vmem:[%s13126_s0 + $0xb80] ss:$8 sm:$0xf0]   ;;  %v5909_v47 = vld [vmem:[%s13126_s0 + $0xb06] ss:$8 sm:$0xf0]   ;;  %v790_v9 = vpop.permute.xlu1 %789  }
  0x9b   :  { %v5619_v44 = vld [vmem:[%s13126_s0 + $0xa80] ss:$8 sm:$0xf]   ;;  %v418_v48 = vsel %vm4_vm0, %v5632_v43, %v5631_v41  ;;  %5731 = vst.msk [vmem:[%s13127_s1 + $0x1e0] sm:$0xff] %vm583_vm2, %v746_v45   ;;  %5728 = vst.msk [vmem:[%s13127_s1 + $0x1c0] sm:$0xff] %vm583_vm2, %v735_v50   ;;  %v1403_v56 = vsel %vm4_vm0, %v5909_v47, %v5908_v40 }
  0x9c   :  { %v5620_v49 = vld [vmem:[%s13126_s0 + $0xa80] ss:$8 sm:$0xf0]   ;;  %v5905_v51 = vld [vmem:[%s13126_s0 + $0xa06] ss:$8 sm:$0xf]   ;;  %1404 = vrot.lane.b32.xlu1 %v1403_v56, %s7030_s3  ;;  %v779_v14 = vpop.permute.xlu0 %778  }
  0x9d   :  { %v5906_v52 = vld [vmem:[%s13126_s0 + $0xa06] ss:$8 sm:$0xf0]   ;;  %5633 = vst.msk [vmem:[%s13127_s1 + $0x170] sm:$0xff] %vm6_vm1, %v418_v48   ;;  %v382_v53 = vsel %vm4_vm0, %v5620_v49, %v5619_v44 }
  0x9e   :  { %v5914_v54 = vld [vmem:[%s13126_s0 + $0xd06] ss:$8 sm:$0xf]   ;;  %5621 = vst.msk [vmem:[%s13127_s1 + $0x150] sm:$0xff] %vm6_vm1, %v382_v53   ;;  %v1392_v60 = vsel %vm4_vm0, %v5906_v52, %v5905_v51  ;;  %v812_v23 = vpop.permute.xlu1 %811  }
  0x9f   :  { %v5655_v55 = vld [vmem:[%s13126_s0 + $0xd80] ss:$8 sm:$0xf]   ;;  %v5915_v61 = vld [vmem:[%s13126_s0 + $0xd06] ss:$8 sm:$0xf0]   ;;  %1393 = vrot.lane.b32.xlu0 %v1392_v60, %s7030_s3 }
  0xa0   :  { %v5656_v57 = vld [vmem:[%s13126_s0 + $0xd80] ss:$8 sm:$0xf0]   ;;  %5737 = vst.msk [vmem:[%s13127_s1 + $0x28] sm:$0xff] %vm583_vm2, %v768_v59   ;;  %5734 = vst.msk [vmem:[%s13127_s1 + $0x8] sm:$0xff] %vm583_vm2, %v757_v0   ;;  %v1425_v6 = vsel %vm4_vm0, %v5915_v61, %v5914_v54  ;;  %v801_v28 = vpop.permute.xlu0 %800  }
  0xa1   :  { %v5643_v58 = vld [vmem:[%s13126_s0 + $0xc80] ss:$8 sm:$0xf]   ;;  %v490_v62 = vsel %vm4_vm0, %v5656_v57, %v5655_v55  ;;  %v5911_v1 = vld [vmem:[%s13126_s0 + $0xc06] ss:$8 sm:$0xf]   ;;  %1426 = vrot.lane.b32.xlu1 %v1425_v6, %s7030_s3 }
  0xa2   :  { %v5644_v63 = vld [vmem:[%s13126_s0 + $0xc80] ss:$8 sm:$0xf0]   ;;  %v5912_v2 = vld [vmem:[%s13126_s0 + $0xc06] ss:$8 sm:$0xf0]   ;;  %v834_v37 = vpop.permute.xlu1 %833  }
  0xa3   :  { %5657 = vst.msk [vmem:[%s13127_s1 + $0x1b0] sm:$0xff] %vm6_vm1, %v490_v62   ;;  %v454_v3 = vsel %vm4_vm0, %v5644_v63, %v5643_v58  ;;  %v5920_v4 = vld [vmem:[%s13126_s0 + $0xf06] ss:$8 sm:$0xf]   ;;  %v1414_v10 = vsel %vm4_vm0, %v5912_v2, %v5911_v1 }
  0xa4   :  { %5645 = vst.msk [vmem:[%s13127_s1 + $0x190] sm:$0xff] %vm6_vm1, %v454_v3   ;;  %v5679_v5 = vld [vmem:[%s13126_s0 + $0xf80] ss:$8 sm:$0xf]   ;;  %1415 = vrot.lane.b32.xlu0 %v1414_v10, %s7030_s3  ;;  %v823_v42 = vpop.permute.xlu0 %822  }
  0xa5   :  { %v5680_v7 = vld [vmem:[%s13126_s0 + $0xf80] ss:$8 sm:$0xf0]   ;;  %v5921_v11 = vld [vmem:[%s13126_s0 + $0xf06] ss:$8 sm:$0xf0]  }
  0xa6   :  { %v5667_v8 = vld [vmem:[%s13126_s0 + $0xe80] ss:$8 sm:$0xf]   ;;  %v562_v12 = vsel %vm4_vm0, %v5680_v7, %v5679_v5  ;;  %5743 = vst.msk [vmem:[%s13127_s1 + $0x68] sm:$0xff] %vm583_vm2, %v790_v9   ;;  %5740 = vst.msk [vmem:[%s13127_s1 + $0x48] sm:$0xff] %vm583_vm2, %v779_v14   ;;  %v1447_v20 = vsel %vm4_vm0, %v5921_v11, %v5920_v4  ;;  %v856_v51 = vpop.permute.xlu1 %855  }
  0xa7   :  { %v5668_v13 = vld [vmem:[%s13126_s0 + $0xe80] ss:$8 sm:$0xf0]   ;;  %v5917_v15 = vld [vmem:[%s13126_s0 + $0xe06] ss:$8 sm:$0xf]   ;;  %1448 = vrot.lane.b32.xlu1 %v1447_v20, %s7030_s3 }
  0xa8   :  { %v5918_v16 = vld [vmem:[%s13126_s0 + $0xe06] ss:$8 sm:$0xf0]   ;;  %5681 = vst.msk [vmem:[%s13127_s1 + $0x1f0] sm:$0xff] %vm6_vm1, %v562_v12   ;;  %v526_v17 = vsel %vm4_vm0, %v5668_v13, %v5667_v8  ;;  %v845_v56 = vpop.permute.xlu0 %844  }
  0xa9   :  { %v5926_v18 = vld [vmem:[%s13126_s0 + $0x146] ss:$8 sm:$0xf]   ;;  %5669 = vst.msk [vmem:[%s13127_s1 + $0x1d0] sm:$0xff] %vm6_vm1, %v526_v17   ;;  %v1436_v24 = vsel %vm4_vm0, %v5918_v16, %v5917_v15 }
  0xaa   :  { %v5514_v19 = vld [vmem:[%s13126_s0 + $0x1c0] ss:$8 sm:$0xf]   ;;  %v5927_v25 = vld [vmem:[%s13126_s0 + $0x146] ss:$8 sm:$0xf0]   ;;  %1437 = vrot.lane.b32.xlu0 %v1436_v24, %s7030_s3  ;;  %v878_v1 = vpop.permute.xlu1 %877  }
  0xab   :  { %v5515_v21 = vld [vmem:[%s13126_s0 + $0x1c0] ss:$8 sm:$0xf0]   ;;  %5749 = vst.msk [vmem:[%s13127_s1 + $0xa8] sm:$0xff] %vm583_vm2, %v812_v23   ;;  %5746 = vst.msk [vmem:[%s13127_s1 + $0x88] sm:$0xff] %vm583_vm2, %v801_v28   ;;  %v1469_v34 = vsel %vm4_vm0, %v5927_v25, %v5926_v18 }
  0xac   :  { %v5502_v22 = vld [vmem:[%s13126_s0 + $0xc0] ss:$8 sm:$0xf]   ;;  %v67_v26 = vsel %vm4_vm0, %v5515_v21, %v5514_v19  ;;  %v5923_v29 = vld [vmem:[%s13126_s0 + $0x46] ss:$8 sm:$0xf]   ;;  %1470 = vrot.lane.b32.xlu1 %v1469_v34, %s7030_s3  ;;  %v867_v6 = vpop.permute.xlu0 %866  }
  0xad   :  { %v5503_v27 = vld [vmem:[%s13126_s0 + $0xc0] ss:$8 sm:$0xf0]   ;;  %v5924_v30 = vld [vmem:[%s13126_s0 + $0x46] ss:$8 sm:$0xf0]  }
  0xae   :  { %5516 = vst.msk [vmem:[%s13127_s1 + $0x38] sm:$0xff] %vm6_vm1, %v67_v26   ;;  %v31_v31 = vsel %vm4_vm0, %v5503_v27, %v5502_v22  ;;  %v5932_v32 = vld [vmem:[%s13126_s0 + $0x346] ss:$8 sm:$0xf]   ;;  %v1458_v38 = vsel %vm4_vm0, %v5924_v30, %v5923_v29  ;;  %v900_v15 = vpop.permute.xlu1 %899  }
  0xaf   :  { %5504 = vst.msk [vmem:[%s13127_s1 + $0x18] sm:$0xff] %vm6_vm1, %v31_v31   ;;  %v5538_v33 = vld [vmem:[%s13126_s0 + $0x3c0] ss:$8 sm:$0xf]   ;;  %1459 = vrot.lane.b32.xlu0 %v1458_v38, %s7030_s3 }
  0xb0   :  { %v5539_v35 = vld [vmem:[%s13126_s0 + $0x3c0] ss:$8 sm:$0xf0]   ;;  %v5933_v39 = vld [vmem:[%s13126_s0 + $0x346] ss:$8 sm:$0xf0]   ;;  %v889_v20 = vpop.permute.xlu0 %888  }
  0xb1   :  { %v5526_v36 = vld [vmem:[%s13126_s0 + $0x2c0] ss:$8 sm:$0xf]   ;;  %v139_v40 = vsel %vm4_vm0, %v5539_v35, %v5538_v33  ;;  %5755 = vst.msk [vmem:[%s13127_s1 + $0xe8] sm:$0xff] %vm583_vm2, %v834_v37   ;;  %5752 = vst.msk [vmem:[%s13127_s1 + $0xc8] sm:$0xff] %vm583_vm2, %v823_v42   ;;  %v1491_v48 = vsel %vm4_vm0, %v5933_v39, %v5932_v32 }
  0xb2   :  { %v5527_v41 = vld [vmem:[%s13126_s0 + $0x2c0] ss:$8 sm:$0xf0]   ;;  %v5929_v43 = vld [vmem:[%s13126_s0 + $0x246] ss:$8 sm:$0xf]   ;;  %1492 = vrot.lane.b32.xlu1 %v1491_v48, %s7030_s3  ;;  %v922_v29 = vpop.permute.xlu1 %921  }
  0xb3   :  { %v5930_v44 = vld [vmem:[%s13126_s0 + $0x246] ss:$8 sm:$0xf0]   ;;  %5540 = vst.msk [vmem:[%s13127_s1 + $0x78] sm:$0xff] %vm6_vm1, %v139_v40   ;;  %v103_v45 = vsel %vm4_vm0, %v5527_v41, %v5526_v36 }
  0xb4   :  { %v5938_v46 = vld [vmem:[%s13126_s0 + $0x546] ss:$8 sm:$0xf]   ;;  %5528 = vst.msk [vmem:[%s13127_s1 + $0x58] sm:$0xff] %vm6_vm1, %v103_v45   ;;  %v1480_v52 = vsel %vm4_vm0, %v5930_v44, %v5929_v43  ;;  %v911_v34 = vpop.permute.xlu0 %910  }
  0xb5   :  { %v5562_v47 = vld [vmem:[%s13126_s0 + $0x5c0] ss:$8 sm:$0xf]   ;;  %v5939_v53 = vld [vmem:[%s13126_s0 + $0x546] ss:$8 sm:$0xf0]   ;;  %1481 = vrot.lane.b32.xlu0 %v1480_v52, %s7030_s3 }
  0xb6   :  { %v5563_v49 = vld [vmem:[%s13126_s0 + $0x5c0] ss:$8 sm:$0xf0]   ;;  %5761 = vst.msk [vmem:[%s13127_s1 + $0x128] sm:$0xff] %vm583_vm2, %v856_v51   ;;  %5758 = vst.msk [vmem:[%s13127_s1 + $0x108] sm:$0xff] %vm583_vm2, %v845_v56   ;;  %v1513_v62 = vsel %vm4_vm0, %v5939_v53, %v5938_v46  ;;  %v944_v43 = vpop.permute.xlu1 %943  }
  0xb7   :  { %v5550_v50 = vld [vmem:[%s13126_s0 + $0x4c0] ss:$8 sm:$0xf]   ;;  %v211_v54 = vsel %vm4_vm0, %v5563_v49, %v5562_v47  ;;  %v5935_v57 = vld [vmem:[%s13126_s0 + $0x446] ss:$8 sm:$0xf]   ;;  %1514 = vrot.lane.b32.xlu1 %v1513_v62, %s7030_s3 }
  0xb8   :  { %v5551_v55 = vld [vmem:[%s13126_s0 + $0x4c0] ss:$8 sm:$0xf0]   ;;  %v5936_v58 = vld [vmem:[%s13126_s0 + $0x446] ss:$8 sm:$0xf0]   ;;  %v933_v48 = vpop.permute.xlu0 %932  }
  0xb9   :  { %5564 = vst.msk [vmem:[%s13127_s1 + $0xb8] sm:$0xff] %vm6_vm1, %v211_v54   ;;  %v175_v59 = vsel %vm4_vm0, %v5551_v55, %v5550_v50  ;;  %v5944_v60 = vld [vmem:[%s13126_s0 + $0x746] ss:$8 sm:$0xf]   ;;  %v1502_v2 = vsel %vm4_vm0, %v5936_v58, %v5935_v57 }
  0xba   :  { %5552 = vst.msk [vmem:[%s13127_s1 + $0x98] sm:$0xff] %vm6_vm1, %v175_v59   ;;  %v5586_v61 = vld [vmem:[%s13126_s0 + $0x7c0] ss:$8 sm:$0xf]   ;;  %1503 = vrot.lane.b32.xlu0 %v1502_v2, %s7030_s3  ;;  %v966_v57 = vpop.permute.xlu1 %965  }
  0xbb   :  { %v5587_v63 = vld [vmem:[%s13126_s0 + $0x7c0] ss:$8 sm:$0xf0]   ;;  %v5945_v3 = vld [vmem:[%s13126_s0 + $0x746] ss:$8 sm:$0xf0]  }
  0xbc   :  { %v5574_v0 = vld [vmem:[%s13126_s0 + $0x6c0] ss:$8 sm:$0xf]   ;;  %v283_v4 = vsel %vm4_vm0, %v5587_v63, %v5586_v61  ;;  %5767 = vst.msk [vmem:[%s13127_s1 + $0x168] sm:$0xff] %vm583_vm2, %v878_v1   ;;  %5764 = vst.msk [vmem:[%s13127_s1 + $0x148] sm:$0xff] %vm583_vm2, %v867_v6   ;;  %v1535_v12 = vsel %vm4_vm0, %v5945_v3, %v5944_v60  ;;  %v955_v62 = vpop.permute.xlu0 %954  }
  0xbd   :  { %v5575_v5 = vld [vmem:[%s13126_s0 + $0x6c0] ss:$8 sm:$0xf0]   ;;  %v5941_v7 = vld [vmem:[%s13126_s0 + $0x646] ss:$8 sm:$0xf]   ;;  %1536 = vrot.lane.b32.xlu1 %v1535_v12, %s7030_s3 }
  0xbe   :  { %v5942_v8 = vld [vmem:[%s13126_s0 + $0x646] ss:$8 sm:$0xf0]   ;;  %5588 = vst.msk [vmem:[%s13127_s1 + $0xf8] sm:$0xff] %vm6_vm1, %v283_v4   ;;  %v247_v9 = vsel %vm4_vm0, %v5575_v5, %v5574_v0  ;;  %v988_v3 = vpop.permute.xlu1 %987  }
  0xbf   :  { %v5950_v10 = vld [vmem:[%s13126_s0 + $0x946] ss:$8 sm:$0xf]   ;;  %5576 = vst.msk [vmem:[%s13127_s1 + $0xd8] sm:$0xff] %vm6_vm1, %v247_v9   ;;  %v1524_v16 = vsel %vm4_vm0, %v5942_v8, %v5941_v7 }
  0xc0   :  { %v5610_v11 = vld [vmem:[%s13126_s0 + $0x9c0] ss:$8 sm:$0xf]   ;;  %v5951_v17 = vld [vmem:[%s13126_s0 + $0x946] ss:$8 sm:$0xf0]   ;;  %1525 = vrot.lane.b32.xlu0 %v1524_v16, %s7030_s3  ;;  %v977_v7 = vpop.permute.xlu0 %976  }
  0xc1   :  { %v5611_v13 = vld [vmem:[%s13126_s0 + $0x9c0] ss:$8 sm:$0xf0]   ;;  %5773 = vst.msk [vmem:[%s13127_s1 + $0x1a8] sm:$0xff] %vm583_vm2, %v900_v15   ;;  %5770 = vst.msk [vmem:[%s13127_s1 + $0x188] sm:$0xff] %vm583_vm2, %v889_v20   ;;  %v1557_v26 = vsel %vm4_vm0, %v5951_v17, %v5950_v10 }
  0xc2   :  { %v5598_v14 = vld [vmem:[%s13126_s0 + $0x8c0] ss:$8 sm:$0xf]   ;;  %v355_v18 = vsel %vm4_vm0, %v5611_v13, %v5610_v11  ;;  %v5947_v21 = vld [vmem:[%s13126_s0 + $0x846] ss:$8 sm:$0xf]   ;;  %1558 = vrot.lane.b32.xlu1 %v1557_v26, %s7030_s3  ;;  %v1010_v11 = vpop.permute.xlu1 %1009  }
  0xc3   :  { %v5599_v19 = vld [vmem:[%s13126_s0 + $0x8c0] ss:$8 sm:$0xf0]   ;;  %v5948_v22 = vld [vmem:[%s13126_s0 + $0x846] ss:$8 sm:$0xf0]  }
  0xc4   :  { %5612 = vst.msk [vmem:[%s13127_s1 + $0x138] sm:$0xff] %vm6_vm1, %v355_v18   ;;  %v319_v23 = vsel %vm4_vm0, %v5599_v19, %v5598_v14  ;;  %v5956_v24 = vld [vmem:[%s13126_s0 + $0xb46] ss:$8 sm:$0xf]   ;;  %v1546_v30 = vsel %vm4_vm0, %v5948_v22, %v5947_v21  ;;  %v999_v15 = vpop.permute.xlu0 %998  }
  0xc5   :  { %5600 = vst.msk [vmem:[%s13127_s1 + $0x118] sm:$0xff] %vm6_vm1, %v319_v23   ;;  %v5634_v25 = vld [vmem:[%s13126_s0 + $0xbc0] ss:$8 sm:$0xf]   ;;  %1547 = vrot.lane.b32.xlu0 %v1546_v30, %s7030_s3 }
  0xc6   :  { %v5635_v27 = vld [vmem:[%s13126_s0 + $0xbc0] ss:$8 sm:$0xf0]   ;;  %v5957_v31 = vld [vmem:[%s13126_s0 + $0xb46] ss:$8 sm:$0xf0]   ;;  %v1032_v19 = vpop.permute.xlu1 %1031  }
  0xc7   :  { %v5622_v28 = vld [vmem:[%s13126_s0 + $0xac0] ss:$8 sm:$0xf]   ;;  %v427_v32 = vsel %vm4_vm0, %v5635_v27, %v5634_v25  ;;  %5779 = vst.msk [vmem:[%s13127_s1 + $0x1e8] sm:$0xff] %vm583_vm2, %v922_v29   ;;  %5776 = vst.msk [vmem:[%s13127_s1 + $0x1c8] sm:$0xff] %vm583_vm2, %v911_v34   ;;  %v1579_v40 = vsel %vm4_vm0, %v5957_v31, %v5956_v24 }
  0xc8   :  { %v5623_v33 = vld [vmem:[%s13126_s0 + $0xac0] ss:$8 sm:$0xf0]   ;;  %v5953_v35 = vld [vmem:[%s13126_s0 + $0xa46] ss:$8 sm:$0xf]   ;;  %1580 = vrot.lane.b32.xlu1 %v1579_v40, %s7030_s3  ;;  %v1021_v23 = vpop.permute.xlu0 %1020  }
  0xc9   :  { %v5954_v36 = vld [vmem:[%s13126_s0 + $0xa46] ss:$8 sm:$0xf0]   ;;  %5636 = vst.msk [vmem:[%s13127_s1 + $0x178] sm:$0xff] %vm6_vm1, %v427_v32   ;;  %v391_v37 = vsel %vm4_vm0, %v5623_v33, %v5622_v28 }
  0xca   :  { %v5962_v38 = vld [vmem:[%s13126_s0 + $0xd46] ss:$8 sm:$0xf]   ;;  %5624 = vst.msk [vmem:[%s13127_s1 + $0x158] sm:$0xff] %vm6_vm1, %v391_v37   ;;  %v1568_v44 = vsel %vm4_vm0, %v5954_v36, %v5953_v35  ;;  %v1054_v27 = vpop.permute.xlu1 %1053  }
  0xcb   :  { %v5658_v39 = vld [vmem:[%s13126_s0 + $0xdc0] ss:$8 sm:$0xf]   ;;  %v5963_v45 = vld [vmem:[%s13126_s0 + $0xd46] ss:$8 sm:$0xf0]   ;;  %1569 = vrot.lane.b32.xlu0 %v1568_v44, %s7030_s3 }
  0xcc   :  { %v5659_v41 = vld [vmem:[%s13126_s0 + $0xdc0] ss:$8 sm:$0xf0]   ;;  %5785 = vst.msk [vmem:[%s13127_s1 + $0x30] sm:$0xff] %vm583_vm2, %v944_v43   ;;  %5782 = vst.msk [vmem:[%s13127_s1 + $0x10] sm:$0xff] %vm583_vm2, %v933_v48   ;;  %v1601_v54 = vsel %vm4_vm0, %v5963_v45, %v5962_v38  ;;  %v1043_v31 = vpop.permute.xlu0 %1042  }
  0xcd   :  { %v5646_v42 = vld [vmem:[%s13126_s0 + $0xcc0] ss:$8 sm:$0xf]   ;;  %v499_v46 = vsel %vm4_vm0, %v5659_v41, %v5658_v39  ;;  %v5959_v49 = vld [vmem:[%s13126_s0 + $0xc46] ss:$8 sm:$0xf]   ;;  %1602 = vrot.lane.b32.xlu1 %v1601_v54, %s7030_s3 }
  0xce   :  { %v5647_v47 = vld [vmem:[%s13126_s0 + $0xcc0] ss:$8 sm:$0xf0]   ;;  %v5960_v50 = vld [vmem:[%s13126_s0 + $0xc46] ss:$8 sm:$0xf0]   ;;  %v1076_v35 = vpop.permute.xlu1 %1075  }
  0xcf   :  { %5660 = vst.msk [vmem:[%s13127_s1 + $0x1b8] sm:$0xff] %vm6_vm1, %v499_v46   ;;  %v463_v51 = vsel %vm4_vm0, %v5647_v47, %v5646_v42  ;;  %v5968_v52 = vld [vmem:[%s13126_s0 + $0xf46] ss:$8 sm:$0xf]   ;;  %v1590_v58 = vsel %vm4_vm0, %v5960_v50, %v5959_v49 }
  0xd0   :  { %5648 = vst.msk [vmem:[%s13127_s1 + $0x198] sm:$0xff] %vm6_vm1, %v463_v51   ;;  %v5682_v53 = vld [vmem:[%s13126_s0 + $0xfc0] ss:$8 sm:$0xf]   ;;  %1591 = vrot.lane.b32.xlu0 %v1590_v58, %s7030_s3  ;;  %v1065_v39 = vpop.permute.xlu0 %1064  }
  0xd1   :  { %v5683_v55 = vld [vmem:[%s13126_s0 + $0xfc0] ss:$8 sm:$0xf0]   ;;  %v5969_v59 = vld [vmem:[%s13126_s0 + $0xf46] ss:$8 sm:$0xf0]  }
  0xd2   :  { %v5670_v56 = vld [vmem:[%s13126_s0 + $0xec0] ss:$8 sm:$0xf]   ;;  %v571_v60 = vsel %vm4_vm0, %v5683_v55, %v5682_v53  ;;  %5791 = vst.msk [vmem:[%s13127_s1 + $0x70] sm:$0xff] %vm583_vm2, %v966_v57   ;;  %5788 = vst.msk [vmem:[%s13127_s1 + $0x50] sm:$0xff] %vm583_vm2, %v955_v62   ;;  %v1623_v2 = vsel %vm4_vm0, %v5969_v59, %v5968_v52  ;;  %v1098_v43 = vpop.permute.xlu1 %1097  }
  0xd3   :  { %v5671_v61 = vld [vmem:[%s13126_s0 + $0xec0] ss:$8 sm:$0xf0]   ;;  %v5965_v63 = vld [vmem:[%s13126_s0 + $0xe46] ss:$8 sm:$0xf]   ;;  %1624 = vrot.lane.b32.xlu1 %v1623_v2, %s7030_s3 }
  0xd4   :  { %v5966_v0 = vld [vmem:[%s13126_s0 + $0xe46] ss:$8 sm:$0xf0]   ;;  %5684 = vst.msk [vmem:[%s13127_s1 + $0x1f8] sm:$0xff] %vm6_vm1, %v571_v60   ;;  %v535_v1 = vsel %vm4_vm0, %v5671_v61, %v5670_v56  ;;  %v1087_v47 = vpop.permute.xlu0 %1086  }
  0xd5   :  { %5672 = vst.msk [vmem:[%s13127_s1 + $0x1d8] sm:$0xff] %vm6_vm1, %v535_v1   ;;  %v1612_v4 = vsel %vm4_vm0, %v5966_v0, %v5965_v63  ;;  %v5974_v5 = vld [vmem:[%s13126_s0 + $0x186] ss:$8 sm:$0xf]  }
  0xd6   :  { %v5975_v6 = vld [vmem:[%s13126_s0 + $0x186] ss:$8 sm:$0xf0]   ;;  %5797 = vst.msk [vmem:[%s13127_s1 + $0xb0] sm:$0xff] %vm583_vm2, %v988_v3   ;;  %5794 = vst.msk [vmem:[%s13127_s1 + $0x90] sm:$0xff] %vm583_vm2, %v977_v7   ;;  %1613 = vrot.lane.b32.xlu0 %v1612_v4, %s7030_s3  ;;  %v1120_v51 = vpop.permute.xlu1 %1119  }
  0xd7   :  { %v5971_v8 = vld [vmem:[%s13126_s0 + $0x86] ss:$8 sm:$0xf]   ;;  %v1645_v10 = vsel %vm4_vm0, %v5975_v6, %v5974_v5  ;;  %5803 = vst.msk [vmem:[%s13127_s1 + $0xf0] sm:$0xff] %vm583_vm2, %v1010_v11   ;;  %5800 = vst.msk [vmem:[%s13127_s1 + $0xd0] sm:$0xff] %vm583_vm2, %v999_v15  }
  0xd8   :  { %v5972_v9 = vld [vmem:[%s13126_s0 + $0x86] ss:$8 sm:$0xf0]   ;;  %1646 = vrot.lane.b32.xlu1 %v1645_v10, %s7030_s3  ;;  %5809 = vst.msk [vmem:[%s13127_s1 + $0x130] sm:$0xff] %vm583_vm2, %v1032_v19   ;;  %5806 = vst.msk [vmem:[%s13127_s1 + $0x110] sm:$0xff] %vm583_vm2, %v1021_v23   ;;  %v1109_v55 = vpop.permute.xlu0 %1108  }
  0xd9   :  { %v1634_v12 = vsel %vm4_vm0, %v5972_v9, %v5971_v8  ;;  %v5980_v13 = vld [vmem:[%s13126_s0 + $0x386] ss:$8 sm:$0xf]   ;;  %5815 = vst.msk [vmem:[%s13127_s1 + $0x170] sm:$0xff] %vm583_vm2, %v1054_v27   ;;  %5812 = vst.msk [vmem:[%s13127_s1 + $0x150] sm:$0xff] %vm583_vm2, %v1043_v31  }
  0xda   :  { %v5981_v14 = vld [vmem:[%s13126_s0 + $0x386] ss:$8 sm:$0xf0]   ;;  %1635 = vrot.lane.b32.xlu0 %v1634_v12, %s7030_s3  ;;  %5821 = vst.msk [vmem:[%s13127_s1 + $0x1b0] sm:$0xff] %vm583_vm2, %v1076_v35   ;;  %5818 = vst.msk [vmem:[%s13127_s1 + $0x190] sm:$0xff] %vm583_vm2, %v1065_v39   ;;  %v1142_v59 = vpop.permute.xlu1 %1141  }
  0xdb   :  { %v5977_v16 = vld [vmem:[%s13126_s0 + $0x286] ss:$8 sm:$0xf]   ;;  %v1667_v18 = vsel %vm4_vm0, %v5981_v14, %v5980_v13  ;;  %5827 = vst.msk [vmem:[%s13127_s1 + $0x1f0] sm:$0xff] %vm583_vm2, %v1098_v43   ;;  %5824 = vst.msk [vmem:[%s13127_s1 + $0x1d0] sm:$0xff] %vm583_vm2, %v1087_v47  }
  0xdc   :  { %v5978_v17 = vld [vmem:[%s13126_s0 + $0x286] ss:$8 sm:$0xf0]   ;;  %1668 = vrot.lane.b32.xlu1 %v1667_v18, %s7030_s3  ;;  %5833 = vst.msk [vmem:[%s13127_s1 + $0x38] sm:$0xff] %vm583_vm2, %v1120_v51   ;;  %5830 = vst.msk [vmem:[%s13127_s1 + $0x18] sm:$0xff] %vm583_vm2, %v1109_v55   ;;  %v1131_v63 = vpop.permute.xlu0 %1130  }
  0xdd   :  { %v1656_v20 = vsel %vm4_vm0, %v5978_v17, %v5977_v16  ;;  %v5986_v21 = vld [vmem:[%s13126_s0 + $0x586] ss:$8 sm:$0xf]   ;;  %5839 = vst.msk [vmem:[%s13127_s1 + $0x78] sm:$0xff] %vm583_vm2, %v1142_v59   ;;  %5836 = vst.msk [vmem:[%s13127_s1 + $0x58] sm:$0xff] %vm583_vm2, %v1131_v63  }
  0xde   :  { %v5987_v22 = vld [vmem:[%s13126_s0 + $0x586] ss:$8 sm:$0xf0]   ;;  %1657 = vrot.lane.b32.xlu0 %v1656_v20, %s7030_s3  ;;  %v1164_v3 = vpop.permute.xlu1 %1163  }
  0xdf   :  { %v5983_v24 = vld [vmem:[%s13126_s0 + $0x486] ss:$8 sm:$0xf]   ;;  %v1689_v26 = vsel %vm4_vm0, %v5987_v22, %v5986_v21  ;;  %5845 = vst.msk [vmem:[%s13127_s1 + $0xb8] sm:$0xff] %vm583_vm2, %v1164_v3  }
  0xe0   :  { %v5984_v25 = vld [vmem:[%s13126_s0 + $0x486] ss:$8 sm:$0xf0]   ;;  %1690 = vrot.lane.b32.xlu1 %v1689_v26, %s7030_s3  ;;  %v1153_v7 = vpop.permute.xlu0 %1152  }
  0xe1   :  { %v1678_v28 = vsel %vm4_vm0, %v5984_v25, %v5983_v24  ;;  %v5992_v29 = vld [vmem:[%s13126_s0 + $0x786] ss:$8 sm:$0xf]   ;;  %5842 = vst.msk [vmem:[%s13127_s1 + $0x98] sm:$0xff] %vm583_vm2, %v1153_v7  }
  0xe2   :  { %v5993_v30 = vld [vmem:[%s13126_s0 + $0x786] ss:$8 sm:$0xf0]   ;;  %1679 = vrot.lane.b32.xlu0 %v1678_v28, %s7030_s3  ;;  %v1186_v11 = vpop.permute.xlu1 %1185  }
  0xe3   :  { %v5989_v32 = vld [vmem:[%s13126_s0 + $0x686] ss:$8 sm:$0xf]   ;;  %v1711_v34 = vsel %vm4_vm0, %v5993_v30, %v5992_v29  ;;  %5851 = vst.msk [vmem:[%s13127_s1 + $0xf8] sm:$0xff] %vm583_vm2, %v1186_v11  }
  0xe4   :  { %v5990_v33 = vld [vmem:[%s13126_s0 + $0x686] ss:$8 sm:$0xf0]   ;;  %1712 = vrot.lane.b32.xlu1 %v1711_v34, %s7030_s3  ;;  %v1175_v15 = vpop.permute.xlu0 %1174  }
  0xe5   :  { %v1700_v36 = vsel %vm4_vm0, %v5990_v33, %v5989_v32  ;;  %v5998_v37 = vld [vmem:[%s13126_s0 + $0x986] ss:$8 sm:$0xf]   ;;  %5848 = vst.msk [vmem:[%s13127_s1 + $0xd8] sm:$0xff] %vm583_vm2, %v1175_v15  }
  0xe6   :  { %v5999_v38 = vld [vmem:[%s13126_s0 + $0x986] ss:$8 sm:$0xf0]   ;;  %1701 = vrot.lane.b32.xlu0 %v1700_v36, %s7030_s3  ;;  %v1208_v19 = vpop.permute.xlu1 %1207  }
  0xe7   :  { %v5995_v40 = vld [vmem:[%s13126_s0 + $0x886] ss:$8 sm:$0xf]   ;;  %v1733_v42 = vsel %vm4_vm0, %v5999_v38, %v5998_v37  ;;  %5857 = vst.msk [vmem:[%s13127_s1 + $0x138] sm:$0xff] %vm583_vm2, %v1208_v19  }
  0xe8   :  { %v5996_v41 = vld [vmem:[%s13126_s0 + $0x886] ss:$8 sm:$0xf0]   ;;  %1734 = vrot.lane.b32.xlu1 %v1733_v42, %s7030_s3  ;;  %v1197_v23 = vpop.permute.xlu0 %1196  }
  0xe9   :  { %v1722_v44 = vsel %vm4_vm0, %v5996_v41, %v5995_v40  ;;  %v6004_v45 = vld [vmem:[%s13126_s0 + $0xb86] ss:$8 sm:$0xf]   ;;  %5854 = vst.msk [vmem:[%s13127_s1 + $0x118] sm:$0xff] %vm583_vm2, %v1197_v23  }
  0xea   :  { %v6005_v46 = vld [vmem:[%s13126_s0 + $0xb86] ss:$8 sm:$0xf0]   ;;  %1723 = vrot.lane.b32.xlu0 %v1722_v44, %s7030_s3  ;;  %v1230_v27 = vpop.permute.xlu1 %1229  }
  0xeb   :  { %v6001_v48 = vld [vmem:[%s13126_s0 + $0xa86] ss:$8 sm:$0xf]   ;;  %v1755_v50 = vsel %vm4_vm0, %v6005_v46, %v6004_v45  ;;  %5863 = vst.msk [vmem:[%s13127_s1 + $0x178] sm:$0xff] %vm583_vm2, %v1230_v27  }
  0xec   :  { %v6002_v49 = vld [vmem:[%s13126_s0 + $0xa86] ss:$8 sm:$0xf0]   ;;  %1756 = vrot.lane.b32.xlu1 %v1755_v50, %s7030_s3  ;;  %v1219_v31 = vpop.permute.xlu0 %1218  }
  0xed   :  { %v1744_v52 = vsel %vm4_vm0, %v6002_v49, %v6001_v48  ;;  %v6010_v53 = vld [vmem:[%s13126_s0 + $0xd86] ss:$8 sm:$0xf]   ;;  %5860 = vst.msk [vmem:[%s13127_s1 + $0x158] sm:$0xff] %vm583_vm2, %v1219_v31  }
  0xee   :  { %v6011_v54 = vld [vmem:[%s13126_s0 + $0xd86] ss:$8 sm:$0xf0]   ;;  %1745 = vrot.lane.b32.xlu0 %v1744_v52, %s7030_s3  ;;  %v1252_v35 = vpop.permute.xlu1 %1251  }
  0xef   :  { %v6007_v56 = vld [vmem:[%s13126_s0 + $0xc86] ss:$8 sm:$0xf]   ;;  %v1777_v58 = vsel %vm4_vm0, %v6011_v54, %v6010_v53  ;;  %5869 = vst.msk [vmem:[%s13127_s1 + $0x1b8] sm:$0xff] %vm583_vm2, %v1252_v35  }
  0xf0   :  { %v6008_v57 = vld [vmem:[%s13126_s0 + $0xc86] ss:$8 sm:$0xf0]   ;;  %1778 = vrot.lane.b32.xlu1 %v1777_v58, %s7030_s3  ;;  %v1241_v39 = vpop.permute.xlu0 %1240  }
  0xf1   :  { %v1766_v60 = vsel %vm4_vm0, %v6008_v57, %v6007_v56  ;;  %v6016_v61 = vld [vmem:[%s13126_s0 + $0xf86] ss:$8 sm:$0xf]   ;;  %5866 = vst.msk [vmem:[%s13127_s1 + $0x198] sm:$0xff] %vm583_vm2, %v1241_v39  }
  0xf2   :  { %v6017_v62 = vld [vmem:[%s13126_s0 + $0xf86] ss:$8 sm:$0xf0]   ;;  %1767 = vrot.lane.b32.xlu0 %v1766_v60, %s7030_s3  ;;  %v1274_v43 = vpop.permute.xlu1 %1273  }
  0xf3   :  { %v6013_v0 = vld [vmem:[%s13126_s0 + $0xe86] ss:$8 sm:$0xf]   ;;  %v1799_v2 = vsel %vm4_vm0, %v6017_v62, %v6016_v61  ;;  %5875 = vst.msk [vmem:[%s13127_s1 + $0x1f8] sm:$0xff] %vm583_vm2, %v1274_v43  }
  0xf4   :  { %v6014_v1 = vld [vmem:[%s13126_s0 + $0xe86] ss:$8 sm:$0xf0]   ;;  %1800 = vrot.lane.b32.xlu1 %v1799_v2, %s7030_s3  ;;  %v1263_v47 = vpop.permute.xlu0 %1262  }
  0xf5   :  { %v1788_v4 = vsel %vm4_vm0, %v6014_v1, %v6013_v0  ;;  %v6022_v5 = vld [vmem:[%s13126_s0 + $0x1c6] ss:$8 sm:$0xf]   ;;  %5872 = vst.msk [vmem:[%s13127_s1 + $0x1d8] sm:$0xff] %vm583_vm2, %v1263_v47  }
  0xf6   :  { %v6023_v6 = vld [vmem:[%s13126_s0 + $0x1c6] ss:$8 sm:$0xf0]   ;;  %1789 = vrot.lane.b32.xlu0 %v1788_v4, %s7030_s3  ;;  %v1295_v51 = vpop.permute.xlu1 %1294  }
  0xf7   :  { %v6019_v8 = vld [vmem:[%s13126_s0 + $0xc6] ss:$8 sm:$0xf]   ;;  %v1821_v10 = vsel %vm4_vm0, %v6023_v6, %v6022_v5  ;;  %5880 = vst.msk [vmem:[%s13127_s1 + $0x20] sm:$0xff] %vm1286_vm3, %v1295_v51  }
  0xf8   :  { %v6020_v9 = vld [vmem:[%s13126_s0 + $0xc6] ss:$8 sm:$0xf0]   ;;  %1822 = vrot.lane.b32.xlu1 %v1821_v10, %s7030_s3  ;;  %v1285_v55 = vpop.permute.xlu0 %1284   ;;  %v6069_v5 = vld [vmem:[%s13126_s0 + $0x105] ss:$8 sm:$0xf]  }
  0xf9   :  { %v1810_v12 = vsel %vm4_vm0, %v6020_v9, %v6019_v8  ;;  %v6028_v13 = vld [vmem:[%s13126_s0 + $0x3c6] ss:$8 sm:$0xf]   ;;  %1287 = vst.msk [vmem:[%s13127_s1] sm:$0xff] %vm1286_vm3, %v1285_v55  }
  0xfa   :  { %v6029_v14 = vld [vmem:[%s13126_s0 + $0x3c6] ss:$8 sm:$0xf0]   ;;  %1811 = vrot.lane.b32.xlu0 %v1810_v12, %s7030_s3  ;;  %v1317_v59 = vpop.permute.xlu1 %1316   ;;  %v6070_v6 = vld [vmem:[%s13126_s0 + $0x105] ss:$8 sm:$0xf0]  }
  0xfb   :  { %v6025_v16 = vld [vmem:[%s13126_s0 + $0x2c6] ss:$8 sm:$0xf]   ;;  %v1843_v18 = vsel %vm4_vm0, %v6029_v14, %v6028_v13  ;;  %5886 = vst.msk [vmem:[%s13127_s1 + $0x60] sm:$0xff] %vm1286_vm3, %v1317_v59   ;;  %v1996_v10 = vsel %vm4_vm0, %v6070_v6, %v6069_v5 }
  0xfc   :  { %v6026_v17 = vld [vmem:[%s13126_s0 + $0x2c6] ss:$8 sm:$0xf0]   ;;  %1844 = vrot.lane.b32.xlu1 %v1843_v18, %s7030_s3  ;;  %v1306_v63 = vpop.permute.xlu0 %1305   ;;  %v6067_v8 = vld [vmem:[%s13126_s0 + $0x5] ss:$8 sm:$0xf]  }
  0xfd   :  { %v1832_v20 = vsel %vm4_vm0, %v6026_v17, %v6025_v16  ;;  %v6034_v21 = vld [vmem:[%s13126_s0 + $0x5c6] ss:$8 sm:$0xf]   ;;  %5883 = vst.msk [vmem:[%s13127_s1 + $0x40] sm:$0xff] %vm1286_vm3, %v1306_v63  }
  0xfe   :  { %v6035_v22 = vld [vmem:[%s13126_s0 + $0x5c6] ss:$8 sm:$0xf0]   ;;  %1833 = vrot.lane.b32.xlu0 %v1832_v20, %s7030_s3  ;;  %v1339_v3 = vpop.permute.xlu1 %1338   ;;  %v6068_v9 = vld [vmem:[%s13126_s0 + $0x5] ss:$8 sm:$0xf0]  }
  0xff   :  { %v6031_v24 = vld [vmem:[%s13126_s0 + $0x4c6] ss:$8 sm:$0xf]   ;;  %v1865_v26 = vsel %vm4_vm0, %v6035_v22, %v6034_v21  ;;  %5892 = vst.msk [vmem:[%s13127_s1 + $0xa0] sm:$0xff] %vm1286_vm3, %v1339_v3   ;;  %v1986_v12 = vsel %vm4_vm0, %v6068_v9, %v6067_v8 }
 0x100   :  { %v6032_v25 = vld [vmem:[%s13126_s0 + $0x4c6] ss:$8 sm:$0xf0]   ;;  %1866 = vrot.lane.b32.xlu1 %v1865_v26, %s7030_s3  ;;  %v1328_v7 = vpop.permute.xlu0 %1327   ;;  %v6075_v13 = vld [vmem:[%s13126_s0 + $0x305] ss:$8 sm:$0xf]  }
 0x101   :  { %v1854_v28 = vsel %vm4_vm0, %v6032_v25, %v6031_v24  ;;  %v6040_v29 = vld [vmem:[%s13126_s0 + $0x7c6] ss:$8 sm:$0xf]   ;;  %5889 = vst.msk [vmem:[%s13127_s1 + $0x80] sm:$0xff] %vm1286_vm3, %v1328_v7  }
 0x102   :  { %v6041_v30 = vld [vmem:[%s13126_s0 + $0x7c6] ss:$8 sm:$0xf0]   ;;  %1855 = vrot.lane.b32.xlu0 %v1854_v28, %s7030_s3  ;;  %v6076_v14 = vld [vmem:[%s13126_s0 + $0x305] ss:$8 sm:$0xf0]  }
 0x103   :  { %v6037_v32 = vld [vmem:[%s13126_s0 + $0x6c6] ss:$8 sm:$0xf]   ;;  %v1887_v34 = vsel %vm4_vm0, %v6041_v30, %v6040_v29  ;;  %v1361_v11 = vpop.permute.xlu1 %1360   ;;  %v6072_v16 = vld [vmem:[%s13126_s0 + $0x205] ss:$8 sm:$0xf]   ;;  %v2018_v18 = vsel %vm4_vm0, %v6076_v14, %v6075_v13 }
 0x104   :  { %v6038_v33 = vld [vmem:[%s13126_s0 + $0x6c6] ss:$8 sm:$0xf0]   ;;  %1888 = vrot.lane.b32.xlu1 %v1887_v34, %s7030_s3  ;;  %5898 = vst.msk [vmem:[%s13127_s1 + $0xe0] sm:$0xff] %vm1286_vm3, %v1361_v11  }
 0x105   :  { %v1876_v36 = vsel %vm4_vm0, %v6038_v33, %v6037_v32  ;;  %v6046_v37 = vld [vmem:[%s13126_s0 + $0x9c6] ss:$8 sm:$0xf]   ;;  %v6073_v17 = vld [vmem:[%s13126_s0 + $0x205] ss:$8 sm:$0xf0]  }
 0x106   :  { %v6047_v38 = vld [vmem:[%s13126_s0 + $0x9c6] ss:$8 sm:$0xf0]   ;;  %1877 = vrot.lane.b32.xlu0 %v1876_v36, %s7030_s3  ;;  %v1350_v15 = vpop.permute.xlu0 %1349   ;;  %v2007_v20 = vsel %vm4_vm0, %v6073_v17, %v6072_v16  ;;  %v6081_v21 = vld [vmem:[%s13126_s0 + $0x505] ss:$8 sm:$0xf]  }
 0x107   :  { %v6043_v40 = vld [vmem:[%s13126_s0 + $0x8c6] ss:$8 sm:$0xf]   ;;  %v1909_v42 = vsel %vm4_vm0, %v6047_v38, %v6046_v37  ;;  %5895 = vst.msk [vmem:[%s13127_s1 + $0xc0] sm:$0xff] %vm1286_vm3, %v1350_v15  }
 0x108   :  { %v6044_v41 = vld [vmem:[%s13126_s0 + $0x8c6] ss:$8 sm:$0xf0]   ;;  %1910 = vrot.lane.b32.xlu1 %v1909_v42, %s7030_s3  ;;  %v1383_v19 = vpop.permute.xlu1 %1382   ;;  %v6082_v22 = vld [vmem:[%s13126_s0 + $0x505] ss:$8 sm:$0xf0]  }
 0x109   :  { %v1898_v44 = vsel %vm4_vm0, %v6044_v41, %v6043_v40  ;;  %v6052_v45 = vld [vmem:[%s13126_s0 + $0xbc6] ss:$8 sm:$0xf]   ;;  %5904 = vst.msk [vmem:[%s13127_s1 + $0x120] sm:$0xff] %vm1286_vm3, %v1383_v19   ;;  %v2040_v26 = vsel %vm4_vm0, %v6082_v22, %v6081_v21 }
 0x10a   :  { %v6053_v46 = vld [vmem:[%s13126_s0 + $0xbc6] ss:$8 sm:$0xf0]   ;;  %1899 = vrot.lane.b32.xlu0 %v1898_v44, %s7030_s3  ;;  %v6078_v24 = vld [vmem:[%s13126_s0 + $0x405] ss:$8 sm:$0xf]  }
 0x10b   :  { %v6049_v48 = vld [vmem:[%s13126_s0 + $0xac6] ss:$8 sm:$0xf]   ;;  %v1931_v50 = vsel %vm4_vm0, %v6053_v46, %v6052_v45  ;;  %v1372_v23 = vpop.permute.xlu0 %1371   ;;  %v6079_v25 = vld [vmem:[%s13126_s0 + $0x405] ss:$8 sm:$0xf0]  }
 0x10c   :  { %v6050_v49 = vld [vmem:[%s13126_s0 + $0xac6] ss:$8 sm:$0xf0]   ;;  %1932 = vrot.lane.b32.xlu1 %v1931_v50, %s7030_s3  ;;  %5901 = vst.msk [vmem:[%s13127_s1 + $0x100] sm:$0xff] %vm1286_vm3, %v1372_v23   ;;  %v2029_v28 = vsel %vm4_vm0, %v6079_v25, %v6078_v24 }
 0x10d   :  { %v1920_v52 = vsel %vm4_vm0, %v6050_v49, %v6049_v48  ;;  %v6058_v53 = vld [vmem:[%s13126_s0 + $0xdc6] ss:$8 sm:$0xf]   ;;  %v6087_v29 = vld [vmem:[%s13126_s0 + $0x705] ss:$8 sm:$0xf]  }
 0x10e   :  { %v6059_v54 = vld [vmem:[%s13126_s0 + $0xdc6] ss:$8 sm:$0xf0]   ;;  %1921 = vrot.lane.b32.xlu0 %v1920_v52, %s7030_s3  ;;  %v1405_v27 = vpop.permute.xlu1 %1404   ;;  %v6088_v30 = vld [vmem:[%s13126_s0 + $0x705] ss:$8 sm:$0xf0]  }
 0x10f   :  { %v6055_v56 = vld [vmem:[%s13126_s0 + $0xcc6] ss:$8 sm:$0xf]   ;;  %v1953_v58 = vsel %vm4_vm0, %v6059_v54, %v6058_v53  ;;  %5910 = vst.msk [vmem:[%s13127_s1 + $0x160] sm:$0xff] %vm1286_vm3, %v1405_v27   ;;  %v2062_v34 = vsel %vm4_vm0, %v6088_v30, %v6087_v29 }
 0x110   :  { %v6056_v57 = vld [vmem:[%s13126_s0 + $0xcc6] ss:$8 sm:$0xf0]   ;;  %1954 = vrot.lane.b32.xlu1 %v1953_v58, %s7030_s3  ;;  %v6084_v32 = vld [vmem:[%s13126_s0 + $0x605] ss:$8 sm:$0xf]  }
 0x111   :  { %v1942_v60 = vsel %vm4_vm0, %v6056_v57, %v6055_v56  ;;  %v6064_v61 = vld [vmem:[%s13126_s0 + $0xfc6] ss:$8 sm:$0xf]   ;;  %v1394_v31 = vpop.permute.xlu0 %1393   ;;  %v6085_v33 = vld [vmem:[%s13126_s0 + $0x605] ss:$8 sm:$0xf0]  }
 0x112   :  { %v6065_v62 = vld [vmem:[%s13126_s0 + $0xfc6] ss:$8 sm:$0xf0]   ;;  %1943 = vrot.lane.b32.xlu0 %v1942_v60, %s7030_s3  ;;  %5907 = vst.msk [vmem:[%s13127_s1 + $0x140] sm:$0xff] %vm1286_vm3, %v1394_v31   ;;  %v2051_v36 = vsel %vm4_vm0, %v6085_v33, %v6084_v32 }
 0x113   :  { %v6061_v0 = vld [vmem:[%s13126_s0 + $0xec6] ss:$8 sm:$0xf]   ;;  %v1975_v2 = vsel %vm4_vm0, %v6065_v62, %v6064_v61  ;;  %v1427_v35 = vpop.permute.xlu1 %1426   ;;  %v6093_v37 = vld [vmem:[%s13126_s0 + $0x905] ss:$8 sm:$0xf]  }
 0x114   :  { %v6062_v1 = vld [vmem:[%s13126_s0 + $0xec6] ss:$8 sm:$0xf0]   ;;  %1976 = vrot.lane.b32.xlu1 %v1975_v2, %s7030_s3  ;;  %v6094_v38 = vld [vmem:[%s13126_s0 + $0x905] ss:$8 sm:$0xf0]  }
 0x115   :  { %v1964_v4 = vsel %vm4_vm0, %v6062_v1, %v6061_v0  ;;  %5916 = vst.msk [vmem:[%s13127_s1 + $0x1a0] sm:$0xff] %vm1286_vm3, %v1427_v35   ;;  %v6090_v40 = vld [vmem:[%s13126_s0 + $0x805] ss:$8 sm:$0xf]   ;;  %v2084_v42 = vsel %vm4_vm0, %v6094_v38, %v6093_v37 }
 0x116   :  { %1965 = vrot.lane.b32.xlu0 %v1964_v4, %s7030_s3  ;;  %v1416_v39 = vpop.permute.xlu0 %1415   ;;  %v6091_v41 = vld [vmem:[%s13126_s0 + $0x805] ss:$8 sm:$0xf0]  }
 0x117   :  { %5913 = vst.msk [vmem:[%s13127_s1 + $0x180] sm:$0xff] %vm1286_vm3, %v1416_v39   ;;  %v2073_v44 = vsel %vm4_vm0, %v6091_v41, %v6090_v40  ;;  %v6099_v45 = vld [vmem:[%s13126_s0 + $0xb05] ss:$8 sm:$0xf]  }
 0x118   :  { %1997 = vrot.lane.b32.xlu1 %v1996_v10, %s7031_s25  ;;  %v6100_v46 = vld [vmem:[%s13126_s0 + $0xb05] ss:$8 sm:$0xf0]  }
 0x119   :  { %v1449_v43 = vpop.permute.xlu1 %1448   ;;  %v6096_v48 = vld [vmem:[%s13126_s0 + $0xa05] ss:$8 sm:$0xf]   ;;  %v2106_v50 = vsel %vm4_vm0, %v6100_v46, %v6099_v45 }
 0x11a   :  { %1987 = vrot.lane.b32.xlu0 %v1986_v12, %s7031_s25  ;;  %5922 = vst.msk [vmem:[%s13127_s1 + $0x1e0] sm:$0xff] %vm1286_vm3, %v1449_v43   ;;  %v6097_v49 = vld [vmem:[%s13126_s0 + $0xa05] ss:$8 sm:$0xf0]  }
 0x11b   :  { %v2095_v52 = vsel %vm4_vm0, %v6097_v49, %v6096_v48  ;;  %v6105_v53 = vld [vmem:[%s13126_s0 + $0xd05] ss:$8 sm:$0xf]  }
 0x11c   :  { %2019 = vrot.lane.b32.xlu1 %v2018_v18, %s7031_s25  ;;  %v1438_v47 = vpop.permute.xlu0 %1437   ;;  %v6106_v54 = vld [vmem:[%s13126_s0 + $0xd05] ss:$8 sm:$0xf0]  }
 0x11d   :  { %5919 = vst.msk [vmem:[%s13127_s1 + $0x1c0] sm:$0xff] %vm1286_vm3, %v1438_v47   ;;  %v6102_v56 = vld [vmem:[%s13126_s0 + $0xc05] ss:$8 sm:$0xf]   ;;  %v2128_v58 = vsel %vm4_vm0, %v6106_v54, %v6105_v53 }
 0x11e   :  { %2008 = vrot.lane.b32.xlu0 %v2007_v20, %s7031_s25  ;;  %v1471_v51 = vpop.permute.xlu1 %1470   ;;  %v6103_v57 = vld [vmem:[%s13126_s0 + $0xc05] ss:$8 sm:$0xf0]  }
 0x11f   :  { %5928 = vst.msk [vmem:[%s13127_s1 + $0x28] sm:$0xff] %vm1286_vm3, %v1471_v51   ;;  %v2117_v60 = vsel %vm4_vm0, %v6103_v57, %v6102_v56  ;;  %v6111_v61 = vld [vmem:[%s13126_s0 + $0xf05] ss:$8 sm:$0xf]  }
 0x120   :  { %2041 = vrot.lane.b32.xlu1 %v2040_v26, %s7031_s25  ;;  %v6112_v62 = vld [vmem:[%s13126_s0 + $0xf05] ss:$8 sm:$0xf0]  }
 0x121   :  { %v1460_v55 = vpop.permute.xlu0 %1459   ;;  %v6108_v0 = vld [vmem:[%s13126_s0 + $0xe05] ss:$8 sm:$0xf]   ;;  %v2150_v2 = vsel %vm4_vm0, %v6112_v62, %v6111_v61 }
 0x122   :  { %2030 = vrot.lane.b32.xlu0 %v2029_v28, %s7031_s25  ;;  %5925 = vst.msk [vmem:[%s13127_s1 + $0x8] sm:$0xff] %vm1286_vm3, %v1460_v55   ;;  %v6109_v1 = vld [vmem:[%s13126_s0 + $0xe05] ss:$8 sm:$0xf0]  }
 0x123   :  { %v2139_v4 = vsel %vm4_vm0, %v6109_v1, %v6108_v0  ;;  %v6117_v5 = vld [vmem:[%s13126_s0 + $0x145] ss:$8 sm:$0xf]  }
 0x124   :  { %2063 = vrot.lane.b32.xlu1 %v2062_v34, %s7031_s25  ;;  %v1493_v59 = vpop.permute.xlu1 %1492   ;;  %v6118_v6 = vld [vmem:[%s13126_s0 + $0x145] ss:$8 sm:$0xf0]  }
 0x125   :  { %5934 = vst.msk [vmem:[%s13127_s1 + $0x68] sm:$0xff] %vm1286_vm3, %v1493_v59   ;;  %v6114_v8 = vld [vmem:[%s13126_s0 + $0x45] ss:$8 sm:$0xf]   ;;  %v2172_v10 = vsel %vm4_vm0, %v6118_v6, %v6117_v5 }
 0x126   :  { %2052 = vrot.lane.b32.xlu0 %v2051_v36, %s7031_s25  ;;  %v6115_v9 = vld [vmem:[%s13126_s0 + $0x45] ss:$8 sm:$0xf0]  }
 0x127   :  { %v1482_v63 = vpop.permute.xlu0 %1481   ;;  %v2161_v12 = vsel %vm4_vm0, %v6115_v9, %v6114_v8  ;;  %v6123_v13 = vld [vmem:[%s13126_s0 + $0x345] ss:$8 sm:$0xf]  }
 0x128   :  { %2085 = vrot.lane.b32.xlu1 %v2084_v42, %s7031_s25  ;;  %5931 = vst.msk [vmem:[%s13127_s1 + $0x48] sm:$0xff] %vm1286_vm3, %v1482_v63   ;;  %v6124_v14 = vld [vmem:[%s13126_s0 + $0x345] ss:$8 sm:$0xf0]  }
 0x129   :  { %v1515_v3 = vpop.permute.xlu1 %1514   ;;  %v6120_v16 = vld [vmem:[%s13126_s0 + $0x245] ss:$8 sm:$0xf]   ;;  %v2194_v18 = vsel %vm4_vm0, %v6124_v14, %v6123_v13 }
 0x12a   :  { %2074 = vrot.lane.b32.xlu0 %v2073_v44, %s7031_s25  ;;  %5940 = vst.msk [vmem:[%s13127_s1 + $0xa8] sm:$0xff] %vm1286_vm3, %v1515_v3   ;;  %v6121_v17 = vld [vmem:[%s13126_s0 + $0x245] ss:$8 sm:$0xf0]  }
 0x12b   :  { %v2183_v20 = vsel %vm4_vm0, %v6121_v17, %v6120_v16  ;;  %v6129_v21 = vld [vmem:[%s13126_s0 + $0x545] ss:$8 sm:$0xf]  }
 0x12c   :  { %2107 = vrot.lane.b32.xlu1 %v2106_v50, %s7031_s25  ;;  %v1504_v7 = vpop.permute.xlu0 %1503   ;;  %v6130_v22 = vld [vmem:[%s13126_s0 + $0x545] ss:$8 sm:$0xf0]  }
 0x12d   :  { %5937 = vst.msk [vmem:[%s13127_s1 + $0x88] sm:$0xff] %vm1286_vm3, %v1504_v7   ;;  %v6126_v24 = vld [vmem:[%s13126_s0 + $0x445] ss:$8 sm:$0xf]   ;;  %v2216_v26 = vsel %vm4_vm0, %v6130_v22, %v6129_v21 }
 0x12e   :  { %2096 = vrot.lane.b32.xlu0 %v2095_v52, %s7031_s25  ;;  %v6127_v25 = vld [vmem:[%s13126_s0 + $0x445] ss:$8 sm:$0xf0]  }
 0x12f   :  { %v1537_v11 = vpop.permute.xlu1 %1536   ;;  %v2205_v28 = vsel %vm4_vm0, %v6127_v25, %v6126_v24  ;;  %v6135_v29 = vld [vmem:[%s13126_s0 + $0x745] ss:$8 sm:$0xf]  }
 0x130   :  { %2129 = vrot.lane.b32.xlu1 %v2128_v58, %s7031_s25  ;;  %5946 = vst.msk [vmem:[%s13127_s1 + $0xe8] sm:$0xff] %vm1286_vm3, %v1537_v11   ;;  %v6136_v30 = vld [vmem:[%s13126_s0 + $0x745] ss:$8 sm:$0xf0]  }
 0x131   :  { %v6132_v32 = vld [vmem:[%s13126_s0 + $0x645] ss:$8 sm:$0xf]   ;;  %v2238_v34 = vsel %vm4_vm0, %v6136_v30, %v6135_v29 }
 0x132   :  { %2118 = vrot.lane.b32.xlu0 %v2117_v60, %s7031_s25  ;;  %v1526_v15 = vpop.permute.xlu0 %1525   ;;  %v6133_v33 = vld [vmem:[%s13126_s0 + $0x645] ss:$8 sm:$0xf0]  }
 0x133   :  { %5943 = vst.msk [vmem:[%s13127_s1 + $0xc8] sm:$0xff] %vm1286_vm3, %v1526_v15   ;;  %v2227_v36 = vsel %vm4_vm0, %v6133_v33, %v6132_v32  ;;  %v6141_v37 = vld [vmem:[%s13126_s0 + $0x945] ss:$8 sm:$0xf]  }
 0x134   :  { %2151 = vrot.lane.b32.xlu1 %v2150_v2, %s7031_s25  ;;  %v1559_v19 = vpop.permute.xlu1 %1558   ;;  %v6142_v38 = vld [vmem:[%s13126_s0 + $0x945] ss:$8 sm:$0xf0]  }
 0x135   :  { %5952 = vst.msk [vmem:[%s13127_s1 + $0x128] sm:$0xff] %vm1286_vm3, %v1559_v19   ;;  %v6138_v40 = vld [vmem:[%s13126_s0 + $0x845] ss:$8 sm:$0xf]   ;;  %v2260_v42 = vsel %vm4_vm0, %v6142_v38, %v6141_v37 }
 0x136   :  { %2140 = vrot.lane.b32.xlu0 %v2139_v4, %s7031_s25  ;;  %v6139_v41 = vld [vmem:[%s13126_s0 + $0x845] ss:$8 sm:$0xf0]  }
 0x137   :  { %v1548_v23 = vpop.permute.xlu0 %1547   ;;  %v2249_v44 = vsel %vm4_vm0, %v6139_v41, %v6138_v40  ;;  %v6147_v45 = vld [vmem:[%s13126_s0 + $0xb45] ss:$8 sm:$0xf]  }
 0x138   :  { %2173 = vrot.lane.b32.xlu1 %v2172_v10, %s7031_s25  ;;  %5949 = vst.msk [vmem:[%s13127_s1 + $0x108] sm:$0xff] %vm1286_vm3, %v1548_v23   ;;  %v6148_v46 = vld [vmem:[%s13126_s0 + $0xb45] ss:$8 sm:$0xf0]  }
 0x139   :  { %v6144_v48 = vld [vmem:[%s13126_s0 + $0xa45] ss:$8 sm:$0xf]   ;;  %v2282_v50 = vsel %vm4_vm0, %v6148_v46, %v6147_v45 }
 0x13a   :  { %2162 = vrot.lane.b32.xlu0 %v2161_v12, %s7031_s25  ;;  %v1581_v27 = vpop.permute.xlu1 %1580   ;;  %v6145_v49 = vld [vmem:[%s13126_s0 + $0xa45] ss:$8 sm:$0xf0]  }
 0x13b   :  { %5958 = vst.msk [vmem:[%s13127_s1 + $0x168] sm:$0xff] %vm1286_vm3, %v1581_v27   ;;  %v2271_v52 = vsel %vm4_vm0, %v6145_v49, %v6144_v48  ;;  %v6153_v53 = vld [vmem:[%s13126_s0 + $0xd45] ss:$8 sm:$0xf]  }
 0x13c   :  { %2195 = vrot.lane.b32.xlu1 %v2194_v18, %s7031_s25  ;;  %v6154_v54 = vld [vmem:[%s13126_s0 + $0xd45] ss:$8 sm:$0xf0]  }
 0x13d   :  { %v1570_v31 = vpop.permute.xlu0 %1569   ;;  %v6150_v56 = vld [vmem:[%s13126_s0 + $0xc45] ss:$8 sm:$0xf]   ;;  %v2304_v58 = vsel %vm4_vm0, %v6154_v54, %v6153_v53 }
 0x13e   :  { %2184 = vrot.lane.b32.xlu0 %v2183_v20, %s7031_s25  ;;  %5955 = vst.msk [vmem:[%s13127_s1 + $0x148] sm:$0xff] %vm1286_vm3, %v1570_v31   ;;  %v6151_v57 = vld [vmem:[%s13126_s0 + $0xc45] ss:$8 sm:$0xf0]  }
 0x13f   :  { %v1603_v35 = vpop.permute.xlu1 %1602   ;;  %v2293_v60 = vsel %vm4_vm0, %v6151_v57, %v6150_v56  ;;  %v6159_v61 = vld [vmem:[%s13126_s0 + $0xf45] ss:$8 sm:$0xf]  }
 0x140   :  { %2217 = vrot.lane.b32.xlu1 %v2216_v26, %s7031_s25  ;;  %5964 = vst.msk [vmem:[%s13127_s1 + $0x1a8] sm:$0xff] %vm1286_vm3, %v1603_v35   ;;  %v6160_v62 = vld [vmem:[%s13126_s0 + $0xf45] ss:$8 sm:$0xf0]  }
 0x141   :  { %v6156_v0 = vld [vmem:[%s13126_s0 + $0xe45] ss:$8 sm:$0xf]   ;;  %v2326_v2 = vsel %vm4_vm0, %v6160_v62, %v6159_v61 }
 0x142   :  { %2206 = vrot.lane.b32.xlu0 %v2205_v28, %s7031_s25  ;;  %v1592_v39 = vpop.permute.xlu0 %1591   ;;  %v6157_v1 = vld [vmem:[%s13126_s0 + $0xe45] ss:$8 sm:$0xf0]  }
 0x143   :  { %5961 = vst.msk [vmem:[%s13127_s1 + $0x188] sm:$0xff] %vm1286_vm3, %v1592_v39   ;;  %v2315_v4 = vsel %vm4_vm0, %v6157_v1, %v6156_v0  ;;  %v6165_v5 = vld [vmem:[%s13126_s0 + $0x185] ss:$8 sm:$0xf]  }
 0x144   :  { %2239 = vrot.lane.b32.xlu1 %v2238_v34, %s7031_s25  ;;  %v6166_v6 = vld [vmem:[%s13126_s0 + $0x185] ss:$8 sm:$0xf0]  }
 0x145   :  { %v1625_v43 = vpop.permute.xlu1 %1624   ;;  %v6162_v8 = vld [vmem:[%s13126_s0 + $0x85] ss:$8 sm:$0xf]   ;;  %v2348_v10 = vsel %vm4_vm0, %v6166_v6, %v6165_v5 }
 0x146   :  { %2228 = vrot.lane.b32.xlu0 %v2227_v36, %s7031_s25  ;;  %5970 = vst.msk [vmem:[%s13127_s1 + $0x1e8] sm:$0xff] %vm1286_vm3, %v1625_v43   ;;  %v6163_v9 = vld [vmem:[%s13126_s0 + $0x85] ss:$8 sm:$0xf0]  }
 0x147   :  { %v2337_v12 = vsel %vm4_vm0, %v6163_v9, %v6162_v8  ;;  %v6171_v13 = vld [vmem:[%s13126_s0 + $0x385] ss:$8 sm:$0xf]  }
 0x148   :  { %v1614_v47 = vpop.permute.xlu0 %1613   ;;  %2261 = vrot.lane.b32.xlu1 %v2260_v42, %s7031_s25  ;;  %v6172_v14 = vld [vmem:[%s13126_s0 + $0x385] ss:$8 sm:$0xf0]  }
 0x149   :  { %5967 = vst.msk [vmem:[%s13127_s1 + $0x1c8] sm:$0xff] %vm1286_vm3, %v1614_v47   ;;  %v6168_v16 = vld [vmem:[%s13126_s0 + $0x285] ss:$8 sm:$0xf]   ;;  %v2370_v18 = vsel %vm4_vm0, %v6172_v14, %v6171_v13 }
 0x14a   :  { %2250 = vrot.lane.b32.xlu0 %v2249_v44, %s7031_s25  ;;  %v1647_v51 = vpop.permute.xlu1 %1646   ;;  %v6169_v17 = vld [vmem:[%s13126_s0 + $0x285] ss:$8 sm:$0xf0]  }
 0x14b   :  { %5976 = vst.msk [vmem:[%s13127_s1 + $0x30] sm:$0xff] %vm1286_vm3, %v1647_v51   ;;  %v2359_v20 = vsel %vm4_vm0, %v6169_v17, %v6168_v16  ;;  %v6177_v21 = vld [vmem:[%s13126_s0 + $0x585] ss:$8 sm:$0xf]  }
 0x14c   :  { %v1636_v55 = vpop.permute.xlu0 %1635   ;;  %2283 = vrot.lane.b32.xlu1 %v2282_v50, %s7031_s25  ;;  %v6178_v22 = vld [vmem:[%s13126_s0 + $0x585] ss:$8 sm:$0xf0]  }
 0x14d   :  { %5973 = vst.msk [vmem:[%s13127_s1 + $0x10] sm:$0xff] %vm1286_vm3, %v1636_v55   ;;  %v6174_v24 = vld [vmem:[%s13126_s0 + $0x485] ss:$8 sm:$0xf]   ;;  %v2392_v26 = vsel %vm4_vm0, %v6178_v22, %v6177_v21 }
 0x14e   :  { %2272 = vrot.lane.b32.xlu0 %v2271_v52, %s7031_s25  ;;  %v1669_v59 = vpop.permute.xlu1 %1668   ;;  %v6175_v25 = vld [vmem:[%s13126_s0 + $0x485] ss:$8 sm:$0xf0]  }
 0x14f   :  { %5982 = vst.msk [vmem:[%s13127_s1 + $0x70] sm:$0xff] %vm1286_vm3, %v1669_v59   ;;  %v2381_v28 = vsel %vm4_vm0, %v6175_v25, %v6174_v24  ;;  %v6183_v29 = vld [vmem:[%s13126_s0 + $0x785] ss:$8 sm:$0xf]  }
 0x150   :  { %v1658_v63 = vpop.permute.xlu0 %1657   ;;  %2305 = vrot.lane.b32.xlu1 %v2304_v58, %s7031_s25  ;;  %v6184_v30 = vld [vmem:[%s13126_s0 + $0x785] ss:$8 sm:$0xf0]  }
 0x151   :  { %5979 = vst.msk [vmem:[%s13127_s1 + $0x50] sm:$0xff] %vm1286_vm3, %v1658_v63   ;;  %v6180_v32 = vld [vmem:[%s13126_s0 + $0x685] ss:$8 sm:$0xf]   ;;  %v2414_v34 = vsel %vm4_vm0, %v6184_v30, %v6183_v29 }
 0x152   :  { %2294 = vrot.lane.b32.xlu0 %v2293_v60, %s7031_s25  ;;  %v1691_v3 = vpop.permute.xlu1 %1690   ;;  %v6181_v33 = vld [vmem:[%s13126_s0 + $0x685] ss:$8 sm:$0xf0]  }
 0x153   :  { %5988 = vst.msk [vmem:[%s13127_s1 + $0xb0] sm:$0xff] %vm1286_vm3, %v1691_v3   ;;  %v2403_v36 = vsel %vm4_vm0, %v6181_v33, %v6180_v32  ;;  %v6189_v37 = vld [vmem:[%s13126_s0 + $0x985] ss:$8 sm:$0xf]  }
 0x154   :  { %v1680_v7 = vpop.permute.xlu0 %1679   ;;  %2327 = vrot.lane.b32.xlu1 %v2326_v2, %s7031_s25  ;;  %v6190_v38 = vld [vmem:[%s13126_s0 + $0x985] ss:$8 sm:$0xf0]  }
 0x155   :  { %5985 = vst.msk [vmem:[%s13127_s1 + $0x90] sm:$0xff] %vm1286_vm3, %v1680_v7   ;;  %v6186_v40 = vld [vmem:[%s13126_s0 + $0x885] ss:$8 sm:$0xf]   ;;  %v2436_v42 = vsel %vm4_vm0, %v6190_v38, %v6189_v37 }
 0x156   :  { %2316 = vrot.lane.b32.xlu0 %v2315_v4, %s7031_s25  ;;  %v1713_v11 = vpop.permute.xlu1 %1712   ;;  %v6187_v41 = vld [vmem:[%s13126_s0 + $0x885] ss:$8 sm:$0xf0]  }
 0x157   :  { %5994 = vst.msk [vmem:[%s13127_s1 + $0xf0] sm:$0xff] %vm1286_vm3, %v1713_v11   ;;  %v2425_v44 = vsel %vm4_vm0, %v6187_v41, %v6186_v40  ;;  %v6195_v45 = vld [vmem:[%s13126_s0 + $0xb85] ss:$8 sm:$0xf]  }
 0x158   :  { %v1702_v15 = vpop.permute.xlu0 %1701   ;;  %2349 = vrot.lane.b32.xlu1 %v2348_v10, %s7031_s25  ;;  %v6196_v46 = vld [vmem:[%s13126_s0 + $0xb85] ss:$8 sm:$0xf0]  }
 0x159   :  { %5991 = vst.msk [vmem:[%s13127_s1 + $0xd0] sm:$0xff] %vm1286_vm3, %v1702_v15   ;;  %v6192_v48 = vld [vmem:[%s13126_s0 + $0xa85] ss:$8 sm:$0xf]   ;;  %v2458_v50 = vsel %vm4_vm0, %v6196_v46, %v6195_v45 }
 0x15a   :  { %2338 = vrot.lane.b32.xlu0 %v2337_v12, %s7031_s25  ;;  %v1735_v19 = vpop.permute.xlu1 %1734   ;;  %v6193_v49 = vld [vmem:[%s13126_s0 + $0xa85] ss:$8 sm:$0xf0]  }
 0x15b   :  { %6000 = vst.msk [vmem:[%s13127_s1 + $0x130] sm:$0xff] %vm1286_vm3, %v1735_v19   ;;  %v2447_v52 = vsel %vm4_vm0, %v6193_v49, %v6192_v48  ;;  %v6201_v53 = vld [vmem:[%s13126_s0 + $0xd85] ss:$8 sm:$0xf]  }
 0x15c   :  { %v1724_v23 = vpop.permute.xlu0 %1723   ;;  %2371 = vrot.lane.b32.xlu1 %v2370_v18, %s7031_s25  ;;  %v6202_v54 = vld [vmem:[%s13126_s0 + $0xd85] ss:$8 sm:$0xf0]  }
 0x15d   :  { %5997 = vst.msk [vmem:[%s13127_s1 + $0x110] sm:$0xff] %vm1286_vm3, %v1724_v23   ;;  %v6198_v56 = vld [vmem:[%s13126_s0 + $0xc85] ss:$8 sm:$0xf]   ;;  %v2480_v58 = vsel %vm4_vm0, %v6202_v54, %v6201_v53 }
 0x15e   :  { %2360 = vrot.lane.b32.xlu0 %v2359_v20, %s7031_s25  ;;  %v1757_v27 = vpop.permute.xlu1 %1756   ;;  %v6199_v57 = vld [vmem:[%s13126_s0 + $0xc85] ss:$8 sm:$0xf0]  }
 0x15f   :  { %6006 = vst.msk [vmem:[%s13127_s1 + $0x170] sm:$0xff] %vm1286_vm3, %v1757_v27   ;;  %v2469_v60 = vsel %vm4_vm0, %v6199_v57, %v6198_v56  ;;  %v6207_v61 = vld [vmem:[%s13126_s0 + $0xf85] ss:$8 sm:$0xf]  }
 0x160   :  { %v1746_v31 = vpop.permute.xlu0 %1745   ;;  %2393 = vrot.lane.b32.xlu1 %v2392_v26, %s7031_s25  ;;  %v6208_v62 = vld [vmem:[%s13126_s0 + $0xf85] ss:$8 sm:$0xf0]  }
 0x161   :  { %6003 = vst.msk [vmem:[%s13127_s1 + $0x150] sm:$0xff] %vm1286_vm3, %v1746_v31   ;;  %v6204_v0 = vld [vmem:[%s13126_s0 + $0xe85] ss:$8 sm:$0xf]   ;;  %v2502_v2 = vsel %vm4_vm0, %v6208_v62, %v6207_v61 }
 0x162   :  { %2382 = vrot.lane.b32.xlu0 %v2381_v28, %s7031_s25  ;;  %v1779_v35 = vpop.permute.xlu1 %1778   ;;  %v6205_v1 = vld [vmem:[%s13126_s0 + $0xe85] ss:$8 sm:$0xf0]  }
 0x163   :  { %6012 = vst.msk [vmem:[%s13127_s1 + $0x1b0] sm:$0xff] %vm1286_vm3, %v1779_v35   ;;  %v2491_v4 = vsel %vm4_vm0, %v6205_v1, %v6204_v0  ;;  %v6213_v5 = vld [vmem:[%s13126_s0 + $0x1c5] ss:$8 sm:$0xf]  }
 0x164   :  { %v1768_v39 = vpop.permute.xlu0 %1767   ;;  %2415 = vrot.lane.b32.xlu1 %v2414_v34, %s7031_s25  ;;  %v6214_v6 = vld [vmem:[%s13126_s0 + $0x1c5] ss:$8 sm:$0xf0]  }
 0x165   :  { %6009 = vst.msk [vmem:[%s13127_s1 + $0x190] sm:$0xff] %vm1286_vm3, %v1768_v39   ;;  %v6210_v8 = vld [vmem:[%s13126_s0 + $0xc5] ss:$8 sm:$0xf]   ;;  %v2524_v10 = vsel %vm4_vm0, %v6214_v6, %v6213_v5 }
 0x166   :  { %2404 = vrot.lane.b32.xlu0 %v2403_v36, %s7031_s25  ;;  %v1801_v43 = vpop.permute.xlu1 %1800   ;;  %v6211_v9 = vld [vmem:[%s13126_s0 + $0xc5] ss:$8 sm:$0xf0]   ;;  %v6260_v5 = vld [vmem:[%s13126_s0 + $0x104] ss:$8 sm:$0xf]  }
 0x167   :  { %6018 = vst.msk [vmem:[%s13127_s1 + $0x1f0] sm:$0xff] %vm1286_vm3, %v1801_v43   ;;  %v2513_v12 = vsel %vm4_vm0, %v6211_v9, %v6210_v8  ;;  %v6219_v13 = vld [vmem:[%s13126_s0 + $0x3c5] ss:$8 sm:$0xf]  }
 0x168   :  { %v1790_v47 = vpop.permute.xlu0 %1789   ;;  %2437 = vrot.lane.b32.xlu1 %v2436_v42, %s7031_s25  ;;  %v6220_v14 = vld [vmem:[%s13126_s0 + $0x3c5] ss:$8 sm:$0xf0]   ;;  %v6261_v6 = vld [vmem:[%s13126_s0 + $0x104] ss:$8 sm:$0xf0]  }
 0x169   :  { %6015 = vst.msk [vmem:[%s13127_s1 + $0x1d0] sm:$0xff] %vm1286_vm3, %v1790_v47   ;;  %v6216_v16 = vld [vmem:[%s13126_s0 + $0x2c5] ss:$8 sm:$0xf]   ;;  %v2546_v18 = vsel %vm4_vm0, %v6220_v14, %v6219_v13 }
 0x16a   :  { %2426 = vrot.lane.b32.xlu0 %v2425_v44, %s7031_s25  ;;  %v1823_v51 = vpop.permute.xlu1 %1822   ;;  %v6217_v17 = vld [vmem:[%s13126_s0 + $0x2c5] ss:$8 sm:$0xf0]   ;;  %v6258_v8 = vld [vmem:[%s13126_s0 + $0x4] ss:$8 sm:$0xf]  }
 0x16b   :  { %6024 = vst.msk [vmem:[%s13127_s1 + $0x38] sm:$0xff] %vm1286_vm3, %v1823_v51   ;;  %v2535_v20 = vsel %vm4_vm0, %v6217_v17, %v6216_v16  ;;  %v6225_v21 = vld [vmem:[%s13126_s0 + $0x5c5] ss:$8 sm:$0xf]  }
 0x16c   :  { %v1812_v55 = vpop.permute.xlu0 %1811   ;;  %2459 = vrot.lane.b32.xlu1 %v2458_v50, %s7031_s25  ;;  %v6226_v22 = vld [vmem:[%s13126_s0 + $0x5c5] ss:$8 sm:$0xf0]   ;;  %v6259_v9 = vld [vmem:[%s13126_s0 + $0x4] ss:$8 sm:$0xf0]  }
 0x16d   :  { %6021 = vst.msk [vmem:[%s13127_s1 + $0x18] sm:$0xff] %vm1286_vm3, %v1812_v55   ;;  %v6222_v24 = vld [vmem:[%s13126_s0 + $0x4c5] ss:$8 sm:$0xf]   ;;  %v2568_v26 = vsel %vm4_vm0, %v6226_v22, %v6225_v21 }
 0x16e   :  { %2448 = vrot.lane.b32.xlu0 %v2447_v52, %s7031_s25  ;;  %v1845_v59 = vpop.permute.xlu1 %1844   ;;  %v6223_v25 = vld [vmem:[%s13126_s0 + $0x4c5] ss:$8 sm:$0xf0]   ;;  %v6266_v13 = vld [vmem:[%s13126_s0 + $0x304] ss:$8 sm:$0xf]  }
 0x16f   :  { %6030 = vst.msk [vmem:[%s13127_s1 + $0x78] sm:$0xff] %vm1286_vm3, %v1845_v59   ;;  %v2557_v28 = vsel %vm4_vm0, %v6223_v25, %v6222_v24  ;;  %v6231_v29 = vld [vmem:[%s13126_s0 + $0x7c5] ss:$8 sm:$0xf]  }
 0x170   :  { %v1834_v63 = vpop.permute.xlu0 %1833   ;;  %2481 = vrot.lane.b32.xlu1 %v2480_v58, %s7031_s25  ;;  %v6232_v30 = vld [vmem:[%s13126_s0 + $0x7c5] ss:$8 sm:$0xf0]   ;;  %v6267_v14 = vld [vmem:[%s13126_s0 + $0x304] ss:$8 sm:$0xf0]  }
 0x171   :  { %6027 = vst.msk [vmem:[%s13127_s1 + $0x58] sm:$0xff] %vm1286_vm3, %v1834_v63   ;;  %v6228_v32 = vld [vmem:[%s13126_s0 + $0x6c5] ss:$8 sm:$0xf]   ;;  %v2590_v34 = vsel %vm4_vm0, %v6232_v30, %v6231_v29 }
 0x172   :  { %2470 = vrot.lane.b32.xlu0 %v2469_v60, %s7031_s25  ;;  %v1867_v3 = vpop.permute.xlu1 %1866   ;;  %v6229_v33 = vld [vmem:[%s13126_s0 + $0x6c5] ss:$8 sm:$0xf0]   ;;  %v6263_v16 = vld [vmem:[%s13126_s0 + $0x204] ss:$8 sm:$0xf]  }
 0x173   :  { %6036 = vst.msk [vmem:[%s13127_s1 + $0xb8] sm:$0xff] %vm1286_vm3, %v1867_v3   ;;  %v2579_v36 = vsel %vm4_vm0, %v6229_v33, %v6228_v32  ;;  %v6237_v37 = vld [vmem:[%s13126_s0 + $0x9c5] ss:$8 sm:$0xf]  }
 0x174   :  { %v1856_v7 = vpop.permute.xlu0 %1855   ;;  %2503 = vrot.lane.b32.xlu1 %v2502_v2, %s7031_s25  ;;  %v6238_v38 = vld [vmem:[%s13126_s0 + $0x9c5] ss:$8 sm:$0xf0]   ;;  %v6264_v17 = vld [vmem:[%s13126_s0 + $0x204] ss:$8 sm:$0xf0]  }
 0x175   :  { %6033 = vst.msk [vmem:[%s13127_s1 + $0x98] sm:$0xff] %vm1286_vm3, %v1856_v7   ;;  %v6234_v40 = vld [vmem:[%s13126_s0 + $0x8c5] ss:$8 sm:$0xf]   ;;  %v2612_v42 = vsel %vm4_vm0, %v6238_v38, %v6237_v37 }
 0x176   :  { %2492 = vrot.lane.b32.xlu0 %v2491_v4, %s7031_s25  ;;  %v1889_v11 = vpop.permute.xlu1 %1888   ;;  %v6235_v41 = vld [vmem:[%s13126_s0 + $0x8c5] ss:$8 sm:$0xf0]   ;;  %v6272_v21 = vld [vmem:[%s13126_s0 + $0x504] ss:$8 sm:$0xf]  }
 0x177   :  { %6042 = vst.msk [vmem:[%s13127_s1 + $0xf8] sm:$0xff] %vm1286_vm3, %v1889_v11   ;;  %v2601_v44 = vsel %vm4_vm0, %v6235_v41, %v6234_v40  ;;  %v6243_v45 = vld [vmem:[%s13126_s0 + $0xbc5] ss:$8 sm:$0xf]  }
 0x178   :  { %v1878_v15 = vpop.permute.xlu0 %1877   ;;  %2525 = vrot.lane.b32.xlu1 %v2524_v10, %s7031_s25  ;;  %v6244_v46 = vld [vmem:[%s13126_s0 + $0xbc5] ss:$8 sm:$0xf0]   ;;  %v2699_v10 = vsel %vm4_vm0, %v6261_v6, %v6260_v5  ;;  %v6273_v22 = vld [vmem:[%s13126_s0 + $0x504] ss:$8 sm:$0xf0]  }
 0x179   :  { %6039 = vst.msk [vmem:[%s13127_s1 + $0xd8] sm:$0xff] %vm1286_vm3, %v1878_v15   ;;  %v6240_v48 = vld [vmem:[%s13126_s0 + $0xac5] ss:$8 sm:$0xf]   ;;  %v2634_v50 = vsel %vm4_vm0, %v6244_v46, %v6243_v45 }
 0x17a   :  { %2514 = vrot.lane.b32.xlu0 %v2513_v12, %s7031_s25  ;;  %v1911_v19 = vpop.permute.xlu1 %1910   ;;  %v6241_v49 = vld [vmem:[%s13126_s0 + $0xac5] ss:$8 sm:$0xf0]   ;;  %v2689_v12 = vsel %vm4_vm0, %v6259_v9, %v6258_v8  ;;  %v6269_v24 = vld [vmem:[%s13126_s0 + $0x404] ss:$8 sm:$0xf]  }
 0x17b   :  { %6048 = vst.msk [vmem:[%s13127_s1 + $0x138] sm:$0xff] %vm1286_vm3, %v1911_v19   ;;  %v2623_v52 = vsel %vm4_vm0, %v6241_v49, %v6240_v48  ;;  %v6249_v53 = vld [vmem:[%s13126_s0 + $0xdc5] ss:$8 sm:$0xf]  }
 0x17c   :  { %v1900_v23 = vpop.permute.xlu0 %1899   ;;  %2547 = vrot.lane.b32.xlu1 %v2546_v18, %s7031_s25  ;;  %v6250_v54 = vld [vmem:[%s13126_s0 + $0xdc5] ss:$8 sm:$0xf0]   ;;  %v2721_v18 = vsel %vm4_vm0, %v6267_v14, %v6266_v13  ;;  %v6270_v25 = vld [vmem:[%s13126_s0 + $0x404] ss:$8 sm:$0xf0]  }
 0x17d   :  { %6045 = vst.msk [vmem:[%s13127_s1 + $0x118] sm:$0xff] %vm1286_vm3, %v1900_v23   ;;  %v6246_v56 = vld [vmem:[%s13126_s0 + $0xcc5] ss:$8 sm:$0xf]   ;;  %v2656_v58 = vsel %vm4_vm0, %v6250_v54, %v6249_v53 }
 0x17e   :  { %2536 = vrot.lane.b32.xlu0 %v2535_v20, %s7031_s25  ;;  %v1933_v27 = vpop.permute.xlu1 %1932   ;;  %v6247_v57 = vld [vmem:[%s13126_s0 + $0xcc5] ss:$8 sm:$0xf0]   ;;  %v2710_v20 = vsel %vm4_vm0, %v6264_v17, %v6263_v16  ;;  %v6278_v29 = vld [vmem:[%s13126_s0 + $0x704] ss:$8 sm:$0xf]  }
 0x17f   :  { %6054 = vst.msk [vmem:[%s13127_s1 + $0x178] sm:$0xff] %vm1286_vm3, %v1933_v27   ;;  %v2645_v60 = vsel %vm4_vm0, %v6247_v57, %v6246_v56  ;;  %v6255_v61 = vld [vmem:[%s13126_s0 + $0xfc5] ss:$8 sm:$0xf]  }
 0x180   :  { %v1922_v31 = vpop.permute.xlu0 %1921   ;;  %2569 = vrot.lane.b32.xlu1 %v2568_v26, %s7031_s25  ;;  %v6256_v62 = vld [vmem:[%s13126_s0 + $0xfc5] ss:$8 sm:$0xf0]   ;;  %v2743_v26 = vsel %vm4_vm0, %v6273_v22, %v6272_v21  ;;  %v6279_v30 = vld [vmem:[%s13126_s0 + $0x704] ss:$8 sm:$0xf0]  }
 0x181   :  { %6051 = vst.msk [vmem:[%s13127_s1 + $0x158] sm:$0xff] %vm1286_vm3, %v1922_v31   ;;  %v6252_v0 = vld [vmem:[%s13126_s0 + $0xec5] ss:$8 sm:$0xf]   ;;  %v2678_v2 = vsel %vm4_vm0, %v6256_v62, %v6255_v61 }
 0x182   :  { %2558 = vrot.lane.b32.xlu0 %v2557_v28, %s7031_s25  ;;  %v1955_v35 = vpop.permute.xlu1 %1954   ;;  %v6253_v1 = vld [vmem:[%s13126_s0 + $0xec5] ss:$8 sm:$0xf0]   ;;  %v2732_v28 = vsel %vm4_vm0, %v6270_v25, %v6269_v24  ;;  %v6275_v32 = vld [vmem:[%s13126_s0 + $0x604] ss:$8 sm:$0xf]  }
 0x183   :  { %6060 = vst.msk [vmem:[%s13127_s1 + $0x1b8] sm:$0xff] %vm1286_vm3, %v1955_v35   ;;  %v2667_v4 = vsel %vm4_vm0, %v6253_v1, %v6252_v0  ;;  %v6276_v33 = vld [vmem:[%s13126_s0 + $0x604] ss:$8 sm:$0xf0]  }
 0x184   :  { %v1944_v39 = vpop.permute.xlu0 %1943   ;;  %2591 = vrot.lane.b32.xlu1 %v2590_v34, %s7031_s25  ;;  %v2765_v34 = vsel %vm4_vm0, %v6279_v30, %v6278_v29  ;;  %v6284_v37 = vld [vmem:[%s13126_s0 + $0x904] ss:$8 sm:$0xf]  }
 0x185   :  { %6057 = vst.msk [vmem:[%s13127_s1 + $0x198] sm:$0xff] %vm1286_vm3, %v1944_v39   ;;  %v6285_v38 = vld [vmem:[%s13126_s0 + $0x904] ss:$8 sm:$0xf0]  }
 0x186   :  { %2580 = vrot.lane.b32.xlu0 %v2579_v36, %s7031_s25  ;;  %v1977_v43 = vpop.permute.xlu1 %1976   ;;  %v2754_v36 = vsel %vm4_vm0, %v6276_v33, %v6275_v32  ;;  %v6281_v40 = vld [vmem:[%s13126_s0 + $0x804] ss:$8 sm:$0xf]  }
 0x187   :  { %6066 = vst.msk [vmem:[%s13127_s1 + $0x1f8] sm:$0xff] %vm1286_vm3, %v1977_v43   ;;  %v6282_v41 = vld [vmem:[%s13126_s0 + $0x804] ss:$8 sm:$0xf0]  }
 0x188   :  { %v1966_v47 = vpop.permute.xlu0 %1965   ;;  %2613 = vrot.lane.b32.xlu1 %v2612_v42, %s7031_s25  ;;  %v2787_v42 = vsel %vm4_vm0, %v6285_v38, %v6284_v37  ;;  %v6290_v45 = vld [vmem:[%s13126_s0 + $0xb04] ss:$8 sm:$0xf]  }
 0x189   :  { %6063 = vst.msk [vmem:[%s13127_s1 + $0x1d8] sm:$0xff] %vm1286_vm3, %v1966_v47   ;;  %v6291_v46 = vld [vmem:[%s13126_s0 + $0xb04] ss:$8 sm:$0xf0]  }
 0x18a   :  { %2602 = vrot.lane.b32.xlu0 %v2601_v44, %s7031_s25  ;;  %v1998_v51 = vpop.permute.xlu1 %1997   ;;  %v2776_v44 = vsel %vm4_vm0, %v6282_v41, %v6281_v40  ;;  %v6287_v48 = vld [vmem:[%s13126_s0 + $0xa04] ss:$8 sm:$0xf]  }
 0x18b   :  { %6071 = vst.msk [vmem:[%s13127_s1 + $0x20] sm:$0xff] %vm1989_vm4, %v1998_v51   ;;  %v6288_v49 = vld [vmem:[%s13126_s0 + $0xa04] ss:$8 sm:$0xf0]  }
 0x18c   :  { %v1988_v55 = vpop.permute.xlu0 %1987   ;;  %2635 = vrot.lane.b32.xlu1 %v2634_v50, %s7031_s25  ;;  %v2809_v50 = vsel %vm4_vm0, %v6291_v46, %v6290_v45  ;;  %v6296_v53 = vld [vmem:[%s13126_s0 + $0xd04] ss:$8 sm:$0xf]  }
 0x18d   :  { %1990 = vst.msk [vmem:[%s13127_s1] sm:$0xff] %vm1989_vm4, %v1988_v55   ;;  %v6297_v54 = vld [vmem:[%s13126_s0 + $0xd04] ss:$8 sm:$0xf0]  }
 0x18e   :  { %2624 = vrot.lane.b32.xlu0 %v2623_v52, %s7031_s25  ;;  %v2020_v59 = vpop.permute.xlu1 %2019   ;;  %v2798_v52 = vsel %vm4_vm0, %v6288_v49, %v6287_v48  ;;  %v6293_v56 = vld [vmem:[%s13126_s0 + $0xc04] ss:$8 sm:$0xf]  }
 0x18f   :  { %6077 = vst.msk [vmem:[%s13127_s1 + $0x60] sm:$0xff] %vm1989_vm4, %v2020_v59   ;;  %v6294_v57 = vld [vmem:[%s13126_s0 + $0xc04] ss:$8 sm:$0xf0]  }
 0x190   :  { %v2009_v63 = vpop.permute.xlu0 %2008   ;;  %2657 = vrot.lane.b32.xlu1 %v2656_v58, %s7031_s25  ;;  %v2831_v58 = vsel %vm4_vm0, %v6297_v54, %v6296_v53  ;;  %v6302_v61 = vld [vmem:[%s13126_s0 + $0xf04] ss:$8 sm:$0xf]  }
 0x191   :  { %6074 = vst.msk [vmem:[%s13127_s1 + $0x40] sm:$0xff] %vm1989_vm4, %v2009_v63   ;;  %v6303_v62 = vld [vmem:[%s13126_s0 + $0xf04] ss:$8 sm:$0xf0]  }
 0x192   :  { %2646 = vrot.lane.b32.xlu0 %v2645_v60, %s7031_s25  ;;  %v2042_v3 = vpop.permute.xlu1 %2041   ;;  %v2820_v60 = vsel %vm4_vm0, %v6294_v57, %v6293_v56  ;;  %v6299_v0 = vld [vmem:[%s13126_s0 + $0xe04] ss:$8 sm:$0xf]  }
 0x193   :  { %6083 = vst.msk [vmem:[%s13127_s1 + $0xa0] sm:$0xff] %vm1989_vm4, %v2042_v3   ;;  %v6300_v1 = vld [vmem:[%s13126_s0 + $0xe04] ss:$8 sm:$0xf0]  }
 0x194   :  { %v2031_v7 = vpop.permute.xlu0 %2030   ;;  %2679 = vrot.lane.b32.xlu1 %v2678_v2, %s7031_s25  ;;  %v2853_v2 = vsel %vm4_vm0, %v6303_v62, %v6302_v61  ;;  %v6308_v5 = vld [vmem:[%s13126_s0 + $0x144] ss:$8 sm:$0xf]  }
 0x195   :  { %6080 = vst.msk [vmem:[%s13127_s1 + $0x80] sm:$0xff] %vm1989_vm4, %v2031_v7   ;;  %v6309_v6 = vld [vmem:[%s13126_s0 + $0x144] ss:$8 sm:$0xf0]  }
 0x196   :  { %2668 = vrot.lane.b32.xlu0 %v2667_v4, %s7031_s25  ;;  %v2064_v11 = vpop.permute.xlu1 %2063   ;;  %v2842_v4 = vsel %vm4_vm0, %v6300_v1, %v6299_v0  ;;  %v6305_v8 = vld [vmem:[%s13126_s0 + $0x44] ss:$8 sm:$0xf]  }
 0x197   :  { %6089 = vst.msk [vmem:[%s13127_s1 + $0xe0] sm:$0xff] %vm1989_vm4, %v2064_v11   ;;  %v6306_v9 = vld [vmem:[%s13126_s0 + $0x44] ss:$8 sm:$0xf0]  }
 0x198   :  { %v2053_v15 = vpop.permute.xlu0 %2052   ;;  %2700 = vrot.lane.b32.xlu1 %v2699_v10, %s7032_s16  ;;  %v2875_v10 = vsel %vm4_vm0, %v6309_v6, %v6308_v5  ;;  %v6314_v13 = vld [vmem:[%s13126_s0 + $0x344] ss:$8 sm:$0xf]  }
 0x199   :  { %6086 = vst.msk [vmem:[%s13127_s1 + $0xc0] sm:$0xff] %vm1989_vm4, %v2053_v15   ;;  %v6315_v14 = vld [vmem:[%s13126_s0 + $0x344] ss:$8 sm:$0xf0]  }
 0x19a   :  { %2690 = vrot.lane.b32.xlu0 %v2689_v12, %s7032_s16  ;;  %v2086_v19 = vpop.permute.xlu1 %2085   ;;  %v2864_v12 = vsel %vm4_vm0, %v6306_v9, %v6305_v8  ;;  %v6311_v16 = vld [vmem:[%s13126_s0 + $0x244] ss:$8 sm:$0xf]  }
 0x19b   :  { %6095 = vst.msk [vmem:[%s13127_s1 + $0x120] sm:$0xff] %vm1989_vm4, %v2086_v19   ;;  %v6312_v17 = vld [vmem:[%s13126_s0 + $0x244] ss:$8 sm:$0xf0]  }
 0x19c   :  { %v2075_v23 = vpop.permute.xlu0 %2074   ;;  %2722 = vrot.lane.b32.xlu1 %v2721_v18, %s7032_s16  ;;  %v2897_v18 = vsel %vm4_vm0, %v6315_v14, %v6314_v13  ;;  %v6320_v21 = vld [vmem:[%s13126_s0 + $0x544] ss:$8 sm:$0xf]  }
 0x19d   :  { %6092 = vst.msk [vmem:[%s13127_s1 + $0x100] sm:$0xff] %vm1989_vm4, %v2075_v23   ;;  %v6321_v22 = vld [vmem:[%s13126_s0 + $0x544] ss:$8 sm:$0xf0]  }
 0x19e   :  { %2711 = vrot.lane.b32.xlu0 %v2710_v20, %s7032_s16  ;;  %v2108_v27 = vpop.permute.xlu1 %2107   ;;  %v2886_v20 = vsel %vm4_vm0, %v6312_v17, %v6311_v16  ;;  %v6317_v24 = vld [vmem:[%s13126_s0 + $0x444] ss:$8 sm:$0xf]  }
 0x19f   :  { %6101 = vst.msk [vmem:[%s13127_s1 + $0x160] sm:$0xff] %vm1989_vm4, %v2108_v27   ;;  %v6318_v25 = vld [vmem:[%s13126_s0 + $0x444] ss:$8 sm:$0xf0]  }
 0x1a0   :  { %v2097_v31 = vpop.permute.xlu0 %2096   ;;  %2744 = vrot.lane.b32.xlu1 %v2743_v26, %s7032_s16  ;;  %v2919_v26 = vsel %vm4_vm0, %v6321_v22, %v6320_v21  ;;  %v6326_v29 = vld [vmem:[%s13126_s0 + $0x744] ss:$8 sm:$0xf]  }
 0x1a1   :  { %6098 = vst.msk [vmem:[%s13127_s1 + $0x140] sm:$0xff] %vm1989_vm4, %v2097_v31   ;;  %v6327_v30 = vld [vmem:[%s13126_s0 + $0x744] ss:$8 sm:$0xf0]  }
 0x1a2   :  { %2733 = vrot.lane.b32.xlu0 %v2732_v28, %s7032_s16  ;;  %v2130_v35 = vpop.permute.xlu1 %2129   ;;  %v2908_v28 = vsel %vm4_vm0, %v6318_v25, %v6317_v24  ;;  %v6323_v32 = vld [vmem:[%s13126_s0 + $0x644] ss:$8 sm:$0xf]  }
 0x1a3   :  { %6107 = vst.msk [vmem:[%s13127_s1 + $0x1a0] sm:$0xff] %vm1989_vm4, %v2130_v35   ;;  %v6324_v33 = vld [vmem:[%s13126_s0 + $0x644] ss:$8 sm:$0xf0]  }
 0x1a4   :  { %v2119_v39 = vpop.permute.xlu0 %2118   ;;  %2766 = vrot.lane.b32.xlu1 %v2765_v34, %s7032_s16  ;;  %v2941_v34 = vsel %vm4_vm0, %v6327_v30, %v6326_v29  ;;  %v6332_v37 = vld [vmem:[%s13126_s0 + $0x944] ss:$8 sm:$0xf]  }
 0x1a5   :  { %6104 = vst.msk [vmem:[%s13127_s1 + $0x180] sm:$0xff] %vm1989_vm4, %v2119_v39   ;;  %v6333_v38 = vld [vmem:[%s13126_s0 + $0x944] ss:$8 sm:$0xf0]  }
 0x1a6   :  { %2755 = vrot.lane.b32.xlu0 %v2754_v36, %s7032_s16  ;;  %v2152_v43 = vpop.permute.xlu1 %2151   ;;  %v2930_v36 = vsel %vm4_vm0, %v6324_v33, %v6323_v32  ;;  %v6329_v40 = vld [vmem:[%s13126_s0 + $0x844] ss:$8 sm:$0xf]  }
 0x1a7   :  { %6113 = vst.msk [vmem:[%s13127_s1 + $0x1e0] sm:$0xff] %vm1989_vm4, %v2152_v43   ;;  %v6330_v41 = vld [vmem:[%s13126_s0 + $0x844] ss:$8 sm:$0xf0]  }
 0x1a8   :  { %v2141_v47 = vpop.permute.xlu0 %2140   ;;  %2788 = vrot.lane.b32.xlu1 %v2787_v42, %s7032_s16  ;;  %v2963_v42 = vsel %vm4_vm0, %v6333_v38, %v6332_v37  ;;  %v6338_v45 = vld [vmem:[%s13126_s0 + $0xb44] ss:$8 sm:$0xf]  }
 0x1a9   :  { %6110 = vst.msk [vmem:[%s13127_s1 + $0x1c0] sm:$0xff] %vm1989_vm4, %v2141_v47   ;;  %v6339_v46 = vld [vmem:[%s13126_s0 + $0xb44] ss:$8 sm:$0xf0]  }
 0x1aa   :  { %2777 = vrot.lane.b32.xlu0 %v2776_v44, %s7032_s16  ;;  %v2174_v51 = vpop.permute.xlu1 %2173   ;;  %v2952_v44 = vsel %vm4_vm0, %v6330_v41, %v6329_v40  ;;  %v6335_v48 = vld [vmem:[%s13126_s0 + $0xa44] ss:$8 sm:$0xf]  }
 0x1ab   :  { %6119 = vst.msk [vmem:[%s13127_s1 + $0x28] sm:$0xff] %vm1989_vm4, %v2174_v51   ;;  %v6336_v49 = vld [vmem:[%s13126_s0 + $0xa44] ss:$8 sm:$0xf0]  }
 0x1ac   :  { %v2163_v55 = vpop.permute.xlu0 %2162   ;;  %2810 = vrot.lane.b32.xlu1 %v2809_v50, %s7032_s16  ;;  %v2985_v50 = vsel %vm4_vm0, %v6339_v46, %v6338_v45  ;;  %v6344_v53 = vld [vmem:[%s13126_s0 + $0xd44] ss:$8 sm:$0xf]  }
 0x1ad   :  { %6116 = vst.msk [vmem:[%s13127_s1 + $0x8] sm:$0xff] %vm1989_vm4, %v2163_v55   ;;  %v6345_v54 = vld [vmem:[%s13126_s0 + $0xd44] ss:$8 sm:$0xf0]  }
 0x1ae   :  { %2799 = vrot.lane.b32.xlu0 %v2798_v52, %s7032_s16  ;;  %v2196_v59 = vpop.permute.xlu1 %2195   ;;  %v2974_v52 = vsel %vm4_vm0, %v6336_v49, %v6335_v48  ;;  %v6341_v56 = vld [vmem:[%s13126_s0 + $0xc44] ss:$8 sm:$0xf]  }
 0x1af   :  { %6125 = vst.msk [vmem:[%s13127_s1 + $0x68] sm:$0xff] %vm1989_vm4, %v2196_v59   ;;  %v6342_v57 = vld [vmem:[%s13126_s0 + $0xc44] ss:$8 sm:$0xf0]  }
 0x1b0   :  { %v2185_v63 = vpop.permute.xlu0 %2184   ;;  %2832 = vrot.lane.b32.xlu1 %v2831_v58, %s7032_s16  ;;  %v3007_v58 = vsel %vm4_vm0, %v6345_v54, %v6344_v53  ;;  %v6350_v61 = vld [vmem:[%s13126_s0 + $0xf44] ss:$8 sm:$0xf]  }
 0x1b1   :  { %6122 = vst.msk [vmem:[%s13127_s1 + $0x48] sm:$0xff] %vm1989_vm4, %v2185_v63   ;;  %v6351_v62 = vld [vmem:[%s13126_s0 + $0xf44] ss:$8 sm:$0xf0]  }
 0x1b2   :  { %2821 = vrot.lane.b32.xlu0 %v2820_v60, %s7032_s16  ;;  %v2218_v3 = vpop.permute.xlu1 %2217   ;;  %v2996_v60 = vsel %vm4_vm0, %v6342_v57, %v6341_v56  ;;  %v6347_v0 = vld [vmem:[%s13126_s0 + $0xe44] ss:$8 sm:$0xf]  }
 0x1b3   :  { %6131 = vst.msk [vmem:[%s13127_s1 + $0xa8] sm:$0xff] %vm1989_vm4, %v2218_v3   ;;  %v6348_v1 = vld [vmem:[%s13126_s0 + $0xe44] ss:$8 sm:$0xf0]  }
 0x1b4   :  { %v2207_v7 = vpop.permute.xlu0 %2206   ;;  %2854 = vrot.lane.b32.xlu1 %v2853_v2, %s7032_s16  ;;  %v3029_v2 = vsel %vm4_vm0, %v6351_v62, %v6350_v61  ;;  %v6356_v5 = vld [vmem:[%s13126_s0 + $0x184] ss:$8 sm:$0xf]  }
 0x1b5   :  { %6128 = vst.msk [vmem:[%s13127_s1 + $0x88] sm:$0xff] %vm1989_vm4, %v2207_v7   ;;  %v6357_v6 = vld [vmem:[%s13126_s0 + $0x184] ss:$8 sm:$0xf0]  }
 0x1b6   :  { %2843 = vrot.lane.b32.xlu0 %v2842_v4, %s7032_s16  ;;  %v2240_v11 = vpop.permute.xlu1 %2239   ;;  %v3018_v4 = vsel %vm4_vm0, %v6348_v1, %v6347_v0  ;;  %v6353_v8 = vld [vmem:[%s13126_s0 + $0x84] ss:$8 sm:$0xf]  }
 0x1b7   :  { %6137 = vst.msk [vmem:[%s13127_s1 + $0xe8] sm:$0xff] %vm1989_vm4, %v2240_v11   ;;  %v6354_v9 = vld [vmem:[%s13126_s0 + $0x84] ss:$8 sm:$0xf0]  }
 0x1b8   :  { %v2229_v15 = vpop.permute.xlu0 %2228   ;;  %2876 = vrot.lane.b32.xlu1 %v2875_v10, %s7032_s16  ;;  %v3051_v10 = vsel %vm4_vm0, %v6357_v6, %v6356_v5  ;;  %v6362_v13 = vld [vmem:[%s13126_s0 + $0x384] ss:$8 sm:$0xf]  }
 0x1b9   :  { %6134 = vst.msk [vmem:[%s13127_s1 + $0xc8] sm:$0xff] %vm1989_vm4, %v2229_v15   ;;  %v6363_v14 = vld [vmem:[%s13126_s0 + $0x384] ss:$8 sm:$0xf0]  }
 0x1ba   :  { %2865 = vrot.lane.b32.xlu0 %v2864_v12, %s7032_s16  ;;  %v2262_v19 = vpop.permute.xlu1 %2261   ;;  %v3040_v12 = vsel %vm4_vm0, %v6354_v9, %v6353_v8  ;;  %v6359_v16 = vld [vmem:[%s13126_s0 + $0x284] ss:$8 sm:$0xf]  }
 0x1bb   :  { %6143 = vst.msk [vmem:[%s13127_s1 + $0x128] sm:$0xff] %vm1989_vm4, %v2262_v19   ;;  %v6360_v17 = vld [vmem:[%s13126_s0 + $0x284] ss:$8 sm:$0xf0]  }
 0x1bc   :  { %v2251_v23 = vpop.permute.xlu0 %2250   ;;  %2898 = vrot.lane.b32.xlu1 %v2897_v18, %s7032_s16  ;;  %v3073_v18 = vsel %vm4_vm0, %v6363_v14, %v6362_v13  ;;  %v6368_v21 = vld [vmem:[%s13126_s0 + $0x584] ss:$8 sm:$0xf]  }
 0x1bd   :  { %6140 = vst.msk [vmem:[%s13127_s1 + $0x108] sm:$0xff] %vm1989_vm4, %v2251_v23   ;;  %v6369_v22 = vld [vmem:[%s13126_s0 + $0x584] ss:$8 sm:$0xf0]  }
 0x1be   :  { %2887 = vrot.lane.b32.xlu0 %v2886_v20, %s7032_s16  ;;  %v2284_v27 = vpop.permute.xlu1 %2283   ;;  %v3062_v20 = vsel %vm4_vm0, %v6360_v17, %v6359_v16  ;;  %v6365_v24 = vld [vmem:[%s13126_s0 + $0x484] ss:$8 sm:$0xf]  }
 0x1bf   :  { %6149 = vst.msk [vmem:[%s13127_s1 + $0x168] sm:$0xff] %vm1989_vm4, %v2284_v27   ;;  %v6366_v25 = vld [vmem:[%s13126_s0 + $0x484] ss:$8 sm:$0xf0]  }
 0x1c0   :  { %v2273_v31 = vpop.permute.xlu0 %2272   ;;  %2920 = vrot.lane.b32.xlu1 %v2919_v26, %s7032_s16  ;;  %v3095_v26 = vsel %vm4_vm0, %v6369_v22, %v6368_v21  ;;  %v6374_v29 = vld [vmem:[%s13126_s0 + $0x784] ss:$8 sm:$0xf]  }
 0x1c1   :  { %6146 = vst.msk [vmem:[%s13127_s1 + $0x148] sm:$0xff] %vm1989_vm4, %v2273_v31   ;;  %v6375_v30 = vld [vmem:[%s13126_s0 + $0x784] ss:$8 sm:$0xf0]  }
 0x1c2   :  { %2909 = vrot.lane.b32.xlu0 %v2908_v28, %s7032_s16  ;;  %v2306_v35 = vpop.permute.xlu1 %2305   ;;  %v3084_v28 = vsel %vm4_vm0, %v6366_v25, %v6365_v24  ;;  %v6371_v32 = vld [vmem:[%s13126_s0 + $0x684] ss:$8 sm:$0xf]  }
 0x1c3   :  { %6155 = vst.msk [vmem:[%s13127_s1 + $0x1a8] sm:$0xff] %vm1989_vm4, %v2306_v35   ;;  %v6372_v33 = vld [vmem:[%s13126_s0 + $0x684] ss:$8 sm:$0xf0]  }
 0x1c4   :  { %v2295_v39 = vpop.permute.xlu0 %2294   ;;  %2942 = vrot.lane.b32.xlu1 %v2941_v34, %s7032_s16  ;;  %v3117_v34 = vsel %vm4_vm0, %v6375_v30, %v6374_v29  ;;  %v6380_v37 = vld [vmem:[%s13126_s0 + $0x984] ss:$8 sm:$0xf]  }
 0x1c5   :  { %6152 = vst.msk [vmem:[%s13127_s1 + $0x188] sm:$0xff] %vm1989_vm4, %v2295_v39   ;;  %v6381_v38 = vld [vmem:[%s13126_s0 + $0x984] ss:$8 sm:$0xf0]  }
 0x1c6   :  { %2931 = vrot.lane.b32.xlu0 %v2930_v36, %s7032_s16  ;;  %v2328_v43 = vpop.permute.xlu1 %2327   ;;  %v3106_v36 = vsel %vm4_vm0, %v6372_v33, %v6371_v32  ;;  %v6377_v40 = vld [vmem:[%s13126_s0 + $0x884] ss:$8 sm:$0xf]  }
 0x1c7   :  { %6161 = vst.msk [vmem:[%s13127_s1 + $0x1e8] sm:$0xff] %vm1989_vm4, %v2328_v43   ;;  %v6378_v41 = vld [vmem:[%s13126_s0 + $0x884] ss:$8 sm:$0xf0]  }
 0x1c8   :  { %v2317_v47 = vpop.permute.xlu0 %2316   ;;  %2964 = vrot.lane.b32.xlu1 %v2963_v42, %s7032_s16  ;;  %v3139_v42 = vsel %vm4_vm0, %v6381_v38, %v6380_v37  ;;  %v6386_v45 = vld [vmem:[%s13126_s0 + $0xb84] ss:$8 sm:$0xf]  }
 0x1c9   :  { %6158 = vst.msk [vmem:[%s13127_s1 + $0x1c8] sm:$0xff] %vm1989_vm4, %v2317_v47   ;;  %v6387_v46 = vld [vmem:[%s13126_s0 + $0xb84] ss:$8 sm:$0xf0]  }
 0x1ca   :  { %2953 = vrot.lane.b32.xlu0 %v2952_v44, %s7032_s16  ;;  %v2350_v51 = vpop.permute.xlu1 %2349   ;;  %v3128_v44 = vsel %vm4_vm0, %v6378_v41, %v6377_v40  ;;  %v6383_v48 = vld [vmem:[%s13126_s0 + $0xa84] ss:$8 sm:$0xf]  }
 0x1cb   :  { %6167 = vst.msk [vmem:[%s13127_s1 + $0x30] sm:$0xff] %vm1989_vm4, %v2350_v51   ;;  %v6384_v49 = vld [vmem:[%s13126_s0 + $0xa84] ss:$8 sm:$0xf0]  }
 0x1cc   :  { %v2339_v55 = vpop.permute.xlu0 %2338   ;;  %2986 = vrot.lane.b32.xlu1 %v2985_v50, %s7032_s16  ;;  %v3161_v50 = vsel %vm4_vm0, %v6387_v46, %v6386_v45  ;;  %v6392_v53 = vld [vmem:[%s13126_s0 + $0xd84] ss:$8 sm:$0xf]  }
 0x1cd   :  { %6164 = vst.msk [vmem:[%s13127_s1 + $0x10] sm:$0xff] %vm1989_vm4, %v2339_v55   ;;  %v6393_v54 = vld [vmem:[%s13126_s0 + $0xd84] ss:$8 sm:$0xf0]  }
 0x1ce   :  { %2975 = vrot.lane.b32.xlu0 %v2974_v52, %s7032_s16  ;;  %v2372_v59 = vpop.permute.xlu1 %2371   ;;  %v3150_v52 = vsel %vm4_vm0, %v6384_v49, %v6383_v48  ;;  %v6389_v56 = vld [vmem:[%s13126_s0 + $0xc84] ss:$8 sm:$0xf]  }
 0x1cf   :  { %6173 = vst.msk [vmem:[%s13127_s1 + $0x70] sm:$0xff] %vm1989_vm4, %v2372_v59   ;;  %v6390_v57 = vld [vmem:[%s13126_s0 + $0xc84] ss:$8 sm:$0xf0]  }
 0x1d0   :  { %v2361_v63 = vpop.permute.xlu0 %2360   ;;  %3008 = vrot.lane.b32.xlu1 %v3007_v58, %s7032_s16  ;;  %v3183_v58 = vsel %vm4_vm0, %v6393_v54, %v6392_v53  ;;  %v6398_v61 = vld [vmem:[%s13126_s0 + $0xf84] ss:$8 sm:$0xf]  }
 0x1d1   :  { %6170 = vst.msk [vmem:[%s13127_s1 + $0x50] sm:$0xff] %vm1989_vm4, %v2361_v63   ;;  %v6399_v62 = vld [vmem:[%s13126_s0 + $0xf84] ss:$8 sm:$0xf0]  }
 0x1d2   :  { %2997 = vrot.lane.b32.xlu0 %v2996_v60, %s7032_s16  ;;  %v2394_v3 = vpop.permute.xlu1 %2393   ;;  %v3172_v60 = vsel %vm4_vm0, %v6390_v57, %v6389_v56  ;;  %v6395_v0 = vld [vmem:[%s13126_s0 + $0xe84] ss:$8 sm:$0xf]  }
 0x1d3   :  { %6179 = vst.msk [vmem:[%s13127_s1 + $0xb0] sm:$0xff] %vm1989_vm4, %v2394_v3   ;;  %v6396_v1 = vld [vmem:[%s13126_s0 + $0xe84] ss:$8 sm:$0xf0]  }
 0x1d4   :  { %v2383_v7 = vpop.permute.xlu0 %2382   ;;  %3030 = vrot.lane.b32.xlu1 %v3029_v2, %s7032_s16  ;;  %v3205_v2 = vsel %vm4_vm0, %v6399_v62, %v6398_v61  ;;  %v6404_v5 = vld [vmem:[%s13126_s0 + $0x1c4] ss:$8 sm:$0xf]  }
 0x1d5   :  { %6176 = vst.msk [vmem:[%s13127_s1 + $0x90] sm:$0xff] %vm1989_vm4, %v2383_v7   ;;  %v6405_v6 = vld [vmem:[%s13126_s0 + $0x1c4] ss:$8 sm:$0xf0]  }
 0x1d6   :  { %3019 = vrot.lane.b32.xlu0 %v3018_v4, %s7032_s16  ;;  %v2416_v11 = vpop.permute.xlu1 %2415   ;;  %v3194_v4 = vsel %vm4_vm0, %v6396_v1, %v6395_v0  ;;  %v6401_v8 = vld [vmem:[%s13126_s0 + $0xc4] ss:$8 sm:$0xf]  }
 0x1d7   :  { %6185 = vst.msk [vmem:[%s13127_s1 + $0xf0] sm:$0xff] %vm1989_vm4, %v2416_v11   ;;  %v6402_v9 = vld [vmem:[%s13126_s0 + $0xc4] ss:$8 sm:$0xf0]  }
 0x1d8   :  { %v2405_v15 = vpop.permute.xlu0 %2404   ;;  %3052 = vrot.lane.b32.xlu1 %v3051_v10, %s7032_s16  ;;  %v3227_v10 = vsel %vm4_vm0, %v6405_v6, %v6404_v5  ;;  %v6410_v13 = vld [vmem:[%s13126_s0 + $0x3c4] ss:$8 sm:$0xf]   ;;  %v6451_v5 = vld [vmem:[%s13126_s0 + $0x103] ss:$8 sm:$0xf]  }
 0x1d9   :  { %6182 = vst.msk [vmem:[%s13127_s1 + $0xd0] sm:$0xff] %vm1989_vm4, %v2405_v15   ;;  %v6411_v14 = vld [vmem:[%s13126_s0 + $0x3c4] ss:$8 sm:$0xf0]  }
 0x1da   :  { %3041 = vrot.lane.b32.xlu0 %v3040_v12, %s7032_s16  ;;  %v2438_v19 = vpop.permute.xlu1 %2437   ;;  %v3216_v12 = vsel %vm4_vm0, %v6402_v9, %v6401_v8  ;;  %v6407_v16 = vld [vmem:[%s13126_s0 + $0x2c4] ss:$8 sm:$0xf]   ;;  %v6452_v6 = vld [vmem:[%s13126_s0 + $0x103] ss:$8 sm:$0xf0]  }
 0x1db   :  { %6191 = vst.msk [vmem:[%s13127_s1 + $0x130] sm:$0xff] %vm1989_vm4, %v2438_v19   ;;  %v6408_v17 = vld [vmem:[%s13126_s0 + $0x2c4] ss:$8 sm:$0xf0]  }
 0x1dc   :  { %v2427_v23 = vpop.permute.xlu0 %2426   ;;  %3074 = vrot.lane.b32.xlu1 %v3073_v18, %s7032_s16  ;;  %v3249_v18 = vsel %vm4_vm0, %v6411_v14, %v6410_v13  ;;  %v6416_v21 = vld [vmem:[%s13126_s0 + $0x5c4] ss:$8 sm:$0xf]   ;;  %v6449_v8 = vld [vmem:[%s13126_s0 + $0x3] ss:$8 sm:$0xf]  }
 0x1dd   :  { %6188 = vst.msk [vmem:[%s13127_s1 + $0x110] sm:$0xff] %vm1989_vm4, %v2427_v23   ;;  %v6417_v22 = vld [vmem:[%s13126_s0 + $0x5c4] ss:$8 sm:$0xf0]  }
 0x1de   :  { %3063 = vrot.lane.b32.xlu0 %v3062_v20, %s7032_s16  ;;  %v2460_v27 = vpop.permute.xlu1 %2459   ;;  %v3238_v20 = vsel %vm4_vm0, %v6408_v17, %v6407_v16  ;;  %v6413_v24 = vld [vmem:[%s13126_s0 + $0x4c4] ss:$8 sm:$0xf]   ;;  %v6450_v9 = vld [vmem:[%s13126_s0 + $0x3] ss:$8 sm:$0xf0]  }
 0x1df   :  { %6197 = vst.msk [vmem:[%s13127_s1 + $0x170] sm:$0xff] %vm1989_vm4, %v2460_v27   ;;  %v6414_v25 = vld [vmem:[%s13126_s0 + $0x4c4] ss:$8 sm:$0xf0]  }
 0x1e0   :  { %v2449_v31 = vpop.permute.xlu0 %2448   ;;  %3096 = vrot.lane.b32.xlu1 %v3095_v26, %s7032_s16  ;;  %v3271_v26 = vsel %vm4_vm0, %v6417_v22, %v6416_v21  ;;  %v6422_v29 = vld [vmem:[%s13126_s0 + $0x7c4] ss:$8 sm:$0xf]   ;;  %v6457_v13 = vld [vmem:[%s13126_s0 + $0x303] ss:$8 sm:$0xf]  }
 0x1e1   :  { %6194 = vst.msk [vmem:[%s13127_s1 + $0x150] sm:$0xff] %vm1989_vm4, %v2449_v31   ;;  %v6423_v30 = vld [vmem:[%s13126_s0 + $0x7c4] ss:$8 sm:$0xf0]  }
 0x1e2   :  { %3085 = vrot.lane.b32.xlu0 %v3084_v28, %s7032_s16  ;;  %v2482_v35 = vpop.permute.xlu1 %2481   ;;  %v3260_v28 = vsel %vm4_vm0, %v6414_v25, %v6413_v24  ;;  %v6419_v32 = vld [vmem:[%s13126_s0 + $0x6c4] ss:$8 sm:$0xf]   ;;  %v6458_v14 = vld [vmem:[%s13126_s0 + $0x303] ss:$8 sm:$0xf0]  }
 0x1e3   :  { %6203 = vst.msk [vmem:[%s13127_s1 + $0x1b0] sm:$0xff] %vm1989_vm4, %v2482_v35   ;;  %v6420_v33 = vld [vmem:[%s13126_s0 + $0x6c4] ss:$8 sm:$0xf0]  }
 0x1e4   :  { %v2471_v39 = vpop.permute.xlu0 %2470   ;;  %3118 = vrot.lane.b32.xlu1 %v3117_v34, %s7032_s16  ;;  %v3293_v34 = vsel %vm4_vm0, %v6423_v30, %v6422_v29  ;;  %v6428_v37 = vld [vmem:[%s13126_s0 + $0x9c4] ss:$8 sm:$0xf]   ;;  %v6454_v16 = vld [vmem:[%s13126_s0 + $0x203] ss:$8 sm:$0xf]  }
 0x1e5   :  { %6200 = vst.msk [vmem:[%s13127_s1 + $0x190] sm:$0xff] %vm1989_vm4, %v2471_v39   ;;  %v6429_v38 = vld [vmem:[%s13126_s0 + $0x9c4] ss:$8 sm:$0xf0]  }
 0x1e6   :  { %3107 = vrot.lane.b32.xlu0 %v3106_v36, %s7032_s16  ;;  %v2504_v43 = vpop.permute.xlu1 %2503   ;;  %v3282_v36 = vsel %vm4_vm0, %v6420_v33, %v6419_v32  ;;  %v6425_v40 = vld [vmem:[%s13126_s0 + $0x8c4] ss:$8 sm:$0xf]   ;;  %v6455_v17 = vld [vmem:[%s13126_s0 + $0x203] ss:$8 sm:$0xf0]  }
 0x1e7   :  { %6209 = vst.msk [vmem:[%s13127_s1 + $0x1f0] sm:$0xff] %vm1989_vm4, %v2504_v43   ;;  %v6426_v41 = vld [vmem:[%s13126_s0 + $0x8c4] ss:$8 sm:$0xf0]  }
 0x1e8   :  { %v2493_v47 = vpop.permute.xlu0 %2492   ;;  %3140 = vrot.lane.b32.xlu1 %v3139_v42, %s7032_s16  ;;  %v3315_v42 = vsel %vm4_vm0, %v6429_v38, %v6428_v37  ;;  %v6434_v45 = vld [vmem:[%s13126_s0 + $0xbc4] ss:$8 sm:$0xf]   ;;  %v6463_v21 = vld [vmem:[%s13126_s0 + $0x503] ss:$8 sm:$0xf]  }
 0x1e9   :  { %6206 = vst.msk [vmem:[%s13127_s1 + $0x1d0] sm:$0xff] %vm1989_vm4, %v2493_v47   ;;  %v6435_v46 = vld [vmem:[%s13126_s0 + $0xbc4] ss:$8 sm:$0xf0]  }
 0x1ea   :  { %3129 = vrot.lane.b32.xlu0 %v3128_v44, %s7032_s16  ;;  %v2526_v51 = vpop.permute.xlu1 %2525   ;;  %v3304_v44 = vsel %vm4_vm0, %v6426_v41, %v6425_v40  ;;  %v6431_v48 = vld [vmem:[%s13126_s0 + $0xac4] ss:$8 sm:$0xf]   ;;  %v6464_v22 = vld [vmem:[%s13126_s0 + $0x503] ss:$8 sm:$0xf0]  }
 0x1eb   :  { %6215 = vst.msk [vmem:[%s13127_s1 + $0x38] sm:$0xff] %vm1989_vm4, %v2526_v51   ;;  %v6432_v49 = vld [vmem:[%s13126_s0 + $0xac4] ss:$8 sm:$0xf0]  }
 0x1ec   :  { %v2515_v55 = vpop.permute.xlu0 %2514   ;;  %3162 = vrot.lane.b32.xlu1 %v3161_v50, %s7032_s16  ;;  %v3337_v50 = vsel %vm4_vm0, %v6435_v46, %v6434_v45  ;;  %v6440_v53 = vld [vmem:[%s13126_s0 + $0xdc4] ss:$8 sm:$0xf]   ;;  %v6460_v24 = vld [vmem:[%s13126_s0 + $0x403] ss:$8 sm:$0xf]  }
 0x1ed   :  { %6212 = vst.msk [vmem:[%s13127_s1 + $0x18] sm:$0xff] %vm1989_vm4, %v2515_v55   ;;  %v6441_v54 = vld [vmem:[%s13126_s0 + $0xdc4] ss:$8 sm:$0xf0]  }
 0x1ee   :  { %3151 = vrot.lane.b32.xlu0 %v3150_v52, %s7032_s16  ;;  %v2548_v59 = vpop.permute.xlu1 %2547   ;;  %v3326_v52 = vsel %vm4_vm0, %v6432_v49, %v6431_v48  ;;  %v6437_v56 = vld [vmem:[%s13126_s0 + $0xcc4] ss:$8 sm:$0xf]   ;;  %v6461_v25 = vld [vmem:[%s13126_s0 + $0x403] ss:$8 sm:$0xf0]  }
 0x1ef   :  { %6221 = vst.msk [vmem:[%s13127_s1 + $0x78] sm:$0xff] %vm1989_vm4, %v2548_v59   ;;  %v6438_v57 = vld [vmem:[%s13126_s0 + $0xcc4] ss:$8 sm:$0xf0]  }
 0x1f0   :  { %v2537_v63 = vpop.permute.xlu0 %2536   ;;  %3184 = vrot.lane.b32.xlu1 %v3183_v58, %s7032_s16  ;;  %v3359_v58 = vsel %vm4_vm0, %v6441_v54, %v6440_v53  ;;  %v6446_v61 = vld [vmem:[%s13126_s0 + $0xfc4] ss:$8 sm:$0xf]   ;;  %v6469_v29 = vld [vmem:[%s13126_s0 + $0x703] ss:$8 sm:$0xf]  }
 0x1f1   :  { %6218 = vst.msk [vmem:[%s13127_s1 + $0x58] sm:$0xff] %vm1989_vm4, %v2537_v63   ;;  %v6447_v62 = vld [vmem:[%s13126_s0 + $0xfc4] ss:$8 sm:$0xf0]  }
 0x1f2   :  { %3173 = vrot.lane.b32.xlu0 %v3172_v60, %s7032_s16  ;;  %v2570_v3 = vpop.permute.xlu1 %2569   ;;  %v3348_v60 = vsel %vm4_vm0, %v6438_v57, %v6437_v56  ;;  %v6443_v0 = vld [vmem:[%s13126_s0 + $0xec4] ss:$8 sm:$0xf]   ;;  %v6470_v30 = vld [vmem:[%s13126_s0 + $0x703] ss:$8 sm:$0xf0]  }
 0x1f3   :  { %6227 = vst.msk [vmem:[%s13127_s1 + $0xb8] sm:$0xff] %vm1989_vm4, %v2570_v3   ;;  %v6444_v1 = vld [vmem:[%s13126_s0 + $0xec4] ss:$8 sm:$0xf0]  }
 0x1f4   :  { %v2559_v7 = vpop.permute.xlu0 %2558   ;;  %3206 = vrot.lane.b32.xlu1 %v3205_v2, %s7032_s16  ;;  %v3381_v2 = vsel %vm4_vm0, %v6447_v62, %v6446_v61  ;;  %v6466_v32 = vld [vmem:[%s13126_s0 + $0x603] ss:$8 sm:$0xf]  }
 0x1f5   :  { %6224 = vst.msk [vmem:[%s13127_s1 + $0x98] sm:$0xff] %vm1989_vm4, %v2559_v7   ;;  %v6467_v33 = vld [vmem:[%s13126_s0 + $0x603] ss:$8 sm:$0xf0]  }
 0x1f6   :  { %3195 = vrot.lane.b32.xlu0 %v3194_v4, %s7032_s16  ;;  %v2592_v11 = vpop.permute.xlu1 %2591   ;;  %v3370_v4 = vsel %vm4_vm0, %v6444_v1, %v6443_v0  ;;  %v6475_v37 = vld [vmem:[%s13126_s0 + $0x903] ss:$8 sm:$0xf]  }
 0x1f7   :  { %6233 = vst.msk [vmem:[%s13127_s1 + $0xf8] sm:$0xff] %vm1989_vm4, %v2592_v11   ;;  %v6476_v38 = vld [vmem:[%s13126_s0 + $0x903] ss:$8 sm:$0xf0]  }
 0x1f8   :  { %v2581_v15 = vpop.permute.xlu0 %2580   ;;  %3228 = vrot.lane.b32.xlu1 %v3227_v10, %s7032_s16  ;;  %v3402_v10 = vsel %vm4_vm0, %v6452_v6, %v6451_v5  ;;  %v6472_v40 = vld [vmem:[%s13126_s0 + $0x803] ss:$8 sm:$0xf]  }
 0x1f9   :  { %6230 = vst.msk [vmem:[%s13127_s1 + $0xd8] sm:$0xff] %vm1989_vm4, %v2581_v15   ;;  %v6473_v41 = vld [vmem:[%s13126_s0 + $0x803] ss:$8 sm:$0xf0]  }
 0x1fa   :  { %3217 = vrot.lane.b32.xlu0 %v3216_v12, %s7032_s16  ;;  %v2614_v19 = vpop.permute.xlu1 %2613   ;;  %v3392_v12 = vsel %vm4_vm0, %v6450_v9, %v6449_v8  ;;  %v6481_v45 = vld [vmem:[%s13126_s0 + $0xb03] ss:$8 sm:$0xf]  }
 0x1fb   :  { %6239 = vst.msk [vmem:[%s13127_s1 + $0x138] sm:$0xff] %vm1989_vm4, %v2614_v19   ;;  %v6482_v46 = vld [vmem:[%s13126_s0 + $0xb03] ss:$8 sm:$0xf0]  }
 0x1fc   :  { %v2603_v23 = vpop.permute.xlu0 %2602   ;;  %3250 = vrot.lane.b32.xlu1 %v3249_v18, %s7032_s16  ;;  %v3424_v18 = vsel %vm4_vm0, %v6458_v14, %v6457_v13  ;;  %v6478_v48 = vld [vmem:[%s13126_s0 + $0xa03] ss:$8 sm:$0xf]  }
 0x1fd   :  { %6236 = vst.msk [vmem:[%s13127_s1 + $0x118] sm:$0xff] %vm1989_vm4, %v2603_v23   ;;  %v6479_v49 = vld [vmem:[%s13126_s0 + $0xa03] ss:$8 sm:$0xf0]  }
 0x1fe   :  { %3239 = vrot.lane.b32.xlu0 %v3238_v20, %s7032_s16  ;;  %v2636_v27 = vpop.permute.xlu1 %2635   ;;  %v3413_v20 = vsel %vm4_vm0, %v6455_v17, %v6454_v16  ;;  %v6487_v53 = vld [vmem:[%s13126_s0 + $0xd03] ss:$8 sm:$0xf]  }
 0x1ff   :  { %6245 = vst.msk [vmem:[%s13127_s1 + $0x178] sm:$0xff] %vm1989_vm4, %v2636_v27   ;;  %v6488_v54 = vld [vmem:[%s13126_s0 + $0xd03] ss:$8 sm:$0xf0]  }
 0x200   :  { %v2625_v31 = vpop.permute.xlu0 %2624   ;;  %3272 = vrot.lane.b32.xlu1 %v3271_v26, %s7032_s16  ;;  %v3446_v26 = vsel %vm4_vm0, %v6464_v22, %v6463_v21  ;;  %v6484_v56 = vld [vmem:[%s13126_s0 + $0xc03] ss:$8 sm:$0xf]  }
 0x201   :  { %6242 = vst.msk [vmem:[%s13127_s1 + $0x158] sm:$0xff] %vm1989_vm4, %v2625_v31   ;;  %v6485_v57 = vld [vmem:[%s13126_s0 + $0xc03] ss:$8 sm:$0xf0]  }
 0x202   :  { %3261 = vrot.lane.b32.xlu0 %v3260_v28, %s7032_s16  ;;  %v2658_v35 = vpop.permute.xlu1 %2657   ;;  %v3435_v28 = vsel %vm4_vm0, %v6461_v25, %v6460_v24  ;;  %v6493_v61 = vld [vmem:[%s13126_s0 + $0xf03] ss:$8 sm:$0xf]  }
 0x203   :  { %6251 = vst.msk [vmem:[%s13127_s1 + $0x1b8] sm:$0xff] %vm1989_vm4, %v2658_v35   ;;  %v6494_v62 = vld [vmem:[%s13126_s0 + $0xf03] ss:$8 sm:$0xf0]  }
 0x204   :  { %v2647_v39 = vpop.permute.xlu0 %2646   ;;  %3294 = vrot.lane.b32.xlu1 %v3293_v34, %s7032_s16  ;;  %v3468_v34 = vsel %vm4_vm0, %v6470_v30, %v6469_v29  ;;  %v6490_v0 = vld [vmem:[%s13126_s0 + $0xe03] ss:$8 sm:$0xf]  }
 0x205   :  { %6248 = vst.msk [vmem:[%s13127_s1 + $0x198] sm:$0xff] %vm1989_vm4, %v2647_v39   ;;  %v6491_v1 = vld [vmem:[%s13126_s0 + $0xe03] ss:$8 sm:$0xf0]  }
 0x206   :  { %3283 = vrot.lane.b32.xlu0 %v3282_v36, %s7032_s16  ;;  %v2680_v43 = vpop.permute.xlu1 %2679   ;;  %v3457_v36 = vsel %vm4_vm0, %v6467_v33, %v6466_v32  ;;  %v6499_v5 = vld [vmem:[%s13126_s0 + $0x143] ss:$8 sm:$0xf]  }
 0x207   :  { %6257 = vst.msk [vmem:[%s13127_s1 + $0x1f8] sm:$0xff] %vm1989_vm4, %v2680_v43   ;;  %v6500_v6 = vld [vmem:[%s13126_s0 + $0x143] ss:$8 sm:$0xf0]  }
 0x208   :  { %v2669_v47 = vpop.permute.xlu0 %2668   ;;  %3316 = vrot.lane.b32.xlu1 %v3315_v42, %s7032_s16  ;;  %v3490_v42 = vsel %vm4_vm0, %v6476_v38, %v6475_v37  ;;  %v6496_v8 = vld [vmem:[%s13126_s0 + $0x43] ss:$8 sm:$0xf]  }
 0x209   :  { %6254 = vst.msk [vmem:[%s13127_s1 + $0x1d8] sm:$0xff] %vm1989_vm4, %v2669_v47   ;;  %v6497_v9 = vld [vmem:[%s13126_s0 + $0x43] ss:$8 sm:$0xf0]  }
 0x20a   :  { %3305 = vrot.lane.b32.xlu0 %v3304_v44, %s7032_s16  ;;  %v2701_v51 = vpop.permute.xlu1 %2700   ;;  %v3479_v44 = vsel %vm4_vm0, %v6473_v41, %v6472_v40  ;;  %v6505_v13 = vld [vmem:[%s13126_s0 + $0x343] ss:$8 sm:$0xf]  }
 0x20b   :  { %6262 = vst.msk [vmem:[%s13127_s1 + $0x20] sm:$0xff] %vm2692_vm5, %v2701_v51   ;;  %v6506_v14 = vld [vmem:[%s13126_s0 + $0x343] ss:$8 sm:$0xf0]  }
 0x20c   :  { %v2691_v55 = vpop.permute.xlu0 %2690   ;;  %3338 = vrot.lane.b32.xlu1 %v3337_v50, %s7032_s16  ;;  %v3512_v50 = vsel %vm4_vm0, %v6482_v46, %v6481_v45  ;;  %v6502_v16 = vld [vmem:[%s13126_s0 + $0x243] ss:$8 sm:$0xf]  }
 0x20d   :  { %2693 = vst.msk [vmem:[%s13127_s1] sm:$0xff] %vm2692_vm5, %v2691_v55   ;;  %v6503_v17 = vld [vmem:[%s13126_s0 + $0x243] ss:$8 sm:$0xf0]  }
 0x20e   :  { %3327 = vrot.lane.b32.xlu0 %v3326_v52, %s7032_s16  ;;  %v2723_v59 = vpop.permute.xlu1 %2722   ;;  %v3501_v52 = vsel %vm4_vm0, %v6479_v49, %v6478_v48  ;;  %v6511_v21 = vld [vmem:[%s13126_s0 + $0x543] ss:$8 sm:$0xf]  }
 0x20f   :  { %6268 = vst.msk [vmem:[%s13127_s1 + $0x60] sm:$0xff] %vm2692_vm5, %v2723_v59   ;;  %v6512_v22 = vld [vmem:[%s13126_s0 + $0x543] ss:$8 sm:$0xf0]  }
 0x210   :  { %v2712_v63 = vpop.permute.xlu0 %2711   ;;  %3360 = vrot.lane.b32.xlu1 %v3359_v58, %s7032_s16  ;;  %v3534_v58 = vsel %vm4_vm0, %v6488_v54, %v6487_v53  ;;  %v6508_v24 = vld [vmem:[%s13126_s0 + $0x443] ss:$8 sm:$0xf]  }
 0x211   :  { %6265 = vst.msk [vmem:[%s13127_s1 + $0x40] sm:$0xff] %vm2692_vm5, %v2712_v63   ;;  %v6509_v25 = vld [vmem:[%s13126_s0 + $0x443] ss:$8 sm:$0xf0]  }
 0x212   :  { %3349 = vrot.lane.b32.xlu0 %v3348_v60, %s7032_s16  ;;  %v2745_v3 = vpop.permute.xlu1 %2744   ;;  %v3523_v60 = vsel %vm4_vm0, %v6485_v57, %v6484_v56  ;;  %v6517_v29 = vld [vmem:[%s13126_s0 + $0x743] ss:$8 sm:$0xf]  }
 0x213   :  { %6274 = vst.msk [vmem:[%s13127_s1 + $0xa0] sm:$0xff] %vm2692_vm5, %v2745_v3   ;;  %v6518_v30 = vld [vmem:[%s13126_s0 + $0x743] ss:$8 sm:$0xf0]  }
 0x214   :  { %v2734_v7 = vpop.permute.xlu0 %2733   ;;  %3382 = vrot.lane.b32.xlu1 %v3381_v2, %s7032_s16  ;;  %v3556_v2 = vsel %vm4_vm0, %v6494_v62, %v6493_v61  ;;  %v6514_v32 = vld [vmem:[%s13126_s0 + $0x643] ss:$8 sm:$0xf]  }
 0x215   :  { %6271 = vst.msk [vmem:[%s13127_s1 + $0x80] sm:$0xff] %vm2692_vm5, %v2734_v7   ;;  %v6515_v33 = vld [vmem:[%s13126_s0 + $0x643] ss:$8 sm:$0xf0]  }
 0x216   :  { %3371 = vrot.lane.b32.xlu0 %v3370_v4, %s7032_s16  ;;  %v2767_v11 = vpop.permute.xlu1 %2766   ;;  %v3545_v4 = vsel %vm4_vm0, %v6491_v1, %v6490_v0  ;;  %v6523_v37 = vld [vmem:[%s13126_s0 + $0x943] ss:$8 sm:$0xf]  }
 0x217   :  { %6280 = vst.msk [vmem:[%s13127_s1 + $0xe0] sm:$0xff] %vm2692_vm5, %v2767_v11   ;;  %v6524_v38 = vld [vmem:[%s13126_s0 + $0x943] ss:$8 sm:$0xf0]  }
 0x218   :  { %v2756_v15 = vpop.permute.xlu0 %2755   ;;  %3403 = vrot.lane.b32.xlu1 %v3402_v10, %s7033_s8  ;;  %v3578_v10 = vsel %vm4_vm0, %v6500_v6, %v6499_v5  ;;  %v6520_v40 = vld [vmem:[%s13126_s0 + $0x843] ss:$8 sm:$0xf]  }
 0x219   :  { %6277 = vst.msk [vmem:[%s13127_s1 + $0xc0] sm:$0xff] %vm2692_vm5, %v2756_v15   ;;  %v6521_v41 = vld [vmem:[%s13126_s0 + $0x843] ss:$8 sm:$0xf0]  }
 0x21a   :  { %3393 = vrot.lane.b32.xlu0 %v3392_v12, %s7033_s8  ;;  %v2789_v19 = vpop.permute.xlu1 %2788   ;;  %v3567_v12 = vsel %vm4_vm0, %v6497_v9, %v6496_v8  ;;  %v6529_v45 = vld [vmem:[%s13126_s0 + $0xb43] ss:$8 sm:$0xf]  }
 0x21b   :  { %6286 = vst.msk [vmem:[%s13127_s1 + $0x120] sm:$0xff] %vm2692_vm5, %v2789_v19   ;;  %v6530_v46 = vld [vmem:[%s13126_s0 + $0xb43] ss:$8 sm:$0xf0]  }
 0x21c   :  { %v2778_v23 = vpop.permute.xlu0 %2777   ;;  %3425 = vrot.lane.b32.xlu1 %v3424_v18, %s7033_s8  ;;  %v3600_v18 = vsel %vm4_vm0, %v6506_v14, %v6505_v13  ;;  %v6526_v48 = vld [vmem:[%s13126_s0 + $0xa43] ss:$8 sm:$0xf]  }
 0x21d   :  { %6283 = vst.msk [vmem:[%s13127_s1 + $0x100] sm:$0xff] %vm2692_vm5, %v2778_v23   ;;  %v6527_v49 = vld [vmem:[%s13126_s0 + $0xa43] ss:$8 sm:$0xf0]  }
 0x21e   :  { %3414 = vrot.lane.b32.xlu0 %v3413_v20, %s7033_s8  ;;  %v2811_v27 = vpop.permute.xlu1 %2810   ;;  %v3589_v20 = vsel %vm4_vm0, %v6503_v17, %v6502_v16  ;;  %v6535_v53 = vld [vmem:[%s13126_s0 + $0xd43] ss:$8 sm:$0xf]  }
 0x21f   :  { %6292 = vst.msk [vmem:[%s13127_s1 + $0x160] sm:$0xff] %vm2692_vm5, %v2811_v27   ;;  %v6536_v54 = vld [vmem:[%s13126_s0 + $0xd43] ss:$8 sm:$0xf0]  }
 0x220   :  { %v2800_v31 = vpop.permute.xlu0 %2799   ;;  %3447 = vrot.lane.b32.xlu1 %v3446_v26, %s7033_s8  ;;  %v3622_v26 = vsel %vm4_vm0, %v6512_v22, %v6511_v21  ;;  %v6532_v56 = vld [vmem:[%s13126_s0 + $0xc43] ss:$8 sm:$0xf]  }
 0x221   :  { %6289 = vst.msk [vmem:[%s13127_s1 + $0x140] sm:$0xff] %vm2692_vm5, %v2800_v31   ;;  %v6533_v57 = vld [vmem:[%s13126_s0 + $0xc43] ss:$8 sm:$0xf0]  }
 0x222   :  { %3436 = vrot.lane.b32.xlu0 %v3435_v28, %s7033_s8  ;;  %v2833_v35 = vpop.permute.xlu1 %2832   ;;  %v3611_v28 = vsel %vm4_vm0, %v6509_v25, %v6508_v24  ;;  %v6541_v61 = vld [vmem:[%s13126_s0 + $0xf43] ss:$8 sm:$0xf]  }
 0x223   :  { %6298 = vst.msk [vmem:[%s13127_s1 + $0x1a0] sm:$0xff] %vm2692_vm5, %v2833_v35   ;;  %v6542_v62 = vld [vmem:[%s13126_s0 + $0xf43] ss:$8 sm:$0xf0]  }
 0x224   :  { %v2822_v39 = vpop.permute.xlu0 %2821   ;;  %3469 = vrot.lane.b32.xlu1 %v3468_v34, %s7033_s8  ;;  %v3644_v34 = vsel %vm4_vm0, %v6518_v30, %v6517_v29  ;;  %v6538_v0 = vld [vmem:[%s13126_s0 + $0xe43] ss:$8 sm:$0xf]  }
 0x225   :  { %6295 = vst.msk [vmem:[%s13127_s1 + $0x180] sm:$0xff] %vm2692_vm5, %v2822_v39   ;;  %v6539_v1 = vld [vmem:[%s13126_s0 + $0xe43] ss:$8 sm:$0xf0]  }
 0x226   :  { %3458 = vrot.lane.b32.xlu0 %v3457_v36, %s7033_s8  ;;  %v2855_v43 = vpop.permute.xlu1 %2854   ;;  %v3633_v36 = vsel %vm4_vm0, %v6515_v33, %v6514_v32  ;;  %v6547_v5 = vld [vmem:[%s13126_s0 + $0x183] ss:$8 sm:$0xf]  }
 0x227   :  { %6304 = vst.msk [vmem:[%s13127_s1 + $0x1e0] sm:$0xff] %vm2692_vm5, %v2855_v43   ;;  %v6548_v6 = vld [vmem:[%s13126_s0 + $0x183] ss:$8 sm:$0xf0]  }
 0x228   :  { %v2844_v47 = vpop.permute.xlu0 %2843   ;;  %3491 = vrot.lane.b32.xlu1 %v3490_v42, %s7033_s8  ;;  %v3666_v42 = vsel %vm4_vm0, %v6524_v38, %v6523_v37  ;;  %v6544_v8 = vld [vmem:[%s13126_s0 + $0x83] ss:$8 sm:$0xf]  }
 0x229   :  { %6301 = vst.msk [vmem:[%s13127_s1 + $0x1c0] sm:$0xff] %vm2692_vm5, %v2844_v47   ;;  %v6545_v9 = vld [vmem:[%s13126_s0 + $0x83] ss:$8 sm:$0xf0]  }
 0x22a   :  { %3480 = vrot.lane.b32.xlu0 %v3479_v44, %s7033_s8  ;;  %v2877_v51 = vpop.permute.xlu1 %2876   ;;  %v3655_v44 = vsel %vm4_vm0, %v6521_v41, %v6520_v40  ;;  %v6553_v13 = vld [vmem:[%s13126_s0 + $0x383] ss:$8 sm:$0xf]  }
 0x22b   :  { %6310 = vst.msk [vmem:[%s13127_s1 + $0x28] sm:$0xff] %vm2692_vm5, %v2877_v51   ;;  %v6554_v14 = vld [vmem:[%s13126_s0 + $0x383] ss:$8 sm:$0xf0]  }
 0x22c   :  { %v2866_v55 = vpop.permute.xlu0 %2865   ;;  %3513 = vrot.lane.b32.xlu1 %v3512_v50, %s7033_s8  ;;  %v3688_v50 = vsel %vm4_vm0, %v6530_v46, %v6529_v45  ;;  %v6550_v16 = vld [vmem:[%s13126_s0 + $0x283] ss:$8 sm:$0xf]  }
 0x22d   :  { %6307 = vst.msk [vmem:[%s13127_s1 + $0x8] sm:$0xff] %vm2692_vm5, %v2866_v55   ;;  %v6551_v17 = vld [vmem:[%s13126_s0 + $0x283] ss:$8 sm:$0xf0]  }
 0x22e   :  { %3502 = vrot.lane.b32.xlu0 %v3501_v52, %s7033_s8  ;;  %v2899_v59 = vpop.permute.xlu1 %2898   ;;  %v3677_v52 = vsel %vm4_vm0, %v6527_v49, %v6526_v48  ;;  %v6559_v21 = vld [vmem:[%s13126_s0 + $0x583] ss:$8 sm:$0xf]  }
 0x22f   :  { %6316 = vst.msk [vmem:[%s13127_s1 + $0x68] sm:$0xff] %vm2692_vm5, %v2899_v59   ;;  %v6560_v22 = vld [vmem:[%s13126_s0 + $0x583] ss:$8 sm:$0xf0]  }
 0x230   :  { %v2888_v63 = vpop.permute.xlu0 %2887   ;;  %3535 = vrot.lane.b32.xlu1 %v3534_v58, %s7033_s8  ;;  %v3710_v58 = vsel %vm4_vm0, %v6536_v54, %v6535_v53  ;;  %v6556_v24 = vld [vmem:[%s13126_s0 + $0x483] ss:$8 sm:$0xf]  }
 0x231   :  { %6313 = vst.msk [vmem:[%s13127_s1 + $0x48] sm:$0xff] %vm2692_vm5, %v2888_v63   ;;  %v6557_v25 = vld [vmem:[%s13126_s0 + $0x483] ss:$8 sm:$0xf0]  }
 0x232   :  { %3524 = vrot.lane.b32.xlu0 %v3523_v60, %s7033_s8  ;;  %v2921_v3 = vpop.permute.xlu1 %2920   ;;  %v3699_v60 = vsel %vm4_vm0, %v6533_v57, %v6532_v56  ;;  %v6565_v29 = vld [vmem:[%s13126_s0 + $0x783] ss:$8 sm:$0xf]  }
 0x233   :  { %6322 = vst.msk [vmem:[%s13127_s1 + $0xa8] sm:$0xff] %vm2692_vm5, %v2921_v3   ;;  %v6566_v30 = vld [vmem:[%s13126_s0 + $0x783] ss:$8 sm:$0xf0]  }
 0x234   :  { %v2910_v7 = vpop.permute.xlu0 %2909   ;;  %3557 = vrot.lane.b32.xlu1 %v3556_v2, %s7033_s8  ;;  %v3732_v2 = vsel %vm4_vm0, %v6542_v62, %v6541_v61  ;;  %v6562_v32 = vld [vmem:[%s13126_s0 + $0x683] ss:$8 sm:$0xf]  }
 0x235   :  { %6319 = vst.msk [vmem:[%s13127_s1 + $0x88] sm:$0xff] %vm2692_vm5, %v2910_v7   ;;  %v6563_v33 = vld [vmem:[%s13126_s0 + $0x683] ss:$8 sm:$0xf0]  }
 0x236   :  { %3546 = vrot.lane.b32.xlu0 %v3545_v4, %s7033_s8  ;;  %v2943_v11 = vpop.permute.xlu1 %2942   ;;  %v3721_v4 = vsel %vm4_vm0, %v6539_v1, %v6538_v0  ;;  %v6571_v37 = vld [vmem:[%s13126_s0 + $0x983] ss:$8 sm:$0xf]  }
 0x237   :  { %6328 = vst.msk [vmem:[%s13127_s1 + $0xe8] sm:$0xff] %vm2692_vm5, %v2943_v11   ;;  %v6572_v38 = vld [vmem:[%s13126_s0 + $0x983] ss:$8 sm:$0xf0]  }
 0x238   :  { %v2932_v15 = vpop.permute.xlu0 %2931   ;;  %3579 = vrot.lane.b32.xlu1 %v3578_v10, %s7033_s8  ;;  %v3754_v10 = vsel %vm4_vm0, %v6548_v6, %v6547_v5  ;;  %v6568_v40 = vld [vmem:[%s13126_s0 + $0x883] ss:$8 sm:$0xf]  }
 0x239   :  { %6325 = vst.msk [vmem:[%s13127_s1 + $0xc8] sm:$0xff] %vm2692_vm5, %v2932_v15   ;;  %v6569_v41 = vld [vmem:[%s13126_s0 + $0x883] ss:$8 sm:$0xf0]  }
 0x23a   :  { %3568 = vrot.lane.b32.xlu0 %v3567_v12, %s7033_s8  ;;  %v2965_v19 = vpop.permute.xlu1 %2964   ;;  %v3743_v12 = vsel %vm4_vm0, %v6545_v9, %v6544_v8  ;;  %v6577_v45 = vld [vmem:[%s13126_s0 + $0xb83] ss:$8 sm:$0xf]  }
 0x23b   :  { %6334 = vst.msk [vmem:[%s13127_s1 + $0x128] sm:$0xff] %vm2692_vm5, %v2965_v19   ;;  %v6578_v46 = vld [vmem:[%s13126_s0 + $0xb83] ss:$8 sm:$0xf0]  }
 0x23c   :  { %v2954_v23 = vpop.permute.xlu0 %2953   ;;  %3601 = vrot.lane.b32.xlu1 %v3600_v18, %s7033_s8  ;;  %v3776_v18 = vsel %vm4_vm0, %v6554_v14, %v6553_v13  ;;  %v6574_v48 = vld [vmem:[%s13126_s0 + $0xa83] ss:$8 sm:$0xf]  }
 0x23d   :  { %6331 = vst.msk [vmem:[%s13127_s1 + $0x108] sm:$0xff] %vm2692_vm5, %v2954_v23   ;;  %v6575_v49 = vld [vmem:[%s13126_s0 + $0xa83] ss:$8 sm:$0xf0]  }
 0x23e   :  { %3590 = vrot.lane.b32.xlu0 %v3589_v20, %s7033_s8  ;;  %v2987_v27 = vpop.permute.xlu1 %2986   ;;  %v3765_v20 = vsel %vm4_vm0, %v6551_v17, %v6550_v16  ;;  %v6583_v53 = vld [vmem:[%s13126_s0 + $0xd83] ss:$8 sm:$0xf]  }
 0x23f   :  { %6340 = vst.msk [vmem:[%s13127_s1 + $0x168] sm:$0xff] %vm2692_vm5, %v2987_v27   ;;  %v6584_v54 = vld [vmem:[%s13126_s0 + $0xd83] ss:$8 sm:$0xf0]  }
 0x240   :  { %v2976_v31 = vpop.permute.xlu0 %2975   ;;  %3623 = vrot.lane.b32.xlu1 %v3622_v26, %s7033_s8  ;;  %v3798_v26 = vsel %vm4_vm0, %v6560_v22, %v6559_v21  ;;  %v6580_v56 = vld [vmem:[%s13126_s0 + $0xc83] ss:$8 sm:$0xf]  }
 0x241   :  { %6337 = vst.msk [vmem:[%s13127_s1 + $0x148] sm:$0xff] %vm2692_vm5, %v2976_v31   ;;  %v6581_v57 = vld [vmem:[%s13126_s0 + $0xc83] ss:$8 sm:$0xf0]  }
 0x242   :  { %3612 = vrot.lane.b32.xlu0 %v3611_v28, %s7033_s8  ;;  %v3009_v35 = vpop.permute.xlu1 %3008   ;;  %v3787_v28 = vsel %vm4_vm0, %v6557_v25, %v6556_v24  ;;  %v6589_v61 = vld [vmem:[%s13126_s0 + $0xf83] ss:$8 sm:$0xf]  }
 0x243   :  { %6346 = vst.msk [vmem:[%s13127_s1 + $0x1a8] sm:$0xff] %vm2692_vm5, %v3009_v35   ;;  %v6590_v62 = vld [vmem:[%s13126_s0 + $0xf83] ss:$8 sm:$0xf0]  }
 0x244   :  { %v2998_v39 = vpop.permute.xlu0 %2997   ;;  %3645 = vrot.lane.b32.xlu1 %v3644_v34, %s7033_s8  ;;  %v3820_v34 = vsel %vm4_vm0, %v6566_v30, %v6565_v29  ;;  %v6586_v0 = vld [vmem:[%s13126_s0 + $0xe83] ss:$8 sm:$0xf]  }
 0x245   :  { %6343 = vst.msk [vmem:[%s13127_s1 + $0x188] sm:$0xff] %vm2692_vm5, %v2998_v39   ;;  %v6587_v1 = vld [vmem:[%s13126_s0 + $0xe83] ss:$8 sm:$0xf0]  }
 0x246   :  { %3634 = vrot.lane.b32.xlu0 %v3633_v36, %s7033_s8  ;;  %v3031_v43 = vpop.permute.xlu1 %3030   ;;  %v3809_v36 = vsel %vm4_vm0, %v6563_v33, %v6562_v32  ;;  %v6595_v5 = vld [vmem:[%s13126_s0 + $0x1c3] ss:$8 sm:$0xf]  }
 0x247   :  { %6352 = vst.msk [vmem:[%s13127_s1 + $0x1e8] sm:$0xff] %vm2692_vm5, %v3031_v43   ;;  %v6596_v6 = vld [vmem:[%s13126_s0 + $0x1c3] ss:$8 sm:$0xf0]  }
 0x248   :  { %v3020_v47 = vpop.permute.xlu0 %3019   ;;  %3667 = vrot.lane.b32.xlu1 %v3666_v42, %s7033_s8  ;;  %v3842_v42 = vsel %vm4_vm0, %v6572_v38, %v6571_v37  ;;  %v6592_v8 = vld [vmem:[%s13126_s0 + $0xc3] ss:$8 sm:$0xf]  }
 0x249   :  { %6349 = vst.msk [vmem:[%s13127_s1 + $0x1c8] sm:$0xff] %vm2692_vm5, %v3020_v47   ;;  %v6593_v9 = vld [vmem:[%s13126_s0 + $0xc3] ss:$8 sm:$0xf0]  }
 0x24a   :  { %3656 = vrot.lane.b32.xlu0 %v3655_v44, %s7033_s8  ;;  %v3053_v51 = vpop.permute.xlu1 %3052   ;;  %v3831_v44 = vsel %vm4_vm0, %v6569_v41, %v6568_v40  ;;  %v6601_v13 = vld [vmem:[%s13126_s0 + $0x3c3] ss:$8 sm:$0xf]  }
 0x24b   :  { %6358 = vst.msk [vmem:[%s13127_s1 + $0x30] sm:$0xff] %vm2692_vm5, %v3053_v51   ;;  %v6602_v14 = vld [vmem:[%s13126_s0 + $0x3c3] ss:$8 sm:$0xf0]  }
 0x24c   :  { %v3042_v55 = vpop.permute.xlu0 %3041   ;;  %3689 = vrot.lane.b32.xlu1 %v3688_v50, %s7033_s8  ;;  %v3864_v50 = vsel %vm4_vm0, %v6578_v46, %v6577_v45  ;;  %v6598_v16 = vld [vmem:[%s13126_s0 + $0x2c3] ss:$8 sm:$0xf]  }
 0x24d   :  { %6355 = vst.msk [vmem:[%s13127_s1 + $0x10] sm:$0xff] %vm2692_vm5, %v3042_v55   ;;  %v6599_v17 = vld [vmem:[%s13126_s0 + $0x2c3] ss:$8 sm:$0xf0]  }
 0x24e   :  { %3678 = vrot.lane.b32.xlu0 %v3677_v52, %s7033_s8  ;;  %v3075_v59 = vpop.permute.xlu1 %3074   ;;  %v3853_v52 = vsel %vm4_vm0, %v6575_v49, %v6574_v48  ;;  %v6607_v21 = vld [vmem:[%s13126_s0 + $0x5c3] ss:$8 sm:$0xf]  }
 0x24f   :  { %6364 = vst.msk [vmem:[%s13127_s1 + $0x70] sm:$0xff] %vm2692_vm5, %v3075_v59   ;;  %v6608_v22 = vld [vmem:[%s13126_s0 + $0x5c3] ss:$8 sm:$0xf0]  }
 0x250   :  { %v3064_v63 = vpop.permute.xlu0 %3063   ;;  %3711 = vrot.lane.b32.xlu1 %v3710_v58, %s7033_s8  ;;  %v3886_v58 = vsel %vm4_vm0, %v6584_v54, %v6583_v53  ;;  %v6604_v24 = vld [vmem:[%s13126_s0 + $0x4c3] ss:$8 sm:$0xf]  }
 0x251   :  { %6361 = vst.msk [vmem:[%s13127_s1 + $0x50] sm:$0xff] %vm2692_vm5, %v3064_v63   ;;  %v6605_v25 = vld [vmem:[%s13126_s0 + $0x4c3] ss:$8 sm:$0xf0]  }
 0x252   :  { %3700 = vrot.lane.b32.xlu0 %v3699_v60, %s7033_s8  ;;  %v3097_v3 = vpop.permute.xlu1 %3096   ;;  %v3875_v60 = vsel %vm4_vm0, %v6581_v57, %v6580_v56  ;;  %v6613_v29 = vld [vmem:[%s13126_s0 + $0x7c3] ss:$8 sm:$0xf]  }
 0x253   :  { %6370 = vst.msk [vmem:[%s13127_s1 + $0xb0] sm:$0xff] %vm2692_vm5, %v3097_v3   ;;  %v6614_v30 = vld [vmem:[%s13126_s0 + $0x7c3] ss:$8 sm:$0xf0]  }
 0x254   :  { %v3086_v7 = vpop.permute.xlu0 %3085   ;;  %3733 = vrot.lane.b32.xlu1 %v3732_v2, %s7033_s8  ;;  %v3908_v2 = vsel %vm4_vm0, %v6590_v62, %v6589_v61  ;;  %v6610_v32 = vld [vmem:[%s13126_s0 + $0x6c3] ss:$8 sm:$0xf]  }
 0x255   :  { %6367 = vst.msk [vmem:[%s13127_s1 + $0x90] sm:$0xff] %vm2692_vm5, %v3086_v7   ;;  %v6611_v33 = vld [vmem:[%s13126_s0 + $0x6c3] ss:$8 sm:$0xf0]  }
 0x256   :  { %3722 = vrot.lane.b32.xlu0 %v3721_v4, %s7033_s8  ;;  %v3119_v11 = vpop.permute.xlu1 %3118   ;;  %v3897_v4 = vsel %vm4_vm0, %v6587_v1, %v6586_v0  ;;  %v6619_v37 = vld [vmem:[%s13126_s0 + $0x9c3] ss:$8 sm:$0xf]  }
 0x257   :  { %6376 = vst.msk [vmem:[%s13127_s1 + $0xf0] sm:$0xff] %vm2692_vm5, %v3119_v11   ;;  %v6620_v38 = vld [vmem:[%s13126_s0 + $0x9c3] ss:$8 sm:$0xf0]  }
 0x258   :  { %v3108_v15 = vpop.permute.xlu0 %3107   ;;  %3755 = vrot.lane.b32.xlu1 %v3754_v10, %s7033_s8  ;;  %v3930_v10 = vsel %vm4_vm0, %v6596_v6, %v6595_v5  ;;  %v6616_v40 = vld [vmem:[%s13126_s0 + $0x8c3] ss:$8 sm:$0xf]   ;;  %v6642_v5 = vld [vmem:[%s13126_s0 + $0x102] ss:$8 sm:$0xf]  }
 0x259   :  { %6373 = vst.msk [vmem:[%s13127_s1 + $0xd0] sm:$0xff] %vm2692_vm5, %v3108_v15   ;;  %v6617_v41 = vld [vmem:[%s13126_s0 + $0x8c3] ss:$8 sm:$0xf0]  }
 0x25a   :  { %3744 = vrot.lane.b32.xlu0 %v3743_v12, %s7033_s8  ;;  %v3141_v19 = vpop.permute.xlu1 %3140   ;;  %v3919_v12 = vsel %vm4_vm0, %v6593_v9, %v6592_v8  ;;  %v6625_v45 = vld [vmem:[%s13126_s0 + $0xbc3] ss:$8 sm:$0xf]   ;;  %v6643_v6 = vld [vmem:[%s13126_s0 + $0x102] ss:$8 sm:$0xf0]  }
 0x25b   :  { %6382 = vst.msk [vmem:[%s13127_s1 + $0x130] sm:$0xff] %vm2692_vm5, %v3141_v19   ;;  %v6626_v46 = vld [vmem:[%s13126_s0 + $0xbc3] ss:$8 sm:$0xf0]  }
 0x25c   :  { %v3130_v23 = vpop.permute.xlu0 %3129   ;;  %3777 = vrot.lane.b32.xlu1 %v3776_v18, %s7033_s8  ;;  %v3952_v18 = vsel %vm4_vm0, %v6602_v14, %v6601_v13  ;;  %v6622_v48 = vld [vmem:[%s13126_s0 + $0xac3] ss:$8 sm:$0xf]   ;;  %v6640_v8 = vld [vmem:[%s13126_s0 + $0x2] ss:$8 sm:$0xf]  }
 0x25d   :  { %6379 = vst.msk [vmem:[%s13127_s1 + $0x110] sm:$0xff] %vm2692_vm5, %v3130_v23   ;;  %v6623_v49 = vld [vmem:[%s13126_s0 + $0xac3] ss:$8 sm:$0xf0]  }
 0x25e   :  { %3766 = vrot.lane.b32.xlu0 %v3765_v20, %s7033_s8  ;;  %v3163_v27 = vpop.permute.xlu1 %3162   ;;  %v3941_v20 = vsel %vm4_vm0, %v6599_v17, %v6598_v16  ;;  %v6631_v53 = vld [vmem:[%s13126_s0 + $0xdc3] ss:$8 sm:$0xf]   ;;  %v6641_v9 = vld [vmem:[%s13126_s0 + $0x2] ss:$8 sm:$0xf0]  }
 0x25f   :  { %6388 = vst.msk [vmem:[%s13127_s1 + $0x170] sm:$0xff] %vm2692_vm5, %v3163_v27   ;;  %v6632_v54 = vld [vmem:[%s13126_s0 + $0xdc3] ss:$8 sm:$0xf0]  }
 0x260   :  { %v3152_v31 = vpop.permute.xlu0 %3151   ;;  %3799 = vrot.lane.b32.xlu1 %v3798_v26, %s7033_s8  ;;  %v3974_v26 = vsel %vm4_vm0, %v6608_v22, %v6607_v21  ;;  %v6628_v56 = vld [vmem:[%s13126_s0 + $0xcc3] ss:$8 sm:$0xf]   ;;  %v6648_v13 = vld [vmem:[%s13126_s0 + $0x302] ss:$8 sm:$0xf]  }
 0x261   :  { %6385 = vst.msk [vmem:[%s13127_s1 + $0x150] sm:$0xff] %vm2692_vm5, %v3152_v31   ;;  %v6629_v57 = vld [vmem:[%s13126_s0 + $0xcc3] ss:$8 sm:$0xf0]  }
 0x262   :  { %3788 = vrot.lane.b32.xlu0 %v3787_v28, %s7033_s8  ;;  %v3185_v35 = vpop.permute.xlu1 %3184   ;;  %v3963_v28 = vsel %vm4_vm0, %v6605_v25, %v6604_v24  ;;  %v6637_v61 = vld [vmem:[%s13126_s0 + $0xfc3] ss:$8 sm:$0xf]   ;;  %v6649_v14 = vld [vmem:[%s13126_s0 + $0x302] ss:$8 sm:$0xf0]  }
 0x263   :  { %6394 = vst.msk [vmem:[%s13127_s1 + $0x1b0] sm:$0xff] %vm2692_vm5, %v3185_v35   ;;  %v6638_v62 = vld [vmem:[%s13126_s0 + $0xfc3] ss:$8 sm:$0xf0]  }
 0x264   :  { %v3174_v39 = vpop.permute.xlu0 %3173   ;;  %3821 = vrot.lane.b32.xlu1 %v3820_v34, %s7033_s8  ;;  %v3996_v34 = vsel %vm4_vm0, %v6614_v30, %v6613_v29  ;;  %v6634_v0 = vld [vmem:[%s13126_s0 + $0xec3] ss:$8 sm:$0xf]   ;;  %v6645_v16 = vld [vmem:[%s13126_s0 + $0x202] ss:$8 sm:$0xf]  }
 0x265   :  { %6391 = vst.msk [vmem:[%s13127_s1 + $0x190] sm:$0xff] %vm2692_vm5, %v3174_v39   ;;  %v6635_v1 = vld [vmem:[%s13126_s0 + $0xec3] ss:$8 sm:$0xf0]  }
 0x266   :  { %3810 = vrot.lane.b32.xlu0 %v3809_v36, %s7033_s8  ;;  %v3207_v43 = vpop.permute.xlu1 %3206   ;;  %v3985_v36 = vsel %vm4_vm0, %v6611_v33, %v6610_v32  ;;  %v6646_v17 = vld [vmem:[%s13126_s0 + $0x202] ss:$8 sm:$0xf0]  }
 0x267   :  { %6400 = vst.msk [vmem:[%s13127_s1 + $0x1f0] sm:$0xff] %vm2692_vm5, %v3207_v43   ;;  %v6654_v21 = vld [vmem:[%s13126_s0 + $0x502] ss:$8 sm:$0xf]  }
 0x268   :  { %v3196_v47 = vpop.permute.xlu0 %3195   ;;  %3843 = vrot.lane.b32.xlu1 %v3842_v42, %s7033_s8  ;;  %v4018_v42 = vsel %vm4_vm0, %v6620_v38, %v6619_v37  ;;  %v6655_v22 = vld [vmem:[%s13126_s0 + $0x502] ss:$8 sm:$0xf0]  }
 0x269   :  { %6397 = vst.msk [vmem:[%s13127_s1 + $0x1d0] sm:$0xff] %vm2692_vm5, %v3196_v47   ;;  %v6651_v24 = vld [vmem:[%s13126_s0 + $0x402] ss:$8 sm:$0xf]  }
 0x26a   :  { %3832 = vrot.lane.b32.xlu0 %v3831_v44, %s7033_s8  ;;  %v3229_v51 = vpop.permute.xlu1 %3228   ;;  %v4007_v44 = vsel %vm4_vm0, %v6617_v41, %v6616_v40  ;;  %v6652_v25 = vld [vmem:[%s13126_s0 + $0x402] ss:$8 sm:$0xf0]  }
 0x26b   :  { %6406 = vst.msk [vmem:[%s13127_s1 + $0x38] sm:$0xff] %vm2692_vm5, %v3229_v51   ;;  %v6660_v29 = vld [vmem:[%s13126_s0 + $0x702] ss:$8 sm:$0xf]  }
 0x26c   :  { %v3218_v55 = vpop.permute.xlu0 %3217   ;;  %3865 = vrot.lane.b32.xlu1 %v3864_v50, %s7033_s8  ;;  %v4040_v50 = vsel %vm4_vm0, %v6626_v46, %v6625_v45  ;;  %v6661_v30 = vld [vmem:[%s13126_s0 + $0x702] ss:$8 sm:$0xf0]  }
 0x26d   :  { %6403 = vst.msk [vmem:[%s13127_s1 + $0x18] sm:$0xff] %vm2692_vm5, %v3218_v55   ;;  %v6657_v32 = vld [vmem:[%s13126_s0 + $0x602] ss:$8 sm:$0xf]  }
 0x26e   :  { %3854 = vrot.lane.b32.xlu0 %v3853_v52, %s7033_s8  ;;  %v3251_v59 = vpop.permute.xlu1 %3250   ;;  %v4029_v52 = vsel %vm4_vm0, %v6623_v49, %v6622_v48  ;;  %v6658_v33 = vld [vmem:[%s13126_s0 + $0x602] ss:$8 sm:$0xf0]  }
 0x26f   :  { %6412 = vst.msk [vmem:[%s13127_s1 + $0x78] sm:$0xff] %vm2692_vm5, %v3251_v59   ;;  %v6666_v37 = vld [vmem:[%s13126_s0 + $0x902] ss:$8 sm:$0xf]  }
 0x270   :  { %v3240_v63 = vpop.permute.xlu0 %3239   ;;  %3887 = vrot.lane.b32.xlu1 %v3886_v58, %s7033_s8  ;;  %v4062_v58 = vsel %vm4_vm0, %v6632_v54, %v6631_v53  ;;  %v6667_v38 = vld [vmem:[%s13126_s0 + $0x902] ss:$8 sm:$0xf0]  }
 0x271   :  { %6409 = vst.msk [vmem:[%s13127_s1 + $0x58] sm:$0xff] %vm2692_vm5, %v3240_v63   ;;  %v6663_v40 = vld [vmem:[%s13126_s0 + $0x802] ss:$8 sm:$0xf]  }
 0x272   :  { %3876 = vrot.lane.b32.xlu0 %v3875_v60, %s7033_s8  ;;  %v3273_v3 = vpop.permute.xlu1 %3272   ;;  %v4051_v60 = vsel %vm4_vm0, %v6629_v57, %v6628_v56  ;;  %v6664_v41 = vld [vmem:[%s13126_s0 + $0x802] ss:$8 sm:$0xf0]  }
 0x273   :  { %6418 = vst.msk [vmem:[%s13127_s1 + $0xb8] sm:$0xff] %vm2692_vm5, %v3273_v3   ;;  %v6672_v45 = vld [vmem:[%s13126_s0 + $0xb02] ss:$8 sm:$0xf]  }
 0x274   :  { %v3262_v7 = vpop.permute.xlu0 %3261   ;;  %3909 = vrot.lane.b32.xlu1 %v3908_v2, %s7033_s8  ;;  %v4084_v2 = vsel %vm4_vm0, %v6638_v62, %v6637_v61  ;;  %v6673_v46 = vld [vmem:[%s13126_s0 + $0xb02] ss:$8 sm:$0xf0]  }
 0x275   :  { %6415 = vst.msk [vmem:[%s13127_s1 + $0x98] sm:$0xff] %vm2692_vm5, %v3262_v7   ;;  %v6669_v48 = vld [vmem:[%s13126_s0 + $0xa02] ss:$8 sm:$0xf]  }
 0x276   :  { %3898 = vrot.lane.b32.xlu0 %v3897_v4, %s7033_s8  ;;  %v3295_v11 = vpop.permute.xlu1 %3294   ;;  %v4073_v4 = vsel %vm4_vm0, %v6635_v1, %v6634_v0  ;;  %v6670_v49 = vld [vmem:[%s13126_s0 + $0xa02] ss:$8 sm:$0xf0]  }
 0x277   :  { %6424 = vst.msk [vmem:[%s13127_s1 + $0xf8] sm:$0xff] %vm2692_vm5, %v3295_v11   ;;  %v6678_v53 = vld [vmem:[%s13126_s0 + $0xd02] ss:$8 sm:$0xf]  }
 0x278   :  { %v3284_v15 = vpop.permute.xlu0 %3283   ;;  %3931 = vrot.lane.b32.xlu1 %v3930_v10, %s7033_s8  ;;  %v4105_v10 = vsel %vm4_vm0, %v6643_v6, %v6642_v5  ;;  %v6679_v54 = vld [vmem:[%s13126_s0 + $0xd02] ss:$8 sm:$0xf0]  }
 0x279   :  { %6421 = vst.msk [vmem:[%s13127_s1 + $0xd8] sm:$0xff] %vm2692_vm5, %v3284_v15   ;;  %v6675_v56 = vld [vmem:[%s13126_s0 + $0xc02] ss:$8 sm:$0xf]  }
 0x27a   :  { %3920 = vrot.lane.b32.xlu0 %v3919_v12, %s7033_s8  ;;  %v3317_v19 = vpop.permute.xlu1 %3316   ;;  %v4095_v12 = vsel %vm4_vm0, %v6641_v9, %v6640_v8  ;;  %v6676_v57 = vld [vmem:[%s13126_s0 + $0xc02] ss:$8 sm:$0xf0]  }
 0x27b   :  { %6430 = vst.msk [vmem:[%s13127_s1 + $0x138] sm:$0xff] %vm2692_vm5, %v3317_v19   ;;  %v6684_v61 = vld [vmem:[%s13126_s0 + $0xf02] ss:$8 sm:$0xf]  }
 0x27c   :  { %v3306_v23 = vpop.permute.xlu0 %3305   ;;  %3953 = vrot.lane.b32.xlu1 %v3952_v18, %s7033_s8  ;;  %v4127_v18 = vsel %vm4_vm0, %v6649_v14, %v6648_v13  ;;  %v6685_v62 = vld [vmem:[%s13126_s0 + $0xf02] ss:$8 sm:$0xf0]  }
 0x27d   :  { %6427 = vst.msk [vmem:[%s13127_s1 + $0x118] sm:$0xff] %vm2692_vm5, %v3306_v23   ;;  %v6681_v0 = vld [vmem:[%s13126_s0 + $0xe02] ss:$8 sm:$0xf]  }
 0x27e   :  { %3942 = vrot.lane.b32.xlu0 %v3941_v20, %s7033_s8  ;;  %v3339_v27 = vpop.permute.xlu1 %3338   ;;  %v4116_v20 = vsel %vm4_vm0, %v6646_v17, %v6645_v16  ;;  %v6682_v1 = vld [vmem:[%s13126_s0 + $0xe02] ss:$8 sm:$0xf0]  }
 0x27f   :  { %6436 = vst.msk [vmem:[%s13127_s1 + $0x178] sm:$0xff] %vm2692_vm5, %v3339_v27   ;;  %v6690_v5 = vld [vmem:[%s13126_s0 + $0x142] ss:$8 sm:$0xf]  }
 0x280   :  { %v3328_v31 = vpop.permute.xlu0 %3327   ;;  %3975 = vrot.lane.b32.xlu1 %v3974_v26, %s7033_s8  ;;  %v4149_v26 = vsel %vm4_vm0, %v6655_v22, %v6654_v21  ;;  %v6691_v6 = vld [vmem:[%s13126_s0 + $0x142] ss:$8 sm:$0xf0]  }
 0x281   :  { %6433 = vst.msk [vmem:[%s13127_s1 + $0x158] sm:$0xff] %vm2692_vm5, %v3328_v31   ;;  %v6687_v8 = vld [vmem:[%s13126_s0 + $0x42] ss:$8 sm:$0xf]  }
 0x282   :  { %3964 = vrot.lane.b32.xlu0 %v3963_v28, %s7033_s8  ;;  %v3361_v35 = vpop.permute.xlu1 %3360   ;;  %v4138_v28 = vsel %vm4_vm0, %v6652_v25, %v6651_v24  ;;  %v6688_v9 = vld [vmem:[%s13126_s0 + $0x42] ss:$8 sm:$0xf0]  }
 0x283   :  { %6442 = vst.msk [vmem:[%s13127_s1 + $0x1b8] sm:$0xff] %vm2692_vm5, %v3361_v35   ;;  %v6696_v13 = vld [vmem:[%s13126_s0 + $0x342] ss:$8 sm:$0xf]  }
 0x284   :  { %v3350_v39 = vpop.permute.xlu0 %3349   ;;  %3997 = vrot.lane.b32.xlu1 %v3996_v34, %s7033_s8  ;;  %v4171_v34 = vsel %vm4_vm0, %v6661_v30, %v6660_v29  ;;  %v6697_v14 = vld [vmem:[%s13126_s0 + $0x342] ss:$8 sm:$0xf0]  }
 0x285   :  { %6439 = vst.msk [vmem:[%s13127_s1 + $0x198] sm:$0xff] %vm2692_vm5, %v3350_v39   ;;  %v6693_v16 = vld [vmem:[%s13126_s0 + $0x242] ss:$8 sm:$0xf]  }
 0x286   :  { %3986 = vrot.lane.b32.xlu0 %v3985_v36, %s7033_s8  ;;  %v3383_v43 = vpop.permute.xlu1 %3382   ;;  %v4160_v36 = vsel %vm4_vm0, %v6658_v33, %v6657_v32  ;;  %v6694_v17 = vld [vmem:[%s13126_s0 + $0x242] ss:$8 sm:$0xf0]  }
 0x287   :  { %6448 = vst.msk [vmem:[%s13127_s1 + $0x1f8] sm:$0xff] %vm2692_vm5, %v3383_v43   ;;  %v6702_v21 = vld [vmem:[%s13126_s0 + $0x542] ss:$8 sm:$0xf]  }
 0x288   :  { %v3372_v47 = vpop.permute.xlu0 %3371   ;;  %4019 = vrot.lane.b32.xlu1 %v4018_v42, %s7033_s8  ;;  %v4193_v42 = vsel %vm4_vm0, %v6667_v38, %v6666_v37  ;;  %v6703_v22 = vld [vmem:[%s13126_s0 + $0x542] ss:$8 sm:$0xf0]  }
 0x289   :  { %6445 = vst.msk [vmem:[%s13127_s1 + $0x1d8] sm:$0xff] %vm2692_vm5, %v3372_v47   ;;  %v6699_v24 = vld [vmem:[%s13126_s0 + $0x442] ss:$8 sm:$0xf]  }
 0x28a   :  { %4008 = vrot.lane.b32.xlu0 %v4007_v44, %s7033_s8  ;;  %v3404_v51 = vpop.permute.xlu1 %3403   ;;  %v4182_v44 = vsel %vm4_vm0, %v6664_v41, %v6663_v40  ;;  %v6700_v25 = vld [vmem:[%s13126_s0 + $0x442] ss:$8 sm:$0xf0]  }
 0x28b   :  { %6453 = vst.msk [vmem:[%s13127_s1 + $0x20] sm:$0xff] %vm3395_vm6, %v3404_v51   ;;  %v6708_v29 = vld [vmem:[%s13126_s0 + $0x742] ss:$8 sm:$0xf]  }
 0x28c   :  { %v3394_v55 = vpop.permute.xlu0 %3393   ;;  %4041 = vrot.lane.b32.xlu1 %v4040_v50, %s7033_s8  ;;  %v4215_v50 = vsel %vm4_vm0, %v6673_v46, %v6672_v45  ;;  %v6709_v30 = vld [vmem:[%s13126_s0 + $0x742] ss:$8 sm:$0xf0]  }
 0x28d   :  { %3396 = vst.msk [vmem:[%s13127_s1] sm:$0xff] %vm3395_vm6, %v3394_v55   ;;  %v6705_v32 = vld [vmem:[%s13126_s0 + $0x642] ss:$8 sm:$0xf]  }
 0x28e   :  { %4030 = vrot.lane.b32.xlu0 %v4029_v52, %s7033_s8  ;;  %v3426_v59 = vpop.permute.xlu1 %3425   ;;  %v4204_v52 = vsel %vm4_vm0, %v6670_v49, %v6669_v48  ;;  %v6706_v33 = vld [vmem:[%s13126_s0 + $0x642] ss:$8 sm:$0xf0]  }
 0x28f   :  { %6459 = vst.msk [vmem:[%s13127_s1 + $0x60] sm:$0xff] %vm3395_vm6, %v3426_v59   ;;  %v6714_v37 = vld [vmem:[%s13126_s0 + $0x942] ss:$8 sm:$0xf]  }
 0x290   :  { %v3415_v63 = vpop.permute.xlu0 %3414   ;;  %4063 = vrot.lane.b32.xlu1 %v4062_v58, %s7033_s8  ;;  %v4237_v58 = vsel %vm4_vm0, %v6679_v54, %v6678_v53  ;;  %v6715_v38 = vld [vmem:[%s13126_s0 + $0x942] ss:$8 sm:$0xf0]  }
 0x291   :  { %6456 = vst.msk [vmem:[%s13127_s1 + $0x40] sm:$0xff] %vm3395_vm6, %v3415_v63   ;;  %v6711_v40 = vld [vmem:[%s13126_s0 + $0x842] ss:$8 sm:$0xf]  }
 0x292   :  { %4052 = vrot.lane.b32.xlu0 %v4051_v60, %s7033_s8  ;;  %v3448_v3 = vpop.permute.xlu1 %3447   ;;  %v4226_v60 = vsel %vm4_vm0, %v6676_v57, %v6675_v56  ;;  %v6712_v41 = vld [vmem:[%s13126_s0 + $0x842] ss:$8 sm:$0xf0]  }
 0x293   :  { %6465 = vst.msk [vmem:[%s13127_s1 + $0xa0] sm:$0xff] %vm3395_vm6, %v3448_v3   ;;  %v6720_v45 = vld [vmem:[%s13126_s0 + $0xb42] ss:$8 sm:$0xf]  }
 0x294   :  { %v3437_v7 = vpop.permute.xlu0 %3436   ;;  %4085 = vrot.lane.b32.xlu1 %v4084_v2, %s7033_s8  ;;  %v4259_v2 = vsel %vm4_vm0, %v6685_v62, %v6684_v61  ;;  %v6721_v46 = vld [vmem:[%s13126_s0 + $0xb42] ss:$8 sm:$0xf0]  }
 0x295   :  { %6462 = vst.msk [vmem:[%s13127_s1 + $0x80] sm:$0xff] %vm3395_vm6, %v3437_v7   ;;  %v6717_v48 = vld [vmem:[%s13126_s0 + $0xa42] ss:$8 sm:$0xf]  }
 0x296   :  { %4074 = vrot.lane.b32.xlu0 %v4073_v4, %s7033_s8  ;;  %v3470_v11 = vpop.permute.xlu1 %3469   ;;  %v4248_v4 = vsel %vm4_vm0, %v6682_v1, %v6681_v0  ;;  %v6718_v49 = vld [vmem:[%s13126_s0 + $0xa42] ss:$8 sm:$0xf0]  }
 0x297   :  { %6471 = vst.msk [vmem:[%s13127_s1 + $0xe0] sm:$0xff] %vm3395_vm6, %v3470_v11   ;;  %v6726_v53 = vld [vmem:[%s13126_s0 + $0xd42] ss:$8 sm:$0xf]  }
 0x298   :  { %v3459_v15 = vpop.permute.xlu0 %3458   ;;  %4106 = vrot.lane.b32.xlu1 %v4105_v10, %s7034_s28  ;;  %v4281_v10 = vsel %vm4_vm0, %v6691_v6, %v6690_v5  ;;  %v6727_v54 = vld [vmem:[%s13126_s0 + $0xd42] ss:$8 sm:$0xf0]  }
 0x299   :  { %6468 = vst.msk [vmem:[%s13127_s1 + $0xc0] sm:$0xff] %vm3395_vm6, %v3459_v15   ;;  %v6723_v56 = vld [vmem:[%s13126_s0 + $0xc42] ss:$8 sm:$0xf]  }
 0x29a   :  { %4096 = vrot.lane.b32.xlu0 %v4095_v12, %s7034_s28  ;;  %v3492_v19 = vpop.permute.xlu1 %3491   ;;  %v4270_v12 = vsel %vm4_vm0, %v6688_v9, %v6687_v8  ;;  %v6724_v57 = vld [vmem:[%s13126_s0 + $0xc42] ss:$8 sm:$0xf0]  }
 0x29b   :  { %6477 = vst.msk [vmem:[%s13127_s1 + $0x120] sm:$0xff] %vm3395_vm6, %v3492_v19   ;;  %v6732_v61 = vld [vmem:[%s13126_s0 + $0xf42] ss:$8 sm:$0xf]  }
 0x29c   :  { %v3481_v23 = vpop.permute.xlu0 %3480   ;;  %4128 = vrot.lane.b32.xlu1 %v4127_v18, %s7034_s28  ;;  %v4303_v18 = vsel %vm4_vm0, %v6697_v14, %v6696_v13  ;;  %v6733_v62 = vld [vmem:[%s13126_s0 + $0xf42] ss:$8 sm:$0xf0]  }
 0x29d   :  { %6474 = vst.msk [vmem:[%s13127_s1 + $0x100] sm:$0xff] %vm3395_vm6, %v3481_v23   ;;  %v6729_v0 = vld [vmem:[%s13126_s0 + $0xe42] ss:$8 sm:$0xf]  }
 0x29e   :  { %4117 = vrot.lane.b32.xlu0 %v4116_v20, %s7034_s28  ;;  %v3514_v27 = vpop.permute.xlu1 %3513   ;;  %v4292_v20 = vsel %vm4_vm0, %v6694_v17, %v6693_v16  ;;  %v6730_v1 = vld [vmem:[%s13126_s0 + $0xe42] ss:$8 sm:$0xf0]  }
 0x29f   :  { %6483 = vst.msk [vmem:[%s13127_s1 + $0x160] sm:$0xff] %vm3395_vm6, %v3514_v27   ;;  %v6738_v5 = vld [vmem:[%s13126_s0 + $0x182] ss:$8 sm:$0xf]  }
 0x2a0   :  { %v3503_v31 = vpop.permute.xlu0 %3502   ;;  %4150 = vrot.lane.b32.xlu1 %v4149_v26, %s7034_s28  ;;  %v4325_v26 = vsel %vm4_vm0, %v6703_v22, %v6702_v21  ;;  %v6739_v6 = vld [vmem:[%s13126_s0 + $0x182] ss:$8 sm:$0xf0]  }
 0x2a1   :  { %6480 = vst.msk [vmem:[%s13127_s1 + $0x140] sm:$0xff] %vm3395_vm6, %v3503_v31   ;;  %v6735_v8 = vld [vmem:[%s13126_s0 + $0x82] ss:$8 sm:$0xf]  }
 0x2a2   :  { %4139 = vrot.lane.b32.xlu0 %v4138_v28, %s7034_s28  ;;  %v3536_v35 = vpop.permute.xlu1 %3535   ;;  %v4314_v28 = vsel %vm4_vm0, %v6700_v25, %v6699_v24  ;;  %v6736_v9 = vld [vmem:[%s13126_s0 + $0x82] ss:$8 sm:$0xf0]  }
 0x2a3   :  { %6489 = vst.msk [vmem:[%s13127_s1 + $0x1a0] sm:$0xff] %vm3395_vm6, %v3536_v35   ;;  %v6744_v13 = vld [vmem:[%s13126_s0 + $0x382] ss:$8 sm:$0xf]  }
 0x2a4   :  { %v3525_v39 = vpop.permute.xlu0 %3524   ;;  %4172 = vrot.lane.b32.xlu1 %v4171_v34, %s7034_s28  ;;  %v4347_v34 = vsel %vm4_vm0, %v6709_v30, %v6708_v29  ;;  %v6745_v14 = vld [vmem:[%s13126_s0 + $0x382] ss:$8 sm:$0xf0]  }
 0x2a5   :  { %6486 = vst.msk [vmem:[%s13127_s1 + $0x180] sm:$0xff] %vm3395_vm6, %v3525_v39   ;;  %v6741_v16 = vld [vmem:[%s13126_s0 + $0x282] ss:$8 sm:$0xf]  }
 0x2a6   :  { %4161 = vrot.lane.b32.xlu0 %v4160_v36, %s7034_s28  ;;  %v3558_v43 = vpop.permute.xlu1 %3557   ;;  %v4336_v36 = vsel %vm4_vm0, %v6706_v33, %v6705_v32  ;;  %v6742_v17 = vld [vmem:[%s13126_s0 + $0x282] ss:$8 sm:$0xf0]  }
 0x2a7   :  { %6495 = vst.msk [vmem:[%s13127_s1 + $0x1e0] sm:$0xff] %vm3395_vm6, %v3558_v43   ;;  %v6750_v21 = vld [vmem:[%s13126_s0 + $0x582] ss:$8 sm:$0xf]  }
 0x2a8   :  { %v3547_v47 = vpop.permute.xlu0 %3546   ;;  %4194 = vrot.lane.b32.xlu1 %v4193_v42, %s7034_s28  ;;  %v4369_v42 = vsel %vm4_vm0, %v6715_v38, %v6714_v37  ;;  %v6751_v22 = vld [vmem:[%s13126_s0 + $0x582] ss:$8 sm:$0xf0]  }
 0x2a9   :  { %6492 = vst.msk [vmem:[%s13127_s1 + $0x1c0] sm:$0xff] %vm3395_vm6, %v3547_v47   ;;  %v6747_v24 = vld [vmem:[%s13126_s0 + $0x482] ss:$8 sm:$0xf]  }
 0x2aa   :  { %4183 = vrot.lane.b32.xlu0 %v4182_v44, %s7034_s28  ;;  %v3580_v51 = vpop.permute.xlu1 %3579   ;;  %v4358_v44 = vsel %vm4_vm0, %v6712_v41, %v6711_v40  ;;  %v6748_v25 = vld [vmem:[%s13126_s0 + $0x482] ss:$8 sm:$0xf0]  }
 0x2ab   :  { %6501 = vst.msk [vmem:[%s13127_s1 + $0x28] sm:$0xff] %vm3395_vm6, %v3580_v51   ;;  %v6756_v29 = vld [vmem:[%s13126_s0 + $0x782] ss:$8 sm:$0xf]  }
 0x2ac   :  { %v3569_v55 = vpop.permute.xlu0 %3568   ;;  %4216 = vrot.lane.b32.xlu1 %v4215_v50, %s7034_s28  ;;  %v4391_v50 = vsel %vm4_vm0, %v6721_v46, %v6720_v45  ;;  %v6757_v30 = vld [vmem:[%s13126_s0 + $0x782] ss:$8 sm:$0xf0]  }
 0x2ad   :  { %6498 = vst.msk [vmem:[%s13127_s1 + $0x8] sm:$0xff] %vm3395_vm6, %v3569_v55   ;;  %v6753_v32 = vld [vmem:[%s13126_s0 + $0x682] ss:$8 sm:$0xf]  }
 0x2ae   :  { %4205 = vrot.lane.b32.xlu0 %v4204_v52, %s7034_s28  ;;  %v3602_v59 = vpop.permute.xlu1 %3601   ;;  %v4380_v52 = vsel %vm4_vm0, %v6718_v49, %v6717_v48  ;;  %v6754_v33 = vld [vmem:[%s13126_s0 + $0x682] ss:$8 sm:$0xf0]  }
 0x2af   :  { %6507 = vst.msk [vmem:[%s13127_s1 + $0x68] sm:$0xff] %vm3395_vm6, %v3602_v59   ;;  %v6762_v37 = vld [vmem:[%s13126_s0 + $0x982] ss:$8 sm:$0xf]  }
 0x2b0   :  { %v3591_v63 = vpop.permute.xlu0 %3590   ;;  %4238 = vrot.lane.b32.xlu1 %v4237_v58, %s7034_s28  ;;  %v4413_v58 = vsel %vm4_vm0, %v6727_v54, %v6726_v53  ;;  %v6763_v38 = vld [vmem:[%s13126_s0 + $0x982] ss:$8 sm:$0xf0]  }
 0x2b1   :  { %6504 = vst.msk [vmem:[%s13127_s1 + $0x48] sm:$0xff] %vm3395_vm6, %v3591_v63   ;;  %v6759_v40 = vld [vmem:[%s13126_s0 + $0x882] ss:$8 sm:$0xf]  }
 0x2b2   :  { %4227 = vrot.lane.b32.xlu0 %v4226_v60, %s7034_s28  ;;  %v3624_v3 = vpop.permute.xlu1 %3623   ;;  %v4402_v60 = vsel %vm4_vm0, %v6724_v57, %v6723_v56  ;;  %v6760_v41 = vld [vmem:[%s13126_s0 + $0x882] ss:$8 sm:$0xf0]  }
 0x2b3   :  { %6513 = vst.msk [vmem:[%s13127_s1 + $0xa8] sm:$0xff] %vm3395_vm6, %v3624_v3   ;;  %v6768_v45 = vld [vmem:[%s13126_s0 + $0xb82] ss:$8 sm:$0xf]  }
 0x2b4   :  { %v3613_v7 = vpop.permute.xlu0 %3612   ;;  %4260 = vrot.lane.b32.xlu1 %v4259_v2, %s7034_s28  ;;  %v4435_v2 = vsel %vm4_vm0, %v6733_v62, %v6732_v61  ;;  %v6769_v46 = vld [vmem:[%s13126_s0 + $0xb82] ss:$8 sm:$0xf0]  }
 0x2b5   :  { %6510 = vst.msk [vmem:[%s13127_s1 + $0x88] sm:$0xff] %vm3395_vm6, %v3613_v7   ;;  %v6765_v48 = vld [vmem:[%s13126_s0 + $0xa82] ss:$8 sm:$0xf]  }
 0x2b6   :  { %4249 = vrot.lane.b32.xlu0 %v4248_v4, %s7034_s28  ;;  %v3646_v11 = vpop.permute.xlu1 %3645   ;;  %v4424_v4 = vsel %vm4_vm0, %v6730_v1, %v6729_v0  ;;  %v6766_v49 = vld [vmem:[%s13126_s0 + $0xa82] ss:$8 sm:$0xf0]  }
 0x2b7   :  { %6519 = vst.msk [vmem:[%s13127_s1 + $0xe8] sm:$0xff] %vm3395_vm6, %v3646_v11   ;;  %v6774_v53 = vld [vmem:[%s13126_s0 + $0xd82] ss:$8 sm:$0xf]  }
 0x2b8   :  { %v3635_v15 = vpop.permute.xlu0 %3634   ;;  %4282 = vrot.lane.b32.xlu1 %v4281_v10, %s7034_s28  ;;  %v4457_v10 = vsel %vm4_vm0, %v6739_v6, %v6738_v5  ;;  %v6775_v54 = vld [vmem:[%s13126_s0 + $0xd82] ss:$8 sm:$0xf0]  }
 0x2b9   :  { %6516 = vst.msk [vmem:[%s13127_s1 + $0xc8] sm:$0xff] %vm3395_vm6, %v3635_v15   ;;  %v6771_v56 = vld [vmem:[%s13126_s0 + $0xc82] ss:$8 sm:$0xf]  }
 0x2ba   :  { %4271 = vrot.lane.b32.xlu0 %v4270_v12, %s7034_s28  ;;  %v3668_v19 = vpop.permute.xlu1 %3667   ;;  %v4446_v12 = vsel %vm4_vm0, %v6736_v9, %v6735_v8  ;;  %v6772_v57 = vld [vmem:[%s13126_s0 + $0xc82] ss:$8 sm:$0xf0]  }
 0x2bb   :  { %6525 = vst.msk [vmem:[%s13127_s1 + $0x128] sm:$0xff] %vm3395_vm6, %v3668_v19   ;;  %v6780_v61 = vld [vmem:[%s13126_s0 + $0xf82] ss:$8 sm:$0xf]  }
 0x2bc   :  { %v3657_v23 = vpop.permute.xlu0 %3656   ;;  %4304 = vrot.lane.b32.xlu1 %v4303_v18, %s7034_s28  ;;  %v4479_v18 = vsel %vm4_vm0, %v6745_v14, %v6744_v13  ;;  %v6781_v62 = vld [vmem:[%s13126_s0 + $0xf82] ss:$8 sm:$0xf0]  }
 0x2bd   :  { %6522 = vst.msk [vmem:[%s13127_s1 + $0x108] sm:$0xff] %vm3395_vm6, %v3657_v23   ;;  %v6777_v0 = vld [vmem:[%s13126_s0 + $0xe82] ss:$8 sm:$0xf]  }
 0x2be   :  { %4293 = vrot.lane.b32.xlu0 %v4292_v20, %s7034_s28  ;;  %v3690_v27 = vpop.permute.xlu1 %3689   ;;  %v4468_v20 = vsel %vm4_vm0, %v6742_v17, %v6741_v16  ;;  %v6778_v1 = vld [vmem:[%s13126_s0 + $0xe82] ss:$8 sm:$0xf0]  }
 0x2bf   :  { %6531 = vst.msk [vmem:[%s13127_s1 + $0x168] sm:$0xff] %vm3395_vm6, %v3690_v27   ;;  %v6786_v5 = vld [vmem:[%s13126_s0 + $0x1c2] ss:$8 sm:$0xf]  }
 0x2c0   :  { %v3679_v31 = vpop.permute.xlu0 %3678   ;;  %4326 = vrot.lane.b32.xlu1 %v4325_v26, %s7034_s28  ;;  %v4501_v26 = vsel %vm4_vm0, %v6751_v22, %v6750_v21  ;;  %v6787_v6 = vld [vmem:[%s13126_s0 + $0x1c2] ss:$8 sm:$0xf0]  }
 0x2c1   :  { %6528 = vst.msk [vmem:[%s13127_s1 + $0x148] sm:$0xff] %vm3395_vm6, %v3679_v31   ;;  %v6783_v8 = vld [vmem:[%s13126_s0 + $0xc2] ss:$8 sm:$0xf]  }
 0x2c2   :  { %4315 = vrot.lane.b32.xlu0 %v4314_v28, %s7034_s28  ;;  %v3712_v35 = vpop.permute.xlu1 %3711   ;;  %v4490_v28 = vsel %vm4_vm0, %v6748_v25, %v6747_v24  ;;  %v6784_v9 = vld [vmem:[%s13126_s0 + $0xc2] ss:$8 sm:$0xf0]  }
 0x2c3   :  { %6537 = vst.msk [vmem:[%s13127_s1 + $0x1a8] sm:$0xff] %vm3395_vm6, %v3712_v35   ;;  %v6792_v13 = vld [vmem:[%s13126_s0 + $0x3c2] ss:$8 sm:$0xf]  }
 0x2c4   :  { %v3701_v39 = vpop.permute.xlu0 %3700   ;;  %4348 = vrot.lane.b32.xlu1 %v4347_v34, %s7034_s28  ;;  %v4523_v34 = vsel %vm4_vm0, %v6757_v30, %v6756_v29  ;;  %v6793_v14 = vld [vmem:[%s13126_s0 + $0x3c2] ss:$8 sm:$0xf0]  }
 0x2c5   :  { %6534 = vst.msk [vmem:[%s13127_s1 + $0x188] sm:$0xff] %vm3395_vm6, %v3701_v39   ;;  %v6789_v16 = vld [vmem:[%s13126_s0 + $0x2c2] ss:$8 sm:$0xf]  }
 0x2c6   :  { %4337 = vrot.lane.b32.xlu0 %v4336_v36, %s7034_s28  ;;  %v3734_v43 = vpop.permute.xlu1 %3733   ;;  %v4512_v36 = vsel %vm4_vm0, %v6754_v33, %v6753_v32  ;;  %v6790_v17 = vld [vmem:[%s13126_s0 + $0x2c2] ss:$8 sm:$0xf0]  }
 0x2c7   :  { %6543 = vst.msk [vmem:[%s13127_s1 + $0x1e8] sm:$0xff] %vm3395_vm6, %v3734_v43   ;;  %v6798_v21 = vld [vmem:[%s13126_s0 + $0x5c2] ss:$8 sm:$0xf]  }
 0x2c8   :  { %v3723_v47 = vpop.permute.xlu0 %3722   ;;  %4370 = vrot.lane.b32.xlu1 %v4369_v42, %s7034_s28  ;;  %v4545_v42 = vsel %vm4_vm0, %v6763_v38, %v6762_v37  ;;  %v6799_v22 = vld [vmem:[%s13126_s0 + $0x5c2] ss:$8 sm:$0xf0]  }
 0x2c9   :  { %6540 = vst.msk [vmem:[%s13127_s1 + $0x1c8] sm:$0xff] %vm3395_vm6, %v3723_v47   ;;  %v6795_v24 = vld [vmem:[%s13126_s0 + $0x4c2] ss:$8 sm:$0xf]  }
 0x2ca   :  { %4359 = vrot.lane.b32.xlu0 %v4358_v44, %s7034_s28  ;;  %v3756_v51 = vpop.permute.xlu1 %3755   ;;  %v4534_v44 = vsel %vm4_vm0, %v6760_v41, %v6759_v40  ;;  %v6796_v25 = vld [vmem:[%s13126_s0 + $0x4c2] ss:$8 sm:$0xf0]  }
 0x2cb   :  { %6549 = vst.msk [vmem:[%s13127_s1 + $0x30] sm:$0xff] %vm3395_vm6, %v3756_v51   ;;  %v6804_v29 = vld [vmem:[%s13126_s0 + $0x7c2] ss:$8 sm:$0xf]  }
 0x2cc   :  { %v3745_v55 = vpop.permute.xlu0 %3744   ;;  %4392 = vrot.lane.b32.xlu1 %v4391_v50, %s7034_s28  ;;  %v4567_v50 = vsel %vm4_vm0, %v6769_v46, %v6768_v45  ;;  %v6805_v30 = vld [vmem:[%s13126_s0 + $0x7c2] ss:$8 sm:$0xf0]  }
 0x2cd   :  { %6546 = vst.msk [vmem:[%s13127_s1 + $0x10] sm:$0xff] %vm3395_vm6, %v3745_v55   ;;  %v6801_v32 = vld [vmem:[%s13126_s0 + $0x6c2] ss:$8 sm:$0xf]  }
 0x2ce   :  { %4381 = vrot.lane.b32.xlu0 %v4380_v52, %s7034_s28  ;;  %v3778_v59 = vpop.permute.xlu1 %3777   ;;  %v4556_v52 = vsel %vm4_vm0, %v6766_v49, %v6765_v48  ;;  %v6802_v33 = vld [vmem:[%s13126_s0 + $0x6c2] ss:$8 sm:$0xf0]  }
 0x2cf   :  { %6555 = vst.msk [vmem:[%s13127_s1 + $0x70] sm:$0xff] %vm3395_vm6, %v3778_v59   ;;  %v6810_v37 = vld [vmem:[%s13126_s0 + $0x9c2] ss:$8 sm:$0xf]  }
 0x2d0   :  { %v3767_v63 = vpop.permute.xlu0 %3766   ;;  %4414 = vrot.lane.b32.xlu1 %v4413_v58, %s7034_s28  ;;  %v4589_v58 = vsel %vm4_vm0, %v6775_v54, %v6774_v53  ;;  %v6811_v38 = vld [vmem:[%s13126_s0 + $0x9c2] ss:$8 sm:$0xf0]  }
 0x2d1   :  { %6552 = vst.msk [vmem:[%s13127_s1 + $0x50] sm:$0xff] %vm3395_vm6, %v3767_v63   ;;  %v6807_v40 = vld [vmem:[%s13126_s0 + $0x8c2] ss:$8 sm:$0xf]  }
 0x2d2   :  { %4403 = vrot.lane.b32.xlu0 %v4402_v60, %s7034_s28  ;;  %v3800_v3 = vpop.permute.xlu1 %3799   ;;  %v4578_v60 = vsel %vm4_vm0, %v6772_v57, %v6771_v56  ;;  %v6808_v41 = vld [vmem:[%s13126_s0 + $0x8c2] ss:$8 sm:$0xf0]  }
 0x2d3   :  { %6561 = vst.msk [vmem:[%s13127_s1 + $0xb0] sm:$0xff] %vm3395_vm6, %v3800_v3   ;;  %v6816_v45 = vld [vmem:[%s13126_s0 + $0xbc2] ss:$8 sm:$0xf]  }
 0x2d4   :  { %v3789_v7 = vpop.permute.xlu0 %3788   ;;  %4436 = vrot.lane.b32.xlu1 %v4435_v2, %s7034_s28  ;;  %v4611_v2 = vsel %vm4_vm0, %v6781_v62, %v6780_v61  ;;  %v6817_v46 = vld [vmem:[%s13126_s0 + $0xbc2] ss:$8 sm:$0xf0]  }
 0x2d5   :  { %6558 = vst.msk [vmem:[%s13127_s1 + $0x90] sm:$0xff] %vm3395_vm6, %v3789_v7   ;;  %v6813_v48 = vld [vmem:[%s13126_s0 + $0xac2] ss:$8 sm:$0xf]  }
 0x2d6   :  { %4425 = vrot.lane.b32.xlu0 %v4424_v4, %s7034_s28  ;;  %v3822_v11 = vpop.permute.xlu1 %3821   ;;  %v4600_v4 = vsel %vm4_vm0, %v6778_v1, %v6777_v0  ;;  %v6814_v49 = vld [vmem:[%s13126_s0 + $0xac2] ss:$8 sm:$0xf0]  }
 0x2d7   :  { %6567 = vst.msk [vmem:[%s13127_s1 + $0xf0] sm:$0xff] %vm3395_vm6, %v3822_v11   ;;  %v6822_v53 = vld [vmem:[%s13126_s0 + $0xdc2] ss:$8 sm:$0xf]  }
 0x2d8   :  { %v3811_v15 = vpop.permute.xlu0 %3810   ;;  %4458 = vrot.lane.b32.xlu1 %v4457_v10, %s7034_s28  ;;  %v4633_v10 = vsel %vm4_vm0, %v6787_v6, %v6786_v5  ;;  %v6823_v54 = vld [vmem:[%s13126_s0 + $0xdc2] ss:$8 sm:$0xf0]   ;;  %v6833_v5 = vld [vmem:[%s13126_s0 + $0x101] ss:$8 sm:$0xf]  }
 0x2d9   :  { %6564 = vst.msk [vmem:[%s13127_s1 + $0xd0] sm:$0xff] %vm3395_vm6, %v3811_v15   ;;  %v6819_v56 = vld [vmem:[%s13126_s0 + $0xcc2] ss:$8 sm:$0xf]  }
 0x2da   :  { %4447 = vrot.lane.b32.xlu0 %v4446_v12, %s7034_s28  ;;  %v3844_v19 = vpop.permute.xlu1 %3843   ;;  %v4622_v12 = vsel %vm4_vm0, %v6784_v9, %v6783_v8  ;;  %v6820_v57 = vld [vmem:[%s13126_s0 + $0xcc2] ss:$8 sm:$0xf0]   ;;  %v6834_v6 = vld [vmem:[%s13126_s0 + $0x101] ss:$8 sm:$0xf0]  }
 0x2db   :  { %6573 = vst.msk [vmem:[%s13127_s1 + $0x130] sm:$0xff] %vm3395_vm6, %v3844_v19   ;;  %v6828_v61 = vld [vmem:[%s13126_s0 + $0xfc2] ss:$8 sm:$0xf]  }
 0x2dc   :  { %v3833_v23 = vpop.permute.xlu0 %3832   ;;  %4480 = vrot.lane.b32.xlu1 %v4479_v18, %s7034_s28  ;;  %v4655_v18 = vsel %vm4_vm0, %v6793_v14, %v6792_v13  ;;  %v6829_v62 = vld [vmem:[%s13126_s0 + $0xfc2] ss:$8 sm:$0xf0]   ;;  %v6831_v8 = vld [vmem:[%s13126_s0 + $0x1] ss:$8 sm:$0xf]  }
 0x2dd   :  { %6570 = vst.msk [vmem:[%s13127_s1 + $0x110] sm:$0xff] %vm3395_vm6, %v3833_v23   ;;  %v6825_v0 = vld [vmem:[%s13126_s0 + $0xec2] ss:$8 sm:$0xf]  }
 0x2de   :  { %4469 = vrot.lane.b32.xlu0 %v4468_v20, %s7034_s28  ;;  %v3866_v27 = vpop.permute.xlu1 %3865   ;;  %v4644_v20 = vsel %vm4_vm0, %v6790_v17, %v6789_v16  ;;  %v6826_v1 = vld [vmem:[%s13126_s0 + $0xec2] ss:$8 sm:$0xf0]   ;;  %v6832_v9 = vld [vmem:[%s13126_s0 + $0x1] ss:$8 sm:$0xf0]  }
 0x2df   :  { %6579 = vst.msk [vmem:[%s13127_s1 + $0x170] sm:$0xff] %vm3395_vm6, %v3866_v27   ;;  %v6839_v13 = vld [vmem:[%s13126_s0 + $0x301] ss:$8 sm:$0xf]  }
 0x2e0   :  { %v3855_v31 = vpop.permute.xlu0 %3854   ;;  %4502 = vrot.lane.b32.xlu1 %v4501_v26, %s7034_s28  ;;  %v4677_v26 = vsel %vm4_vm0, %v6799_v22, %v6798_v21  ;;  %v6840_v14 = vld [vmem:[%s13126_s0 + $0x301] ss:$8 sm:$0xf0]  }
 0x2e1   :  { %6576 = vst.msk [vmem:[%s13127_s1 + $0x150] sm:$0xff] %vm3395_vm6, %v3855_v31   ;;  %v6836_v16 = vld [vmem:[%s13126_s0 + $0x201] ss:$8 sm:$0xf]  }
 0x2e2   :  { %4491 = vrot.lane.b32.xlu0 %v4490_v28, %s7034_s28  ;;  %v3888_v35 = vpop.permute.xlu1 %3887   ;;  %v4666_v28 = vsel %vm4_vm0, %v6796_v25, %v6795_v24  ;;  %v6837_v17 = vld [vmem:[%s13126_s0 + $0x201] ss:$8 sm:$0xf0]  }
 0x2e3   :  { %6585 = vst.msk [vmem:[%s13127_s1 + $0x1b0] sm:$0xff] %vm3395_vm6, %v3888_v35   ;;  %v6845_v21 = vld [vmem:[%s13126_s0 + $0x501] ss:$8 sm:$0xf]  }
 0x2e4   :  { %v3877_v39 = vpop.permute.xlu0 %3876   ;;  %4524 = vrot.lane.b32.xlu1 %v4523_v34, %s7034_s28  ;;  %v4699_v34 = vsel %vm4_vm0, %v6805_v30, %v6804_v29  ;;  %v6846_v22 = vld [vmem:[%s13126_s0 + $0x501] ss:$8 sm:$0xf0]  }
 0x2e5   :  { %6582 = vst.msk [vmem:[%s13127_s1 + $0x190] sm:$0xff] %vm3395_vm6, %v3877_v39   ;;  %v6842_v24 = vld [vmem:[%s13126_s0 + $0x401] ss:$8 sm:$0xf]  }
 0x2e6   :  { %4513 = vrot.lane.b32.xlu0 %v4512_v36, %s7034_s28  ;;  %v3910_v43 = vpop.permute.xlu1 %3909   ;;  %v4688_v36 = vsel %vm4_vm0, %v6802_v33, %v6801_v32  ;;  %v6843_v25 = vld [vmem:[%s13126_s0 + $0x401] ss:$8 sm:$0xf0]  }
 0x2e7   :  { %6591 = vst.msk [vmem:[%s13127_s1 + $0x1f0] sm:$0xff] %vm3395_vm6, %v3910_v43   ;;  %v6851_v29 = vld [vmem:[%s13126_s0 + $0x701] ss:$8 sm:$0xf]  }
 0x2e8   :  { %v3899_v47 = vpop.permute.xlu0 %3898   ;;  %4546 = vrot.lane.b32.xlu1 %v4545_v42, %s7034_s28  ;;  %v4721_v42 = vsel %vm4_vm0, %v6811_v38, %v6810_v37  ;;  %v6852_v30 = vld [vmem:[%s13126_s0 + $0x701] ss:$8 sm:$0xf0]  }
 0x2e9   :  { %6588 = vst.msk [vmem:[%s13127_s1 + $0x1d0] sm:$0xff] %vm3395_vm6, %v3899_v47   ;;  %v6848_v32 = vld [vmem:[%s13126_s0 + $0x601] ss:$8 sm:$0xf]  }
 0x2ea   :  { %4535 = vrot.lane.b32.xlu0 %v4534_v44, %s7034_s28  ;;  %v3932_v51 = vpop.permute.xlu1 %3931   ;;  %v4710_v44 = vsel %vm4_vm0, %v6808_v41, %v6807_v40  ;;  %v6849_v33 = vld [vmem:[%s13126_s0 + $0x601] ss:$8 sm:$0xf0]  }
 0x2eb   :  { %6597 = vst.msk [vmem:[%s13127_s1 + $0x38] sm:$0xff] %vm3395_vm6, %v3932_v51   ;;  %v6857_v37 = vld [vmem:[%s13126_s0 + $0x901] ss:$8 sm:$0xf]  }
 0x2ec   :  { %v3921_v55 = vpop.permute.xlu0 %3920   ;;  %4568 = vrot.lane.b32.xlu1 %v4567_v50, %s7034_s28  ;;  %v4743_v50 = vsel %vm4_vm0, %v6817_v46, %v6816_v45  ;;  %v6858_v38 = vld [vmem:[%s13126_s0 + $0x901] ss:$8 sm:$0xf0]  }
 0x2ed   :  { %6594 = vst.msk [vmem:[%s13127_s1 + $0x18] sm:$0xff] %vm3395_vm6, %v3921_v55   ;;  %v6854_v40 = vld [vmem:[%s13126_s0 + $0x801] ss:$8 sm:$0xf]  }
 0x2ee   :  { %4557 = vrot.lane.b32.xlu0 %v4556_v52, %s7034_s28  ;;  %v3954_v59 = vpop.permute.xlu1 %3953   ;;  %v4732_v52 = vsel %vm4_vm0, %v6814_v49, %v6813_v48  ;;  %v6855_v41 = vld [vmem:[%s13126_s0 + $0x801] ss:$8 sm:$0xf0]  }
 0x2ef   :  { %6603 = vst.msk [vmem:[%s13127_s1 + $0x78] sm:$0xff] %vm3395_vm6, %v3954_v59   ;;  %v6863_v45 = vld [vmem:[%s13126_s0 + $0xb01] ss:$8 sm:$0xf]  }
 0x2f0   :  { %v3943_v63 = vpop.permute.xlu0 %3942   ;;  %4590 = vrot.lane.b32.xlu1 %v4589_v58, %s7034_s28  ;;  %v4765_v58 = vsel %vm4_vm0, %v6823_v54, %v6822_v53  ;;  %v6864_v46 = vld [vmem:[%s13126_s0 + $0xb01] ss:$8 sm:$0xf0]  }
 0x2f1   :  { %6600 = vst.msk [vmem:[%s13127_s1 + $0x58] sm:$0xff] %vm3395_vm6, %v3943_v63   ;;  %v6860_v48 = vld [vmem:[%s13126_s0 + $0xa01] ss:$8 sm:$0xf]  }
 0x2f2   :  { %4579 = vrot.lane.b32.xlu0 %v4578_v60, %s7034_s28  ;;  %v3976_v3 = vpop.permute.xlu1 %3975   ;;  %v4754_v60 = vsel %vm4_vm0, %v6820_v57, %v6819_v56  ;;  %v6861_v49 = vld [vmem:[%s13126_s0 + $0xa01] ss:$8 sm:$0xf0]  }
 0x2f3   :  { %6609 = vst.msk [vmem:[%s13127_s1 + $0xb8] sm:$0xff] %vm3395_vm6, %v3976_v3   ;;  %v6869_v53 = vld [vmem:[%s13126_s0 + $0xd01] ss:$8 sm:$0xf]  }
 0x2f4   :  { %v3965_v7 = vpop.permute.xlu0 %3964   ;;  %4612 = vrot.lane.b32.xlu1 %v4611_v2, %s7034_s28  ;;  %v4787_v2 = vsel %vm4_vm0, %v6829_v62, %v6828_v61  ;;  %v6870_v54 = vld [vmem:[%s13126_s0 + $0xd01] ss:$8 sm:$0xf0]  }
 0x2f5   :  { %6606 = vst.msk [vmem:[%s13127_s1 + $0x98] sm:$0xff] %vm3395_vm6, %v3965_v7   ;;  %v6866_v56 = vld [vmem:[%s13126_s0 + $0xc01] ss:$8 sm:$0xf]  }
 0x2f6   :  { %4601 = vrot.lane.b32.xlu0 %v4600_v4, %s7034_s28  ;;  %v3998_v11 = vpop.permute.xlu1 %3997   ;;  %v4776_v4 = vsel %vm4_vm0, %v6826_v1, %v6825_v0  ;;  %v6867_v57 = vld [vmem:[%s13126_s0 + $0xc01] ss:$8 sm:$0xf0]  }
 0x2f7   :  { %6615 = vst.msk [vmem:[%s13127_s1 + $0xf8] sm:$0xff] %vm3395_vm6, %v3998_v11   ;;  %v6875_v61 = vld [vmem:[%s13126_s0 + $0xf01] ss:$8 sm:$0xf]  }
 0x2f8   :  { %v3987_v15 = vpop.permute.xlu0 %3986   ;;  %4634 = vrot.lane.b32.xlu1 %v4633_v10, %s7034_s28  ;;  %v4808_v10 = vsel %vm4_vm0, %v6834_v6, %v6833_v5  ;;  %v6876_v62 = vld [vmem:[%s13126_s0 + $0xf01] ss:$8 sm:$0xf0]  }
 0x2f9   :  { %6612 = vst.msk [vmem:[%s13127_s1 + $0xd8] sm:$0xff] %vm3395_vm6, %v3987_v15   ;;  %v6872_v0 = vld [vmem:[%s13126_s0 + $0xe01] ss:$8 sm:$0xf]  }
 0x2fa   :  { %4623 = vrot.lane.b32.xlu0 %v4622_v12, %s7034_s28  ;;  %v4020_v19 = vpop.permute.xlu1 %4019   ;;  %v4798_v12 = vsel %vm4_vm0, %v6832_v9, %v6831_v8  ;;  %v6873_v1 = vld [vmem:[%s13126_s0 + $0xe01] ss:$8 sm:$0xf0]  }
 0x2fb   :  { %6621 = vst.msk [vmem:[%s13127_s1 + $0x138] sm:$0xff] %vm3395_vm6, %v4020_v19   ;;  %v6881_v5 = vld [vmem:[%s13126_s0 + $0x141] ss:$8 sm:$0xf]  }
 0x2fc   :  { %v4009_v23 = vpop.permute.xlu0 %4008   ;;  %4656 = vrot.lane.b32.xlu1 %v4655_v18, %s7034_s28  ;;  %v4830_v18 = vsel %vm4_vm0, %v6840_v14, %v6839_v13  ;;  %v6882_v6 = vld [vmem:[%s13126_s0 + $0x141] ss:$8 sm:$0xf0]  }
 0x2fd   :  { %6618 = vst.msk [vmem:[%s13127_s1 + $0x118] sm:$0xff] %vm3395_vm6, %v4009_v23   ;;  %v6878_v8 = vld [vmem:[%s13126_s0 + $0x41] ss:$8 sm:$0xf]  }
 0x2fe   :  { %4645 = vrot.lane.b32.xlu0 %v4644_v20, %s7034_s28  ;;  %v4042_v27 = vpop.permute.xlu1 %4041   ;;  %v4819_v20 = vsel %vm4_vm0, %v6837_v17, %v6836_v16  ;;  %v6879_v9 = vld [vmem:[%s13126_s0 + $0x41] ss:$8 sm:$0xf0]  }
 0x2ff   :  { %6627 = vst.msk [vmem:[%s13127_s1 + $0x178] sm:$0xff] %vm3395_vm6, %v4042_v27   ;;  %v6887_v13 = vld [vmem:[%s13126_s0 + $0x341] ss:$8 sm:$0xf]  }
 0x300   :  { %v4031_v31 = vpop.permute.xlu0 %4030   ;;  %4678 = vrot.lane.b32.xlu1 %v4677_v26, %s7034_s28  ;;  %v4852_v26 = vsel %vm4_vm0, %v6846_v22, %v6845_v21  ;;  %v6888_v14 = vld [vmem:[%s13126_s0 + $0x341] ss:$8 sm:$0xf0]  }
 0x301   :  { %6624 = vst.msk [vmem:[%s13127_s1 + $0x158] sm:$0xff] %vm3395_vm6, %v4031_v31   ;;  %v6884_v16 = vld [vmem:[%s13126_s0 + $0x241] ss:$8 sm:$0xf]  }
 0x302   :  { %4667 = vrot.lane.b32.xlu0 %v4666_v28, %s7034_s28  ;;  %v4064_v35 = vpop.permute.xlu1 %4063   ;;  %v4841_v28 = vsel %vm4_vm0, %v6843_v25, %v6842_v24  ;;  %v6885_v17 = vld [vmem:[%s13126_s0 + $0x241] ss:$8 sm:$0xf0]  }
 0x303   :  { %6633 = vst.msk [vmem:[%s13127_s1 + $0x1b8] sm:$0xff] %vm3395_vm6, %v4064_v35   ;;  %v6893_v21 = vld [vmem:[%s13126_s0 + $0x541] ss:$8 sm:$0xf]  }
 0x304   :  { %v4053_v39 = vpop.permute.xlu0 %4052   ;;  %4700 = vrot.lane.b32.xlu1 %v4699_v34, %s7034_s28  ;;  %v4874_v34 = vsel %vm4_vm0, %v6852_v30, %v6851_v29  ;;  %v6894_v22 = vld [vmem:[%s13126_s0 + $0x541] ss:$8 sm:$0xf0]  }
 0x305   :  { %6630 = vst.msk [vmem:[%s13127_s1 + $0x198] sm:$0xff] %vm3395_vm6, %v4053_v39   ;;  %v6890_v24 = vld [vmem:[%s13126_s0 + $0x441] ss:$8 sm:$0xf]  }
 0x306   :  { %4689 = vrot.lane.b32.xlu0 %v4688_v36, %s7034_s28  ;;  %v4086_v43 = vpop.permute.xlu1 %4085   ;;  %v4863_v36 = vsel %vm4_vm0, %v6849_v33, %v6848_v32  ;;  %v6891_v25 = vld [vmem:[%s13126_s0 + $0x441] ss:$8 sm:$0xf0]  }
 0x307   :  { %6639 = vst.msk [vmem:[%s13127_s1 + $0x1f8] sm:$0xff] %vm3395_vm6, %v4086_v43   ;;  %v6899_v29 = vld [vmem:[%s13126_s0 + $0x741] ss:$8 sm:$0xf]  }
 0x308   :  { %v4075_v47 = vpop.permute.xlu0 %4074   ;;  %4722 = vrot.lane.b32.xlu1 %v4721_v42, %s7034_s28  ;;  %v4896_v42 = vsel %vm4_vm0, %v6858_v38, %v6857_v37  ;;  %v6900_v30 = vld [vmem:[%s13126_s0 + $0x741] ss:$8 sm:$0xf0]  }
 0x309   :  { %6636 = vst.msk [vmem:[%s13127_s1 + $0x1d8] sm:$0xff] %vm3395_vm6, %v4075_v47   ;;  %v6896_v32 = vld [vmem:[%s13126_s0 + $0x641] ss:$8 sm:$0xf]  }
 0x30a   :  { %4711 = vrot.lane.b32.xlu0 %v4710_v44, %s7034_s28  ;;  %v4107_v51 = vpop.permute.xlu1 %4106   ;;  %v4885_v44 = vsel %vm4_vm0, %v6855_v41, %v6854_v40  ;;  %v6897_v33 = vld [vmem:[%s13126_s0 + $0x641] ss:$8 sm:$0xf0]  }
 0x30b   :  { %6644 = vst.msk [vmem:[%s13127_s1 + $0x20] sm:$0xff] %vm4098_vm7, %v4107_v51   ;;  %v6905_v37 = vld [vmem:[%s13126_s0 + $0x941] ss:$8 sm:$0xf]  }
 0x30c   :  { %v4097_v55 = vpop.permute.xlu0 %4096   ;;  %4744 = vrot.lane.b32.xlu1 %v4743_v50, %s7034_s28  ;;  %v4918_v50 = vsel %vm4_vm0, %v6864_v46, %v6863_v45  ;;  %v6906_v38 = vld [vmem:[%s13126_s0 + $0x941] ss:$8 sm:$0xf0]  }
 0x30d   :  { %4099 = vst.msk [vmem:[%s13127_s1] sm:$0xff] %vm4098_vm7, %v4097_v55   ;;  %v6902_v40 = vld [vmem:[%s13126_s0 + $0x841] ss:$8 sm:$0xf]  }
 0x30e   :  { %4733 = vrot.lane.b32.xlu0 %v4732_v52, %s7034_s28  ;;  %v4129_v59 = vpop.permute.xlu1 %4128   ;;  %v4907_v52 = vsel %vm4_vm0, %v6861_v49, %v6860_v48  ;;  %v6903_v41 = vld [vmem:[%s13126_s0 + $0x841] ss:$8 sm:$0xf0]  }
 0x30f   :  { %6650 = vst.msk [vmem:[%s13127_s1 + $0x60] sm:$0xff] %vm4098_vm7, %v4129_v59   ;;  %v6911_v45 = vld [vmem:[%s13126_s0 + $0xb41] ss:$8 sm:$0xf]  }
 0x310   :  { %v4118_v63 = vpop.permute.xlu0 %4117   ;;  %4766 = vrot.lane.b32.xlu1 %v4765_v58, %s7034_s28  ;;  %v4940_v58 = vsel %vm4_vm0, %v6870_v54, %v6869_v53  ;;  %v6912_v46 = vld [vmem:[%s13126_s0 + $0xb41] ss:$8 sm:$0xf0]  }
 0x311   :  { %6647 = vst.msk [vmem:[%s13127_s1 + $0x40] sm:$0xff] %vm4098_vm7, %v4118_v63   ;;  %v6908_v48 = vld [vmem:[%s13126_s0 + $0xa41] ss:$8 sm:$0xf]  }
 0x312   :  { %4755 = vrot.lane.b32.xlu0 %v4754_v60, %s7034_s28  ;;  %v4151_v3 = vpop.permute.xlu1 %4150   ;;  %v4929_v60 = vsel %vm4_vm0, %v6867_v57, %v6866_v56  ;;  %v6909_v49 = vld [vmem:[%s13126_s0 + $0xa41] ss:$8 sm:$0xf0]  }
 0x313   :  { %6656 = vst.msk [vmem:[%s13127_s1 + $0xa0] sm:$0xff] %vm4098_vm7, %v4151_v3   ;;  %v6917_v53 = vld [vmem:[%s13126_s0 + $0xd41] ss:$8 sm:$0xf]  }
 0x314   :  { %v4140_v7 = vpop.permute.xlu0 %4139   ;;  %4788 = vrot.lane.b32.xlu1 %v4787_v2, %s7034_s28  ;;  %v4962_v2 = vsel %vm4_vm0, %v6876_v62, %v6875_v61  ;;  %v6918_v54 = vld [vmem:[%s13126_s0 + $0xd41] ss:$8 sm:$0xf0]  }
 0x315   :  { %6653 = vst.msk [vmem:[%s13127_s1 + $0x80] sm:$0xff] %vm4098_vm7, %v4140_v7   ;;  %v6914_v56 = vld [vmem:[%s13126_s0 + $0xc41] ss:$8 sm:$0xf]  }
 0x316   :  { %4777 = vrot.lane.b32.xlu0 %v4776_v4, %s7034_s28  ;;  %v4173_v11 = vpop.permute.xlu1 %4172   ;;  %v4951_v4 = vsel %vm4_vm0, %v6873_v1, %v6872_v0  ;;  %v6915_v57 = vld [vmem:[%s13126_s0 + $0xc41] ss:$8 sm:$0xf0]  }
 0x317   :  { %6662 = vst.msk [vmem:[%s13127_s1 + $0xe0] sm:$0xff] %vm4098_vm7, %v4173_v11   ;;  %v6923_v61 = vld [vmem:[%s13126_s0 + $0xf41] ss:$8 sm:$0xf]  }
 0x318   :  { %v4162_v15 = vpop.permute.xlu0 %4161   ;;  %4809 = vrot.lane.b32.xlu1 %v4808_v10, %s7035_s19  ;;  %v4984_v10 = vsel %vm4_vm0, %v6882_v6, %v6881_v5  ;;  %v6924_v62 = vld [vmem:[%s13126_s0 + $0xf41] ss:$8 sm:$0xf0]  }
 0x319   :  { %6659 = vst.msk [vmem:[%s13127_s1 + $0xc0] sm:$0xff] %vm4098_vm7, %v4162_v15   ;;  %v6920_v0 = vld [vmem:[%s13126_s0 + $0xe41] ss:$8 sm:$0xf]  }
 0x31a   :  { %4799 = vrot.lane.b32.xlu0 %v4798_v12, %s7035_s19  ;;  %v4195_v19 = vpop.permute.xlu1 %4194   ;;  %v4973_v12 = vsel %vm4_vm0, %v6879_v9, %v6878_v8  ;;  %v6921_v1 = vld [vmem:[%s13126_s0 + $0xe41] ss:$8 sm:$0xf0]  }
 0x31b   :  { %6668 = vst.msk [vmem:[%s13127_s1 + $0x120] sm:$0xff] %vm4098_vm7, %v4195_v19   ;;  %v6929_v5 = vld [vmem:[%s13126_s0 + $0x181] ss:$8 sm:$0xf]  }
 0x31c   :  { %v4184_v23 = vpop.permute.xlu0 %4183   ;;  %4831 = vrot.lane.b32.xlu1 %v4830_v18, %s7035_s19  ;;  %v5006_v18 = vsel %vm4_vm0, %v6888_v14, %v6887_v13  ;;  %v6930_v6 = vld [vmem:[%s13126_s0 + $0x181] ss:$8 sm:$0xf0]  }
 0x31d   :  { %6665 = vst.msk [vmem:[%s13127_s1 + $0x100] sm:$0xff] %vm4098_vm7, %v4184_v23   ;;  %v6926_v8 = vld [vmem:[%s13126_s0 + $0x81] ss:$8 sm:$0xf]  }
 0x31e   :  { %4820 = vrot.lane.b32.xlu0 %v4819_v20, %s7035_s19  ;;  %v4217_v27 = vpop.permute.xlu1 %4216   ;;  %v4995_v20 = vsel %vm4_vm0, %v6885_v17, %v6884_v16  ;;  %v6927_v9 = vld [vmem:[%s13126_s0 + $0x81] ss:$8 sm:$0xf0]  }
 0x31f   :  { %6674 = vst.msk [vmem:[%s13127_s1 + $0x160] sm:$0xff] %vm4098_vm7, %v4217_v27   ;;  %v6935_v13 = vld [vmem:[%s13126_s0 + $0x381] ss:$8 sm:$0xf]  }
 0x320   :  { %v4206_v31 = vpop.permute.xlu0 %4205   ;;  %4853 = vrot.lane.b32.xlu1 %v4852_v26, %s7035_s19  ;;  %v5028_v26 = vsel %vm4_vm0, %v6894_v22, %v6893_v21  ;;  %v6936_v14 = vld [vmem:[%s13126_s0 + $0x381] ss:$8 sm:$0xf0]  }
 0x321   :  { %6671 = vst.msk [vmem:[%s13127_s1 + $0x140] sm:$0xff] %vm4098_vm7, %v4206_v31   ;;  %v6932_v16 = vld [vmem:[%s13126_s0 + $0x281] ss:$8 sm:$0xf]  }
 0x322   :  { %4842 = vrot.lane.b32.xlu0 %v4841_v28, %s7035_s19  ;;  %v4239_v35 = vpop.permute.xlu1 %4238   ;;  %v5017_v28 = vsel %vm4_vm0, %v6891_v25, %v6890_v24  ;;  %v6933_v17 = vld [vmem:[%s13126_s0 + $0x281] ss:$8 sm:$0xf0]  }
 0x323   :  { %6680 = vst.msk [vmem:[%s13127_s1 + $0x1a0] sm:$0xff] %vm4098_vm7, %v4239_v35   ;;  %v6941_v21 = vld [vmem:[%s13126_s0 + $0x581] ss:$8 sm:$0xf]  }
 0x324   :  { %v4228_v39 = vpop.permute.xlu0 %4227   ;;  %4875 = vrot.lane.b32.xlu1 %v4874_v34, %s7035_s19  ;;  %v5050_v34 = vsel %vm4_vm0, %v6900_v30, %v6899_v29  ;;  %v6942_v22 = vld [vmem:[%s13126_s0 + $0x581] ss:$8 sm:$0xf0]  }
 0x325   :  { %6677 = vst.msk [vmem:[%s13127_s1 + $0x180] sm:$0xff] %vm4098_vm7, %v4228_v39   ;;  %v6938_v24 = vld [vmem:[%s13126_s0 + $0x481] ss:$8 sm:$0xf]  }
 0x326   :  { %4864 = vrot.lane.b32.xlu0 %v4863_v36, %s7035_s19  ;;  %v4261_v43 = vpop.permute.xlu1 %4260   ;;  %v5039_v36 = vsel %vm4_vm0, %v6897_v33, %v6896_v32  ;;  %v6939_v25 = vld [vmem:[%s13126_s0 + $0x481] ss:$8 sm:$0xf0]  }
 0x327   :  { %6686 = vst.msk [vmem:[%s13127_s1 + $0x1e0] sm:$0xff] %vm4098_vm7, %v4261_v43   ;;  %v6947_v29 = vld [vmem:[%s13126_s0 + $0x781] ss:$8 sm:$0xf]  }
 0x328   :  { %v4250_v47 = vpop.permute.xlu0 %4249   ;;  %4897 = vrot.lane.b32.xlu1 %v4896_v42, %s7035_s19  ;;  %v5072_v42 = vsel %vm4_vm0, %v6906_v38, %v6905_v37  ;;  %v6948_v30 = vld [vmem:[%s13126_s0 + $0x781] ss:$8 sm:$0xf0]  }
 0x329   :  { %6683 = vst.msk [vmem:[%s13127_s1 + $0x1c0] sm:$0xff] %vm4098_vm7, %v4250_v47   ;;  %v6944_v32 = vld [vmem:[%s13126_s0 + $0x681] ss:$8 sm:$0xf]  }
 0x32a   :  { %4886 = vrot.lane.b32.xlu0 %v4885_v44, %s7035_s19  ;;  %v4283_v51 = vpop.permute.xlu1 %4282   ;;  %v5061_v44 = vsel %vm4_vm0, %v6903_v41, %v6902_v40  ;;  %v6945_v33 = vld [vmem:[%s13126_s0 + $0x681] ss:$8 sm:$0xf0]  }
 0x32b   :  { %6692 = vst.msk [vmem:[%s13127_s1 + $0x28] sm:$0xff] %vm4098_vm7, %v4283_v51   ;;  %v6953_v37 = vld [vmem:[%s13126_s0 + $0x981] ss:$8 sm:$0xf]  }
 0x32c   :  { %v4272_v55 = vpop.permute.xlu0 %4271   ;;  %4919 = vrot.lane.b32.xlu1 %v4918_v50, %s7035_s19  ;;  %v5094_v50 = vsel %vm4_vm0, %v6912_v46, %v6911_v45  ;;  %v6954_v38 = vld [vmem:[%s13126_s0 + $0x981] ss:$8 sm:$0xf0]  }
 0x32d   :  { %6689 = vst.msk [vmem:[%s13127_s1 + $0x8] sm:$0xff] %vm4098_vm7, %v4272_v55   ;;  %v6950_v40 = vld [vmem:[%s13126_s0 + $0x881] ss:$8 sm:$0xf]  }
 0x32e   :  { %4908 = vrot.lane.b32.xlu0 %v4907_v52, %s7035_s19  ;;  %v4305_v59 = vpop.permute.xlu1 %4304   ;;  %v5083_v52 = vsel %vm4_vm0, %v6909_v49, %v6908_v48  ;;  %v6951_v41 = vld [vmem:[%s13126_s0 + $0x881] ss:$8 sm:$0xf0]  }
 0x32f   :  { %6698 = vst.msk [vmem:[%s13127_s1 + $0x68] sm:$0xff] %vm4098_vm7, %v4305_v59   ;;  %v6959_v45 = vld [vmem:[%s13126_s0 + $0xb81] ss:$8 sm:$0xf]  }
 0x330   :  { %v4294_v63 = vpop.permute.xlu0 %4293   ;;  %4941 = vrot.lane.b32.xlu1 %v4940_v58, %s7035_s19  ;;  %v5116_v58 = vsel %vm4_vm0, %v6918_v54, %v6917_v53  ;;  %v6960_v46 = vld [vmem:[%s13126_s0 + $0xb81] ss:$8 sm:$0xf0]  }
 0x331   :  { %6695 = vst.msk [vmem:[%s13127_s1 + $0x48] sm:$0xff] %vm4098_vm7, %v4294_v63   ;;  %v6956_v48 = vld [vmem:[%s13126_s0 + $0xa81] ss:$8 sm:$0xf]  }
 0x332   :  { %4930 = vrot.lane.b32.xlu0 %v4929_v60, %s7035_s19  ;;  %v4327_v3 = vpop.permute.xlu1 %4326   ;;  %v5105_v60 = vsel %vm4_vm0, %v6915_v57, %v6914_v56  ;;  %v6957_v49 = vld [vmem:[%s13126_s0 + $0xa81] ss:$8 sm:$0xf0]  }
 0x333   :  { %6704 = vst.msk [vmem:[%s13127_s1 + $0xa8] sm:$0xff] %vm4098_vm7, %v4327_v3   ;;  %v6965_v53 = vld [vmem:[%s13126_s0 + $0xd81] ss:$8 sm:$0xf]  }
 0x334   :  { %v4316_v7 = vpop.permute.xlu0 %4315   ;;  %4963 = vrot.lane.b32.xlu1 %v4962_v2, %s7035_s19  ;;  %v5138_v2 = vsel %vm4_vm0, %v6924_v62, %v6923_v61  ;;  %v6966_v54 = vld [vmem:[%s13126_s0 + $0xd81] ss:$8 sm:$0xf0]  }
 0x335   :  { %6701 = vst.msk [vmem:[%s13127_s1 + $0x88] sm:$0xff] %vm4098_vm7, %v4316_v7   ;;  %v6962_v56 = vld [vmem:[%s13126_s0 + $0xc81] ss:$8 sm:$0xf]  }
 0x336   :  { %4952 = vrot.lane.b32.xlu0 %v4951_v4, %s7035_s19  ;;  %v4349_v11 = vpop.permute.xlu1 %4348   ;;  %v5127_v4 = vsel %vm4_vm0, %v6921_v1, %v6920_v0  ;;  %v6963_v57 = vld [vmem:[%s13126_s0 + $0xc81] ss:$8 sm:$0xf0]  }
 0x337   :  { %6710 = vst.msk [vmem:[%s13127_s1 + $0xe8] sm:$0xff] %vm4098_vm7, %v4349_v11   ;;  %v6971_v61 = vld [vmem:[%s13126_s0 + $0xf81] ss:$8 sm:$0xf]  }
 0x338   :  { %v4338_v15 = vpop.permute.xlu0 %4337   ;;  %4985 = vrot.lane.b32.xlu1 %v4984_v10, %s7035_s19  ;;  %v5160_v10 = vsel %vm4_vm0, %v6930_v6, %v6929_v5  ;;  %v6972_v62 = vld [vmem:[%s13126_s0 + $0xf81] ss:$8 sm:$0xf0]  }
 0x339   :  { %6707 = vst.msk [vmem:[%s13127_s1 + $0xc8] sm:$0xff] %vm4098_vm7, %v4338_v15   ;;  %v6968_v0 = vld [vmem:[%s13126_s0 + $0xe81] ss:$8 sm:$0xf]  }
 0x33a   :  { %4974 = vrot.lane.b32.xlu0 %v4973_v12, %s7035_s19  ;;  %v4371_v19 = vpop.permute.xlu1 %4370   ;;  %v5149_v12 = vsel %vm4_vm0, %v6927_v9, %v6926_v8  ;;  %v6969_v1 = vld [vmem:[%s13126_s0 + $0xe81] ss:$8 sm:$0xf0]  }
 0x33b   :  { %6716 = vst.msk [vmem:[%s13127_s1 + $0x128] sm:$0xff] %vm4098_vm7, %v4371_v19   ;;  %v6977_v5 = vld [vmem:[%s13126_s0 + $0x1c1] ss:$8 sm:$0xf]  }
 0x33c   :  { %v4360_v23 = vpop.permute.xlu0 %4359   ;;  %5007 = vrot.lane.b32.xlu1 %v5006_v18, %s7035_s19  ;;  %v5182_v18 = vsel %vm4_vm0, %v6936_v14, %v6935_v13  ;;  %v6978_v6 = vld [vmem:[%s13126_s0 + $0x1c1] ss:$8 sm:$0xf0]  }
 0x33d   :  { %6713 = vst.msk [vmem:[%s13127_s1 + $0x108] sm:$0xff] %vm4098_vm7, %v4360_v23   ;;  %v6974_v8 = vld [vmem:[%s13126_s0 + $0xc1] ss:$8 sm:$0xf]  }
 0x33e   :  { %4996 = vrot.lane.b32.xlu0 %v4995_v20, %s7035_s19  ;;  %v4393_v27 = vpop.permute.xlu1 %4392   ;;  %v5171_v20 = vsel %vm4_vm0, %v6933_v17, %v6932_v16  ;;  %v6975_v9 = vld [vmem:[%s13126_s0 + $0xc1] ss:$8 sm:$0xf0]  }
 0x33f   :  { %6722 = vst.msk [vmem:[%s13127_s1 + $0x168] sm:$0xff] %vm4098_vm7, %v4393_v27   ;;  %v6983_v13 = vld [vmem:[%s13126_s0 + $0x3c1] ss:$8 sm:$0xf]  }
 0x340   :  { %v4382_v31 = vpop.permute.xlu0 %4381   ;;  %5029 = vrot.lane.b32.xlu1 %v5028_v26, %s7035_s19  ;;  %v5204_v26 = vsel %vm4_vm0, %v6942_v22, %v6941_v21  ;;  %v6984_v14 = vld [vmem:[%s13126_s0 + $0x3c1] ss:$8 sm:$0xf0]  }
 0x341   :  { %6719 = vst.msk [vmem:[%s13127_s1 + $0x148] sm:$0xff] %vm4098_vm7, %v4382_v31   ;;  %v6980_v16 = vld [vmem:[%s13126_s0 + $0x2c1] ss:$8 sm:$0xf]  }
 0x342   :  { %5018 = vrot.lane.b32.xlu0 %v5017_v28, %s7035_s19  ;;  %v4415_v35 = vpop.permute.xlu1 %4414   ;;  %v5193_v28 = vsel %vm4_vm0, %v6939_v25, %v6938_v24  ;;  %v6981_v17 = vld [vmem:[%s13126_s0 + $0x2c1] ss:$8 sm:$0xf0]  }
 0x343   :  { %6728 = vst.msk [vmem:[%s13127_s1 + $0x1a8] sm:$0xff] %vm4098_vm7, %v4415_v35   ;;  %v6989_v21 = vld [vmem:[%s13126_s0 + $0x5c1] ss:$8 sm:$0xf]  }
 0x344   :  { %v4404_v39 = vpop.permute.xlu0 %4403   ;;  %5051 = vrot.lane.b32.xlu1 %v5050_v34, %s7035_s19  ;;  %v5226_v34 = vsel %vm4_vm0, %v6948_v30, %v6947_v29  ;;  %v6990_v22 = vld [vmem:[%s13126_s0 + $0x5c1] ss:$8 sm:$0xf0]  }
 0x345   :  { %6725 = vst.msk [vmem:[%s13127_s1 + $0x188] sm:$0xff] %vm4098_vm7, %v4404_v39   ;;  %v6986_v24 = vld [vmem:[%s13126_s0 + $0x4c1] ss:$8 sm:$0xf]  }
 0x346   :  { %5040 = vrot.lane.b32.xlu0 %v5039_v36, %s7035_s19  ;;  %v4437_v43 = vpop.permute.xlu1 %4436   ;;  %v5215_v36 = vsel %vm4_vm0, %v6945_v33, %v6944_v32  ;;  %v6987_v25 = vld [vmem:[%s13126_s0 + $0x4c1] ss:$8 sm:$0xf0]  }
 0x347   :  { %6734 = vst.msk [vmem:[%s13127_s1 + $0x1e8] sm:$0xff] %vm4098_vm7, %v4437_v43   ;;  %v6995_v29 = vld [vmem:[%s13126_s0 + $0x7c1] ss:$8 sm:$0xf]  }
 0x348   :  { %v4426_v47 = vpop.permute.xlu0 %4425   ;;  %5073 = vrot.lane.b32.xlu1 %v5072_v42, %s7035_s19  ;;  %v5248_v42 = vsel %vm4_vm0, %v6954_v38, %v6953_v37  ;;  %v6996_v30 = vld [vmem:[%s13126_s0 + $0x7c1] ss:$8 sm:$0xf0]  }
 0x349   :  { %6731 = vst.msk [vmem:[%s13127_s1 + $0x1c8] sm:$0xff] %vm4098_vm7, %v4426_v47   ;;  %v6992_v32 = vld [vmem:[%s13126_s0 + $0x6c1] ss:$8 sm:$0xf]  }
 0x34a   :  { %5062 = vrot.lane.b32.xlu0 %v5061_v44, %s7035_s19  ;;  %v4459_v51 = vpop.permute.xlu1 %4458   ;;  %v5237_v44 = vsel %vm4_vm0, %v6951_v41, %v6950_v40  ;;  %v6993_v33 = vld [vmem:[%s13126_s0 + $0x6c1] ss:$8 sm:$0xf0]  }
 0x34b   :  { %6740 = vst.msk [vmem:[%s13127_s1 + $0x30] sm:$0xff] %vm4098_vm7, %v4459_v51   ;;  %v7001_v37 = vld [vmem:[%s13126_s0 + $0x9c1] ss:$8 sm:$0xf]  }
 0x34c   :  { %v4448_v55 = vpop.permute.xlu0 %4447   ;;  %5095 = vrot.lane.b32.xlu1 %v5094_v50, %s7035_s19  ;;  %v5270_v50 = vsel %vm4_vm0, %v6960_v46, %v6959_v45  ;;  %v7002_v38 = vld [vmem:[%s13126_s0 + $0x9c1] ss:$8 sm:$0xf0]  }
 0x34d   :  { %6737 = vst.msk [vmem:[%s13127_s1 + $0x10] sm:$0xff] %vm4098_vm7, %v4448_v55   ;;  %v6998_v40 = vld [vmem:[%s13126_s0 + $0x8c1] ss:$8 sm:$0xf]  }
 0x34e   :  { %5084 = vrot.lane.b32.xlu0 %v5083_v52, %s7035_s19  ;;  %v4481_v59 = vpop.permute.xlu1 %4480   ;;  %v5259_v52 = vsel %vm4_vm0, %v6957_v49, %v6956_v48  ;;  %v6999_v41 = vld [vmem:[%s13126_s0 + $0x8c1] ss:$8 sm:$0xf0]  }
 0x34f   :  { %6746 = vst.msk [vmem:[%s13127_s1 + $0x70] sm:$0xff] %vm4098_vm7, %v4481_v59   ;;  %v7007_v45 = vld [vmem:[%s13126_s0 + $0xbc1] ss:$8 sm:$0xf]  }
 0x350   :  { %v4470_v63 = vpop.permute.xlu0 %4469   ;;  %5117 = vrot.lane.b32.xlu1 %v5116_v58, %s7035_s19  ;;  %v5292_v58 = vsel %vm4_vm0, %v6966_v54, %v6965_v53  ;;  %v7008_v46 = vld [vmem:[%s13126_s0 + $0xbc1] ss:$8 sm:$0xf0]  }
 0x351   :  { %6743 = vst.msk [vmem:[%s13127_s1 + $0x50] sm:$0xff] %vm4098_vm7, %v4470_v63   ;;  %v7004_v48 = vld [vmem:[%s13126_s0 + $0xac1] ss:$8 sm:$0xf]  }
 0x352   :  { %5106 = vrot.lane.b32.xlu0 %v5105_v60, %s7035_s19  ;;  %v4503_v3 = vpop.permute.xlu1 %4502   ;;  %v5281_v60 = vsel %vm4_vm0, %v6963_v57, %v6962_v56  ;;  %v7005_v49 = vld [vmem:[%s13126_s0 + $0xac1] ss:$8 sm:$0xf0]  }
 0x353   :  { %6752 = vst.msk [vmem:[%s13127_s1 + $0xb0] sm:$0xff] %vm4098_vm7, %v4503_v3   ;;  %v7013_v53 = vld [vmem:[%s13126_s0 + $0xdc1] ss:$8 sm:$0xf]  }
 0x354   :  { %v4492_v7 = vpop.permute.xlu0 %4491   ;;  %5139 = vrot.lane.b32.xlu1 %v5138_v2, %s7035_s19  ;;  %v5314_v2 = vsel %vm4_vm0, %v6972_v62, %v6971_v61  ;;  %v7014_v54 = vld [vmem:[%s13126_s0 + $0xdc1] ss:$8 sm:$0xf0]  }
 0x355   :  { %6749 = vst.msk [vmem:[%s13127_s1 + $0x90] sm:$0xff] %vm4098_vm7, %v4492_v7   ;;  %v7010_v56 = vld [vmem:[%s13126_s0 + $0xcc1] ss:$8 sm:$0xf]  }
 0x356   :  { %5128 = vrot.lane.b32.xlu0 %v5127_v4, %s7035_s19  ;;  %v4525_v11 = vpop.permute.xlu1 %4524   ;;  %v5303_v4 = vsel %vm4_vm0, %v6969_v1, %v6968_v0  ;;  %v7011_v57 = vld [vmem:[%s13126_s0 + $0xcc1] ss:$8 sm:$0xf0]  }
 0x357   :  { %6758 = vst.msk [vmem:[%s13127_s1 + $0xf0] sm:$0xff] %vm4098_vm7, %v4525_v11   ;;  %v7019_v61 = vld [vmem:[%s13126_s0 + $0xfc1] ss:$8 sm:$0xf]  }
 0x358   :  { %v4514_v15 = vpop.permute.xlu0 %4513   ;;  %5161 = vrot.lane.b32.xlu1 %v5160_v10, %s7035_s19  ;;  %v5336_v10 = vsel %vm4_vm0, %v6978_v6, %v6977_v5  ;;  %v7020_v62 = vld [vmem:[%s13126_s0 + $0xfc1] ss:$8 sm:$0xf0]  }
 0x359   :  { %6755 = vst.msk [vmem:[%s13127_s1 + $0xd0] sm:$0xff] %vm4098_vm7, %v4514_v15   ;;  %v7016_v0 = vld [vmem:[%s13126_s0 + $0xec1] ss:$8 sm:$0xf]  }
 0x35a   :  { %5150 = vrot.lane.b32.xlu0 %v5149_v12, %s7035_s19  ;;  %v4547_v19 = vpop.permute.xlu1 %4546   ;;  %v5325_v12 = vsel %vm4_vm0, %v6975_v9, %v6974_v8  ;;  %v7017_v1 = vld [vmem:[%s13126_s0 + $0xec1] ss:$8 sm:$0xf0]  }
 0x35b   :  { %6764 = vst.msk [vmem:[%s13127_s1 + $0x130] sm:$0xff] %vm4098_vm7, %v4547_v19  }
 0x35c   :  { %v4536_v23 = vpop.permute.xlu0 %4535   ;;  %5183 = vrot.lane.b32.xlu1 %v5182_v18, %s7035_s19  ;;  %v5358_v18 = vsel %vm4_vm0, %v6984_v14, %v6983_v13 }
 0x35d   :  { %6761 = vst.msk [vmem:[%s13127_s1 + $0x110] sm:$0xff] %vm4098_vm7, %v4536_v23  }
 0x35e   :  { %5172 = vrot.lane.b32.xlu0 %v5171_v20, %s7035_s19  ;;  %v4569_v27 = vpop.permute.xlu1 %4568   ;;  %v5347_v20 = vsel %vm4_vm0, %v6981_v17, %v6980_v16 }
 0x35f   :  { %6770 = vst.msk [vmem:[%s13127_s1 + $0x170] sm:$0xff] %vm4098_vm7, %v4569_v27  }
 0x360   :  { %v4558_v31 = vpop.permute.xlu0 %4557   ;;  %5205 = vrot.lane.b32.xlu1 %v5204_v26, %s7035_s19  ;;  %v5380_v26 = vsel %vm4_vm0, %v6990_v22, %v6989_v21 }
 0x361   :  { %6767 = vst.msk [vmem:[%s13127_s1 + $0x150] sm:$0xff] %vm4098_vm7, %v4558_v31  }
 0x362   :  { %5194 = vrot.lane.b32.xlu0 %v5193_v28, %s7035_s19  ;;  %v4591_v35 = vpop.permute.xlu1 %4590   ;;  %v5369_v28 = vsel %vm4_vm0, %v6987_v25, %v6986_v24 }
 0x363   :  { %6776 = vst.msk [vmem:[%s13127_s1 + $0x1b0] sm:$0xff] %vm4098_vm7, %v4591_v35  }
 0x364   :  { %v4580_v39 = vpop.permute.xlu0 %4579   ;;  %5227 = vrot.lane.b32.xlu1 %v5226_v34, %s7035_s19  ;;  %v5402_v34 = vsel %vm4_vm0, %v6996_v30, %v6995_v29 }
 0x365   :  { %6773 = vst.msk [vmem:[%s13127_s1 + $0x190] sm:$0xff] %vm4098_vm7, %v4580_v39  }
 0x366   :  { %5216 = vrot.lane.b32.xlu0 %v5215_v36, %s7035_s19  ;;  %v4613_v43 = vpop.permute.xlu1 %4612   ;;  %v5391_v36 = vsel %vm4_vm0, %v6993_v33, %v6992_v32 }
 0x367   :  { %6782 = vst.msk [vmem:[%s13127_s1 + $0x1f0] sm:$0xff] %vm4098_vm7, %v4613_v43  }
 0x368   :  { %v4602_v47 = vpop.permute.xlu0 %4601   ;;  %5249 = vrot.lane.b32.xlu1 %v5248_v42, %s7035_s19  ;;  %v5424_v42 = vsel %vm4_vm0, %v7002_v38, %v7001_v37 }
 0x369   :  { %6779 = vst.msk [vmem:[%s13127_s1 + $0x1d0] sm:$0xff] %vm4098_vm7, %v4602_v47  }
 0x36a   :  { %5238 = vrot.lane.b32.xlu0 %v5237_v44, %s7035_s19  ;;  %v4635_v51 = vpop.permute.xlu1 %4634   ;;  %v5413_v44 = vsel %vm4_vm0, %v6999_v41, %v6998_v40 }
 0x36b   :  { %6788 = vst.msk [vmem:[%s13127_s1 + $0x38] sm:$0xff] %vm4098_vm7, %v4635_v51  }
 0x36c   :  { %v4624_v55 = vpop.permute.xlu0 %4623   ;;  %5271 = vrot.lane.b32.xlu1 %v5270_v50, %s7035_s19  ;;  %v5446_v50 = vsel %vm4_vm0, %v7008_v46, %v7007_v45 }
 0x36d   :  { %6785 = vst.msk [vmem:[%s13127_s1 + $0x18] sm:$0xff] %vm4098_vm7, %v4624_v55  }
 0x36e   :  { %5260 = vrot.lane.b32.xlu0 %v5259_v52, %s7035_s19  ;;  %v4657_v59 = vpop.permute.xlu1 %4656   ;;  %v5435_v52 = vsel %vm4_vm0, %v7005_v49, %v7004_v48 }
 0x36f   :  { %6794 = vst.msk [vmem:[%s13127_s1 + $0x78] sm:$0xff] %vm4098_vm7, %v4657_v59  }
 0x370   :  { %v4646_v63 = vpop.permute.xlu0 %4645   ;;  %5293 = vrot.lane.b32.xlu1 %v5292_v58, %s7035_s19  ;;  %v5468_v58 = vsel %vm4_vm0, %v7014_v54, %v7013_v53 }
 0x371   :  { %6791 = vst.msk [vmem:[%s13127_s1 + $0x58] sm:$0xff] %vm4098_vm7, %v4646_v63  }
 0x372   :  { %5282 = vrot.lane.b32.xlu0 %v5281_v60, %s7035_s19  ;;  %v4679_v3 = vpop.permute.xlu1 %4678   ;;  %v5457_v60 = vsel %vm4_vm0, %v7011_v57, %v7010_v56 }
 0x373   :  { %6800 = vst.msk [vmem:[%s13127_s1 + $0xb8] sm:$0xff] %vm4098_vm7, %v4679_v3  }
 0x374   :  { %v4668_v7 = vpop.permute.xlu0 %4667   ;;  %5315 = vrot.lane.b32.xlu1 %v5314_v2, %s7035_s19  ;;  %v5490_v2 = vsel %vm4_vm0, %v7020_v62, %v7019_v61 }
 0x375   :  { %6797 = vst.msk [vmem:[%s13127_s1 + $0x98] sm:$0xff] %vm4098_vm7, %v4668_v7  }
 0x376   :  { %5304 = vrot.lane.b32.xlu0 %v5303_v4, %s7035_s19  ;;  %v4701_v11 = vpop.permute.xlu1 %4700   ;;  %v5479_v4 = vsel %vm4_vm0, %v7017_v1, %v7016_v0 }
 0x377   :  { %6806 = vst.msk [vmem:[%s13127_s1 + $0xf8] sm:$0xff] %vm4098_vm7, %v4701_v11  }
 0x378   :  { %v4690_v15 = vpop.permute.xlu0 %4689   ;;  %5337 = vrot.lane.b32.xlu1 %v5336_v10, %s7035_s19 }
 0x379   :  { %6803 = vst.msk [vmem:[%s13127_s1 + $0xd8] sm:$0xff] %vm4098_vm7, %v4690_v15  }
 0x37a   :  { %5326 = vrot.lane.b32.xlu0 %v5325_v12, %s7035_s19  ;;  %v4723_v19 = vpop.permute.xlu1 %4722  }
 0x37b   :  { %6812 = vst.msk [vmem:[%s13127_s1 + $0x138] sm:$0xff] %vm4098_vm7, %v4723_v19  }
 0x37c   :  { %v4712_v23 = vpop.permute.xlu0 %4711   ;;  %5359 = vrot.lane.b32.xlu1 %v5358_v18, %s7035_s19 }
 0x37d   :  { %6809 = vst.msk [vmem:[%s13127_s1 + $0x118] sm:$0xff] %vm4098_vm7, %v4712_v23  }
 0x37e   :  { %5348 = vrot.lane.b32.xlu0 %v5347_v20, %s7035_s19  ;;  %v4745_v27 = vpop.permute.xlu1 %4744  }
 0x37f   :  { %6818 = vst.msk [vmem:[%s13127_s1 + $0x178] sm:$0xff] %vm4098_vm7, %v4745_v27  }
 0x380   :  { %v4734_v31 = vpop.permute.xlu0 %4733   ;;  %5381 = vrot.lane.b32.xlu1 %v5380_v26, %s7035_s19 }
 0x381   :  { %6815 = vst.msk [vmem:[%s13127_s1 + $0x158] sm:$0xff] %vm4098_vm7, %v4734_v31  }
 0x382   :  { %5370 = vrot.lane.b32.xlu0 %v5369_v28, %s7035_s19  ;;  %v4767_v35 = vpop.permute.xlu1 %4766  }
 0x383   :  { %6824 = vst.msk [vmem:[%s13127_s1 + $0x1b8] sm:$0xff] %vm4098_vm7, %v4767_v35  }
 0x384   :  { %v4756_v39 = vpop.permute.xlu0 %4755   ;;  %5403 = vrot.lane.b32.xlu1 %v5402_v34, %s7035_s19 }
 0x385   :  { %6821 = vst.msk [vmem:[%s13127_s1 + $0x198] sm:$0xff] %vm4098_vm7, %v4756_v39  }
 0x386   :  { %5392 = vrot.lane.b32.xlu0 %v5391_v36, %s7035_s19  ;;  %v4789_v43 = vpop.permute.xlu1 %4788  }
 0x387   :  { %6830 = vst.msk [vmem:[%s13127_s1 + $0x1f8] sm:$0xff] %vm4098_vm7, %v4789_v43  }
 0x388   :  { %v4778_v47 = vpop.permute.xlu0 %4777   ;;  %5425 = vrot.lane.b32.xlu1 %v5424_v42, %s7035_s19 }
 0x389   :  { %6827 = vst.msk [vmem:[%s13127_s1 + $0x1d8] sm:$0xff] %vm4098_vm7, %v4778_v47  }
 0x38a   :  { %5414 = vrot.lane.b32.xlu0 %v5413_v44, %s7035_s19  ;;  %v4810_v51 = vpop.permute.xlu1 %4809  }
 0x38b   :  { %6835 = vst.msk [vmem:[%s13127_s1 + $0x20] sm:$0xff] %vm4801_vm8, %v4810_v51  }
 0x38c   :  { %v4800_v55 = vpop.permute.xlu0 %4799   ;;  %5447 = vrot.lane.b32.xlu1 %v5446_v50, %s7035_s19 }
 0x38d   :  { %4802 = vst.msk [vmem:[%s13127_s1] sm:$0xff] %vm4801_vm8, %v4800_v55  }
 0x38e   :  { %5436 = vrot.lane.b32.xlu0 %v5435_v52, %s7035_s19  ;;  %v4832_v59 = vpop.permute.xlu1 %4831  }
 0x38f   :  { %6841 = vst.msk [vmem:[%s13127_s1 + $0x60] sm:$0xff] %vm4801_vm8, %v4832_v59  }
 0x390   :  { %v4821_v63 = vpop.permute.xlu0 %4820   ;;  %5469 = vrot.lane.b32.xlu1 %v5468_v58, %s7035_s19 }
 0x391   :  { %6838 = vst.msk [vmem:[%s13127_s1 + $0x40] sm:$0xff] %vm4801_vm8, %v4821_v63  }
 0x392   :  { %5458 = vrot.lane.b32.xlu0 %v5457_v60, %s7035_s19  ;;  %v4854_v3 = vpop.permute.xlu1 %4853  }
 0x393   :  { %6847 = vst.msk [vmem:[%s13127_s1 + $0xa0] sm:$0xff] %vm4801_vm8, %v4854_v3  }
 0x394   :  { %v4843_v5 = vpop.permute.xlu0 %4842   ;;  %5491 = vrot.lane.b32.xlu1 %v5490_v2, %s7035_s19 }
 0x395   :  { %6844 = vst.msk [vmem:[%s13127_s1 + $0x80] sm:$0xff] %vm4801_vm8, %v4843_v5  }
 0x396   :  { %5480 = vrot.lane.b32.xlu0 %v5479_v4, %s7035_s19  ;;  %v4876_v6 = vpop.permute.xlu1 %4875  }
 0x397   :  { %6853 = vst.msk [vmem:[%s13127_s1 + $0xe0] sm:$0xff] %vm4801_vm8, %v4876_v6  }
 0x398   :  { %v4865_v7 = vpop.permute.xlu0 %4864  }
 0x399   :  { %6850 = vst.msk [vmem:[%s13127_s1 + $0xc0] sm:$0xff] %vm4801_vm8, %v4865_v7  }
 0x39a   :  { %v4898_v8 = vpop.permute.xlu1 %4897  }
 0x39b   :  { %6859 = vst.msk [vmem:[%s13127_s1 + $0x120] sm:$0xff] %vm4801_vm8, %v4898_v8  }
 0x39c   :  { %v4887_v9 = vpop.permute.xlu0 %4886  }
 0x39d   :  { %6856 = vst.msk [vmem:[%s13127_s1 + $0x100] sm:$0xff] %vm4801_vm8, %v4887_v9  }
 0x39e   :  { %v4920_v10 = vpop.permute.xlu1 %4919  }
 0x39f   :  { %6865 = vst.msk [vmem:[%s13127_s1 + $0x160] sm:$0xff] %vm4801_vm8, %v4920_v10  }
 0x3a0   :  { %v4909_v11 = vpop.permute.xlu0 %4908  }
 0x3a1   :  { %6862 = vst.msk [vmem:[%s13127_s1 + $0x140] sm:$0xff] %vm4801_vm8, %v4909_v11  }
 0x3a2   :  { %v4942_v12 = vpop.permute.xlu1 %4941  }
 0x3a3   :  { %6871 = vst.msk [vmem:[%s13127_s1 + $0x1a0] sm:$0xff] %vm4801_vm8, %v4942_v12  }
 0x3a4   :  { %v4931_v13 = vpop.permute.xlu0 %4930  }
 0x3a5   :  { %6868 = vst.msk [vmem:[%s13127_s1 + $0x180] sm:$0xff] %vm4801_vm8, %v4931_v13  }
 0x3a6   :  { %v4964_v14 = vpop.permute.xlu1 %4963  }
 0x3a7   :  { %6877 = vst.msk [vmem:[%s13127_s1 + $0x1e0] sm:$0xff] %vm4801_vm8, %v4964_v14  }
 0x3a8   :  { %v4953_v15 = vpop.permute.xlu0 %4952  }
 0x3a9   :  { %6874 = vst.msk [vmem:[%s13127_s1 + $0x1c0] sm:$0xff] %vm4801_vm8, %v4953_v15  }
 0x3aa   :  { %v4986_v16 = vpop.permute.xlu1 %4985  }
 0x3ab   :  { %6883 = vst.msk [vmem:[%s13127_s1 + $0x28] sm:$0xff] %vm4801_vm8, %v4986_v16  }
 0x3ac   :  { %v4975_v17 = vpop.permute.xlu0 %4974  }
 0x3ad   :  { %6880 = vst.msk [vmem:[%s13127_s1 + $0x8] sm:$0xff] %vm4801_vm8, %v4975_v17  }
 0x3ae   :  { %v5008_v18 = vpop.permute.xlu1 %5007  }
 0x3af   :  { %6889 = vst.msk [vmem:[%s13127_s1 + $0x68] sm:$0xff] %vm4801_vm8, %v5008_v18  }
 0x3b0   :  { %v4997_v19 = vpop.permute.xlu0 %4996  }
 0x3b1   :  { %6886 = vst.msk [vmem:[%s13127_s1 + $0x48] sm:$0xff] %vm4801_vm8, %v4997_v19  }
 0x3b2   :  { %v5030_v20 = vpop.permute.xlu1 %5029  }
 0x3b3   :  { %6895 = vst.msk [vmem:[%s13127_s1 + $0xa8] sm:$0xff] %vm4801_vm8, %v5030_v20  }
 0x3b4   :  { %v5019_v21 = vpop.permute.xlu0 %5018  }
 0x3b5   :  { %6892 = vst.msk [vmem:[%s13127_s1 + $0x88] sm:$0xff] %vm4801_vm8, %v5019_v21  }
 0x3b6   :  { %v5052_v22 = vpop.permute.xlu1 %5051  }
 0x3b7   :  { %6901 = vst.msk [vmem:[%s13127_s1 + $0xe8] sm:$0xff] %vm4801_vm8, %v5052_v22  }
 0x3b8   :  { %v5041_v23 = vpop.permute.xlu0 %5040  }
 0x3b9   :  { %6898 = vst.msk [vmem:[%s13127_s1 + $0xc8] sm:$0xff] %vm4801_vm8, %v5041_v23  }
 0x3ba   :  { %v5074_v24 = vpop.permute.xlu1 %5073  }
 0x3bb   :  { %6907 = vst.msk [vmem:[%s13127_s1 + $0x128] sm:$0xff] %vm4801_vm8, %v5074_v24  }
 0x3bc   :  { %v5063_v25 = vpop.permute.xlu0 %5062  }
 0x3bd   :  { %6904 = vst.msk [vmem:[%s13127_s1 + $0x108] sm:$0xff] %vm4801_vm8, %v5063_v25  }
 0x3be   :  { %v5096_v26 = vpop.permute.xlu1 %5095  }
 0x3bf   :  { %6913 = vst.msk [vmem:[%s13127_s1 + $0x168] sm:$0xff] %vm4801_vm8, %v5096_v26  }
 0x3c0   :  { %v5085_v27 = vpop.permute.xlu0 %5084  }
 0x3c1   :  { %6910 = vst.msk [vmem:[%s13127_s1 + $0x148] sm:$0xff] %vm4801_vm8, %v5085_v27  }
 0x3c2   :  { %v5118_v28 = vpop.permute.xlu1 %5117  }
 0x3c3   :  { %6919 = vst.msk [vmem:[%s13127_s1 + $0x1a8] sm:$0xff] %vm4801_vm8, %v5118_v28  }
 0x3c4   :  { %v5107_v29 = vpop.permute.xlu0 %5106  }
 0x3c5   :  { %6916 = vst.msk [vmem:[%s13127_s1 + $0x188] sm:$0xff] %vm4801_vm8, %v5107_v29  }
 0x3c6   :  { %v5140_v30 = vpop.permute.xlu1 %5139  }
 0x3c7   :  { %6925 = vst.msk [vmem:[%s13127_s1 + $0x1e8] sm:$0xff] %vm4801_vm8, %v5140_v30  }
 0x3c8   :  { %v5129_v31 = vpop.permute.xlu0 %5128  }
 0x3c9   :  { %6922 = vst.msk [vmem:[%s13127_s1 + $0x1c8] sm:$0xff] %vm4801_vm8, %v5129_v31  }
 0x3ca   :  { %v5162_v32 = vpop.permute.xlu1 %5161  }
 0x3cb   :  { %6931 = vst.msk [vmem:[%s13127_s1 + $0x30] sm:$0xff] %vm4801_vm8, %v5162_v32  }
 0x3cc   :  { %v5151_v33 = vpop.permute.xlu0 %5150  }
 0x3cd   :  { %6928 = vst.msk [vmem:[%s13127_s1 + $0x10] sm:$0xff] %vm4801_vm8, %v5151_v33  }
 0x3ce   :  { %v5184_v34 = vpop.permute.xlu1 %5183  }
 0x3cf   :  { %6937 = vst.msk [vmem:[%s13127_s1 + $0x70] sm:$0xff] %vm4801_vm8, %v5184_v34  }
 0x3d0   :  { %v5173_v35 = vpop.permute.xlu0 %5172  }
 0x3d1   :  { %6934 = vst.msk [vmem:[%s13127_s1 + $0x50] sm:$0xff] %vm4801_vm8, %v5173_v35  }
 0x3d2   :  { %v5206_v36 = vpop.permute.xlu1 %5205  }
 0x3d3   :  { %6943 = vst.msk [vmem:[%s13127_s1 + $0xb0] sm:$0xff] %vm4801_vm8, %v5206_v36  }
 0x3d4   :  { %v5195_v37 = vpop.permute.xlu0 %5194  }
 0x3d5   :  { %6940 = vst.msk [vmem:[%s13127_s1 + $0x90] sm:$0xff] %vm4801_vm8, %v5195_v37  }
 0x3d6   :  { %v5228_v38 = vpop.permute.xlu1 %5227  }
 0x3d7   :  { %6949 = vst.msk [vmem:[%s13127_s1 + $0xf0] sm:$0xff] %vm4801_vm8, %v5228_v38  }
 0x3d8   :  { %v5217_v39 = vpop.permute.xlu0 %5216  }
 0x3d9   :  { %6946 = vst.msk [vmem:[%s13127_s1 + $0xd0] sm:$0xff] %vm4801_vm8, %v5217_v39  }
 0x3da   :  { %v5250_v40 = vpop.permute.xlu1 %5249  }
 0x3db   :  { %6955 = vst.msk [vmem:[%s13127_s1 + $0x130] sm:$0xff] %vm4801_vm8, %v5250_v40  }
 0x3dc   :  { %v5239_v41 = vpop.permute.xlu0 %5238  }
 0x3dd   :  { %6952 = vst.msk [vmem:[%s13127_s1 + $0x110] sm:$0xff] %vm4801_vm8, %v5239_v41  }
 0x3de   :  { %v5272_v42 = vpop.permute.xlu1 %5271  }
 0x3df   :  { %6961 = vst.msk [vmem:[%s13127_s1 + $0x170] sm:$0xff] %vm4801_vm8, %v5272_v42  }
 0x3e0   :  { %v5261_v43 = vpop.permute.xlu0 %5260  }
 0x3e1   :  { %6958 = vst.msk [vmem:[%s13127_s1 + $0x150] sm:$0xff] %vm4801_vm8, %v5261_v43  }
 0x3e2   :  { %v5294_v44 = vpop.permute.xlu1 %5293  }
 0x3e3   :  { %6967 = vst.msk [vmem:[%s13127_s1 + $0x1b0] sm:$0xff] %vm4801_vm8, %v5294_v44  }
 0x3e4   :  { %v5283_v45 = vpop.permute.xlu0 %5282  }
 0x3e5   :  { %6964 = vst.msk [vmem:[%s13127_s1 + $0x190] sm:$0xff] %vm4801_vm8, %v5283_v45  }
 0x3e6   :  { %v5316_v46 = vpop.permute.xlu1 %5315  }
 0x3e7   :  { %6973 = vst.msk [vmem:[%s13127_s1 + $0x1f0] sm:$0xff] %vm4801_vm8, %v5316_v46  }
 0x3e8   :  { %v5305_v47 = vpop.permute.xlu0 %5304  }
 0x3e9   :  { %6970 = vst.msk [vmem:[%s13127_s1 + $0x1d0] sm:$0xff] %vm4801_vm8, %v5305_v47  }
 0x3ea   :  { %v5338_v48 = vpop.permute.xlu1 %5337  }
 0x3eb   :  { %6979 = vst.msk [vmem:[%s13127_s1 + $0x38] sm:$0xff] %vm4801_vm8, %v5338_v48  }
 0x3ec   :  { %v5327_v49 = vpop.permute.xlu0 %5326  }
 0x3ed   :  { %6976 = vst.msk [vmem:[%s13127_s1 + $0x18] sm:$0xff] %vm4801_vm8, %v5327_v49  }
 0x3ee   :  { %v5360_v50 = vpop.permute.xlu1 %5359  }
 0x3ef   :  { %6985 = vst.msk [vmem:[%s13127_s1 + $0x78] sm:$0xff] %vm4801_vm8, %v5360_v50  }
 0x3f0   :  { %v5349_v51 = vpop.permute.xlu0 %5348  }
 0x3f1   :  { %6982 = vst.msk [vmem:[%s13127_s1 + $0x58] sm:$0xff] %vm4801_vm8, %v5349_v51  }
 0x3f2   :  { %v5382_v52 = vpop.permute.xlu1 %5381  }
 0x3f3   :  { %6991 = vst.msk [vmem:[%s13127_s1 + $0xb8] sm:$0xff] %vm4801_vm8, %v5382_v52  }
 0x3f4   :  { %v5371_v53 = vpop.permute.xlu0 %5370  }
 0x3f5   :  { %6988 = vst.msk [vmem:[%s13127_s1 + $0x98] sm:$0xff] %vm4801_vm8, %v5371_v53  }
 0x3f6   :  { %v5404_v54 = vpop.permute.xlu1 %5403  }
 0x3f7   :  { %6997 = vst.msk [vmem:[%s13127_s1 + $0xf8] sm:$0xff] %vm4801_vm8, %v5404_v54  }
 0x3f8   :  { %v5393_v55 = vpop.permute.xlu0 %5392  }
 0x3f9   :  { %6994 = vst.msk [vmem:[%s13127_s1 + $0xd8] sm:$0xff] %vm4801_vm8, %v5393_v55  }
 0x3fa   :  { %v5426_v56 = vpop.permute.xlu1 %5425  }
 0x3fb   :  { %7003 = vst.msk [vmem:[%s13127_s1 + $0x138] sm:$0xff] %vm4801_vm8, %v5426_v56  }
 0x3fc   :  { %v5415_v57 = vpop.permute.xlu0 %5414  }
 0x3fd   :  { %7000 = vst.msk [vmem:[%s13127_s1 + $0x118] sm:$0xff] %vm4801_vm8, %v5415_v57  }
 0x3fe   :  { %v5448_v58 = vpop.permute.xlu1 %5447  }
 0x3ff   :  { %7009 = vst.msk [vmem:[%s13127_s1 + $0x178] sm:$0xff] %vm4801_vm8, %v5448_v58  }
 0x400   :  { %v5437_v59 = vpop.permute.xlu0 %5436  }
 0x401   :  { %7006 = vst.msk [vmem:[%s13127_s1 + $0x158] sm:$0xff] %vm4801_vm8, %v5437_v59  }
 0x402   :  { %v5470_v60 = vpop.permute.xlu1 %5469  }
 0x403   :  { %7015 = vst.msk [vmem:[%s13127_s1 + $0x1b8] sm:$0xff] %vm4801_vm8, %v5470_v60  }
 0x404   :  { %v5459_v61 = vpop.permute.xlu0 %5458  }
 0x405   :  { %7012 = vst.msk [vmem:[%s13127_s1 + $0x198] sm:$0xff] %vm4801_vm8, %v5459_v61  }
 0x406   :  { %v5492_v62 = vpop.permute.xlu1 %5491  }
 0x407   :  { %7021 = vst.msk [vmem:[%s13127_s1 + $0x1f8] sm:$0xff] %vm4801_vm8, %v5492_v62  }
 0x408   :  { %v5481_v63 = vpop.permute.xlu0 %5480  }
 0x409   :  { %7018 = vst.msk [vmem:[%s13127_s1 + $0x1d8] sm:$0xff] %vm4801_vm8, %v5481_v63  }

// kernel: bottleneck_forward.21
= control target key start
LH: loop header
LB: loop body
LE: loop exit
PB: predicated region body
PF: predicated region fallthrough
CT: control target
= control target key end

     0   :  { %s2024_s15 = smov 0   ;;  %s2651_s0 = inlined_call_operand.vmem [shape: f32[2,4,64,10], index: 0, kind: input, shape index: {}]   ;;  %s2652_s1 = inlined_call_operand.vmem [shape: f32[2,4,64,10], index: 1, kind: input, shape index: {}]   ;;  %s2653_s2 = inlined_call_operand.vmem [shape: f32[2,4,64,8], index: 2, kind: input, shape index: {}]   ;;  %s2654_s3 = inlined_call_operand.vmem [shape: f32[2,4,64,64], index: 3, kind: input, shape index: {}]   ;;  %s2655_s4 = inlined_call_operand.vmem [shape: f32[2,4,64,8], index: 4, kind: output, shape index: {}]  }
   0x1 LB: > { %s1593_s16 = sadd.s32 4294967295, %s1997_s15   ;;  %p1597_p0 = scmp.ge.s32.totalorder %s1997_s15, 1  ;;  %s1997_s15 = sphi %s2024_s15, %s14_s15  }
   0x2   : > { %p192_p1 = scmp.lt.s32.totalorder %s1997_s15, 3 }
   0x4   : > { %p193_p2 = pnand %p1597_p0, %p192_p1 }
   0x5   : > { %p233_p3 = scmp.lt.s32.totalorder (!%p193_p2), %s1593_s16, 1  ;;  %vm387_vm0 = vcmask (!%p193_p2), 80896   ;;  %vm744_vm1 = vcmask (!%p193_p2), 523264   ;;  %vm1469_vm2 = vcmask (!%p193_p2), 64512  }
   0x6   : > { %196 = sbr.rel (%p193_p2) target bundleno = 863 (0x35f), region = 36 }
   0xd   : > { %s2657_s16 = smov (!%p233_p3, %s1593_s16), 1 }
   0xe   : > { %s2032_s17 = sshll.u32 %s2657_s16, 8 }
   0xf   : > { %s2038_s20 = scalar_lea.vmem %s2652_s1, %s2032_s17  ;;  %s2052_s23 = scalar_lea.vmem %s2651_s0, %s2032_s17 }
  0x10   : > { %v307_v0 = vld [vmem:[%s2038_s20] sm:$0xff]  ;;  %v308_v1 = vld [vmem:[%s2038_s20 + $0x8] sm:$0xff]  ;;  %v309_v5 = vld [vmem:[%s2038_s20 + $0x10] sm:$0xff]  ;;  %s2162_s26 = scalar_lea.vmem %s2654_s3, %s2032_s17  ;;  %s2399_s29 = scalar_lea.vmem %s2653_s2, %s2032_s17 }
  0x11   : > { %v315_v2 = vld [vmem:[%s2038_s20 + $0x40] sm:$0xff]  ;;  %v339_v3 = vpack.c.bf16 %v308_v1, %v307_v0  ;;  %v316_v4 = vld [vmem:[%s2038_s20 + $0x48] sm:$0xff]  ;;  %v310_v6 = vld [vmem:[%s2038_s20 + $0x18] sm:$0xff]  ;;  %s2582_s6 = scalar_lea.vmem %s2655_s4, %s2032_s17 }
  0x12   : > { %v343_v7 = vpack.c.bf16 %v316_v4, %v315_v2  ;;  %v340_v8 = vpack.c.bf16 %v310_v6, %v309_v5  ;;  %v317_v9 = vld [vmem:[%s2038_s20 + $0x50] sm:$0xff]  ;;  %v318_v10 = vld [vmem:[%s2038_s20 + $0x58] sm:$0xff]  ;;  %v311_v14 = vld [vmem:[%s2038_s20 + $0x20] sm:$0xff] }
  0x13   : > { %1839 = vmatprep.subr.msk.bf16.mxu0 %vm387_vm0, %v339_v3  ;;  %v401_v11 = vsel %vm387_vm0, %v339_v3, 0  ;;  %v344_v12 = vpack.c.bf16 %v318_v10, %v317_v9  ;;  %v259_v15 = vld [vmem:[%s2052_s23] sm:$0xff]  ;;  %v260_v16 = vld [vmem:[%s2052_s23 + $0x8] sm:$0xff]  ;;  %v313_v28 = vld [vmem:[%s2038_s20 + $0x30] sm:$0xff] }
  0x14   : > { %1843 = vmatprep.subr.msk.bf16.mxu1 %vm387_vm0, %v343_v7  ;;  %1712 = vmatpush3.bf16.xpose.msra.mxu0 %v401_v11  ;;  %v490_v13 = vsel %vm387_vm0, %v343_v7, 0  ;;  %v312_v17 = vld [vmem:[%s2038_s20 + $0x28] sm:$0xff]  ;;  %v291_v18 = vpack.c.bf16 %v260_v16, %v259_v15  ;;  %v267_v19 = vld [vmem:[%s2052_s23 + $0x40] sm:$0xff]  ;;  %v404_v24 = vsel %vm387_vm0, %v340_v8, 0  ;;  %v314_v29 = vld [vmem:[%s2038_s20 + $0x38] sm:$0xff] }
  0x15   : > { %1728 = vmatpush3.bf16.xpose.msra.mxu1 %v490_v13  ;;  %1840 = vmatprep.subr.msk.bf16.mxu0 %vm387_vm0, %v340_v8  ;;  %v268_v20 = vld [vmem:[%s2052_s23 + $0x48] sm:$0xff]  ;;  %v319_v21 = vld [vmem:[%s2038_s20 + $0x60] sm:$0xff]  ;;  %v341_v25 = vpack.c.bf16 %v312_v17, %v311_v14  ;;  %v493_v26 = vsel %vm387_vm0, %v344_v12, 0  ;;  %v321_v30 = vld [vmem:[%s2038_s20 + $0x70] sm:$0xff]  ;;  %v342_v33 = vpack.c.bf16 %v314_v29, %v313_v28 }
  0x16   : > { %1844 = vmatprep.subr.msk.bf16.mxu1 %vm387_vm0, %v344_v12  ;;  %v320_v22 = vld [vmem:[%s2038_s20 + $0x68] sm:$0xff]  ;;  %v295_v23 = vpack.c.bf16 %v268_v20, %v267_v19  ;;  %1719 = vmatprep.mubr.msk.bf16.mxu0 %vm387_vm0, %v291_v18  ;;  %v322_v31 = vld [vmem:[%s2038_s20 + $0x78] sm:$0xff]  ;;  %v323_v36 = vld [vmem:[%s2038_s20 + $0x80] sm:$0xff] }
  0x17   : > { %v345_v27 = vpack.c.bf16 %v320_v22, %v319_v21  ;;  %v407_v32 = vsel %vm387_vm0, %v341_v25, 0  ;;  %v346_v35 = vpack.c.bf16 %v322_v31, %v321_v30  ;;  %v324_v37 = vld [vmem:[%s2038_s20 + $0x88] sm:$0xff]  ;;  %v331_v38 = vld [vmem:[%s2038_s20 + $0xc0] sm:$0xff]  ;;  %v410_v40 = vsel %vm387_vm0, %v342_v33, 0  ;;  %v261_v44 = vld [vmem:[%s2052_s23 + $0x10] sm:$0xff] }
  0x18   : > { %1735 = vmatprep.mubr.msk.bf16.mxu1 %vm387_vm0, %v295_v23  ;;  %v332_v39 = vld [vmem:[%s2038_s20 + $0xc8] sm:$0xff]  ;;  %v347_v41 = vpack.c.bf16 %v324_v37, %v323_v36  ;;  %v262_v45 = vld [vmem:[%s2052_s23 + $0x18] sm:$0xff]  ;;  %v269_v46 = vld [vmem:[%s2052_s23 + $0x50] sm:$0xff] }
  0x19   : > { %v496_v34 = vsel %vm387_vm0, %v345_v27, 0  ;;  %v499_v42 = vsel %vm387_vm0, %v346_v35, 0  ;;  %v351_v43 = vpack.c.bf16 %v332_v39, %v331_v38  ;;  %v270_v47 = vld [vmem:[%s2052_s23 + $0x58] sm:$0xff]  ;;  %v325_v48 = vld [vmem:[%s2038_s20 + $0x90] sm:$0xff]  ;;  %v292_v51 = vpack.c.bf16 %v262_v45, %v261_v44  ;;  %v263_v53 = vld [vmem:[%s2052_s23 + $0x20] sm:$0xff] }
  0x1a   : > { %v326_v49 = vld [vmem:[%s2038_s20 + $0x98] sm:$0xff]  ;;  %v333_v50 = vld [vmem:[%s2038_s20 + $0xd0] sm:$0xff]  ;;  %v264_v54 = vld [vmem:[%s2052_s23 + $0x28] sm:$0xff]  ;;  %v296_v55 = vpack.c.bf16 %v270_v47, %v269_v46  ;;  %v579_v58 = vsel %vm387_vm0, %v347_v41, 0 }
  0x1b   : > { %v334_v52 = vld [vmem:[%s2038_s20 + $0xd8] sm:$0xff]  ;;  %v271_v56 = vld [vmem:[%s2052_s23 + $0x60] sm:$0xff]  ;;  %v272_v57 = vld [vmem:[%s2052_s23 + $0x68] sm:$0xff]  ;;  %v348_v59 = vpack.c.bf16 %v326_v49, %v325_v48  ;;  %v668_v60 = vsel %vm387_vm0, %v351_v43, 0  ;;  %v293_v62 = vpack.c.bf16 %v264_v54, %v263_v53 }
  0x1c   : > { %1714 = vmatpush3.bf16.xpose.msra.mxu0 %v404_v24  ;;  %v352_v61 = vpack.c.bf16 %v334_v52, %v333_v50  ;;  %v297_v63 = vpack.c.bf16 %v272_v57, %v271_v56  ;;  %v265_v0 = vld [vmem:[%s2052_s23 + $0x30] sm:$0xff]  ;;  %v266_v1 = vld [vmem:[%s2052_s23 + $0x38] sm:$0xff]  ;;  %v327_v4 = vld [vmem:[%s2038_s20 + $0xa0] sm:$0xff] }
  0x1d   : > { %1730 = vmatpush3.bf16.xpose.msra.mxu1 %v493_v26  ;;  %1841 = vmatprep.subr.msk.bf16.mxu0 %vm387_vm0, %v341_v25  ;;  %v273_v2 = vld [vmem:[%s2052_s23 + $0x70] sm:$0xff]  ;;  %v274_v3 = vld [vmem:[%s2052_s23 + $0x78] sm:$0xff]  ;;  %v328_v5 = vld [vmem:[%s2038_s20 + $0xa8] sm:$0xff]  ;;  %v294_v7 = vpack.c.bf16 %v266_v1, %v265_v0  ;;  %v582_v14 = vsel %vm387_vm0, %v348_v59, 0 }
  0x1e   : > { %1845 = vmatprep.subr.msk.bf16.mxu1 %vm387_vm0, %v345_v27  ;;  %v335_v6 = vld [vmem:[%s2038_s20 + $0xe0] sm:$0xff]  ;;  %v336_v8 = vld [vmem:[%s2038_s20 + $0xe8] sm:$0xff]  ;;  %v298_v11 = vpack.c.bf16 %v274_v3, %v273_v2  ;;  %v349_v15 = vpack.c.bf16 %v328_v5, %v327_v4  ;;  %v671_v16 = vsel %vm387_vm0, %v352_v61, 0  ;;  %v329_v20 = vld [vmem:[%s2038_s20 + $0xb0] sm:$0xff] }
  0x1f   : > { %v275_v9 = vld [vmem:[%s2052_s23 + $0x80] sm:$0xff]  ;;  %v276_v10 = vld [vmem:[%s2052_s23 + $0x88] sm:$0xff]  ;;  %v353_v17 = vpack.c.bf16 %v336_v8, %v335_v6  ;;  %v330_v21 = vld [vmem:[%s2038_s20 + $0xb8] sm:$0xff] }
  0x20   : > { %v283_v12 = vld [vmem:[%s2052_s23 + $0xc0] sm:$0xff]  ;;  %v284_v13 = vld [vmem:[%s2052_s23 + $0xc8] sm:$0xff]  ;;  %v299_v18 = vpack.c.bf16 %v276_v10, %v275_v9  ;;  %v337_v22 = vld [vmem:[%s2038_s20 + $0xf0] sm:$0xff]  ;;  %v585_v24 = vsel %vm387_vm0, %v349_v15, 0  ;;  %v350_v25 = vpack.c.bf16 %v330_v21, %v329_v20 }
  0x21   : > { %v303_v19 = vpack.c.bf16 %v284_v13, %v283_v12  ;;  %v338_v23 = vld [vmem:[%s2038_s20 + $0xf8] sm:$0xff]  ;;  %v674_v26 = vsel %vm387_vm0, %v353_v17, 0  ;;  %v277_v30 = vld [vmem:[%s2052_s23 + $0x90] sm:$0xff]  ;;  %v287_v36 = vld [vmem:[%s2052_s23 + $0xe0] sm:$0xff] }
  0x22   : > { %v354_v27 = vpack.c.bf16 %v338_v23, %v337_v22  ;;  %v588_v28 = vsel %vm387_vm0, %v350_v25, 0  ;;  %v278_v31 = vld [vmem:[%s2052_s23 + $0x98] sm:$0xff]  ;;  %v288_v37 = vld [vmem:[%s2052_s23 + $0xe8] sm:$0xff]  ;;  %v289_v44 = vld [vmem:[%s2052_s23 + $0xf0] sm:$0xff] }
  0x23   : > { %v300_v38 = vpack.c.bf16 %v278_v31, %v277_v30  ;;  %v290_v45 = vld [vmem:[%s2052_s23 + $0xf8] sm:$0xff]  ;;  %v357_v48 = vld [vmem:[%s2162_s26 + $0x10] sm:$0xff]  ;;  %v356_v6 = vld [vmem:[%s2162_s26 + $0x8] sm:$0xff] }
  0x24   : > { %1716 = vmatpush3.bf16.xpose.msra.mxu0 %v407_v32  ;;  %v677_v29 = vsel %vm387_vm0, %v354_v27, 0  ;;  %v285_v32 = vld [vmem:[%s2052_s23 + $0xd0] sm:$0xff]  ;;  %v306_v47 = vpack.c.bf16 %v290_v45, %v289_v44  ;;  %v358_v56 = vld [vmem:[%s2162_s26 + $0x18] sm:$0xff]  ;;  %v364_v12 = vld [vmem:[%s2162_s26 + $0x48] sm:$0xff] }
  0x25   : > { %1732 = vmatpush3.bf16.xpose.msra.mxu1 %v496_v34  ;;  %1842 = vmatprep.subr.msk.bf16.mxu0 %vm387_vm0, %v342_v33  ;;  %v286_v33 = vld [vmem:[%s2052_s23 + $0xd8] sm:$0xff]  ;;  %v279_v34 = vld [vmem:[%s2052_s23 + $0xa0] sm:$0xff]  ;;  %v365_v50 = vld [vmem:[%s2162_s26 + $0x50] sm:$0xff] }
  0x26   : > { %1846 = vmatprep.subr.msk.bf16.mxu1 %vm387_vm0, %v346_v35  ;;  %v280_v35 = vld [vmem:[%s2052_s23 + $0xa8] sm:$0xff]  ;;  %v304_v39 = vpack.c.bf16 %v286_v33, %v285_v32  ;;  %v366_v3 = vld [vmem:[%s2162_s26 + $0x58] sm:$0xff]  ;;  %v361_v13 = vld [vmem:[%s2162_s26 + $0x30] sm:$0xff] }
  0x27   : > { %v362_v20 = vld [vmem:[%s2162_s26 + $0x38] sm:$0xff] }
  0x2c   : > { %1718 = vmatpush3.bf16.xpose.msra.mxu0 %v410_v40  ;;  %v301_v40 = vpack.c.bf16 %v280_v35, %v279_v34  ;;  %v359_v34 = vld [vmem:[%s2162_s26 + $0x20] sm:$0xff] }
  0x2d   : > { %1734 = vmatpush3.bf16.xpose.msra.mxu1 %v499_v42  ;;  %1847 = vmatprep.subr.msk.bf16.mxu0 %vm387_vm0, %v347_v41  ;;  %v305_v41 = vpack.c.bf16 %v288_v37, %v287_v36  ;;  %v281_v42 = vld [vmem:[%s2052_s23 + $0xb0] sm:$0xff]  ;;  %v360_v36 = vld [vmem:[%s2162_s26 + $0x28] sm:$0xff] }
  0x2e   : > { %1851 = vmatprep.subr.msk.bf16.mxu1 %vm387_vm0, %v351_v43  ;;  %v282_v43 = vld [vmem:[%s2052_s23 + $0xb8] sm:$0xff] }
  0x2f   : > { %v302_v46 = vpack.c.bf16 %v282_v43, %v281_v42 }
  0x33   : > { %1720 = vmatmul.mubr.msk.bf16.vlgmr.msra.gmra.mrb[0].mxu0 %vm387_vm0, %v292_v51  ;;  %v363_v51 = vld [vmem:[%s2162_s26 + $0x40] sm:$0xff] }
  0x34   : > { %1736 = vmatmul.mubr.msk.bf16.vlgmr.msra.gmra.mrb[0].mxu1 %vm387_vm0, %v296_v55  ;;  %1744 = vmatpush3.bf16.xpose.msra.mxu0 %v579_v58 }
  0x35   : > { %1760 = vmatpush3.bf16.xpose.msra.mxu1 %v668_v60  ;;  %1848 = vmatprep.subr.msk.bf16.mxu0 %vm387_vm0, %v348_v59 }
  0x36   : > { %1852 = vmatprep.subr.msk.bf16.mxu1 %vm387_vm0, %v352_v61  ;;  %1723 = vmatprep.mubr.msk.bf16.mxu0 %vm387_vm0, %v293_v62 }
  0x37   : > { %1739 = vmatprep.mubr.msk.bf16.mxu1 %vm387_vm0, %v297_v63  ;;  %v355_v63 = vld [vmem:[%s2162_s26] sm:$0xff] }
  0x3b   : > { %1724 = vmatmul.mubr.msk.bf16.gmra.mrb[4].mxu0 %vm387_vm0, %v294_v7 }
  0x3c   : > { %1746 = vmatpush3.bf16.xpose.msra.mxu0 %v582_v14  ;;  %1740 = vmatmul.mubr.msk.bf16.gmra.mrb[4].mxu1 %vm387_vm0, %v298_v11 }
  0x3d   : > { %1762 = vmatpush3.bf16.xpose.msra.mxu1 %v671_v16  ;;  %1849 = vmatprep.subr.msk.bf16.mxu0 %vm387_vm0, %v349_v15 }
  0x3e   : > { %1853 = vmatprep.subr.msk.bf16.mxu1 %vm387_vm0, %v353_v17  ;;  %1751 = vmatprep.mubr.msk.bf16.mxu0 %vm387_vm0, %v299_v18 }
  0x3f   : > { %1767 = vmatprep.mubr.msk.bf16.mxu1 %vm387_vm0, %v303_v19 }
  0x44   : > { %1748 = vmatpush3.bf16.xpose.msra.mxu0 %v585_v24 }
  0x45   : > { %1764 = vmatpush3.bf16.xpose.msra.mxu1 %v674_v26  ;;  %1850 = vmatprep.subr.msk.bf16.mxu0 %vm387_vm0, %v350_v25  ;;  %v369_v25 = vld [vmem:[%s2162_s26 + $0x70] sm:$0xff] }
  0x46   : > { %1854 = vmatprep.subr.msk.bf16.mxu1 %vm387_vm0, %v354_v27 }
  0x4c   : > { %1750 = vmatpush3.bf16.xpose.msra.mxu0 %v588_v28  ;;  %v370_v28 = vld [vmem:[%s2162_s26 + $0x78] sm:$0xff] }
  0x4d   : > { %1766 = vmatpush3.bf16.xpose.msra.mxu1 %v677_v29 }
  0x53   : > { %1752 = vmatmul.mubr.msk.bf16.vlgmr.msra.gmra.mrb[8].mxu0 %vm387_vm0, %v300_v38 }
  0x54   : > { %1768 = vmatmul.mubr.msk.bf16.vlgmr.msra.gmra.mrb[8].mxu1 %vm387_vm0, %v304_v39  ;;  %1755 = vmatprep.mubr.msk.bf16.mxu0 %vm387_vm0, %v301_v40  ;;  %v367_v39 = vld [vmem:[%s2162_s26 + $0x60] sm:$0xff] }
  0x55   : > { %1771 = vmatprep.mubr.msk.bf16.mxu1 %vm387_vm0, %v305_v41  ;;  %v368_v41 = vld [vmem:[%s2162_s26 + $0x68] sm:$0xff] }
  0x5b   : > { %1756 = vmatmul.mubr.msk.bf16.gmra.mrb[12].mxu0 %vm387_vm0, %v302_v46  ;;  %v373_v46 = vld [vmem:[%s2162_s26 + $0x90] sm:$0xff] }
  0x5c   : > { %1772 = vmatmul.mubr.msk.bf16.gmra.mrb[12].mxu1 %vm387_vm0, %v306_v47 }
 0x106   : > { %v1721_v49 = vpop.f32.mrb[0].mxu0 }
 0x107   : > { %v2167_v52 = vadd.f32 %v1721_v49, %v357_v48  ;;  %v1737_v53 = vpop.f32.mrb[0].mxu1  ;;  %v446_v54 = vpop.f32.mrb[1].mxu0  ;;  %v381_v48 = vld [vmem:[%s2162_s26 + $0xd0] sm:$0xff] }
 0x108   : > { %v535_v55 = vpop.f32.mrb[1].mxu1  ;;  %v1722_v57 = vpop.f32.mrb[2].mxu0  ;;  %v2170_v58 = vadd.f32 %v1737_v53, %v365_v50  ;;  %v2182_v4 = vadd.f32 %v446_v54, %v355_v63  ;;  %v374_v50 = vld [vmem:[%s2162_s26 + $0x98] sm:$0xff] }
 0x109   : > { %v2172_v59 = vadd.f32 %v535_v55, %v363_v51  ;;  %v1738_v60 = vpop.f32.mrb[2].mxu1  ;;  %v449_v61 = vpop.f32.mrb[3].mxu0  ;;  %v751_v62 = vsel %vm744_vm1, %v2167_v52, -inf  ;;  %v2177_v1 = vadd.f32 %v1722_v57, %v358_v56  ;;  %v382_v56 = vld [vmem:[%s2162_s26 + $0xd8] sm:$0xff] }
 0x10a   : > { %v538_v0 = vpop.f32.mrb[3].mxu1  ;;  %752 = vmax.xlane.f32.xlu0 %v751_v62  ;;  %v775_v5 = vsel %vm744_vm1, %v2170_v58, -inf  ;;  %v2187_v8 = vadd.f32 %v1738_v60, %v366_v3  ;;  %v2193_v16 = vadd.f32 %v449_v61, %v356_v6  ;;  %v745_v17 = vsel %vm744_vm1, %v2182_v4, -inf  ;;  %v371_v3 = vld [vmem:[%s2162_s26 + $0x80] sm:$0xff] }
 0x10b   : > { %v769_v2 = vsel %vm744_vm1, %v2172_v59, -inf  ;;  %v754_v9 = vsel %vm744_vm1, %v2177_v1, -inf  ;;  %v2198_v22 = vadd.f32 %v538_v0, %v364_v12 }
 0x10c   : > { %770 = vmax.xlane.f32.xlu1 %v769_v2  ;;  %v778_v23 = vsel %vm744_vm1, %v2187_v8, -inf  ;;  %v748_v26 = vsel %vm744_vm1, %v2193_v16, -inf }
 0x10d   : > { %v772_v29 = vsel %vm744_vm1, %v2198_v22, -inf }
 0x10e   : > { %776 = vmax.xlane.f32.xlu0 %v775_v5  ;;  %v1725_v7 = vpop.f32.mrb[4].mxu0 }
 0x10f   : > { %v462_v10 = vpop.f32.mrb[5].mxu0  ;;  %v1741_v11 = vpop.f32.mrb[4].mxu1  ;;  %v2202_v24 = vadd.f32 %v1725_v7, %v361_v13  ;;  %v379_v13 = vld [vmem:[%s2162_s26 + $0xc0] sm:$0xff] }
 0x110   : > { %755 = vmax.xlane.f32.xlu1 %v754_v9  ;;  %v1726_v14 = vpop.f32.mrb[6].mxu0  ;;  %v551_v15 = vpop.f32.mrb[5].mxu1  ;;  %v2212_v30 = vadd.f32 %v1741_v11, %v369_v25  ;;  %v2224_v37 = vadd.f32 %v462_v10, %v359_v34  ;;  %v372_v10 = vld [vmem:[%s2162_s26 + $0x88] sm:$0xff] }
 0x111   : > { %v465_v18 = vpop.f32.mrb[7].mxu0  ;;  %v1742_v19 = vpop.f32.mrb[6].mxu1  ;;  %v2207_v27 = vadd.f32 %v1726_v14, %v362_v20  ;;  %v763_v31 = vsel %vm744_vm1, %v2202_v24, -inf  ;;  %v2232_v42 = vadd.f32 %v551_v15, %v367_v39  ;;  %v377_v20 = vld [vmem:[%s2162_s26 + $0xb0] sm:$0xff] }
 0x112   : > { %746 = vmax.xlane.f32.xlu0 %v745_v17  ;;  %v554_v21 = vpop.f32.mrb[7].mxu1  ;;  %v2216_v32 = vadd.f32 %v1742_v19, %v370_v28  ;;  %v787_v35 = vsel %vm744_vm1, %v2212_v30, -inf  ;;  %v2229_v40 = vadd.f32 %v465_v18, %v360_v36  ;;  %v757_v43 = vsel %vm744_vm1, %v2224_v37, -inf  ;;  %v380_v19 = vld [vmem:[%s2162_s26 + $0xc8] sm:$0xff] }
 0x113   : > { %v766_v33 = vsel %vm744_vm1, %v2207_v27, -inf  ;;  %v2236_v44 = vadd.f32 %v554_v21, %v368_v41  ;;  %v781_v47 = vsel %vm744_vm1, %v2232_v42, -inf }
 0x114   : > { %779 = vmax.xlane.f32.xlu1 %v778_v23  ;;  %v790_v38 = vsel %vm744_vm1, %v2216_v32, -inf  ;;  %v760_v45 = vsel %vm744_vm1, %v2229_v40, -inf }
 0x115   : > { %v784_v54 = vsel %vm744_vm1, %v2236_v44, -inf }
 0x116   : > { %749 = vmax.xlane.f32.xlu0 %v748_v26 }
 0x118   : > { %773 = vmax.xlane.f32.xlu1 %v772_v29 }
 0x11a   : > { %764 = vmax.xlane.f32.xlu0 %v763_v31  ;;  %v378_v31 = vld [vmem:[%s2162_s26 + $0xb8] sm:$0xff] }
 0x11c   : > { %767 = vmax.xlane.f32.xlu1 %v766_v33 }
 0x11e   : > { %788 = vmax.xlane.f32.xlu0 %v787_v35 }
 0x120   : > { %791 = vmax.xlane.f32.xlu1 %v790_v38  ;;  %v375_v38 = vld [vmem:[%s2162_s26 + $0xa0] sm:$0xff] }
 0x122   : > { %758 = vmax.xlane.f32.xlu0 %v757_v43 }
 0x124   : > { %761 = vmax.xlane.f32.xlu1 %v760_v45 }
 0x126   : > { %v1753_v49 = vpop.f32.mrb[8].mxu0  ;;  %782 = vmax.xlane.f32.xlu0 %v781_v47  ;;  %v376_v47 = vld [vmem:[%s2162_s26 + $0xa8] sm:$0xff] }
 0x127   : > { %v2245_v51 = vadd.f32 %v1753_v49, %v373_v46  ;;  %v624_v53 = vpop.f32.mrb[9].mxu0  ;;  %v1769_v55 = vpop.f32.mrb[8].mxu1 }
 0x128   : > { %785 = vmax.xlane.f32.xlu1 %v784_v54  ;;  %v1754_v57 = vpop.f32.mrb[10].mxu0  ;;  %v2250_v60 = vadd.f32 %v1769_v55, %v381_v48  ;;  %v713_v61 = vpop.f32.mrb[9].mxu1  ;;  %v2264_v11 = vadd.f32 %v624_v53, %v371_v3  ;;  %v383_v48 = vld [vmem:[%s2162_s26 + $0xe0] sm:$0xff] }
 0x129   : > { %v2252_v62 = vadd.f32 %v1754_v57, %v374_v50  ;;  %v627_v63 = vpop.f32.mrb[11].mxu0  ;;  %v799_v0 = vsel %vm744_vm1, %v2245_v51, -inf  ;;  %v1770_v2 = vpop.f32.mrb[10].mxu1  ;;  %v2273_v25 = vadd.f32 %v713_v61, %v379_v13  ;;  %v384_v50 = vld [vmem:[%s2162_s26 + $0xe8] sm:$0xff]  ;;  %v385_v57 = vld [vmem:[%s2162_s26 + $0xf0] sm:$0xff] }
 0x12a   : > { %800 = vmax.xlane.f32.xlu0 %v799_v0  ;;  %v2257_v5 = vadd.f32 %v1770_v2, %v382_v56  ;;  %v716_v6 = vpop.f32.mrb[11].mxu1  ;;  %v823_v9 = vsel %vm744_vm1, %v2250_v60, -inf  ;;  %v2269_v15 = vadd.f32 %v627_v63, %v372_v10  ;;  %v793_v26 = vsel %vm744_vm1, %v2264_v11, -inf  ;;  %v386_v0 = vld [vmem:[%s2162_s26 + $0xf8] sm:$0xff] }
 0x12b   : > { %v802_v7 = vsel %vm744_vm1, %v2252_v62, -inf  ;;  %v2278_v34 = vadd.f32 %v716_v6, %v380_v19  ;;  %v817_v39 = vsel %vm744_vm1, %v2273_v25, -inf }
 0x12c   : > { %803 = vmax.xlane.f32.xlu1 %v802_v7  ;;  %v826_v12 = vsel %vm744_vm1, %v2257_v5, -inf  ;;  %v796_v35 = vsel %vm744_vm1, %v2269_v15, -inf }
 0x12d   : > { %v820_v45 = vsel %vm744_vm1, %v2278_v34, -inf }
 0x12e   : > { %824 = vmax.xlane.f32.xlu0 %v823_v9  ;;  %v1757_v14 = vpop.f32.mrb[12].mxu0 }
 0x12f   : > { %v640_v17 = vpop.f32.mrb[13].mxu0  ;;  %v1773_v18 = vpop.f32.mrb[12].mxu1  ;;  %v2282_v36 = vadd.f32 %v1757_v14, %v377_v20 }
 0x130   : > { %827 = vmax.xlane.f32.xlu1 %v826_v12  ;;  %v1758_v21 = vpop.f32.mrb[14].mxu0  ;;  %v729_v23 = vpop.f32.mrb[13].mxu1  ;;  %v2289_v43 = vadd.f32 %v640_v17, %v375_v38  ;;  %v2314_v2 = vadd.f32 %v1773_v18, %v385_v57 }
 0x131   : > { %v643_v28 = vpop.f32.mrb[15].mxu0  ;;  %v1774_v29 = vpop.f32.mrb[14].mxu1  ;;  %v2287_v41 = vadd.f32 %v1758_v21, %v378_v31  ;;  %v811_v46 = vsel %vm744_vm1, %v2282_v36, -inf  ;;  %v2302_v54 = vadd.f32 %v729_v23, %v383_v48 }
 0x132   : > { %794 = vmax.xlane.f32.xlu0 %v793_v26  ;;  %v732_v33 = vpop.f32.mrb[15].mxu1  ;;  %v2300_v53 = vadd.f32 %v643_v28, %v376_v47  ;;  %v805_v55 = vsel %vm744_vm1, %v2289_v43, -inf  ;;  %v2318_v6 = vadd.f32 %v1774_v29, %v386_v0  ;;  %v835_v7 = vsel %vm744_vm1, %v2314_v2, -inf }
 0x133   : > { %v814_v49 = vsel %vm744_vm1, %v2287_v41, -inf  ;;  %v2306_v56 = vadd.f32 %v732_v33, %v384_v50  ;;  %v829_v63 = vsel %vm744_vm1, %v2302_v54, -inf }
 0x134   : > { %797 = vmax.xlane.f32.xlu1 %v796_v35  ;;  %v808_v61 = vsel %vm744_vm1, %v2300_v53, -inf  ;;  %v838_v9 = vsel %vm744_vm1, %v2318_v6, -inf }
 0x135   : > { %v832_v3 = vsel %vm744_vm1, %v2306_v56, -inf }
 0x136   : > { %818 = vmax.xlane.f32.xlu0 %v817_v39 }
 0x138   : > { %821 = vmax.xlane.f32.xlu1 %v820_v45 }
 0x13a   : > { %812 = vmax.xlane.f32.xlu0 %v811_v46 }
 0x13c   : > { %815 = vmax.xlane.f32.xlu1 %v814_v49 }
 0x13e   : > { %806 = vmax.xlane.f32.xlu0 %v805_v55 }
 0x140   : > { %809 = vmax.xlane.f32.xlu1 %v808_v61 }
 0x142   : > { %830 = vmax.xlane.f32.xlu0 %v829_v63 }
 0x144   : > { %833 = vmax.xlane.f32.xlu1 %v832_v3 }
 0x146   : > { %836 = vmax.xlane.f32.xlu0 %v835_v7 }
 0x148   : > { %839 = vmax.xlane.f32.xlu1 %v838_v9 }
 0x197   : > { %v753_v10 = vpop.xlane.xlu0 %752 }
 0x198   : > { %v843_v12 = vsub.f32 %v2167_v52, %v753_v10 }
 0x199   : > { %v771_v13 = vpop.xlane.xlu1 %770 }
 0x19a   : > { %v877_v14 = vmul.f32 1.442695, %v843_v12  ;;  %v849_v19 = vsub.f32 %v2172_v59, %v771_v13 }
 0x19b   : > { %v777_v17 = vpop.xlane.xlu0 %776 }
 0x19c   : > { %1863 = vpow2.f32 %v877_v14  ;;  %v851_v18 = vsub.f32 %v2170_v58, %v777_v17  ;;  %v889_v31 = vmul.f32 1.442695, %v849_v19 }
 0x19d   : > { %v756_v20 = vpop.xlane.xlu1 %755 }
 0x19e   : > { %v893_v21 = vmul.f32 1.442695, %v851_v18  ;;  %v844_v23 = vsub.f32 %v2177_v1, %v756_v20 }
 0x19f   : > { %v747_v26 = vpop.xlane.xlu0 %746 }
 0x1a0   : > { %1865 = vpow2.f32 %v893_v21  ;;  %v879_v28 = vmul.f32 1.442695, %v844_v23  ;;  %v841_v29 = vsub.f32 %v2182_v4, %v747_v26 }
 0x1a1   : > { %v780_v33 = vpop.xlane.xlu1 %779 }
 0x1a2   : > { %1867 = vpow2.f32 %v879_v28  ;;  %v873_v52 = vmul.f32 1.442695, %v841_v29  ;;  %v852_v35 = vsub.f32 %v2187_v8, %v780_v33 }
 0x1a3   : > { %v750_v38 = vpop.xlane.xlu0 %749 }
 0x1a4   : > { %1869 = vpow2.f32 %v873_v52  ;;  %v895_v58 = vmul.f32 1.442695, %v852_v35  ;;  %v842_v59 = vsub.f32 %v2193_v16, %v750_v38 }
 0x1a5   : > { %1871 = vpow2.f32 %v889_v31  ;;  %v774_v39 = vpop.xlane.xlu1 %773 }
 0x1a6   : > { %v2331_v45 = vpop.eup %1863  ;;  %1873 = vpow2.f32 %v895_v58  ;;  %v875_v1 = vmul.f32 1.442695, %v842_v59  ;;  %v850_v46 = vsub.f32 %v2198_v22, %v774_v39 }
 0x1a7   : > { %v765_v4 = vpop.xlane.xlu0 %764  ;;  %v943_v47 = vsel %vm744_vm1, %v2331_v45, 0.0 }
 0x1a8   : > { %1875 = vpow2.f32 %v875_v1  ;;  %v891_v48 = vmul.f32 1.442695, %v850_v46  ;;  %v847_v8 = vsub.f32 %v2202_v24, %v765_v4  ;;  %944 = vadd.xlane.f32.xlu0 %v943_v47 }
 0x1a9   : > { %v768_v49 = vpop.xlane.xlu1 %767 }
 0x1aa   : > { %v2337_v50 = vpop.eup %1865  ;;  %v885_v16 = vmul.f32 1.442695, %v847_v8  ;;  %v848_v55 = vsub.f32 %v2207_v27, %v768_v49  ;;  %1877 = vpow2.f32 %v891_v48 }
 0x1ab   : > { %v789_v57 = vpop.xlane.xlu0 %788  ;;  %v967_v22 = vsel %vm744_vm1, %v2337_v50, 0.0 }
 0x1ac   : > { %v2342_v61 = vpop.eup %1867  ;;  %1879 = vpow2.f32 %v885_v16  ;;  %v887_v63 = vmul.f32 1.442695, %v848_v55  ;;  %v855_v0 = vsub.f32 %v2212_v30, %v789_v57  ;;  %968 = vadd.xlane.f32.xlu0 %v967_v22 }
 0x1ad   : > { %v792_v24 = vpop.xlane.xlu1 %791  ;;  %v946_v3 = vsel %vm744_vm1, %v2342_v61, 0.0 }
 0x1ae   : > { %v2347_v7 = vpop.eup %1869  ;;  %v901_v9 = vmul.f32 1.442695, %v855_v0  ;;  %v856_v27 = vsub.f32 %v2216_v32, %v792_v24  ;;  %947 = vadd.xlane.f32.xlu1 %v946_v3  ;;  %1881 = vpow2.f32 %v887_v63 }
 0x1af   : > { %v2350_v10 = vpop.eup %1871  ;;  %v759_v12 = vpop.xlane.xlu0 %758  ;;  %v937_v13 = vsel %vm744_vm1, %v2347_v7, 0.0 }
 0x1b0   : > { %v2354_v14 = vpop.eup %1873  ;;  %1883 = vpow2.f32 %v901_v9  ;;  %v903_v30 = vmul.f32 1.442695, %v856_v27  ;;  %v845_v17 = vsub.f32 %v2224_v37, %v759_v12  ;;  %938 = vadd.xlane.f32.xlu0 %v937_v13  ;;  %v961_v26 = vsel %vm744_vm1, %v2350_v10, 0.0  ;;  %v1113_v12 = vld [vmem:[%s2399_s29] sm:$0xff]  ;;  %v1114_v13 = vld [vmem:[%s2399_s29 + $0x8] sm:$0xff] }
 0x1b1   : > { %v762_v18 = vpop.xlane.xlu1 %761  ;;  %v970_v19 = vsel %vm744_vm1, %v2354_v14, 0.0 }
 0x1b2   : > { %v2359_v32 = vpop.eup %1875  ;;  %v881_v20 = vmul.f32 1.442695, %v845_v17  ;;  %v846_v21 = vsub.f32 %v2229_v40, %v762_v18  ;;  %971 = vadd.xlane.f32.xlu1 %v970_v19  ;;  %1885 = vpow2.f32 %v903_v30  ;;  %v1145_v18 = vpack.c.bf16 %v1114_v13, %v1113_v12  ;;  %v1119_v13 = vld [vmem:[%s2399_s29 + $0x30] sm:$0xff] }
 0x1b3   : > { %v783_v23 = vpop.xlane.xlu0 %782  ;;  %v940_v28 = vsel %vm744_vm1, %v2359_v32, 0.0 }
 0x1b4   : > { %1887 = vpow2.f32 %v881_v20  ;;  %v883_v37 = vmul.f32 1.442695, %v846_v21  ;;  %v853_v29 = vsub.f32 %v2232_v42, %v783_v23  ;;  %962 = vadd.xlane.f32.xlu0 %v961_v26  ;;  %v2367_v31 = vpop.eup %1877  ;;  %1775 = vmatprep.subr.bf16.mxu0 %v1145_v18 }
 0x1b5   : > { %v786_v33 = vpop.xlane.xlu1 %785  ;;  %v964_v46 = vsel %vm744_vm1, %v2367_v31, 0.0  ;;  %1776 = vmatpush3.bf16.msra.mxu0 %v1145_v18 }
 0x1b6   : > { %v2369_v52 = vpop.eup %1879  ;;  %v897_v40 = vmul.f32 1.442695, %v853_v29  ;;  %v854_v35 = vsub.f32 %v2236_v44, %v786_v33  ;;  %941 = vadd.xlane.f32.xlu1 %v940_v28  ;;  %1889 = vpow2.f32 %v883_v37  ;;  %v1115_v37 = vld [vmem:[%s2399_s29 + $0x10] sm:$0xff]  ;;  %v1116_v29 = vld [vmem:[%s2399_s29 + $0x18] sm:$0xff]  ;;  %v1121_v33 = vld [vmem:[%s2399_s29 + $0x40] sm:$0xff] }
 0x1b7   : > { %v801_v38 = vpop.xlane.xlu0 %800  ;;  %v955_v58 = vsel %vm744_vm1, %v2369_v52, 0.0 }
 0x1b8   : > { %1891 = vpow2.f32 %v897_v40  ;;  %v899_v59 = vmul.f32 1.442695, %v854_v35  ;;  %v859_v39 = vsub.f32 %v2245_v51, %v801_v38  ;;  %956 = vadd.xlane.f32.xlu0 %v955_v58  ;;  %v2375_v42 = vpop.eup %1881  ;;  %v1146_v58 = vpack.c.bf16 %v1116_v29, %v1115_v37 }
 0x1b9   : > { %v804_v1 = vpop.xlane.xlu1 %803  ;;  %v958_v57 = vsel %vm744_vm1, %v2375_v42, 0.0 }
 0x1ba   : > { %v2379_v4 = vpop.eup %1883  ;;  %v909_v44 = vmul.f32 1.442695, %v859_v39  ;;  %v860_v47 = vsub.f32 %v2252_v62, %v804_v1  ;;  %965 = vadd.xlane.f32.xlu1 %v964_v46  ;;  %1893 = vpow2.f32 %v899_v59  ;;  %1777 = vmatprep.subr.bf16.mxu0 %v1146_v58 }
 0x1bb   : > { %v825_v48 = vpop.xlane.xlu0 %824  ;;  %v979_v8 = vsel %vm744_vm1, %v2379_v4, 0.0  ;;  %1778 = vmatpush3.bf16.msra.mxu0 %v1146_v58  ;;  %v1128_v58 = vld [vmem:[%s2399_s29 + $0x78] sm:$0xff] }
 0x1bc   : > { %1895 = vpow2.f32 %v909_v44  ;;  %v911_v51 = vmul.f32 1.442695, %v860_v47  ;;  %v867_v49 = vsub.f32 %v2250_v60, %v825_v48  ;;  %980 = vadd.xlane.f32.xlu0 %v979_v8  ;;  %v2385_v16 = vpop.eup %1885  ;;  %v1117_v8 = vld [vmem:[%s2399_s29 + $0x20] sm:$0xff] }
 0x1bd   : > { %v828_v55 = vpop.xlane.xlu1 %827  ;;  %v982_v27 = vsel %vm744_vm1, %v2385_v16, 0.0 }
 0x1be   : > { %v2389_v22 = vpop.eup %1887  ;;  %v925_v62 = vmul.f32 1.442695, %v867_v49  ;;  %v868_v63 = vsub.f32 %v2257_v5, %v828_v55  ;;  %959 = vadd.xlane.f32.xlu1 %v958_v57  ;;  %1897 = vpow2.f32 %v911_v51  ;;  %v1118_v51 = vld [vmem:[%s2399_s29 + $0x28] sm:$0xff]  ;;  %v1123_v49 = vld [vmem:[%s2399_s29 + $0x50] sm:$0xff] }
 0x1bf   : > { %v795_v0 = vpop.xlane.xlu0 %794  ;;  %v949_v24 = vsel %vm744_vm1, %v2389_v22, 0.0 }
 0x1c0   : > { %1899 = vpow2.f32 %v925_v62  ;;  %v927_v60 = vmul.f32 1.442695, %v868_v63  ;;  %v857_v3 = vsub.f32 %v2264_v11, %v795_v0  ;;  %950 = vadd.xlane.f32.xlu0 %v949_v24  ;;  %v2401_v9 = vpop.eup %1889  ;;  %v1124_v63 = vld [vmem:[%s2399_s29 + $0x58] sm:$0xff] }
 0x1c1   : > { %v798_v5 = vpop.xlane.xlu1 %797 }
 0x1c2   : > { %v2407_v30 = vpop.eup %1891  ;;  %v905_v17 = vmul.f32 1.442695, %v857_v3  ;;  %v858_v11 = vsub.f32 %v2269_v15, %v798_v5  ;;  %983 = vadd.xlane.f32.xlu1 %v982_v27  ;;  %1901 = vpow2.f32 %v927_v60  ;;  %v952_v15 = vsel %vm744_vm1, %v2401_v9, 0.0 }
 0x1c3   : > { %v819_v19 = vpop.xlane.xlu0 %818  ;;  %v973_v20 = vsel %vm744_vm1, %v2407_v30, 0.0  ;;  %v1150_v60 = vpack.c.bf16 %v1124_v63, %v1123_v49 }
 0x1c4   : > { %1903 = vpow2.f32 %v905_v17  ;;  %v907_v21 = vmul.f32 1.442695, %v858_v11  ;;  %v865_v23 = vsub.f32 %v2273_v25, %v819_v19  ;;  %974 = vadd.xlane.f32.xlu0 %v973_v20  ;;  %v2413_v26 = vpop.eup %1893  ;;  %v1122_v25 = vld [vmem:[%s2399_s29 + $0x48] sm:$0xff]  ;;  %v1120_v17 = vld [vmem:[%s2399_s29 + $0x38] sm:$0xff]  ;;  %v1125_v11 = vld [vmem:[%s2399_s29 + $0x60] sm:$0xff] }
 0x1c5   : > { %v822_v28 = vpop.xlane.xlu1 %821  ;;  %v1149_v1 = vpack.c.bf16 %v1122_v25, %v1121_v33  ;;  %v976_v48 = vsel %vm744_vm1, %v2413_v26, 0.0 }
 0x1c6   : > { %v2420_v40 = vpop.eup %1895  ;;  %v921_v35 = vmul.f32 1.442695, %v865_v23  ;;  %v866_v38 = vsub.f32 %v2278_v34, %v822_v28  ;;  %953 = vadd.xlane.f32.xlu1 %v952_v15  ;;  %1905 = vpow2.f32 %v907_v21  ;;  %v1126_v21 = vld [vmem:[%s2399_s29 + $0x68] sm:$0xff] }
 0x1c7   : > { %v813_v59 = vpop.xlane.xlu0 %812  ;;  %v991_v39 = vsel %vm744_vm1, %v2420_v40, 0.0  ;;  %1791 = vmatprep.subr.bf16.mxu1 %v1149_v1  ;;  %v1151_v15 = vpack.c.bf16 %v1126_v21, %v1125_v11  ;;  %v1137_v21 = vld [vmem:[%s2399_s29 + $0xc0] sm:$0xff] }
 0x1c8   : > { %1907 = vpow2.f32 %v921_v35  ;;  %v923_v46 = vmul.f32 1.442695, %v866_v38  ;;  %v863_v44 = vsub.f32 %v2282_v36, %v813_v59  ;;  %992 = vadd.xlane.f32.xlu0 %v991_v39  ;;  %v2427_v34 = vpop.eup %1897  ;;  %1792 = vmatpush3.bf16.msra.mxu1 %v1149_v1  ;;  %v1147_v36 = vpack.c.bf16 %v1118_v51, %v1117_v8  ;;  %v1127_v38 = vld [vmem:[%s2399_s29 + $0x70] sm:$0xff] }
 0x1c9   : > { %v816_v47 = vpop.xlane.xlu1 %815  ;;  %v994_v12 = vsel %vm744_vm1, %v2427_v34, 0.0  ;;  %1793 = vmatprep.subr.bf16.mxu1 %v1150_v60 }
 0x1ca   : > { %v2434_v55 = vpop.eup %1899  ;;  %v917_v57 = vmul.f32 1.442695, %v863_v44  ;;  %v864_v62 = vsub.f32 %v2287_v41, %v816_v47  ;;  %977 = vadd.xlane.f32.xlu1 %v976_v48  ;;  %1909 = vpow2.f32 %v923_v46  ;;  %1779 = vmatprep.subr.bf16.mxu0 %v1147_v36 }
 0x1cb   : > { %v807_v0 = vpop.xlane.xlu0 %806  ;;  %v1015_v24 = vsel %vm744_vm1, %v2434_v55, 0.0  ;;  %1780 = vmatpush3.bf16.msra.mxu0 %v1147_v36 }
 0x1cc   : > { %1911 = vpow2.f32 %v917_v57  ;;  %v919_v3 = vmul.f32 1.442695, %v864_v62  ;;  %v861_v5 = vsub.f32 %v2289_v43, %v807_v0  ;;  %1016 = vadd.xlane.f32.xlu0 %v1015_v24  ;;  %v2441_v41 = vpop.eup %1901  ;;  %1794 = vmatpush3.bf16.msra.mxu1 %v1150_v60  ;;  %v1148_v43 = vpack.c.bf16 %v1120_v17, %v1119_v13  ;;  %v1129_v13 = vld [vmem:[%s2399_s29 + $0x80] sm:$0xff]  ;;  %v1130_v17 = vld [vmem:[%s2399_s29 + $0x88] sm:$0xff] }
 0x1cd   : > { %v810_v27 = vpop.xlane.xlu1 %809  ;;  %v1018_v35 = vsel %vm744_vm1, %v2441_v41, 0.0  ;;  %1795 = vmatprep.subr.bf16.mxu1 %v1151_v15 }
 0x1ce   : > { %v2448_v18 = vpop.eup %1903  ;;  %v913_v19 = vmul.f32 1.442695, %v861_v5  ;;  %v862_v20 = vsub.f32 %v2300_v53, %v810_v27  ;;  %995 = vadd.xlane.f32.xlu1 %v994_v12  ;;  %1913 = vpow2.f32 %v919_v3  ;;  %1781 = vmatprep.subr.bf16.mxu0 %v1148_v43 }
 0x1cf   : > { %v831_v23 = vpop.xlane.xlu0 %830  ;;  %v985_v28 = vsel %vm744_vm1, %v2448_v18, 0.0  ;;  %1782 = vmatpush3.bf16.msra.mxu0 %v1148_v43 }
 0x1d0   : > { %1915 = vpow2.f32 %v913_v19  ;;  %v915_v37 = vmul.f32 1.442695, %v862_v20  ;;  %v869_v29 = vsub.f32 %v2302_v54, %v831_v23  ;;  %986 = vadd.xlane.f32.xlu0 %v985_v28  ;;  %v2455_v33 = vpop.eup %1905  ;;  %1796 = vmatpush3.bf16.msra.mxu1 %v1151_v15  ;;  %v1152_v54 = vpack.c.bf16 %v1128_v58, %v1127_v38  ;;  %v1138_v28 = vld [vmem:[%s2399_s29 + $0xc8] sm:$0xff] }
 0x1d1   : > { %v834_v53 = vpop.xlane.xlu1 %833  ;;  %v2500_v19 = vpack.c.bf16 %v1130_v17, %v1129_v13  ;;  %v2511_v15 = vpack.c.bf16 %v1138_v28, %v1137_v21 }
 0x1d2   : > { %v2461_v25 = vpop.eup %1907  ;;  %v929_v59 = vmul.f32 1.442695, %v869_v29  ;;  %v870_v39 = vsub.f32 %v2306_v56, %v834_v53  ;;  %1019 = vadd.xlane.f32.xlu1 %v1018_v35  ;;  %1917 = vpow2.f32 %v915_v37  ;;  %1797 = vmatprep.subr.bf16.mxu1 %v1152_v54  ;;  %v988_v56 = vsel %vm744_vm1, %v2455_v33, 0.0 }
 0x1d3   : > { %v837_v1 = vpop.xlane.xlu0 %836  ;;  %v1009_v46 = vsel %vm744_vm1, %v2461_v25, 0.0  ;;  %1807 = vmatprep.subr.bf16.mxu0 %v2500_v19 }
 0x1d4   : > { %1919 = vpow2.f32 %v929_v59  ;;  %v931_v44 = vmul.f32 1.442695, %v870_v39  ;;  %v871_v47 = vsub.f32 %v2314_v2, %v837_v1  ;;  %1010 = vadd.xlane.f32.xlu0 %v1009_v46  ;;  %v2467_v48 = vpop.eup %1909  ;;  %1798 = vmatpush3.bf16.msra.mxu1 %v1152_v54 }
 0x1d5   : > { %v840_v8 = vpop.xlane.xlu1 %839  ;;  %v1012_v63 = vsel %vm744_vm1, %v2467_v48, 0.0  ;;  %1823 = vmatprep.subr.bf16.mxu1 %v2511_v15 }
 0x1d6   : > { %v2471_v51 = vpop.eup %1911  ;;  %v933_v49 = vmul.f32 1.442695, %v871_v47  ;;  %v872_v57 = vsub.f32 %v2318_v6, %v840_v8  ;;  %989 = vadd.xlane.f32.xlu1 %v988_v56  ;;  %1921 = vpow2.f32 %v931_v44 }
 0x1d7   : > { %v1003_v62 = vsel %vm744_vm1, %v2471_v51, 0.0 }
 0x1d8   : > { %1923 = vpow2.f32 %v933_v49  ;;  %v935_v2 = vmul.f32 1.442695, %v872_v57  ;;  %1004 = vadd.xlane.f32.xlu0 %v1003_v62  ;;  %v2476_v36 = vpop.eup %1913 }
 0x1d9   : > { %v1006_v60 = vsel %vm744_vm1, %v2476_v36, 0.0 }
 0x1da   : > { %v2480_v0 = vpop.eup %1915  ;;  %1013 = vadd.xlane.f32.xlu1 %v1012_v63  ;;  %1925 = vpow2.f32 %v935_v2 }
 0x1db   : > { %v997_v6 = vsel %vm744_vm1, %v2480_v0, 0.0 }
 0x1dc   : > { %998 = vadd.xlane.f32.xlu0 %v997_v6  ;;  %v2484_v24 = vpop.eup %1917 }
 0x1dd   : > { %v1000_v12 = vsel %vm744_vm1, %v2484_v24, 0.0 }
 0x1de   : > { %v2488_v3 = vpop.eup %1919  ;;  %1007 = vadd.xlane.f32.xlu1 %v1006_v60 }
 0x1df   : > { %v1021_v5 = vsel %vm744_vm1, %v2488_v3, 0.0 }
 0x1e0   : > { %1022 = vadd.xlane.f32.xlu0 %v1021_v5  ;;  %v2492_v27 = vpop.eup %1921  ;;  %v1131_v5 = vld [vmem:[%s2399_s29 + $0x90] sm:$0xff] }
 0x1e1   : > { %v1024_v43 = vsel %vm744_vm1, %v2492_v27, 0.0 }
 0x1e2   : > { %v2498_v11 = vpop.eup %1923  ;;  %1001 = vadd.xlane.f32.xlu1 %v1000_v12  ;;  %v1132_v12 = vld [vmem:[%s2399_s29 + $0x98] sm:$0xff] }
 0x1e3   : > { %v1027_v20 = vsel %vm744_vm1, %v2498_v11, 0.0 }
 0x1e4   : > { %1028 = vadd.xlane.f32.xlu0 %v1027_v20  ;;  %v2508_v23 = vpop.eup %1925 }
 0x1e5   : > { %v1030_v37 = vsel %vm744_vm1, %v2508_v23, 0.0 }
 0x1e6   : > { %1025 = vadd.xlane.f32.xlu1 %v1024_v43 }
 0x1ea   : > { %1031 = vadd.xlane.f32.xlu1 %v1030_v37 }
 0x235   : > { %v945_v29 = vpop.xlane.xlu0 %944 }
 0x239   : > { %v969_v53 = vpop.xlane.xlu0 %968 }
 0x23b   : > { %v948_v35 = vpop.xlane.xlu1 %947 }
 0x23c   : > { %1927 = vrcp.f32 %v948_v35  ;;  %v1134_v35 = vld [vmem:[%s2399_s29 + $0xa8] sm:$0xff] }
 0x23d   : > { %v939_v38 = vpop.xlane.xlu0 %938 }
 0x23e   : > { %1929 = vrcp.f32 %v939_v38  ;;  %v1139_v38 = vld [vmem:[%s2399_s29 + $0xd0] sm:$0xff] }
 0x23f   : > { %v972_v58 = vpop.xlane.xlu1 %971  ;;  %1931 = vrcp.f32 %v945_v29  ;;  %v1133_v29 = vld [vmem:[%s2399_s29 + $0xa0] sm:$0xff] }
 0x241   : > { %v963_v59 = vpop.xlane.xlu0 %962 }
 0x243   : > { %v942_v39 = vpop.xlane.xlu1 %941 }
 0x244   : > { %1933 = vrcp.f32 %v942_v39 }
 0x245   : > { %1935 = vrcp.f32 %v972_v58  ;;  %v957_v54 = vpop.xlane.xlu0 %956  ;;  %v1140_v58 = vld [vmem:[%s2399_s29 + $0xd8] sm:$0xff] }
 0x246   : > { %1937 = vrcp.f32 %v963_v59  ;;  %v1928_v44 = vpop.eup %1927 }
 0x247   : > { %1939 = vrcp.f32 %v969_v53  ;;  %v966_v1 = vpop.xlane.xlu1 %965  ;;  %v1040_v62 = vmul.f32 %v1928_v44, %v2342_v61 }
 0x248   : > { %1941 = vrcp.f32 %v966_v1  ;;  %v1930_v8 = vpop.eup %1929  ;;  %v1135_v1 = vld [vmem:[%s2399_s29 + $0xb0] sm:$0xff] }
 0x249   : > { %v981_v46 = vpop.xlane.xlu0 %980  ;;  %v1932_v56 = vpop.eup %1931  ;;  %v1034_v6 = vmul.f32 %v1930_v8, %v2347_v7  ;;  %v1154_v7 = vpack.c.bf16 %v1132_v12, %v1131_v5  ;;  %v1142_v8 = vld [vmem:[%s2399_s29 + $0xe8] sm:$0xff] }
 0x24a   : > { %v1038_v17 = vmul.f32 %v1932_v56, %v2331_v45 }
 0x24b   : > { %v960_v47 = vpop.xlane.xlu1 %959 }
 0x24c   : > { %1943 = vrcp.f32 %v960_v47  ;;  %v1098_v28 = vpack.c.bf16 %v1040_v62, %v1038_v17  ;;  %v1141_v47 = vld [vmem:[%s2399_s29 + $0xe0] sm:$0xff]  ;;  %v1143_v62 = vld [vmem:[%s2399_s29 + $0xf0] sm:$0xff] }
 0x24d   : > { %v951_v49 = vpop.xlane.xlu0 %950 }
 0x24e   : > { %v1934_v57 = vpop.eup %1933  ;;  %1945 = vrcp.f32 %v951_v49  ;;  %v1159_v49 = vpack.c.bf16 %v1142_v8, %v1141_v47 }
 0x24f   : > { %v1936_v2 = vpop.eup %1935  ;;  %v984_v63 = vpop.xlane.xlu1 %983  ;;  %v1036_v60 = vmul.f32 %v1934_v57, %v2359_v32  ;;  %1947 = vrcp.f32 %v957_v54  ;;  %v1158_v54 = vpack.c.bf16 %v1140_v58, %v1139_v38 }
 0x250   : > { %v1938_v13 = vpop.eup %1937  ;;  %v1056_v37 = vmul.f32 %v1936_v2, %v2354_v14  ;;  %v1144_v2 = vld [vmem:[%s2399_s29 + $0xf8] sm:$0xff] }
 0x251   : > { %v1940_v20 = vpop.eup %1939  ;;  %v975_v43 = vpop.xlane.xlu0 %974  ;;  %v1097_v21 = vpack.c.bf16 %v1036_v60, %v1034_v6  ;;  %v1050_v45 = vmul.f32 %v1938_v13, %v2350_v10  ;;  %v1160_v13 = vpack.c.bf16 %v1144_v2, %v1143_v62 }
 0x252   : > { %v1942_v61 = vpop.eup %1941  ;;  %v1054_v59 = vmul.f32 %v1940_v20, %v2337_v50  ;;  %v1136_v50 = vld [vmem:[%s2399_s29 + $0xb8] sm:$0xff] }
 0x253   : > { %v954_v32 = vpop.xlane.xlu1 %953  ;;  %1783 = vmatprep.mubr.msk.bf16.mxu0 %vm744_vm1, %v1097_v21  ;;  %v1052_v53 = vmul.f32 %v1942_v61, %v2367_v31  ;;  %v1155_v31 = vpack.c.bf16 %v1134_v35, %v1133_v29 }
 0x254   : > { %1949 = vrcp.f32 %v954_v32  ;;  %1784 = vmatmul.mubr.msk.bf16.vlgmr.msra.gmra.mrb[16].mxu0 %vm744_vm1, %v1098_v28  ;;  %v1102_v10 = vpack.c.bf16 %v1056_v37, %v1054_v59 }
 0x255   : > { %1951 = vrcp.f32 %v984_v63  ;;  %v993_v14 = vpop.xlane.xlu0 %992  ;;  %v1101_v39 = vpack.c.bf16 %v1052_v53, %v1050_v45  ;;  %1808 = vmatpush3.bf16.msra.mxu0 %v2500_v19  ;;  %v1156_v19 = vpack.c.bf16 %v1136_v50, %v1135_v1 }
 0x256   : > { %1953 = vrcp.f32 %v975_v43  ;;  %1809 = vmatprep.subr.bf16.mxu0 %v1154_v7 }
 0x257   : > { %1955 = vrcp.f32 %v981_v46  ;;  %v978_v44 = vpop.xlane.xlu1 %977  ;;  %1799 = vmatprep.mubr.msk.bf16.mxu1 %vm744_vm1, %v1101_v39  ;;  %v1944_v46 = vpop.eup %1943 }
 0x258   : > { %1957 = vrcp.f32 %v978_v44  ;;  %1800 = vmatmul.mubr.msk.bf16.vlgmr.msra.gmra.mrb[16].mxu1 %vm744_vm1, %v1102_v10  ;;  %v1946_v63 = vpop.eup %1945  ;;  %v1048_v12 = vmul.f32 %v1944_v46, %v2375_v42 }
 0x259   : > { %v1017_v56 = vpop.xlane.xlu0 %1016  ;;  %1810 = vmatpush3.bf16.msra.mxu0 %v1154_v7  ;;  %1824 = vmatpush3.bf16.msra.mxu1 %v2511_v15  ;;  %v1948_v6 = vpop.eup %1947  ;;  %v1042_v20 = vmul.f32 %v1946_v63, %v2389_v22 }
 0x25a   : > { %1811 = vmatprep.subr.bf16.mxu0 %v1155_v31  ;;  %1825 = vmatprep.subr.bf16.mxu1 %v1158_v54  ;;  %v1046_v61 = vmul.f32 %v1948_v6, %v2369_v52 }
 0x25b   : > { %v996_v57 = vpop.xlane.xlu1 %995 }
 0x25c   : > { %1959 = vrcp.f32 %v996_v57  ;;  %v1100_v42 = vpack.c.bf16 %v1048_v12, %v1046_v61 }
 0x25d   : > { %v987_v60 = vpop.xlane.xlu0 %986  ;;  %1812 = vmatpush3.bf16.msra.mxu0 %v1155_v31  ;;  %1826 = vmatpush3.bf16.msra.mxu1 %v1158_v54 }
 0x25e   : > { %v1950_v5 = vpop.eup %1949  ;;  %1813 = vmatprep.subr.bf16.mxu0 %v1156_v19  ;;  %1827 = vmatprep.subr.bf16.mxu1 %v1159_v49  ;;  %1961 = vrcp.f32 %v987_v60 }
 0x25f   : > { %v1952_v15 = vpop.eup %1951  ;;  %v1020_v17 = vpop.xlane.xlu1 %1019  ;;  %v1044_v43 = vmul.f32 %v1950_v5, %v2401_v9  ;;  %1963 = vrcp.f32 %v993_v14 }
 0x260   : > { %v1954_v21 = vpop.eup %1953  ;;  %v1064_v32 = vmul.f32 %v1952_v15, %v2385_v16 }
 0x261   : > { %v1956_v28 = vpop.eup %1955  ;;  %v1011_v37 = vpop.xlane.xlu0 %1010  ;;  %v1099_v7 = vpack.c.bf16 %v1044_v43, %v1042_v20  ;;  %1814 = vmatpush3.bf16.msra.mxu0 %v1156_v19  ;;  %1828 = vmatpush3.bf16.msra.mxu1 %v1159_v49  ;;  %v1058_v22 = vmul.f32 %v1954_v21, %v2407_v30 }
 0x262   : > { %v1958_v29 = vpop.eup %1957  ;;  %1829 = vmatprep.subr.bf16.mxu1 %v1160_v13  ;;  %v1062_v9 = vmul.f32 %v1956_v28, %v2379_v4 }
 0x263   : > { %v990_v45 = vpop.xlane.xlu1 %989  ;;  %1787 = vmatprep.mubr.msk.bf16.mxu0 %vm744_vm1, %v1099_v7  ;;  %v1060_v52 = vmul.f32 %v1958_v29, %v2413_v26 }
 0x264   : > { %1965 = vrcp.f32 %v990_v45  ;;  %1788 = vmatmul.mubr.msk.bf16.gmra.mrb[20].mxu0 %vm744_vm1, %v1100_v42  ;;  %v1104_v16 = vpack.c.bf16 %v1064_v32, %v1062_v9 }
 0x265   : > { %1967 = vrcp.f32 %v1020_v17  ;;  %v1005_v53 = vpop.xlane.xlu0 %1004  ;;  %v1103_v35 = vpack.c.bf16 %v1060_v52, %v1058_v22  ;;  %1830 = vmatpush3.bf16.msra.mxu1 %v1160_v13 }
 0x266   : > { %1969 = vrcp.f32 %v1011_v37  ;;  %v1960_v26 = vpop.eup %1959 }
 0x267   : > { %1971 = vrcp.f32 %v1017_v56  ;;  %v1014_v38 = vpop.xlane.xlu1 %1013  ;;  %1803 = vmatprep.mubr.msk.bf16.mxu1 %vm744_vm1, %v1103_v35  ;;  %v1072_v10 = vmul.f32 %v1960_v26, %v2427_v34 }
 0x268   : > { %1973 = vrcp.f32 %v1014_v38  ;;  %1804 = vmatmul.mubr.msk.bf16.gmra.mrb[20].mxu1 %vm744_vm1, %v1104_v16  ;;  %v1962_v59 = vpop.eup %1961 }
 0x269   : > { %v999_v30 = vpop.xlane.xlu0 %998  ;;  %v1964_v14 = vpop.eup %1963  ;;  %v1066_v1 = vmul.f32 %v1962_v59, %v2448_v18 }
 0x26a   : > { %v1070_v47 = vmul.f32 %v1964_v14, %v2420_v40 }
 0x26b   : > { %v1008_v58 = vpop.xlane.xlu1 %1007 }
 0x26c   : > { %1975 = vrcp.f32 %v1008_v58  ;;  %v1106_v49 = vpack.c.bf16 %v1072_v10, %v1070_v47 }
 0x26d   : > { %v1023_v4 = vpop.xlane.xlu0 %1022  ;;  %1977 = vrcp.f32 %v999_v30 }
 0x26e   : > { %v1966_v39 = vpop.eup %1965  ;;  %1979 = vrcp.f32 %v1005_v53 }
 0x26f   : > { %v1968_v31 = vpop.eup %1967  ;;  %v1002_v54 = vpop.xlane.xlu1 %1001  ;;  %v1068_v44 = vmul.f32 %v1966_v39, %v2455_v33 }
 0x270   : > { %v1970_v50 = vpop.eup %1969  ;;  %1981 = vrcp.f32 %v1002_v54  ;;  %v1088_v46 = vmul.f32 %v1968_v31, %v2441_v41 }
 0x271   : > { %v1972_v8 = vpop.eup %1971  ;;  %v1105_v56 = vpack.c.bf16 %v1068_v44, %v1066_v1  ;;  %1983 = vrcp.f32 %v1023_v4  ;;  %v1029_v34 = vpop.xlane.xlu0 %1028  ;;  %v1082_v62 = vmul.f32 %v1970_v50, %v2461_v25 }
 0x272   : > { %v1974_v19 = vpop.eup %1973  ;;  %v1086_v33 = vmul.f32 %v1972_v8, %v2434_v55 }
 0x273   : > { %v1026_v57 = vpop.xlane.xlu1 %1025  ;;  %1815 = vmatprep.mubr.msk.bf16.mxu0 %vm744_vm1, %v1105_v56  ;;  %v1084_v18 = vmul.f32 %v1974_v19, %v2467_v48 }
 0x274   : > { %1985 = vrcp.f32 %v1026_v57  ;;  %1816 = vmatmul.mubr.msk.bf16.vlgmr.msra.gmra.mrb[24].mxu0 %vm744_vm1, %v1106_v49  ;;  %v1110_v2 = vpack.c.bf16 %v1088_v46, %v1086_v33 }
 0x275   : > { %v1109_v40 = vpack.c.bf16 %v1084_v18, %v1082_v62  ;;  %1987 = vrcp.f32 %v1029_v34 }
 0x276   : > { %v1976_v63 = vpop.eup %1975 }
 0x277   : > { %v1032_v6 = vpop.xlane.xlu1 %1031  ;;  %1831 = vmatprep.mubr.msk.bf16.mxu1 %vm744_vm1, %v1109_v40  ;;  %v1978_v41 = vpop.eup %1977  ;;  %v1080_v48 = vmul.f32 %v1976_v63, %v2476_v36 }
 0x278   : > { %1989 = vrcp.f32 %v1032_v6  ;;  %1832 = vmatmul.mubr.msk.bf16.vlgmr.msra.gmra.mrb[24].mxu1 %vm744_vm1, %v1110_v2  ;;  %v1980_v60 = vpop.eup %1979  ;;  %v1074_v55 = vmul.f32 %v1978_v41, %v2480_v0 }
 0x279   : > { %v1078_v13 = vmul.f32 %v1980_v60, %v2471_v51 }
 0x27a   : > { %v1982_v25 = vpop.eup %1981 }
 0x27b   : > { %v1076_v5 = vmul.f32 %v1982_v25, %v2484_v24  ;;  %v1984_v12 = vpop.eup %1983  ;;  %v1108_v20 = vpack.c.bf16 %v1080_v48, %v1078_v13 }
 0x27c   : > { %v1090_v43 = vmul.f32 %v1984_v12, %v2488_v3 }
 0x27d   : > { %v1107_v15 = vpack.c.bf16 %v1076_v5, %v1074_v55 }
 0x27e   : > { %v1986_v17 = vpop.eup %1985 }
 0x27f   : > { %1819 = vmatprep.mubr.msk.bf16.mxu0 %vm744_vm1, %v1107_v15  ;;  %v1092_v21 = vmul.f32 %v1986_v17, %v2492_v27  ;;  %v1988_v61 = vpop.eup %1987 }
 0x280   : > { %1820 = vmatmul.mubr.msk.bf16.gmra.mrb[28].mxu0 %vm744_vm1, %v1108_v20  ;;  %v1094_v24 = vmul.f32 %v1988_v61, %v2498_v11 }
 0x281   : > { %v1111_v36 = vpack.c.bf16 %v1092_v21, %v1090_v43 }
 0x282   : > { %v1990_v0 = vpop.eup %1989 }
 0x283   : > { %1835 = vmatprep.mubr.msk.bf16.mxu1 %vm744_vm1, %v1111_v36  ;;  %v1096_v51 = vmul.f32 %v1990_v0, %v2508_v23 }
 0x285   : > { %v1112_v28 = vpack.c.bf16 %v1096_v51, %v1094_v24 }
 0x287   : > { %1836 = vmatmul.mubr.msk.bf16.gmra.mrb[28].mxu1 %vm744_vm1, %v1112_v28 }
 0x327   : > { %v1785_v3 = vpop.f32.mrb[16].mxu0 }
 0x328   : > { %1472 = vst.msk [vmem:[%s2582_s6 + $0x10] sm:$0xff] %vm1469_vm2, %v1785_v3  ;;  %v1207_v27 = vpop.f32.mrb[17].mxu0 }
 0x329   : > { %1470 = vst.msk [vmem:[%s2582_s6] sm:$0xff] %vm1469_vm2, %v1207_v27  ;;  %v1786_v11 = vpop.f32.mrb[18].mxu0 }
 0x32a   : > { %1473 = vst.msk [vmem:[%s2582_s6 + $0x18] sm:$0xff] %vm1469_vm2, %v1786_v11  ;;  %v1210_v23 = vpop.f32.mrb[19].mxu0 }
 0x32b   : > { %1471 = vst.msk [vmem:[%s2582_s6 + $0x8] sm:$0xff] %vm1469_vm2, %v1210_v23  ;;  %v1801_v37 = vpop.f32.mrb[16].mxu1 }
 0x32c   : > { %1480 = vst.msk [vmem:[%s2582_s6 + $0x50] sm:$0xff] %vm1469_vm2, %v1801_v37  ;;  %v1284_v7 = vpop.f32.mrb[17].mxu1 }
 0x32d   : > { %1478 = vst.msk [vmem:[%s2582_s6 + $0x40] sm:$0xff] %vm1469_vm2, %v1284_v7  ;;  %v1802_v29 = vpop.f32.mrb[18].mxu1 }
 0x32e   : > { %1481 = vst.msk [vmem:[%s2582_s6 + $0x58] sm:$0xff] %vm1469_vm2, %v1802_v29  ;;  %v1287_v42 = vpop.f32.mrb[19].mxu1 }
 0x32f   : > { %1479 = vst.msk [vmem:[%s2582_s6 + $0x48] sm:$0xff] %vm1469_vm2, %v1287_v42 }
 0x337   : > { %v1789_v32 = vpop.f32.mrb[20].mxu0 }
 0x338   : > { %1476 = vst.msk [vmem:[%s2582_s6 + $0x30] sm:$0xff] %vm1469_vm2, %v1789_v32  ;;  %v1223_v45 = vpop.f32.mrb[21].mxu0 }
 0x339   : > { %1474 = vst.msk [vmem:[%s2582_s6 + $0x20] sm:$0xff] %vm1469_vm2, %v1223_v45  ;;  %v1790_v22 = vpop.f32.mrb[22].mxu0 }
 0x33a   : > { %1477 = vst.msk [vmem:[%s2582_s6 + $0x38] sm:$0xff] %vm1469_vm2, %v1790_v22  ;;  %v1226_v52 = vpop.f32.mrb[23].mxu0 }
 0x33b   : > { %1475 = vst.msk [vmem:[%s2582_s6 + $0x28] sm:$0xff] %vm1469_vm2, %v1226_v52  ;;  %v1805_v9 = vpop.f32.mrb[20].mxu1 }
 0x33c   : > { %1484 = vst.msk [vmem:[%s2582_s6 + $0x70] sm:$0xff] %vm1469_vm2, %v1805_v9  ;;  %v1300_v53 = vpop.f32.mrb[21].mxu1 }
 0x33d   : > { %1482 = vst.msk [vmem:[%s2582_s6 + $0x60] sm:$0xff] %vm1469_vm2, %v1300_v53  ;;  %v1806_v35 = vpop.f32.mrb[22].mxu1 }
 0x33e   : > { %1485 = vst.msk [vmem:[%s2582_s6 + $0x78] sm:$0xff] %vm1469_vm2, %v1806_v35  ;;  %v1303_v16 = vpop.f32.mrb[23].mxu1 }
 0x33f   : > { %1483 = vst.msk [vmem:[%s2582_s6 + $0x68] sm:$0xff] %vm1469_vm2, %v1303_v16 }
 0x347   : > { %v1817_v38 = vpop.f32.mrb[24].mxu0 }
 0x348   : > { %1488 = vst.msk [vmem:[%s2582_s6 + $0x90] sm:$0xff] %vm1469_vm2, %v1817_v38  ;;  %v1361_v30 = vpop.f32.mrb[25].mxu0 }
 0x349   : > { %1486 = vst.msk [vmem:[%s2582_s6 + $0x80] sm:$0xff] %vm1469_vm2, %v1361_v30  ;;  %v1818_v26 = vpop.f32.mrb[26].mxu0 }
 0x34a   : > { %1489 = vst.msk [vmem:[%s2582_s6 + $0x98] sm:$0xff] %vm1469_vm2, %v1818_v26  ;;  %v1364_v58 = vpop.f32.mrb[27].mxu0 }
 0x34b   : > { %1487 = vst.msk [vmem:[%s2582_s6 + $0x88] sm:$0xff] %vm1469_vm2, %v1364_v58  ;;  %v1833_v59 = vpop.f32.mrb[24].mxu1 }
 0x34c   : > { %1496 = vst.msk [vmem:[%s2582_s6 + $0xd0] sm:$0xff] %vm1469_vm2, %v1833_v59  ;;  %v1438_v14 = vpop.f32.mrb[25].mxu1 }
 0x34d   : > { %1494 = vst.msk [vmem:[%s2582_s6 + $0xc0] sm:$0xff] %vm1469_vm2, %v1438_v14  ;;  %v1834_v4 = vpop.f32.mrb[26].mxu1 }
 0x34e   : > { %1497 = vst.msk [vmem:[%s2582_s6 + $0xd8] sm:$0xff] %vm1469_vm2, %v1834_v4  ;;  %v1441_v39 = vpop.f32.mrb[27].mxu1 }
 0x34f   : > { %1495 = vst.msk [vmem:[%s2582_s6 + $0xc8] sm:$0xff] %vm1469_vm2, %v1441_v39 }
 0x353   : > { %v1821_v10 = vpop.f32.mrb[28].mxu0 }
 0x354   : > { %1492 = vst.msk [vmem:[%s2582_s6 + $0xb0] sm:$0xff] %vm1469_vm2, %v1821_v10  ;;  %v1377_v31 = vpop.f32.mrb[29].mxu0 }
 0x355   : > { %1490 = vst.msk [vmem:[%s2582_s6 + $0xa0] sm:$0xff] %vm1469_vm2, %v1377_v31  ;;  %v1822_v54 = vpop.f32.mrb[30].mxu0 }
 0x356   : > { %1493 = vst.msk [vmem:[%s2582_s6 + $0xb8] sm:$0xff] %vm1469_vm2, %v1822_v54  ;;  %v1380_v1 = vpop.f32.mrb[31].mxu0 }
 0x357   : > { %1491 = vst.msk [vmem:[%s2582_s6 + $0xa8] sm:$0xff] %vm1469_vm2, %v1380_v1 }
 0x35a   : > { %v1837_v44 = vpop.f32.mrb[28].mxu1 }
 0x35b   : > { %1500 = vst.msk [vmem:[%s2582_s6 + $0xf0] sm:$0xff] %vm1469_vm2, %v1837_v44  ;;  %v1454_v50 = vpop.f32.mrb[29].mxu1 }
 0x35c   : > { %1498 = vst.msk [vmem:[%s2582_s6 + $0xe0] sm:$0xff] %vm1469_vm2, %v1454_v50  ;;  %v1838_v47 = vpop.f32.mrb[30].mxu1 }
 0x35d   : > { %1501 = vst.msk [vmem:[%s2582_s6 + $0xf8] sm:$0xff] %vm1469_vm2, %v1838_v47  ;;  %v1457_v8 = vpop.f32.mrb[31].mxu1 }
 0x35e   : > { %1499 = vst.msk [vmem:[%s2582_s6 + $0xe8] sm:$0xff] %vm1469_vm2, %v1457_v8 }
 0x35f PF: > { %s14_s15 = sadd.s32 1, %s1997_s15  }
 0x360   : > { %p11_p4 = scmp.ge.s32.totalorder %s14_s15, 4  }
 0x362   :  { %13 = sbr.rel (!%p11_p4) target bundleno = 1 (0x1), region = 75 }

// kernel: bottleneck_forward.22
= control target key start
LH: loop header
LB: loop body
LE: loop exit
PB: predicated region body
PF: predicated region fallthrough
CT: control target
= control target key end

     0   :  { %vm110_vm0 = vcmask 1043456   ;;  %vm85_vm1 = vcmask 64512   ;;  %v517_v27 = vmov 0.0   ;;  %s671_s1 = inlined_call_operand.vmem [shape: f32[8,128], index: 1, kind: input, shape index: {}]   ;;  %s672_s0 = inlined_call_operand.vmem [shape: f32[128,8], index: 0, kind: input, shape index: {}]   ;;  %s673_s2 = inlined_call_operand.vmem [shape: f32[1,128], index: 2, kind: input, shape index: {}]   ;;  %s674_s3 = inlined_call_operand.vmem [shape: f32[128,128], index: 3, kind: output, shape index: {0}]   ;;  %s675_s4 = inlined_call_operand.vmem [shape: f32[2,128], index: 4, kind: output, shape index: {1}]  }
   0x1   :  { %v83_v0 = vld [vmem:[%s671_s1] sm:$0xff]  ;;  %v60_v2 = vld [vmem:[%s672_s0 + $0x8] sm:$0xff]  ;;  %v61_v5 = vld [vmem:[%s672_s0 + $0x10] sm:$0xff]  ;;  %42 = vst [vmem:[#allocation3] sm:$0x3] %v517_v27 }
   0x2   :  { %v59_v1 = vld [vmem:[%s672_s0] sm:$0xff]  ;;  %v84_v3 = vpack.c.bf16 %v83_v0, %v83_v0  ;;  %v62_v6 = vld [vmem:[%s672_s0 + $0x18] sm:$0xff]  ;;  %v64_v8 = vld [vmem:[%s672_s0 + $0x28] sm:$0xff] }
   0x3   :  { %v75_v4 = vpack.c.bf16 %v60_v2, %v59_v1  ;;  %v63_v7 = vld [vmem:[%s672_s0 + $0x20] sm:$0xff]  ;;  %v76_v10 = vpack.c.bf16 %v62_v6, %v61_v5  ;;  %v68_v12 = vld [vmem:[%s672_s0 + $0x48] sm:$0xff]  ;;  %v69_v13 = vld [vmem:[%s672_s0 + $0x50] sm:$0xff] }
   0x4   :  { %514 = vmatprep.subr.msk.bf16.mxu0 %vm110_vm0, %v84_v3  ;;  %v112_v9 = vsel %vm110_vm0, %v84_v3, 0  ;;  %v67_v11 = vld [vmem:[%s672_s0 + $0x40] sm:$0xff]  ;;  %v77_v14 = vpack.c.bf16 %v64_v8, %v63_v7  ;;  %515 = vmatprep.subr.msk.bf16.mxu1 %vm110_vm0, %v84_v3  ;;  %v70_v16 = vld [vmem:[%s672_s0 + $0x58] sm:$0xff]  ;;  %v72_v18 = vld [vmem:[%s672_s0 + $0x68] sm:$0xff] }
   0x5   :  { %496 = vmatprep.mubr.msk.bf16.mxu0 %vm85_vm1, %v75_v4  ;;  %495 = vmatpush3.bf16.msra.mxu0 %v112_v9  ;;  %v79_v15 = vpack.c.bf16 %v68_v12, %v67_v11  ;;  %v71_v17 = vld [vmem:[%s672_s0 + $0x60] sm:$0xff]  ;;  %v80_v19 = vpack.c.bf16 %v70_v16, %v69_v13  ;;  %v65_v21 = vld [vmem:[%s672_s0 + $0x30] sm:$0xff]  ;;  %v66_v22 = vld [vmem:[%s672_s0 + $0x38] sm:$0xff] }
   0x6   :  { %513 = vmatpush3.bf16.msra.mxu1 %v112_v9  ;;  %v81_v20 = vpack.c.bf16 %v72_v18, %v71_v17  ;;  %v73_v23 = vld [vmem:[%s672_s0 + $0x70] sm:$0xff]  ;;  %v74_v24 = vld [vmem:[%s672_s0 + $0x78] sm:$0xff]  ;;  %v78_v25 = vpack.c.bf16 %v66_v22, %v65_v21  ;;  %v484_v28 = vld [vmem:[%s673_s2] ss:$0 sm:$0xff] }
   0x7   :  { %504 = vmatprep.mubr.msk.bf16.mxu1 %vm85_vm1, %v79_v15  ;;  %v82_v26 = vpack.c.bf16 %v74_v24, %v73_v23 }
   0x8   :  { %497 = vmatmul.mubr.msk.bf16.vlgmr.msra.gmra.mrb[0].mxu0 %vm85_vm1, %v76_v10 }
   0x9   :  { %500 = vmatprep.mubr.msk.bf16.mxu0 %vm85_vm1, %v77_v14  ;;  %505 = vmatmul.mubr.msk.bf16.vlgmr.msra.gmra.mrb[0].mxu1 %vm85_vm1, %v80_v19 }
   0xa   :  { %508 = vmatprep.mubr.msk.bf16.mxu1 %vm85_vm1, %v81_v20 }
  0x10   :  { %501 = vmatmul.mubr.msk.bf16.gmra.mrb[4].mxu0 %vm85_vm1, %v78_v25 }
  0x11   :  { %509 = vmatmul.mubr.msk.bf16.gmra.mrb[4].mxu1 %vm85_vm1, %v82_v26 }
  0xdb   :  { %v498_v29 = vpop.f32.mrb[0].mxu0 }
  0xdc   :  { %v271_v30 = vadd.f32 %v498_v29, %v484_v28  ;;  %v148_v31 = vpop.f32.mrb[1].mxu0  ;;  %v506_v32 = vpop.f32.mrb[0].mxu1 }
  0xdd   :  { %v269_v33 = vadd.f32 %v484_v28, %v148_v31  ;;  %v499_v34 = vpop.f32.mrb[2].mxu0  ;;  %v608_v35 = vadd.f32 %v506_v32, %v484_v28  ;;  %v180_v36 = vpop.f32.mrb[1].mxu1 }
  0xde   :  { %287 = vst [vmem:[%s674_s3 + $0x10] sm:$0xff] %v271_v30  ;;  %v272_v37 = vadd.f32 %v499_v34, %v484_v28  ;;  %v151_v38 = vpop.f32.mrb[3].mxu0  ;;  %v277_v39 = vadd.f32 %v484_v28, %v180_v36  ;;  %v507_v40 = vpop.f32.mrb[2].mxu1  ;;  %v427_v48 = vmul.f32 %v271_v30, %v271_v30 }
  0xdf   :  { %285 = vst [vmem:[%s674_s3] sm:$0xff] %v269_v33  ;;  %v270_v41 = vadd.f32 %v484_v28, %v151_v38  ;;  %295 = vst [vmem:[%s674_s3 + $0x50] sm:$0xff] %v608_v35  ;;  %v620_v42 = vadd.f32 %v507_v40, %v484_v28  ;;  %v183_v43 = vpop.f32.mrb[3].mxu1  ;;  %v425_v45 = vmul.f32 %v269_v33, %v269_v33 }
  0xe0   :  { %288 = vst [vmem:[%s674_s3 + $0x18] sm:$0xff] %v272_v37  ;;  %293 = vst [vmem:[%s674_s3 + $0x40] sm:$0xff] %v277_v39  ;;  %v278_v44 = vadd.f32 %v484_v28, %v183_v43  ;;  %v428_v52 = vmul.f32 %v272_v37, %v272_v37  ;;  %v433_v18 = vmul.f32 %v277_v39, %v277_v39 }
  0xe1   :  { %286 = vst [vmem:[%s674_s3 + $0x8] sm:$0xff] %v270_v41  ;;  %v401_v46 = vadd.f32 %v270_v41, %v269_v33  ;;  %v426_v47 = vmul.f32 %v270_v41, %v270_v41  ;;  %296 = vst [vmem:[%s674_s3 + $0x58] sm:$0xff] %v620_v42  ;;  %v435_v24 = vmul.f32 %v608_v35, %v608_v35 }
  0xe2   :  { %294 = vst [vmem:[%s674_s3 + $0x48] sm:$0xff] %v278_v44  ;;  %v434_v23 = vmul.f32 %v278_v44, %v278_v44  ;;  %v436_v27 = vmul.f32 %v620_v42, %v620_v42 }
  0xe3   :  { %v402_v49 = vadd.f32 %v401_v46, %v271_v30  ;;  %v441_v50 = vadd.f32 %v426_v47, %v425_v45  ;;  %v502_v51 = vpop.f32.mrb[4].mxu0 }
  0xe4   :  { %v275_v53 = vadd.f32 %v502_v51, %v484_v28  ;;  %v164_v54 = vpop.f32.mrb[5].mxu0  ;;  %v510_v55 = vpop.f32.mrb[4].mxu1 }
  0xe5   :  { %v442_v56 = vadd.f32 %v441_v50, %v427_v48  ;;  %v273_v57 = vadd.f32 %v484_v28, %v164_v54  ;;  %v403_v58 = vadd.f32 %v402_v49, %v272_v37  ;;  %v503_v59 = vpop.f32.mrb[6].mxu0  ;;  %v283_v60 = vadd.f32 %v510_v55, %v484_v28  ;;  %v196_v61 = vpop.f32.mrb[5].mxu1  ;;  %v424_v55 = vld [vmem:[#allocation3 + $0x1] sm:$0x1] }
  0xe6   :  { %291 = vst [vmem:[%s674_s3 + $0x30] sm:$0xff] %v275_v53  ;;  %v276_v62 = vadd.f32 %v503_v59, %v484_v28  ;;  %v167_v63 = vpop.f32.mrb[7].mxu0  ;;  %v281_v0 = vadd.f32 %v484_v28, %v196_v61  ;;  %v511_v1 = vpop.f32.mrb[6].mxu1  ;;  %v431_v12 = vmul.f32 %v275_v53, %v275_v53 }
  0xe7   :  { %289 = vst [vmem:[%s674_s3 + $0x20] sm:$0xff] %v273_v57  ;;  %v404_v2 = vadd.f32 %v403_v58, %v273_v57  ;;  %v429_v3 = vmul.f32 %v273_v57, %v273_v57  ;;  %v443_v4 = vadd.f32 %v442_v56, %v428_v52  ;;  %v274_v5 = vadd.f32 %v484_v28, %v167_v63  ;;  %v199_v6 = vpop.f32.mrb[7].mxu1  ;;  %v400_v52 = vld [vmem:[#allocation3] sm:$0x1] }
  0xe8   :  { %299 = vst [vmem:[%s674_s3 + $0x70] sm:$0xff] %v283_v60  ;;  %292 = vst [vmem:[%s674_s3 + $0x38] sm:$0xff] %v276_v62  ;;  %v284_v7 = vadd.f32 %v511_v1, %v484_v28  ;;  %v282_v11 = vadd.f32 %v484_v28, %v199_v6  ;;  %v432_v15 = vmul.f32 %v276_v62, %v276_v62 }
  0xe9   :  { %297 = vst [vmem:[%s674_s3 + $0x60] sm:$0xff] %v281_v0  ;;  %v444_v8 = vadd.f32 %v443_v4, %v429_v3  ;;  %290 = vst [vmem:[%s674_s3 + $0x28] sm:$0xff] %v274_v5  ;;  %v405_v9 = vadd.f32 %v404_v2, %v274_v5  ;;  %v430_v10 = vmul.f32 %v274_v5, %v274_v5 }
  0xea   :  { %300 = vst [vmem:[%s674_s3 + $0x78] sm:$0xff] %v284_v7  ;;  %298 = vst [vmem:[%s674_s3 + $0x68] sm:$0xff] %v282_v11  ;;  %v437_v30 = vmul.f32 %v281_v0, %v281_v0  ;;  %v438_v36 = vmul.f32 %v282_v11, %v282_v11  ;;  %v439_v37 = vmul.f32 %v283_v60, %v283_v60 }
  0xeb   :  { %v406_v13 = vadd.f32 %v405_v9, %v275_v53  ;;  %v445_v14 = vadd.f32 %v444_v8, %v430_v10  ;;  %v440_v40 = vmul.f32 %v284_v7, %v284_v7 }
  0xed   :  { %v446_v16 = vadd.f32 %v445_v14, %v431_v12  ;;  %v407_v17 = vadd.f32 %v406_v13, %v276_v62 }
  0xef   :  { %v408_v19 = vadd.f32 %v407_v17, %v277_v39  ;;  %v447_v20 = vadd.f32 %v446_v16, %v432_v15 }
  0xf1   :  { %v448_v21 = vadd.f32 %v447_v20, %v433_v18  ;;  %v409_v22 = vadd.f32 %v408_v19, %v278_v44 }
  0xf3   :  { %v410_v25 = vadd.f32 %v409_v22, %v608_v35  ;;  %v449_v26 = vadd.f32 %v448_v21, %v434_v23 }
  0xf5   :  { %v450_v28 = vadd.f32 %v449_v26, %v435_v24  ;;  %v411_v29 = vadd.f32 %v410_v25, %v620_v42 }
  0xf7   :  { %v412_v31 = vadd.f32 %v411_v29, %v281_v0  ;;  %v451_v32 = vadd.f32 %v450_v28, %v436_v27 }
  0xf9   :  { %v452_v33 = vadd.f32 %v451_v32, %v437_v30  ;;  %v413_v34 = vadd.f32 %v412_v31, %v282_v11 }
  0xfb   :  { %v414_v38 = vadd.f32 %v413_v34, %v283_v60  ;;  %v453_v39 = vadd.f32 %v452_v33, %v438_v36 }
  0xfd   :  { %v415_v41 = vadd.f32 %v414_v38, %v284_v7  ;;  %v454_v43 = vadd.f32 %v453_v39, %v439_v37 }
  0xff   :  { %v416_v35 = vrot.slane %v415_v41, 4  ;;  %v455_v44 = vadd.f32 %v454_v43, %v440_v40 }
 0x101   :  { %v417_v45 = vadd.f32 %v416_v35, %v415_v41  ;;  %v456_v46 = vrot.slane %v455_v44, 4 }
 0x103   :  { %v418_v47 = vrot.slane %v417_v45, 2  ;;  %v457_v48 = vadd.f32 %v456_v46, %v455_v44 }
 0x105   :  { %v419_v49 = vadd.f32 %v418_v47, %v417_v45  ;;  %v458_v42 = vrot.slane %v457_v48, 2 }
 0x107   :  { %v420_v50 = vrot.slane %v419_v49, 1  ;;  %v459_v51 = vadd.f32 %v458_v42, %v457_v48 }
 0x109   :  { %v421_v53 = vadd.f32 %v420_v50, %v419_v49  ;;  %v460_v54 = vrot.slane %v459_v51, 1 }
 0x10b   :  { %v422_v56 = vadd.f32 %v421_v53, %v400_v52  ;;  %v461_v57 = vadd.f32 %v460_v54, %v459_v51 }
 0x10d   :  { %423 = vst [vmem:[#allocation3] sm:$0x1] %v422_v56  ;;  %v462_v58 = vadd.f32 %v461_v57, %v424_v55 }
 0x10f   :  { %463 = vst [vmem:[#allocation3 + $0x1] sm:$0x1] %v462_v58 }
 0x116   :  { %v466_v59 = vld [vmem:[#allocation3] sm:$0x3] }
 0x117   :  { %467 = vst [vmem:[%s675_s4] sm:$0x3] %v466_v59 }

// kernel: tile.65
= control target key start
LH: loop header
LB: loop body
LE: loop exit
PB: predicated region body
PF: predicated region fallthrough
CT: control target
= control target key end

     0   :  { %s28_s0 = inlined_call_operand.vmem [shape: f32[8], index: 0, kind: input, shape index: {}]   ;;  %s29_s1 = inlined_call_operand.vmem [shape: f32[16,8], index: 1, kind: output, shape index: {}]  }
   0x1   :  { %v4_v0 = vld [vmem:[%s28_s0] ss:$0 sm:$0xff] }
   0x2   :  { %5 = vst [vmem:[%s29_s1] sm:$0xff] %v4_v0  ;;  %8 = vst [vmem:[%s29_s1 + $0x8] sm:$0xff] %v4_v0 }

// kernel: tile.66
= control target key start
LH: loop header
LB: loop body
LE: loop exit
PB: predicated region body
PF: predicated region fallthrough
CT: control target
= control target key end

     0   :  { %s131_s10 = smov 120   ;;  %s132_s11 = smov 104   ;;  %vm3_vm0 = vcmask 64512   ;;  %vm9_vm1 = vcmask 1048512   ;;  %vm15_vm2 = vcmask 982912   ;;  %vm21_vm3 = vcmask 917312   ;;  %s207_s0 = inlined_call_operand.vmem [shape: f32[16,8], index: 0, kind: input, shape index: {}]   ;;  %s208_s1 = inlined_call_operand.vmem [shape: f32[1,128], index: 1, kind: output, shape index: {}]  }
   0x1   :  { %v101_v0 = vld [vmem:[%s207_s0 + $0xf] sm:$0x1]   ;;  %v103_v1 = vld [vmem:[%s207_s0 + $0xd] sm:$0x1]   ;;  %v102_v2 = vld [vmem:[%s207_s0 + $0xe] sm:$0x1]  }
   0x2   :  { %7 = vrot.lane.b32.xlu0 %v101_v0, %s131_s10  ;;  %19 = vrot.lane.b32.xlu1 %v103_v1, %s132_s11  ;;  %v104_v3 = vld [vmem:[%s207_s0 + $0xc] sm:$0x1]   ;;  %s133_s16 = smov 112   ;;  %s134_s17 = smov 96   ;;  %v105_v4 = vld [vmem:[%s207_s0 + $0xb] sm:$0x1]  }
   0x3   :  { %v106_v5 = vld [vmem:[%s207_s0 + $0xa] sm:$0x1]   ;;  %v2_v6 = vld [vmem:[%s207_s0] sm:$0x1]   ;;  %s135_s24 = smov 88   ;;  %s136_s25 = smov 80  }
   0x4   :  { %4 = vst.msk [vmem:[#allocation0] sm:$0x1] %vm3_vm0, %v2_v6   ;;  %v107_v7 = vld [vmem:[%s207_s0 + $0x9] sm:$0x1]   ;;  %v108_v8 = vld [vmem:[%s207_s0 + $0x8] sm:$0x1]  }
   0x5   :  { %s137_s30 = smov 72   ;;  %s138_s2 = smov 64   ;;  %v109_v9 = vld [vmem:[%s207_s0 + $0x7] sm:$0x1]   ;;  %v110_v10 = vld [vmem:[%s207_s0 + $0x6] sm:$0x1]  }
   0x6   :  { %13 = vrot.lane.b32.xlu0 %v102_v2, %s133_s16  ;;  %25 = vrot.lane.b32.xlu1 %v104_v3, %s134_s17  ;;  %s139_s7 = smov 56   ;;  %s140_s8 = smov 48   ;;  %v111_v11 = vld [vmem:[%s207_s0 + $0x5] sm:$0x1]   ;;  %v112_v12 = vld [vmem:[%s207_s0 + $0x4] sm:$0x1]  }
   0x7   :  { %s141_s13 = smov 40   ;;  %s142_s14 = smov 32   ;;  %v113_v13 = vld [vmem:[%s207_s0 + $0x3] sm:$0x1]   ;;  %v114_v14 = vld [vmem:[%s207_s0 + $0x2] sm:$0x1]  }
   0x8   :  { %s143_s19 = smov 24   ;;  %s144_s20 = smov 16   ;;  %v115_v15 = vld [vmem:[%s207_s0 + $0x1] sm:$0x1]   ;;  %vm27_vm4 = vcmask 851712   ;;  %vm33_vm5 = vcmask 786112  }
   0x9   :  { %s145_s0 = smov 8   ;;  %vm39_vm6 = vcmask 720512   ;;  %vm45_vm7 = vcmask 654912   ;;  %vm51_vm8 = vcmask 589312   ;;  %vm57_vm9 = vcmask 523712  }
   0xa   :  { %31 = vrot.lane.b32.xlu0 %v105_v4, %s135_s24  ;;  %37 = vrot.lane.b32.xlu1 %v106_v5, %s136_s25  ;;  %vm63_vm10 = vcmask 458112   ;;  %vm69_vm11 = vcmask 392512   ;;  %vm75_vm12 = vcmask 326912   ;;  %vm81_vm13 = vcmask 261312  }
   0xb   :  { %vm87_vm14 = vcmask 195712   ;;  %vm93_vm15 = vcmask 130112  }
   0xe   :  { %43 = vrot.lane.b32.xlu0 %v107_v7, %s137_s30  ;;  %49 = vrot.lane.b32.xlu1 %v108_v8, %s138_s2 }
  0x12   :  { %55 = vrot.lane.b32.xlu0 %v109_v9, %s139_s7  ;;  %61 = vrot.lane.b32.xlu1 %v110_v10, %s140_s8 }
  0x16   :  { %67 = vrot.lane.b32.xlu0 %v111_v11, %s141_s13  ;;  %73 = vrot.lane.b32.xlu1 %v112_v12, %s142_s14 }
  0x1a   :  { %79 = vrot.lane.b32.xlu0 %v113_v13, %s143_s19  ;;  %85 = vrot.lane.b32.xlu1 %v114_v14, %s144_s20 }
  0x1e   :  { %91 = vrot.lane.b32.xlu0 %v115_v15, %s145_s0 }
  0x74   :  { %v8_v16 = vpop.permute.xlu0 %7   ;;  %v20_v17 = vpop.permute.xlu1 %19  }
  0x75   :  { %10 = vst.msk [vmem:[#allocation0] sm:$0x1] %vm9_vm1, %v8_v16  }
  0x78   :  { %v14_v18 = vpop.permute.xlu0 %13   ;;  %v26_v19 = vpop.permute.xlu1 %25  }
  0x79   :  { %16 = vst.msk [vmem:[#allocation0] sm:$0x1] %vm15_vm2, %v14_v18  }
  0x7a   :  { %22 = vst.msk [vmem:[#allocation0] sm:$0x1] %vm21_vm3, %v20_v17  }
  0x7b   :  { %28 = vst.msk [vmem:[#allocation0] sm:$0x1] %vm27_vm4, %v26_v19  }
  0x7c   :  { %v32_v20 = vpop.permute.xlu0 %31   ;;  %v38_v21 = vpop.permute.xlu1 %37  }
  0x7d   :  { %34 = vst.msk [vmem:[#allocation0] sm:$0x1] %vm33_vm5, %v32_v20  }
  0x7e   :  { %40 = vst.msk [vmem:[#allocation0] sm:$0x1] %vm39_vm6, %v38_v21  }
  0x80   :  { %v44_v22 = vpop.permute.xlu0 %43   ;;  %v50_v23 = vpop.permute.xlu1 %49  }
  0x81   :  { %46 = vst.msk [vmem:[#allocation0] sm:$0x1] %vm45_vm7, %v44_v22  }
  0x82   :  { %52 = vst.msk [vmem:[#allocation0] sm:$0x1] %vm51_vm8, %v50_v23  }
  0x84   :  { %v56_v24 = vpop.permute.xlu0 %55   ;;  %v62_v25 = vpop.permute.xlu1 %61  }
  0x85   :  { %58 = vst.msk [vmem:[#allocation0] sm:$0x1] %vm57_vm9, %v56_v24  }
  0x86   :  { %64 = vst.msk [vmem:[#allocation0] sm:$0x1] %vm63_vm10, %v62_v25  }
  0x88   :  { %v68_v26 = vpop.permute.xlu0 %67   ;;  %v74_v27 = vpop.permute.xlu1 %73  }
  0x89   :  { %70 = vst.msk [vmem:[#allocation0] sm:$0x1] %vm69_vm11, %v68_v26  }
  0x8a   :  { %76 = vst.msk [vmem:[#allocation0] sm:$0x1] %vm75_vm12, %v74_v27  }
  0x8c   :  { %v80_v28 = vpop.permute.xlu0 %79   ;;  %v86_v29 = vpop.permute.xlu1 %85  }
  0x8d   :  { %82 = vst.msk [vmem:[#allocation0] sm:$0x1] %vm81_vm13, %v80_v28  }
  0x8e   :  { %88 = vst.msk [vmem:[#allocation0] sm:$0x1] %vm87_vm14, %v86_v29  }
  0x90   :  { %v92_v30 = vpop.permute.xlu0 %91  }
  0x91   :  { %94 = vst.msk [vmem:[#allocation0] sm:$0x1] %vm93_vm15, %v92_v30  }
  0x98   :  { %v98_v31 = vld [vmem:[#allocation0] sm:$0x1] }
  0x99   :  { %100 = vst [vmem:[%s208_s1] sm:$0x1] %v98_v31 }

// kernel: bottleneck_forward.23
= control target key start
LH: loop header
LB: loop body
LE: loop exit
PB: predicated region body
PF: predicated region fallthrough
CT: control target
= control target key end

     0   :  { %s71_s0 = inlined_call_operand.vmem [shape: f32[8,128], index: 0, kind: input, shape index: {}]   ;;  %s72_s1 = inlined_call_operand.vmem [shape: f32[1,128], index: 1, kind: input, shape index: {}]   ;;  %s73_s2 = inlined_call_operand.vmem [shape: f32[1,128], index: 2, kind: input, shape index: {}]   ;;  %s74_s3 = inlined_call_operand.vmem [shape: f32[8,128], index: 3, kind: output, shape index: {}]  }
   0x1   :  { %v14_v0 = vld [vmem:[%s71_s0] sm:$0xff] }
   0x2   :  { %v37_v1 = vld [vmem:[%s72_s1] ss:$0 sm:$0xff] }
   0x3   :  { %v38_v2 = vld [vmem:[%s73_s2] ss:$0 sm:$0xff]  ;;  %v22_v3 = vmul.f32 %v37_v1, %v14_v0 }
   0x5   :  { %v30_v4 = vadd.f32 %v38_v2, %v22_v3 }
   0x7   :  { %v31_v5 = vmax.f32 %v30_v4, 0.0 }
   0x9   :  { %32 = vst [vmem:[%s74_s3] sm:$0xff] %v31_v5 }

// kernel: bottleneck_forward.24
= control target key start
LH: loop header
LB: loop body
LE: loop exit
PB: predicated region body
PF: predicated region fallthrough
CT: control target
= control target key end

     0   :  { %vm97_vm0 = vcmask 588800   ;;  %vm122_vm1 = vcmask 1043456   ;;  %v549_v39 = vmov 0.0   ;;  %s724_s1 = inlined_call_operand.vmem [shape: f32[72,128], index: 1, kind: input, shape index: {}]   ;;  %s725_s0 = inlined_call_operand.vmem [shape: f32[128,72], index: 0, kind: input, shape index: {}]   ;;  %s726_s2 = inlined_call_operand.vmem [shape: f32[1,128], index: 2, kind: input, shape index: {}]   ;;  %s727_s3 = inlined_call_operand.vmem [shape: f32[128,128], index: 3, kind: output, shape index: {0}]   ;;  %s728_s4 = inlined_call_operand.vmem [shape: f32[2,128], index: 4, kind: output, shape index: {1}]  }
   0x1   :  { %v83_v0 = vld [vmem:[%s724_s1] sm:$0xff]  ;;  %v84_v1 = vld [vmem:[%s724_s1 + $0x8] sm:$0xff]  ;;  %v85_v2 = vld [vmem:[%s724_s1 + $0x10] sm:$0xff]  ;;  %42 = vst [vmem:[#allocation3] sm:$0x3] %v549_v39 }
   0x2   :  { %v92_v3 = vpack.c.bf16 %v84_v1, %v83_v0  ;;  %v86_v4 = vld [vmem:[%s724_s1 + $0x18] sm:$0xff]  ;;  %v87_v6 = vld [vmem:[%s724_s1 + $0x20] sm:$0xff]  ;;  %v88_v7 = vld [vmem:[%s724_s1 + $0x28] sm:$0xff] }
   0x3   :  { %v93_v5 = vpack.c.bf16 %v86_v4, %v85_v2  ;;  %v59_v8 = vld [vmem:[%s725_s0] sm:$0xff]  ;;  %v60_v9 = vld [vmem:[%s725_s0 + $0x8] sm:$0xff]  ;;  %v94_v11 = vpack.c.bf16 %v88_v7, %v87_v6  ;;  %v89_v13 = vld [vmem:[%s724_s1 + $0x30] sm:$0xff] }
   0x4   :  { %510 = vmatprep.subr.bf16.mxu0 %v92_v3  ;;  %536 = vmatprep.subr.bf16.mxu1 %v92_v3  ;;  %v75_v10 = vpack.c.bf16 %v60_v9, %v59_v8  ;;  %v67_v12 = vld [vmem:[%s725_s0 + $0x40] sm:$0xff]  ;;  %v90_v14 = vld [vmem:[%s724_s1 + $0x38] sm:$0xff]  ;;  %v68_v15 = vld [vmem:[%s725_s0 + $0x48] sm:$0xff] }
   0x5   :  { %511 = vmatpush3.bf16.msra.mxu0 %v92_v3  ;;  %541 = vmatpush3.bf16.msra.mxu1 %v92_v3  ;;  %v79_v16 = vpack.c.bf16 %v68_v15, %v67_v12  ;;  %v95_v17 = vpack.c.bf16 %v90_v14, %v89_v13  ;;  %v91_v18 = vld [vmem:[%s724_s1 + $0x40] sm:$0xff]  ;;  %v61_v20 = vld [vmem:[%s725_s0 + $0x10] sm:$0xff]  ;;  %v62_v21 = vld [vmem:[%s725_s0 + $0x18] sm:$0xff] }
   0x6   :  { %512 = vmatprep.subr.bf16.mxu0 %v93_v5  ;;  %537 = vmatprep.subr.bf16.mxu1 %v93_v5  ;;  %v96_v19 = vpack.c.bf16 %v91_v18, %v91_v18  ;;  %v63_v22 = vld [vmem:[%s725_s0 + $0x20] sm:$0xff]  ;;  %v69_v23 = vld [vmem:[%s725_s0 + $0x50] sm:$0xff]  ;;  %v70_v24 = vld [vmem:[%s725_s0 + $0x58] sm:$0xff]  ;;  %v76_v29 = vpack.c.bf16 %v62_v21, %v61_v20 }
   0x7   :  { %520 = vmatprep.mubr.msk.bf16.mxu0 %vm97_vm0, %v75_v10  ;;  %528 = vmatprep.mubr.msk.bf16.mxu1 %vm97_vm0, %v79_v16  ;;  %v64_v26 = vld [vmem:[%s725_s0 + $0x28] sm:$0xff]  ;;  %v71_v27 = vld [vmem:[%s725_s0 + $0x60] sm:$0xff]  ;;  %v80_v30 = vpack.c.bf16 %v70_v24, %v69_v23  ;;  %v65_v33 = vld [vmem:[%s725_s0 + $0x30] sm:$0xff] }
   0x8   :  { %v124_v25 = vsel %vm122_vm1, %v96_v19, 0  ;;  %v72_v28 = vld [vmem:[%s725_s0 + $0x68] sm:$0xff]  ;;  %v77_v31 = vpack.c.bf16 %v64_v26, %v63_v22  ;;  %v66_v34 = vld [vmem:[%s725_s0 + $0x38] sm:$0xff]  ;;  %v73_v35 = vld [vmem:[%s725_s0 + $0x70] sm:$0xff] }
   0x9   :  { %513 = vmatpush3.bf16.msra.mxu0 %v93_v5  ;;  %542 = vmatpush3.bf16.msra.mxu1 %v93_v5  ;;  %v81_v32 = vpack.c.bf16 %v72_v28, %v71_v27  ;;  %v74_v36 = vld [vmem:[%s725_s0 + $0x78] sm:$0xff]  ;;  %v78_v37 = vpack.c.bf16 %v66_v34, %v65_v33  ;;  %v496_v40 = vld [vmem:[%s726_s2] ss:$0 sm:$0xff] }
   0xa   :  { %514 = vmatprep.subr.bf16.mxu0 %v94_v11  ;;  %538 = vmatprep.subr.bf16.mxu1 %v94_v11  ;;  %v82_v38 = vpack.c.bf16 %v74_v36, %v73_v35 }
   0xd   :  { %515 = vmatpush3.bf16.msra.mxu0 %v94_v11  ;;  %543 = vmatpush3.bf16.msra.mxu1 %v94_v11 }
   0xe   :  { %516 = vmatprep.subr.bf16.mxu0 %v95_v17  ;;  %539 = vmatprep.subr.bf16.mxu1 %v95_v17 }
  0x11   :  { %517 = vmatpush3.bf16.msra.mxu0 %v95_v17  ;;  %544 = vmatpush3.bf16.msra.mxu1 %v95_v17 }
  0x12   :  { %546 = vmatprep.subr.msk.bf16.mxu0 %vm122_vm1, %v96_v19  ;;  %547 = vmatprep.subr.msk.bf16.mxu1 %vm122_vm1, %v96_v19 }
  0x15   :  { %519 = vmatpush3.bf16.msra.mxu0 %v124_v25  ;;  %545 = vmatpush3.bf16.msra.mxu1 %v124_v25 }
  0x18   :  { %521 = vmatmul.mubr.msk.bf16.vlgmr.msra.gmra.mrb[0].mxu0 %vm97_vm0, %v76_v29  ;;  %529 = vmatmul.mubr.msk.bf16.vlgmr.msra.gmra.mrb[0].mxu1 %vm97_vm0, %v80_v30 }
  0x19   :  { %524 = vmatprep.mubr.msk.bf16.mxu0 %vm97_vm0, %v77_v31  ;;  %532 = vmatprep.mubr.msk.bf16.mxu1 %vm97_vm0, %v81_v32 }
  0x20   :  { %525 = vmatmul.mubr.msk.bf16.gmra.mrb[4].mxu0 %vm97_vm0, %v78_v37  ;;  %533 = vmatmul.mubr.msk.bf16.gmra.mrb[4].mxu1 %vm97_vm0, %v82_v38 }
  0xeb   :  { %v522_v41 = vpop.f32.mrb[0].mxu0  ;;  %v530_v42 = vpop.f32.mrb[0].mxu1 }
  0xec   :  { %v283_v43 = vadd.f32 %v522_v41, %v496_v40  ;;  %v160_v44 = vpop.f32.mrb[1].mxu0  ;;  %v661_v45 = vadd.f32 %v530_v42, %v496_v40  ;;  %v192_v46 = vpop.f32.mrb[1].mxu1 }
  0xed   :  { %v281_v47 = vadd.f32 %v496_v40, %v160_v44  ;;  %v523_v48 = vpop.f32.mrb[2].mxu0  ;;  %v289_v49 = vadd.f32 %v496_v40, %v192_v46  ;;  %v531_v50 = vpop.f32.mrb[2].mxu1 }
  0xee   :  { %299 = vst [vmem:[%s727_s3 + $0x10] sm:$0xff] %v283_v43  ;;  %v284_v51 = vadd.f32 %v523_v48, %v496_v40  ;;  %v163_v52 = vpop.f32.mrb[3].mxu0  ;;  %307 = vst [vmem:[%s727_s3 + $0x50] sm:$0xff] %v661_v45  ;;  %v670_v53 = vadd.f32 %v531_v50, %v496_v40  ;;  %v195_v54 = vpop.f32.mrb[3].mxu1  ;;  %v439_v60 = vmul.f32 %v283_v43, %v283_v43 }
  0xef   :  { %297 = vst [vmem:[%s727_s3] sm:$0xff] %v281_v47  ;;  %v282_v55 = vadd.f32 %v496_v40, %v163_v52  ;;  %305 = vst [vmem:[%s727_s3 + $0x40] sm:$0xff] %v289_v49  ;;  %v290_v56 = vadd.f32 %v496_v40, %v195_v54  ;;  %v437_v57 = vmul.f32 %v281_v47, %v281_v47 }
  0xf0   :  { %300 = vst [vmem:[%s727_s3 + $0x18] sm:$0xff] %v284_v51  ;;  %308 = vst [vmem:[%s727_s3 + $0x58] sm:$0xff] %v670_v53  ;;  %v440_v1 = vmul.f32 %v284_v51, %v284_v51  ;;  %v445_v30 = vmul.f32 %v289_v49, %v289_v49  ;;  %v447_v36 = vmul.f32 %v661_v45, %v661_v45 }
  0xf1   :  { %298 = vst [vmem:[%s727_s3 + $0x8] sm:$0xff] %v282_v55  ;;  %v413_v58 = vadd.f32 %v282_v55, %v281_v47  ;;  %v438_v59 = vmul.f32 %v282_v55, %v282_v55  ;;  %306 = vst [vmem:[%s727_s3 + $0x48] sm:$0xff] %v290_v56  ;;  %v446_v35 = vmul.f32 %v290_v56, %v290_v56 }
  0xf2   :  { %v448_v39 = vmul.f32 %v670_v53, %v670_v53 }
  0xf3   :  { %v414_v61 = vadd.f32 %v413_v58, %v283_v43  ;;  %v453_v62 = vadd.f32 %v438_v59, %v437_v57  ;;  %v526_v63 = vpop.f32.mrb[4].mxu0  ;;  %v534_v0 = vpop.f32.mrb[4].mxu1 }
  0xf4   :  { %v287_v2 = vadd.f32 %v526_v63, %v496_v40  ;;  %v176_v3 = vpop.f32.mrb[5].mxu0  ;;  %v295_v4 = vadd.f32 %v534_v0, %v496_v40  ;;  %v208_v5 = vpop.f32.mrb[5].mxu1  ;;  %v412_v0 = vld [vmem:[#allocation3] sm:$0x1] }
  0xf5   :  { %v454_v6 = vadd.f32 %v453_v62, %v439_v60  ;;  %v285_v7 = vadd.f32 %v496_v40, %v176_v3  ;;  %v415_v8 = vadd.f32 %v414_v61, %v284_v51  ;;  %v527_v9 = vpop.f32.mrb[6].mxu0  ;;  %v293_v10 = vadd.f32 %v496_v40, %v208_v5  ;;  %v535_v11 = vpop.f32.mrb[6].mxu1  ;;  %v436_v3 = vld [vmem:[#allocation3 + $0x1] sm:$0x1] }
  0xf6   :  { %303 = vst [vmem:[%s727_s3 + $0x30] sm:$0xff] %v287_v2  ;;  %v288_v12 = vadd.f32 %v527_v9, %v496_v40  ;;  %v179_v13 = vpop.f32.mrb[7].mxu0  ;;  %311 = vst [vmem:[%s727_s3 + $0x70] sm:$0xff] %v295_v4  ;;  %v296_v14 = vadd.f32 %v535_v11, %v496_v40  ;;  %v211_v15 = vpop.f32.mrb[7].mxu1  ;;  %v443_v24 = vmul.f32 %v287_v2, %v287_v2 }
  0xf7   :  { %301 = vst [vmem:[%s727_s3 + $0x20] sm:$0xff] %v285_v7  ;;  %v416_v16 = vadd.f32 %v415_v8, %v285_v7  ;;  %v441_v17 = vmul.f32 %v285_v7, %v285_v7  ;;  %v455_v18 = vadd.f32 %v454_v6, %v440_v1  ;;  %v286_v19 = vadd.f32 %v496_v40, %v179_v13 }
  0xf8   :  { %309 = vst [vmem:[%s727_s3 + $0x60] sm:$0xff] %v293_v10  ;;  %304 = vst [vmem:[%s727_s3 + $0x38] sm:$0xff] %v288_v12  ;;  %v294_v20 = vadd.f32 %v496_v40, %v211_v15  ;;  %v444_v27 = vmul.f32 %v288_v12, %v288_v12  ;;  %v449_v42 = vmul.f32 %v293_v10, %v293_v10 }
  0xf9   :  { %312 = vst [vmem:[%s727_s3 + $0x78] sm:$0xff] %v296_v14  ;;  %v456_v21 = vadd.f32 %v455_v18, %v441_v17  ;;  %302 = vst [vmem:[%s727_s3 + $0x28] sm:$0xff] %v286_v19  ;;  %v417_v22 = vadd.f32 %v416_v16, %v286_v19  ;;  %v442_v23 = vmul.f32 %v286_v19, %v286_v19 }
  0xfa   :  { %310 = vst [vmem:[%s727_s3 + $0x68] sm:$0xff] %v294_v20  ;;  %v450_v48 = vmul.f32 %v294_v20, %v294_v20  ;;  %v452_v52 = vmul.f32 %v296_v14, %v296_v14 }
  0xfb   :  { %v418_v25 = vadd.f32 %v417_v22, %v287_v2  ;;  %v457_v26 = vadd.f32 %v456_v21, %v442_v23 }
  0xfd   :  { %v458_v28 = vadd.f32 %v457_v26, %v443_v24  ;;  %v419_v29 = vadd.f32 %v418_v25, %v288_v12 }
  0xff   :  { %v420_v31 = vadd.f32 %v419_v29, %v289_v49  ;;  %v459_v32 = vadd.f32 %v458_v28, %v444_v27  ;;  %v451_v49 = vmul.f32 %v295_v4, %v295_v4 }
 0x101   :  { %v460_v33 = vadd.f32 %v459_v32, %v445_v30  ;;  %v421_v34 = vadd.f32 %v420_v31, %v290_v56 }
 0x103   :  { %v422_v37 = vadd.f32 %v421_v34, %v661_v45  ;;  %v461_v38 = vadd.f32 %v460_v33, %v446_v35 }
 0x105   :  { %v462_v40 = vadd.f32 %v461_v38, %v447_v36  ;;  %v423_v41 = vadd.f32 %v422_v37, %v670_v53 }
 0x107   :  { %v424_v43 = vadd.f32 %v423_v41, %v293_v10  ;;  %v463_v44 = vadd.f32 %v462_v40, %v448_v39 }
 0x109   :  { %v464_v46 = vadd.f32 %v463_v44, %v449_v42  ;;  %v425_v47 = vadd.f32 %v424_v43, %v294_v20 }
 0x10b   :  { %v426_v50 = vadd.f32 %v425_v47, %v295_v4  ;;  %v465_v51 = vadd.f32 %v464_v46, %v450_v48 }
 0x10d   :  { %v427_v54 = vadd.f32 %v426_v50, %v296_v14  ;;  %v466_v55 = vadd.f32 %v465_v51, %v451_v49 }
 0x10f   :  { %v428_v45 = vrot.slane %v427_v54, 4  ;;  %v467_v56 = vadd.f32 %v466_v55, %v452_v52 }
 0x111   :  { %v429_v57 = vadd.f32 %v428_v45, %v427_v54  ;;  %v468_v58 = vrot.slane %v467_v56, 4 }
 0x113   :  { %v430_v59 = vrot.slane %v429_v57, 2  ;;  %v469_v60 = vadd.f32 %v468_v58, %v467_v56 }
 0x115   :  { %v431_v61 = vadd.f32 %v430_v59, %v429_v57  ;;  %v470_v53 = vrot.slane %v469_v60, 2 }
 0x117   :  { %v432_v62 = vrot.slane %v431_v61, 1  ;;  %v471_v63 = vadd.f32 %v470_v53, %v469_v60 }
 0x119   :  { %v433_v1 = vadd.f32 %v432_v62, %v431_v61  ;;  %v472_v2 = vrot.slane %v471_v63, 1 }
 0x11b   :  { %v434_v5 = vadd.f32 %v433_v1, %v412_v0  ;;  %v473_v4 = vadd.f32 %v472_v2, %v471_v63 }
 0x11d   :  { %435 = vst [vmem:[#allocation3] sm:$0x1] %v434_v5  ;;  %v474_v6 = vadd.f32 %v473_v4, %v436_v3 }
 0x11f   :  { %475 = vst [vmem:[#allocation3 + $0x1] sm:$0x1] %v474_v6 }
 0x126   :  { %v478_v7 = vld [vmem:[#allocation3] sm:$0x3] }
 0x127   :  { %479 = vst [vmem:[%s728_s4] sm:$0x3] %v478_v7 }

// kernel: tile.101
= control target key start
LH: loop header
LB: loop body
LE: loop exit
PB: predicated region body
PF: predicated region fallthrough
CT: control target
= control target key end

     0   :  { %s22_s0 = inlined_call_operand.vmem [shape: f32[32], index: 0, kind: input, shape index: {}]   ;;  %s23_s1 = inlined_call_operand.vmem [shape: f32[4,32], index: 1, kind: output, shape index: {}]  }
   0x1   :  { %v4_v0 = vld [vmem:[%s22_s0] ss:$0 sm:$0xff] }
   0x2   :  { %5 = vst [vmem:[%s23_s1] sm:$0xf] %v4_v0 }

// kernel: tile.102
= control target key start
LH: loop header
LB: loop body
LE: loop exit
PB: predicated region body
PF: predicated region fallthrough
CT: control target
= control target key end

     0   :  { %vm7_vm0 = vcmask 261120   ;;  %s37_s8 = smov 32   ;;  %s38_s9 = smov 64   ;;  %vm13_vm1 = vcmask 1048320   ;;  %vm19_vm2 = vcmask 785920   ;;  %vm25_vm3 = vcmask 523520   ;;  %s55_s0 = inlined_call_operand.vmem [shape: f32[4,32], index: 0, kind: input, shape index: {}]   ;;  %s56_s1 = inlined_call_operand.vmem [shape: f32[1,128], index: 1, kind: output, shape index: {}]  }
   0x1   :  { %v4_v0 = vld [vmem:[%s55_s0] sm:$0xf]  ;;  %s36_s0 = smov 96  }
   0x2   :  { %5 = vst [vmem:[#allocation1] sm:$0xf] %v4_v0 }
   0x9   :  { %v10_v1 = vld [vmem:[#allocation1 + $0x3] sm:$0x1]   ;;  %v22_v2 = vld [vmem:[#allocation1 + $0x1] sm:$0x1]   ;;  %v6_v3 = vld [vmem:[#allocation1] sm:$0x1]  }
   0xa   :  { %11 = vrot.lane.b32.xlu0 %v10_v1, %s36_s0  ;;  %23 = vrot.lane.b32.xlu1 %v22_v2, %s37_s8  ;;  %v16_v4 = vld [vmem:[#allocation1 + $0x2] sm:$0x1]   ;;  %8 = vst.msk [vmem:[#allocation0] sm:$0x1] %vm7_vm0, %v6_v3  }
   0xe   :  { %17 = vrot.lane.b32.xlu0 %v16_v4, %s38_s9 }
  0x7c   :  { %v12_v5 = vpop.permute.xlu0 %11   ;;  %v24_v6 = vpop.permute.xlu1 %23  }
  0x7d   :  { %14 = vst.msk [vmem:[#allocation0] sm:$0x1] %vm13_vm1, %v12_v5  }
  0x80   :  { %v18_v7 = vpop.permute.xlu0 %17  }
  0x81   :  { %20 = vst.msk [vmem:[#allocation0] sm:$0x1] %vm19_vm2, %v18_v7  }
  0x82   :  { %26 = vst.msk [vmem:[#allocation0] sm:$0x1] %vm25_vm3, %v24_v6  }
  0x89   :  { %v30_v8 = vld [vmem:[#allocation0] sm:$0x1] }
  0x8a   :  { %32 = vst [vmem:[%s56_s1] sm:$0x1] %v30_v8 }

// kernel: bottleneck_forward.28
= control target key start
LH: loop header
LB: loop body
LE: loop exit
PB: predicated region body
PF: predicated region fallthrough
CT: control target
= control target key end

     0   :  { %vm91_vm0 = vcmask 326656   ;;  %vm116_vm1 = vcmask 1043456   ;;  %v533_v33 = vmov 0.0   ;;  %s696_s1 = inlined_call_operand.vmem [shape: f32[40,128], index: 1, kind: input, shape index: {}]   ;;  %s697_s0 = inlined_call_operand.vmem [shape: f32[128,40], index: 0, kind: input, shape index: {}]   ;;  %s698_s2 = inlined_call_operand.vmem [shape: f32[1,128], index: 2, kind: input, shape index: {}]   ;;  %s699_s3 = inlined_call_operand.vmem [shape: f32[128,128], index: 3, kind: output, shape index: {0}]   ;;  %s700_s4 = inlined_call_operand.vmem [shape: f32[2,128], index: 4, kind: output, shape index: {1}]  }
   0x1   :  { %v83_v0 = vld [vmem:[%s696_s1] sm:$0xff]  ;;  %v84_v1 = vld [vmem:[%s696_s1 + $0x8] sm:$0xff]  ;;  %v85_v2 = vld [vmem:[%s696_s1 + $0x10] sm:$0xff]  ;;  %42 = vst [vmem:[#allocation3] sm:$0x3] %v533_v33 }
   0x2   :  { %v88_v3 = vpack.c.bf16 %v84_v1, %v83_v0  ;;  %v86_v4 = vld [vmem:[%s696_s1 + $0x18] sm:$0xff]  ;;  %v59_v5 = vld [vmem:[%s697_s0] sm:$0xff]  ;;  %v60_v8 = vld [vmem:[%s697_s0 + $0x8] sm:$0xff] }
   0x3   :  { %v89_v6 = vpack.c.bf16 %v86_v4, %v85_v2  ;;  %v87_v7 = vld [vmem:[%s696_s1 + $0x20] sm:$0xff]  ;;  %v75_v9 = vpack.c.bf16 %v60_v8, %v59_v5  ;;  %v68_v11 = vld [vmem:[%s697_s0 + $0x48] sm:$0xff]  ;;  %v61_v14 = vld [vmem:[%s697_s0 + $0x10] sm:$0xff] }
   0x4   :  { %502 = vmatprep.subr.bf16.mxu0 %v88_v3  ;;  %524 = vmatprep.subr.bf16.mxu1 %v88_v3  ;;  %v67_v10 = vld [vmem:[%s697_s0 + $0x40] sm:$0xff]  ;;  %v90_v12 = vpack.c.bf16 %v87_v7, %v87_v7  ;;  %v62_v15 = vld [vmem:[%s697_s0 + $0x18] sm:$0xff]  ;;  %v69_v17 = vld [vmem:[%s697_s0 + $0x50] sm:$0xff] }
   0x5   :  { %503 = vmatpush3.bf16.msra.mxu0 %v88_v3  ;;  %527 = vmatpush3.bf16.msra.mxu1 %v88_v3  ;;  %v79_v13 = vpack.c.bf16 %v68_v11, %v67_v10  ;;  %v63_v16 = vld [vmem:[%s697_s0 + $0x20] sm:$0xff]  ;;  %v70_v18 = vld [vmem:[%s697_s0 + $0x58] sm:$0xff]  ;;  %v64_v20 = vld [vmem:[%s697_s0 + $0x28] sm:$0xff]  ;;  %v76_v23 = vpack.c.bf16 %v62_v15, %v61_v14 }
   0x6   :  { %504 = vmatprep.subr.bf16.mxu0 %v89_v6  ;;  %508 = vmatprep.mubr.msk.bf16.mxu0 %vm91_vm0, %v75_v9  ;;  %v118_v19 = vsel %vm116_vm1, %v90_v12, 0  ;;  %v71_v21 = vld [vmem:[%s697_s0 + $0x60] sm:$0xff]  ;;  %v72_v22 = vld [vmem:[%s697_s0 + $0x68] sm:$0xff]  ;;  %v80_v24 = vpack.c.bf16 %v70_v18, %v69_v17  ;;  %v77_v25 = vpack.c.bf16 %v64_v20, %v63_v16  ;;  %v65_v27 = vld [vmem:[%s697_s0 + $0x30] sm:$0xff] }
   0x7   :  { %525 = vmatprep.subr.bf16.mxu1 %v89_v6  ;;  %516 = vmatprep.mubr.msk.bf16.mxu1 %vm91_vm0, %v79_v13  ;;  %v81_v26 = vpack.c.bf16 %v72_v22, %v71_v21  ;;  %v66_v28 = vld [vmem:[%s697_s0 + $0x38] sm:$0xff]  ;;  %v73_v29 = vld [vmem:[%s697_s0 + $0x70] sm:$0xff]  ;;  %v490_v34 = vld [vmem:[%s698_s2] ss:$0 sm:$0xff] }
   0x8   :  { %v74_v30 = vld [vmem:[%s697_s0 + $0x78] sm:$0xff]  ;;  %v78_v31 = vpack.c.bf16 %v66_v28, %v65_v27 }
   0x9   :  { %505 = vmatpush3.bf16.msra.mxu0 %v89_v6  ;;  %528 = vmatpush3.bf16.msra.mxu1 %v89_v6  ;;  %v82_v32 = vpack.c.bf16 %v74_v30, %v73_v29 }
   0xa   :  { %530 = vmatprep.subr.msk.bf16.mxu0 %vm116_vm1, %v90_v12  ;;  %531 = vmatprep.subr.msk.bf16.mxu1 %vm116_vm1, %v90_v12 }
   0xd   :  { %507 = vmatpush3.bf16.msra.mxu0 %v118_v19  ;;  %529 = vmatpush3.bf16.msra.mxu1 %v118_v19 }
  0x10   :  { %509 = vmatmul.mubr.msk.bf16.vlgmr.msra.gmra.mrb[0].mxu0 %vm91_vm0, %v76_v23  ;;  %517 = vmatmul.mubr.msk.bf16.vlgmr.msra.gmra.mrb[0].mxu1 %vm91_vm0, %v80_v24 }
  0x11   :  { %512 = vmatprep.mubr.msk.bf16.mxu0 %vm91_vm0, %v77_v25  ;;  %520 = vmatprep.mubr.msk.bf16.mxu1 %vm91_vm0, %v81_v26 }
  0x18   :  { %513 = vmatmul.mubr.msk.bf16.gmra.mrb[4].mxu0 %vm91_vm0, %v78_v31  ;;  %521 = vmatmul.mubr.msk.bf16.gmra.mrb[4].mxu1 %vm91_vm0, %v82_v32 }
  0xe3   :  { %v510_v35 = vpop.f32.mrb[0].mxu0  ;;  %v518_v36 = vpop.f32.mrb[0].mxu1 }
  0xe4   :  { %v277_v37 = vadd.f32 %v510_v35, %v490_v34  ;;  %v154_v38 = vpop.f32.mrb[1].mxu0  ;;  %v633_v39 = vadd.f32 %v518_v36, %v490_v34  ;;  %v186_v40 = vpop.f32.mrb[1].mxu1 }
  0xe5   :  { %v275_v41 = vadd.f32 %v490_v34, %v154_v38  ;;  %v511_v42 = vpop.f32.mrb[2].mxu0  ;;  %v283_v43 = vadd.f32 %v490_v34, %v186_v40  ;;  %v519_v44 = vpop.f32.mrb[2].mxu1 }
  0xe6   :  { %293 = vst [vmem:[%s699_s3 + $0x10] sm:$0xff] %v277_v37  ;;  %v278_v45 = vadd.f32 %v511_v42, %v490_v34  ;;  %v157_v46 = vpop.f32.mrb[3].mxu0  ;;  %301 = vst [vmem:[%s699_s3 + $0x50] sm:$0xff] %v633_v39  ;;  %v642_v47 = vadd.f32 %v519_v44, %v490_v34  ;;  %v189_v48 = vpop.f32.mrb[3].mxu1  ;;  %v433_v54 = vmul.f32 %v277_v37, %v277_v37 }
  0xe7   :  { %291 = vst [vmem:[%s699_s3] sm:$0xff] %v275_v41  ;;  %v276_v49 = vadd.f32 %v490_v34, %v157_v46  ;;  %299 = vst [vmem:[%s699_s3 + $0x40] sm:$0xff] %v283_v43  ;;  %v284_v50 = vadd.f32 %v490_v34, %v189_v48  ;;  %v431_v51 = vmul.f32 %v275_v41, %v275_v41 }
  0xe8   :  { %294 = vst [vmem:[%s699_s3 + $0x18] sm:$0xff] %v278_v45  ;;  %302 = vst [vmem:[%s699_s3 + $0x58] sm:$0xff] %v642_v47  ;;  %v434_v59 = vmul.f32 %v278_v45, %v278_v45  ;;  %v439_v24 = vmul.f32 %v283_v43, %v283_v43  ;;  %v441_v30 = vmul.f32 %v633_v39, %v633_v39 }
  0xe9   :  { %292 = vst [vmem:[%s699_s3 + $0x8] sm:$0xff] %v276_v49  ;;  %v407_v52 = vadd.f32 %v276_v49, %v275_v41  ;;  %v432_v53 = vmul.f32 %v276_v49, %v276_v49  ;;  %300 = vst [vmem:[%s699_s3 + $0x48] sm:$0xff] %v284_v50  ;;  %v440_v29 = vmul.f32 %v284_v50, %v284_v50 }
  0xea   :  { %v442_v33 = vmul.f32 %v642_v47, %v642_v47 }
  0xeb   :  { %v408_v55 = vadd.f32 %v407_v52, %v277_v37  ;;  %v447_v56 = vadd.f32 %v432_v53, %v431_v51  ;;  %v514_v57 = vpop.f32.mrb[4].mxu0  ;;  %v522_v58 = vpop.f32.mrb[4].mxu1 }
  0xec   :  { %v281_v60 = vadd.f32 %v514_v57, %v490_v34  ;;  %v170_v61 = vpop.f32.mrb[5].mxu0  ;;  %v289_v62 = vadd.f32 %v522_v58, %v490_v34  ;;  %v202_v63 = vpop.f32.mrb[5].mxu1  ;;  %v406_v58 = vld [vmem:[#allocation3] sm:$0x1] }
  0xed   :  { %v448_v0 = vadd.f32 %v447_v56, %v433_v54  ;;  %v279_v1 = vadd.f32 %v490_v34, %v170_v61  ;;  %v409_v2 = vadd.f32 %v408_v55, %v278_v45  ;;  %v515_v3 = vpop.f32.mrb[6].mxu0  ;;  %v287_v4 = vadd.f32 %v490_v34, %v202_v63  ;;  %v523_v5 = vpop.f32.mrb[6].mxu1  ;;  %v430_v61 = vld [vmem:[#allocation3 + $0x1] sm:$0x1] }
  0xee   :  { %297 = vst [vmem:[%s699_s3 + $0x30] sm:$0xff] %v281_v60  ;;  %v282_v6 = vadd.f32 %v515_v3, %v490_v34  ;;  %v173_v7 = vpop.f32.mrb[7].mxu0  ;;  %305 = vst [vmem:[%s699_s3 + $0x70] sm:$0xff] %v289_v62  ;;  %v290_v8 = vadd.f32 %v523_v5, %v490_v34  ;;  %v205_v9 = vpop.f32.mrb[7].mxu1  ;;  %v437_v18 = vmul.f32 %v281_v60, %v281_v60 }
  0xef   :  { %295 = vst [vmem:[%s699_s3 + $0x20] sm:$0xff] %v279_v1  ;;  %v410_v10 = vadd.f32 %v409_v2, %v279_v1  ;;  %v435_v11 = vmul.f32 %v279_v1, %v279_v1  ;;  %v449_v12 = vadd.f32 %v448_v0, %v434_v59  ;;  %v280_v13 = vadd.f32 %v490_v34, %v173_v7 }
  0xf0   :  { %303 = vst [vmem:[%s699_s3 + $0x60] sm:$0xff] %v287_v4  ;;  %298 = vst [vmem:[%s699_s3 + $0x38] sm:$0xff] %v282_v6  ;;  %v288_v14 = vadd.f32 %v490_v34, %v205_v9  ;;  %v438_v21 = vmul.f32 %v282_v6, %v282_v6  ;;  %v443_v36 = vmul.f32 %v287_v4, %v287_v4 }
  0xf1   :  { %306 = vst [vmem:[%s699_s3 + $0x78] sm:$0xff] %v290_v8  ;;  %v450_v15 = vadd.f32 %v449_v12, %v435_v11  ;;  %296 = vst [vmem:[%s699_s3 + $0x28] sm:$0xff] %v280_v13  ;;  %v411_v16 = vadd.f32 %v410_v10, %v280_v13  ;;  %v436_v17 = vmul.f32 %v280_v13, %v280_v13 }
  0xf2   :  { %304 = vst [vmem:[%s699_s3 + $0x68] sm:$0xff] %v288_v14  ;;  %v444_v42 = vmul.f32 %v288_v14, %v288_v14  ;;  %v446_v46 = vmul.f32 %v290_v8, %v290_v8 }
  0xf3   :  { %v412_v19 = vadd.f32 %v411_v16, %v281_v60  ;;  %v451_v20 = vadd.f32 %v450_v15, %v436_v17 }
  0xf5   :  { %v452_v22 = vadd.f32 %v451_v20, %v437_v18  ;;  %v413_v23 = vadd.f32 %v412_v19, %v282_v6 }
  0xf7   :  { %v414_v25 = vadd.f32 %v413_v23, %v283_v43  ;;  %v453_v26 = vadd.f32 %v452_v22, %v438_v21  ;;  %v445_v43 = vmul.f32 %v289_v62, %v289_v62 }
  0xf9   :  { %v454_v27 = vadd.f32 %v453_v26, %v439_v24  ;;  %v415_v28 = vadd.f32 %v414_v25, %v284_v50 }
  0xfb   :  { %v416_v31 = vadd.f32 %v415_v28, %v633_v39  ;;  %v455_v32 = vadd.f32 %v454_v27, %v440_v29 }
  0xfd   :  { %v456_v34 = vadd.f32 %v455_v32, %v441_v30  ;;  %v417_v35 = vadd.f32 %v416_v31, %v642_v47 }
  0xff   :  { %v418_v37 = vadd.f32 %v417_v35, %v287_v4  ;;  %v457_v38 = vadd.f32 %v456_v34, %v442_v33 }
 0x101   :  { %v458_v40 = vadd.f32 %v457_v38, %v443_v36  ;;  %v419_v41 = vadd.f32 %v418_v37, %v288_v14 }
 0x103   :  { %v420_v44 = vadd.f32 %v419_v41, %v289_v62  ;;  %v459_v45 = vadd.f32 %v458_v40, %v444_v42 }
 0x105   :  { %v421_v48 = vadd.f32 %v420_v44, %v290_v8  ;;  %v460_v49 = vadd.f32 %v459_v45, %v445_v43 }
 0x107   :  { %v422_v39 = vrot.slane %v421_v48, 4  ;;  %v461_v50 = vadd.f32 %v460_v49, %v446_v46 }
 0x109   :  { %v423_v51 = vadd.f32 %v422_v39, %v421_v48  ;;  %v462_v52 = vrot.slane %v461_v50, 4 }
 0x10b   :  { %v424_v53 = vrot.slane %v423_v51, 2  ;;  %v463_v54 = vadd.f32 %v462_v52, %v461_v50 }
 0x10d   :  { %v425_v55 = vadd.f32 %v424_v53, %v423_v51  ;;  %v464_v47 = vrot.slane %v463_v54, 2 }
 0x10f   :  { %v426_v56 = vrot.slane %v425_v55, 1  ;;  %v465_v57 = vadd.f32 %v464_v47, %v463_v54 }
 0x111   :  { %v427_v59 = vadd.f32 %v426_v56, %v425_v55  ;;  %v466_v60 = vrot.slane %v465_v57, 1 }
 0x113   :  { %v428_v63 = vadd.f32 %v427_v59, %v406_v58  ;;  %v467_v62 = vadd.f32 %v466_v60, %v465_v57 }
 0x115   :  { %429 = vst [vmem:[#allocation3] sm:$0x1] %v428_v63  ;;  %v468_v0 = vadd.f32 %v467_v62, %v430_v61 }
 0x117   :  { %469 = vst [vmem:[#allocation3 + $0x1] sm:$0x1] %v468_v0 }
 0x11e   :  { %v472_v1 = vld [vmem:[#allocation3] sm:$0x3] }
 0x11f   :  { %473 = vst [vmem:[%s700_s4] sm:$0x3] %v472_v1 }

// kernel: bottleneck_forward.35
= control target key start
LH: loop header
LB: loop body
LE: loop exit
PB: predicated region body
PF: predicated region fallthrough
CT: control target
= control target key end

     0   :  { %s132_s0 = inlined_call_operand.vmem [shape: f32[32,128], index: 0, kind: input, shape index: {}]   ;;  %s133_s1 = inlined_call_operand.vmem [shape: f32[1,128], index: 1, kind: input, shape index: {}]   ;;  %s134_s2 = inlined_call_operand.vmem [shape: f32[1,128], index: 2, kind: input, shape index: {}]   ;;  %s135_s3 = inlined_call_operand.vmem [shape: f32[32,128], index: 3, kind: input, shape index: {}]   ;;  %s136_s4 = inlined_call_operand.vmem [shape: f32[32,128], index: 4, kind: output, shape index: {}]  }
   0x1   :  { %v17_v0 = vld [vmem:[%s132_s0] sm:$0xff]  ;;  %v18_v4 = vld [vmem:[%s132_s0 + $0x8] sm:$0xff]  ;;  %v19_v7 = vld [vmem:[%s132_s0 + $0x10] sm:$0xff] }
   0x2   :  { %v63_v1 = vld [vmem:[%s133_s1] ss:$0 sm:$0xff]  ;;  %v20_v8 = vld [vmem:[%s132_s0 + $0x18] sm:$0xff]  ;;  %v44_v10 = vld [vmem:[%s135_s3 + $0x8] sm:$0xff] }
   0x3   :  { %v64_v2 = vld [vmem:[%s134_s2] ss:$0 sm:$0xff]  ;;  %v28_v3 = vmul.f32 %v63_v1, %v17_v0  ;;  %v29_v6 = vmul.f32 %v63_v1, %v18_v4  ;;  %v30_v11 = vmul.f32 %v63_v1, %v19_v7  ;;  %v31_v12 = vmul.f32 %v63_v1, %v20_v8  ;;  %v45_v14 = vld [vmem:[%s135_s3 + $0x10] sm:$0xff]  ;;  %v46_v15 = vld [vmem:[%s135_s3 + $0x18] sm:$0xff] }
   0x4   :  { %v43_v5 = vld [vmem:[%s135_s3] sm:$0xff] }
   0x5   :  { %v39_v9 = vadd.f32 %v64_v2, %v28_v3  ;;  %v40_v13 = vadd.f32 %v64_v2, %v29_v6  ;;  %v41_v17 = vadd.f32 %v64_v2, %v30_v11  ;;  %v42_v18 = vadd.f32 %v64_v2, %v31_v12 }
   0x7   :  { %v47_v16 = vadd.f32 %v43_v5, %v39_v9  ;;  %v48_v19 = vadd.f32 %v44_v10, %v40_v13  ;;  %v49_v21 = vadd.f32 %v45_v14, %v41_v17  ;;  %v50_v22 = vadd.f32 %v46_v15, %v42_v18 }
   0x9   :  { %v51_v20 = vmax.f32 %v47_v16, 0.0  ;;  %v52_v23 = vmax.f32 %v48_v19, 0.0  ;;  %v53_v24 = vmax.f32 %v49_v21, 0.0  ;;  %v54_v25 = vmax.f32 %v50_v22, 0.0 }
   0xb   :  { %55 = vst [vmem:[%s136_s4] sm:$0xff] %v51_v20  ;;  %56 = vst [vmem:[%s136_s4 + $0x8] sm:$0xff] %v52_v23 }
   0xc   :  { %57 = vst [vmem:[%s136_s4 + $0x10] sm:$0xff] %v53_v24  ;;  %58 = vst [vmem:[%s136_s4 + $0x18] sm:$0xff] %v54_v25 }

</bundles_post_ra>
